<compile_context>
chip_gen: v6e
topology: v6e:2x2x1
jax: 0.10.0
libtpu: 0.0.40
codegen_flags: <defaults>
</compile_context>

<pallas_src>
import jax
import jax.numpy as jnp
from jax.experimental import pallas as pl
from jax.experimental.pallas import tpu as pltpu

# Hyperparameters hard-coded in the PyTorch module.
SEQ_LEN = 50
N_LAYERS = 10
OUT_CHS = 64
RES_BLOCK = 5
KSIZE = 5
PAD = 2
# Per-batch row-block length: seq + conv padding, rounded up to a sublane multiple.
SPAD = -(-(SEQ_LEN + 2 * PAD) // 8) * 8            # 56


def gated_cnn_kernel(xwin_ref, mcol_ref, w0_ref, b0_ref, wl_ref, bl_ref,
                     o_ref, hc_ref):
    """One batch tile: fused-gate first conv + 10 gated residual conv layers.

    Row layout: M = B_TILE * SPAD rows; rows [PAD, PAD+SEQ_LEN) of each SPAD
    block hold data, the rest are forced to zero every layer (mcol multiply)
    so (a) shifted matmuls see correct conv zero-padding, (b) batch elements
    never mix, and (c) pltpu.roll wrap rows are guaranteed zero.
    """
    C = OUT_CHS
    M = hc_ref.shape[0]
    mcol = mcol_ref[...]                                     # (M, 1): 1.0 on data rows

    # Layer 0: host-built im2col window -> single (M, K*E) x (K*E, 2C) dot.
    acc = jnp.dot(xwin_ref[0], w0_ref[...], preferred_element_type=jnp.float32)
    acc = acc + b0_ref[...]                                  # fused conv-bias + b_0/c_0
    h = acc[:, :C] * jax.nn.sigmoid(acc[:, C:]) * mcol       # (M, 64)
    res = h

    for i in range(N_LAYERS):                                # static unroll (10 dots)
        # Assemble the K-fused LHS (M, K*C) in VMEM scratch.  Shifts are
        # circular rolls along the sublane axis; wrapped rows land on pad rows
        # that the mcol multiply keeps exactly zero (see invariant above).
        for k in range(KSIZE):
            d = PAD - k
            tap = h if d == 0 else pltpu.roll(h, shift=d % M, axis=0)
            hc_ref[:, k * C:(k + 1) * C] = tap
        acc = jnp.dot(hc_ref[...], wl_ref[i],                # (M,320)x(320,128)
                      preferred_element_type=jnp.float32)
        acc = acc + bl_ref[i]                                # fused biases, (1,128)
        hn = acc[:, :C] * jax.nn.sigmoid(acc[:, C:]) * mcol
        if i % RES_BLOCK == 0:
            hn = hn + res
            res = hn
        h = hn
    o_ref[0] = h


def fc_kernel(x_ref, w_ref, b_ref, o_ref):
    o_ref[...] = jnp.dot(x_ref[...], w_ref[...],
                         preferred_element_type=jnp.float32) + b_ref[...]


def init_params(key, vocab_size, embd_size, class_num):
    """Deterministic synthetic parameters, in PyTorch shape conventions."""
    ks = jax.random.split(key, 15)
    s = 0.1
    nrm = lambda k, shp: s * jax.random.normal(k, shp, jnp.float32)
    p = {}
    p["embedding"] = nrm(ks[0], (vocab_size, embd_size))
    p["w0"] = nrm(ks[1], (OUT_CHS, 1, KSIZE, embd_size))
    p["w0_b"] = nrm(ks[2], (OUT_CHS,))
    p["wg0"] = nrm(ks[3], (OUT_CHS, 1, KSIZE, embd_size))
    p["wg0_b"] = nrm(ks[4], (OUT_CHS,))
    p["b0"] = nrm(ks[5], (1, OUT_CHS, 1, 1))
    p["c0"] = nrm(ks[6], (1, OUT_CHS, 1, 1))
    p["wl"] = nrm(ks[7], (N_LAYERS, OUT_CHS, OUT_CHS, KSIZE, 1))
    p["wl_b"] = nrm(ks[8], (N_LAYERS, OUT_CHS))
    p["wgl"] = nrm(ks[9], (N_LAYERS, OUT_CHS, OUT_CHS, KSIZE, 1))
    p["wgl_b"] = nrm(ks[10], (N_LAYERS, OUT_CHS))
    p["bl"] = nrm(ks[11], (N_LAYERS, 1, OUT_CHS, 1, 1))
    p["cl"] = nrm(ks[12], (N_LAYERS, 1, OUT_CHS, 1, 1))
    p["fc_w"] = nrm(ks[13], (class_num, OUT_CHS * SEQ_LEN))
    p["fc_b"] = nrm(ks[14], (class_num,))
    return p


def gated_cnn_forward(tokens, p, class_num, b_tile=32):
    N, cur = tokens.shape
    C = OUT_CHS
    # Pad (with token id 1) / trim to SEQ_LEN, as in the PyTorch forward.
    if cur < SEQ_LEN:
        tokens = jnp.concatenate(
            [tokens, jnp.ones((N, SEQ_LEN - cur), tokens.dtype)], axis=1)
    elif cur > SEQ_LEN:
        tokens = tokens[:, :SEQ_LEN]

    emb = p["embedding"][tokens]                             # (N, S, E) glue gather
    E = emb.shape[-1]

    # Batch tiling: fold B_TILE batch elements into the matmul M dimension.
    bt = min(b_tile, N)
    # Keep >= 2 grid steps once the batch is big enough to split (v7x: 2 TCs
    # sharded over the "parallel" grid axis).
    if N > 8 and N < 2 * bt:
        bt = -(-N // 2)
    num_tiles = -(-N // bt)
    n_pad = num_tiles * bt
    if n_pad > N:
        emb = jnp.concatenate(
            [emb, jnp.zeros((n_pad - N, SEQ_LEN, E), emb.dtype)], axis=0)
    M = bt * SPAD

    # Host-side im2col for the first conv, in the SPAD-strided row layout:
    # xwin[n, r, k*E:(k+1)*E] = emb[n, (r - PAD) + (k - PAD), :]  (zero if OOB)
    # (For realistic E >= 64 one would instead DMA the raw embedding block and
    #  reuse the in-kernel tap scheme to avoid the 5x HBM-read inflation.)
    xp = jnp.pad(emb, ((0, 0),
                       (2 * PAD, SPAD + KSIZE - 1 - 2 * PAD - SEQ_LEN),
                       (0, 0)))                              # (n_pad, SPAD+K-1, E)
    xwin = jnp.concatenate([xp[:, k:k + SPAD, :] for k in range(KSIZE)],
                           axis=-1)                          # (n_pad, SPAD, K*E)
    xwin = xwin.reshape(num_tiles, M, KSIZE * E)

    # Gate-fused, bias-pre-summed weight re-layout (rows = seq/taps, cols = ch).
    w0_t = jnp.transpose(p["w0"][:, 0], (1, 2, 0))           # (K, E, C)
    wg0_t = jnp.transpose(p["wg0"][:, 0], (1, 2, 0))
    w0f = jnp.concatenate([w0_t, wg0_t], axis=-1).reshape(KSIZE * E, 2 * C)
    b0f = jnp.concatenate([p["w0_b"] + p["b0"].reshape(C),
                           p["wg0_b"] + p["c0"].reshape(C)]).reshape(1, 2 * C)

    wl_t = jnp.transpose(p["wl"][..., 0], (0, 3, 2, 1))      # (L, K, Cin, Cout)
    wgl_t = jnp.transpose(p["wgl"][..., 0], (0, 3, 2, 1))
    wlf = jnp.concatenate([wl_t, wgl_t], axis=-1)            # (L, K, 64, 128)
    wlf = wlf.reshape(N_LAYERS, KSIZE * C, 2 * C)            # K-fused: (L, 320, 128)
    blf = jnp.concatenate([p["wl_b"] + p["bl"].reshape(N_LAYERS, C),
                           p["wgl_b"] + p["cl"].reshape(N_LAYERS, C)],
                          axis=-1).reshape(N_LAYERS, 1, 2 * C)

    # Valid-row mask as a single (M, 1) column (lane-broadcast in the kernel).
    row = jnp.arange(SPAD)
    valid = ((row >= PAD) & (row < PAD + SEQ_LEN)).astype(jnp.float32)
    mcol = jnp.tile(valid, bt).reshape(M, 1)

    h_tiles = pl.pallas_call(
        gated_cnn_kernel,
        out_shape=jax.ShapeDtypeStruct((num_tiles, M, C), jnp.float32),
        grid_spec=pltpu.PrefetchScalarGridSpec(
            num_scalar_prefetch=0,
            grid=(num_tiles,),
            in_specs=[
                pl.BlockSpec((1, M, KSIZE * E), lambda b: (b, 0, 0)),
                pl.BlockSpec((M, 1), lambda b: (0, 0)),
                pl.BlockSpec((KSIZE * E, 2 * C), lambda b: (0, 0)),
                pl.BlockSpec((1, 2 * C), lambda b: (0, 0)),
                pl.BlockSpec((N_LAYERS, KSIZE * C, 2 * C), lambda b: (0, 0, 0)),
                pl.BlockSpec((N_LAYERS, 1, 2 * C), lambda b: (0, 0, 0)),
            ],
            out_specs=pl.BlockSpec((1, M, C), lambda b: (b, 0, 0)),
            scratch_shapes=[pltpu.VMEM((M, KSIZE * C), jnp.float32)],
        ),
        compiler_params=pltpu.CompilerParams(
            dimension_semantics=("parallel",),
            vmem_limit_bytes=64 * 1024 * 1024),
    )(xwin, mcol, w0f, b0f, wlf, blf)

    # Extract data rows; keep (N, S, C) order and fold PyTorch's channel-major
    # flatten into the fc weight layout (no activation transpose).
    h = h_tiles.reshape(n_pad, SPAD, C)[:N, PAD:PAD + SEQ_LEN, :]   # (N, S, C)
    h_flat = h.reshape(N, SEQ_LEN * C)                              # idx = t*C + c

    # fc weight rows permuted so row (t*C + c) holds fc_w[:, c*SEQ_LEN + t];
    # class dim lane-padded to a multiple of 128 (lane-dense output).
    cpad = ((class_num + 127) // 128) * 128
    w_perm = jnp.transpose(p["fc_w"].reshape(class_num, C, SEQ_LEN), (2, 1, 0))
    w_perm = w_perm.reshape(SEQ_LEN * C, class_num)
    wfc = jnp.zeros((SEQ_LEN * C, cpad), jnp.float32).at[:, :class_num].set(w_perm)
    bfc = jnp.zeros((1, cpad), jnp.float32).at[:, :class_num].set(p["fc_b"])

    # fc grid-tiled over batch rows; weight block constant across the grid.
    m_blk = 256 if N >= 256 else -(-N // 8) * 8
    n_fc = -(-N // m_blk) * m_blk
    if n_fc > N:
        h_flat = jnp.concatenate(
            [h_flat, jnp.zeros((n_fc - N, SEQ_LEN * C), jnp.float32)], axis=0)

    out = pl.pallas_call(
        fc_kernel,
        out_shape=jax.ShapeDtypeStruct((n_fc, cpad), jnp.float32),
        grid_spec=pltpu.PrefetchScalarGridSpec(
            num_scalar_prefetch=0,
            grid=(n_fc // m_blk,),
            in_specs=[pl.BlockSpec((m_blk, SEQ_LEN * C), lambda b: (b, 0)),
                      pl.BlockSpec((SEQ_LEN * C, cpad), lambda b: (0, 0)),
                      pl.BlockSpec((1, cpad), lambda b: (0, 0))],
            out_specs=pl.BlockSpec((m_blk, cpad), lambda b: (b, 0)),
        ),
        compiler_params=pltpu.CompilerParams(
            dimension_semantics=("parallel",),
            vmem_limit_bytes=64 * 1024 * 1024),
    )(h_flat, wfc, bfc)
    return out[:N, :class_num]


def reference_forward(tokens, p, class_num):
    """Pure-JAX NCHW reference mirroring the PyTorch module."""
    N, cur = tokens.shape
    if cur < SEQ_LEN:
        tokens = jnp.concatenate(
            [tokens, jnp.ones((N, SEQ_LEN - cur), tokens.dtype)], axis=1)
    elif cur > SEQ_LEN:
        tokens = tokens[:, :SEQ_LEN]
    emb = p["embedding"][tokens]
    x = emb[:, None, :, :]                                   # (N, 1, S, E)
    dn = ("NCHW", "OIHW", "NCHW")
    hp = jax.lax.Precision.HIGHEST

    def conv(v, w, cb):
        y = jax.lax.conv_general_dilated(
            v, w, (1, 1), ((PAD, PAD), (0, 0)),
            dimension_numbers=dn, precision=hp)
        return y + cb.reshape(1, -1, 1, 1)

    a = conv(x, p["w0"], p["w0_b"]) + p["b0"]
    b = conv(x, p["wg0"], p["wg0_b"]) + p["c0"]
    h = a * jax.nn.sigmoid(b)
    res = h
    for i in range(N_LAYERS):
        a = conv(h, p["wl"][i], p["wl_b"][i]) + p["bl"][i]
        b = conv(h, p["wgl"][i], p["wgl_b"][i]) + p["cl"][i]
        h = a * jax.nn.sigmoid(b)
        if i % RES_BLOCK == 0:
            h = h + res
            res = h
    hf = h.reshape(N, -1)
    return jnp.dot(hf, p["fc_w"].T, precision=hp) + p["fc_b"]


if __name__ == "__main__":
    vocab_size, embd_size, class_num = 20, 8, 4
    batch, sent_len = 2, 30                                  # < SEQ_LEN -> pad branch

    key = jax.random.PRNGKey(0)
    kp, kt = jax.random.split(key)
    params = init_params(kp, vocab_size, embd_size, class_num)
    tokens = jax.random.randint(kt, (batch, sent_len), 0, vocab_size,
                                dtype=jnp.int32)

    out = gated_cnn_forward(tokens, params, class_num)
    out = jax.block_until_ready(out)

    ref = reference_forward(tokens, params, class_num)
    if not jnp.allclose(out, ref, rtol=1e-3, atol=1e-3):
        raise AssertionError(
            f"kernel/reference mismatch, max abs diff = "
            f"{float(jnp.max(jnp.abs(out - ref)))}")
    print("KERNEL_OK")
</pallas_src>

<mosaic_0001>
module attributes {stable_mosaic.version = 11 : i64} {
  func.func @gated_cnn_kernel(%arg0: i32, %arg1: memref<1x112x40xf32, #tpu.memory_space<vmem>>, %arg2: memref<112x1xf32, #tpu.memory_space<vmem>>, %arg3: memref<40x128xf32, #tpu.memory_space<vmem>>, %arg4: memref<1x128xf32, #tpu.memory_space<vmem>>, %arg5: memref<10x320x128xf32, #tpu.memory_space<vmem>>, %arg6: memref<10x1x128xf32, #tpu.memory_space<vmem>>, %arg7: memref<1x112x64xf32, #tpu.memory_space<vmem>>, %arg8: memref<112x320xf32, #tpu.memory_space<vmem>>) attributes {dimension_semantics = [#tpu.dimension_semantics<parallel>], iteration_bounds = array<i64: 1>, scalar_prefetch = 0 : i64, scratch_operands = 1 : i64, tpu.core_type = #tpu.core_type<tc>, window_params = [{transform_indices = @transform_0, window_bounds = array<i64: 1, 112, 40>}, {pipeline_mode = #tpu.pipeline_mode<synchronous>, transform_indices = @transform_1, window_bounds = array<i64: 112, 1>}, {pipeline_mode = #tpu.pipeline_mode<synchronous>, transform_indices = @transform_2, window_bounds = array<i64: 40, 128>}, {pipeline_mode = #tpu.pipeline_mode<synchronous>, transform_indices = @transform_3, window_bounds = array<i64: 1, 128>}, {pipeline_mode = #tpu.pipeline_mode<synchronous>, transform_indices = @transform_4, window_bounds = array<i64: 10, 320, 128>}, {pipeline_mode = #tpu.pipeline_mode<synchronous>, transform_indices = @transform_5, window_bounds = array<i64: 10, 1, 128>}, {transform_indices = @transform_6, window_bounds = array<i64: 1, 112, 64>}]} {
    %c0 = arith.constant 0 : index
    %c0_0 = arith.constant 0 : index
    %0 = vector.load %arg2[%c0, %c0_0] : memref<112x1xf32, #tpu.memory_space<vmem>>, vector<112x1xf32>
    %c0_1 = arith.constant 0 : index
    %c0_2 = arith.constant 0 : index
    %c0_3 = arith.constant 0 : index
    %1 = vector.load %arg1[%c0_1, %c0_2, %c0_3] : memref<1x112x40xf32, #tpu.memory_space<vmem>>, vector<1x112x40xf32>
    %2 = vector.shape_cast %1 : vector<1x112x40xf32> to vector<112x40xf32>
    %c0_4 = arith.constant 0 : index
    %c0_5 = arith.constant 0 : index
    %3 = vector.load %arg3[%c0_4, %c0_5] : memref<40x128xf32, #tpu.memory_space<vmem>>, vector<40x128xf32>
    %cst = arith.constant dense<0.000000e+00> : vector<112x128xf32>
    %4 = tpu.matmul %2, %3, %cst {dimension_numbers = #tpu.dot_dimension_numbers<[1], [0], [0], [1], [0, 0, 1, 1], [], []>} : vector<112x40xf32>, vector<40x128xf32>, vector<112x128xf32> -> vector<112x128xf32>
    %c0_6 = arith.constant 0 : index
    %c0_7 = arith.constant 0 : index
    %5 = vector.load %arg4[%c0_6, %c0_7] : memref<1x128xf32, #tpu.memory_space<vmem>>, vector<1x128xf32>
    %6 = vector.broadcast %5 : vector<1x128xf32> to vector<112x128xf32>
    %7 = arith.addf %4, %6 : vector<112x128xf32>
    %8 = vector.extract_strided_slice %7 {offsets = [0, 0], sizes = [112, 64], strides = [1, 1]} : vector<112x128xf32> to vector<112x64xf32>
    %9 = vector.extract_strided_slice %7 {offsets = [0, 64], sizes = [112, 64], strides = [1, 1]} : vector<112x128xf32> to vector<112x64xf32>
    %10 = arith.negf %9 : vector<112x64xf32>
    %11 = math.exp %10 : vector<112x64xf32>
    %cst_8 = arith.constant 1.000000e+00 : f32
    %12 = vector.broadcast %cst_8 : f32 to vector<112x64xf32>
    %13 = arith.addf %12, %11 : vector<112x64xf32>
    %14 = arith.divf %12, %13 : vector<112x64xf32>
    %15 = arith.mulf %8, %14 : vector<112x64xf32>
    %16 = vector.broadcast %0 : vector<112x1xf32> to vector<112x64xf32>
    %17 = arith.mulf %15, %16 : vector<112x64xf32>
    %c2_i32 = arith.constant 2 : i32
    %18 = tpu.dynamic_rotate %17 by %c2_i32 dim 0 : vector<112x64xf32>, i32 -> vector<112x64xf32>
    %c0_9 = arith.constant 0 : index
    %c0_10 = arith.constant 0 : index
    %19 = vector.load %arg8[%c0_9, %c0_10] : memref<112x320xf32, #tpu.memory_space<vmem>>, vector<112x64xf32>
    tpu.vector_store %arg8[%c0_9, %c0_10], %18 {strides = array<i32>} : memref<112x320xf32, #tpu.memory_space<vmem>>, vector<112x64xf32>,
    %c1_i32 = arith.constant 1 : i32
    %20 = tpu.dynamic_rotate %17 by %c1_i32 dim 0 : vector<112x64xf32>, i32 -> vector<112x64xf32>
    %c0_11 = arith.constant 0 : index
    %c64 = arith.constant 64 : index
    %21 = vector.load %arg8[%c0_11, %c64] : memref<112x320xf32, #tpu.memory_space<vmem>>, vector<112x64xf32>
    tpu.vector_store %arg8[%c0_11, %c64], %20 {strides = array<i32>} : memref<112x320xf32, #tpu.memory_space<vmem>>, vector<112x64xf32>,
    %c0_12 = arith.constant 0 : index
    %c128 = arith.constant 128 : index
    %22 = vector.load %arg8[%c0_12, %c128] : memref<112x320xf32, #tpu.memory_space<vmem>>, vector<112x64xf32>
    tpu.vector_store %arg8[%c0_12, %c128], %17 {strides = array<i32>} : memref<112x320xf32, #tpu.memory_space<vmem>>, vector<112x64xf32>,
    %c111_i32 = arith.constant 111 : i32
    %23 = tpu.dynamic_rotate %17 by %c111_i32 dim 0 : vector<112x64xf32>, i32 -> vector<112x64xf32>
    %c0_13 = arith.constant 0 : index
    %c192 = arith.constant 192 : index
    %24 = vector.load %arg8[%c0_13, %c192] : memref<112x320xf32, #tpu.memory_space<vmem>>, vector<112x64xf32>
    tpu.vector_store %arg8[%c0_13, %c192], %23 {strides = array<i32>} : memref<112x320xf32, #tpu.memory_space<vmem>>, vector<112x64xf32>,
    %c110_i32 = arith.constant 110 : i32
    %25 = tpu.dynamic_rotate %17 by %c110_i32 dim 0 : vector<112x64xf32>, i32 -> vector<112x64xf32>
    %c0_14 = arith.constant 0 : index
    %c256 = arith.constant 256 : index
    %26 = vector.load %arg8[%c0_14, %c256] : memref<112x320xf32, #tpu.memory_space<vmem>>, vector<112x64xf32>
    tpu.vector_store %arg8[%c0_14, %c256], %25 {strides = array<i32>} : memref<112x320xf32, #tpu.memory_space<vmem>>, vector<112x64xf32>,
    %c0_15 = arith.constant 0 : index
    %c0_16 = arith.constant 0 : index
    %27 = vector.load %arg8[%c0_15, %c0_16] : memref<112x320xf32, #tpu.memory_space<vmem>>, vector<112x320xf32>
    %c0_17 = arith.constant 0 : index
    %c0_18 = arith.constant 0 : index
    %c0_19 = arith.constant 0 : index
    %28 = vector.load %arg5[%c0_17, %c0_18, %c0_19] : memref<10x320x128xf32, #tpu.memory_space<vmem>>, vector<1x320x128xf32>
    %29 = vector.shape_cast %28 : vector<1x320x128xf32> to vector<320x128xf32>
    %cst_20 = arith.constant dense<0.000000e+00> : vector<112x128xf32>
    %30 = tpu.matmul %27, %29, %cst_20 {dimension_numbers = #tpu.dot_dimension_numbers<[1], [0], [0], [1], [0, 0, 1, 1], [], []>} : vector<112x320xf32>, vector<320x128xf32>, vector<112x128xf32> -> vector<112x128xf32>
    %c0_21 = arith.constant 0 : index
    %c0_22 = arith.constant 0 : index
    %c0_23 = arith.constant 0 : index
    %31 = vector.load %arg6[%c0_21, %c0_22, %c0_23] : memref<10x1x128xf32, #tpu.memory_space<vmem>>, vector<1x1x128xf32>
    %32 = vector.shape_cast %31 : vector<1x1x128xf32> to vector<1x128xf32>
    %33 = vector.broadcast %32 : vector<1x128xf32> to vector<112x128xf32>
    %34 = arith.addf %30, %33 : vector<112x128xf32>
    %35 = vector.extract_strided_slice %34 {offsets = [0, 0], sizes = [112, 64], strides = [1, 1]} : vector<112x128xf32> to vector<112x64xf32>
    %36 = vector.extract_strided_slice %34 {offsets = [0, 64], sizes = [112, 64], strides = [1, 1]} : vector<112x128xf32> to vector<112x64xf32>
    %37 = arith.negf %36 : vector<112x64xf32>
    %38 = math.exp %37 : vector<112x64xf32>
    %cst_24 = arith.constant 1.000000e+00 : f32
    %39 = vector.broadcast %cst_24 : f32 to vector<112x64xf32>
    %40 = arith.addf %39, %38 : vector<112x64xf32>
    %41 = arith.divf %39, %40 : vector<112x64xf32>
    %42 = arith.mulf %35, %41 : vector<112x64xf32>
    %43 = vector.broadcast %0 : vector<112x1xf32> to vector<112x64xf32>
    %44 = arith.mulf %42, %43 : vector<112x64xf32>
    %45 = arith.addf %44, %17 : vector<112x64xf32>
    %c2_i32_25 = arith.constant 2 : i32
    %46 = tpu.dynamic_rotate %45 by %c2_i32_25 dim 0 : vector<112x64xf32>, i32 -> vector<112x64xf32>
    %c0_26 = arith.constant 0 : index
    %c0_27 = arith.constant 0 : index
    %47 = vector.load %arg8[%c0_26, %c0_27] : memref<112x320xf32, #tpu.memory_space<vmem>>, vector<112x64xf32>
    tpu.vector_store %arg8[%c0_26, %c0_27], %46 {strides = array<i32>} : memref<112x320xf32, #tpu.memory_space<vmem>>, vector<112x64xf32>,
    %c1_i32_28 = arith.constant 1 : i32
    %48 = tpu.dynamic_rotate %45 by %c1_i32_28 dim 0 : vector<112x64xf32>, i32 -> vector<112x64xf32>
    %c0_29 = arith.constant 0 : index
    %c64_30 = arith.constant 64 : index
    %49 = vector.load %arg8[%c0_29, %c64_30] : memref<112x320xf32, #tpu.memory_space<vmem>>, vector<112x64xf32>
    tpu.vector_store %arg8[%c0_29, %c64_30], %48 {strides = array<i32>} : memref<112x320xf32, #tpu.memory_space<vmem>>, vector<112x64xf32>,
    %c0_31 = arith.constant 0 : index
    %c128_32 = arith.constant 128 : index
    %50 = vector.load %arg8[%c0_31, %c128_32] : memref<112x320xf32, #tpu.memory_space<vmem>>, vector<112x64xf32>
    tpu.vector_store %arg8[%c0_31, %c128_32], %45 {strides = array<i32>} : memref<112x320xf32, #tpu.memory_space<vmem>>, vector<112x64xf32>,
    %c111_i32_33 = arith.constant 111 : i32
    %51 = tpu.dynamic_rotate %45 by %c111_i32_33 dim 0 : vector<112x64xf32>, i32 -> vector<112x64xf32>
    %c0_34 = arith.constant 0 : index
    %c192_35 = arith.constant 192 : index
    %52 = vector.load %arg8[%c0_34, %c192_35] : memref<112x320xf32, #tpu.memory_space<vmem>>, vector<112x64xf32>
    tpu.vector_store %arg8[%c0_34, %c192_35], %51 {strides = array<i32>} : memref<112x320xf32, #tpu.memory_space<vmem>>, vector<112x64xf32>,
    %c110_i32_36 = arith.constant 110 : i32
    %53 = tpu.dynamic_rotate %45 by %c110_i32_36 dim 0 : vector<112x64xf32>, i32 -> vector<112x64xf32>
    %c0_37 = arith.constant 0 : index
    %c256_38 = arith.constant 256 : index
    %54 = vector.load %arg8[%c0_37, %c256_38] : memref<112x320xf32, #tpu.memory_space<vmem>>, vector<112x64xf32>
    tpu.vector_store %arg8[%c0_37, %c256_38], %53 {strides = array<i32>} : memref<112x320xf32, #tpu.memory_space<vmem>>, vector<112x64xf32>,
    %c0_39 = arith.constant 0 : index
    %c0_40 = arith.constant 0 : index
    %55 = vector.load %arg8[%c0_39, %c0_40] : memref<112x320xf32, #tpu.memory_space<vmem>>, vector<112x320xf32>
    %c1 = arith.constant 1 : index
    %c0_41 = arith.constant 0 : index
    %c0_42 = arith.constant 0 : index
    %56 = vector.load %arg5[%c1, %c0_41, %c0_42] : memref<10x320x128xf32, #tpu.memory_space<vmem>>, vector<1x320x128xf32>
    %57 = vector.shape_cast %56 : vector<1x320x128xf32> to vector<320x128xf32>
    %cst_43 = arith.constant dense<0.000000e+00> : vector<112x128xf32>
    %58 = tpu.matmul %55, %57, %cst_43 {dimension_numbers = #tpu.dot_dimension_numbers<[1], [0], [0], [1], [0, 0, 1, 1], [], []>} : vector<112x320xf32>, vector<320x128xf32>, vector<112x128xf32> -> vector<112x128xf32>
    %c1_44 = arith.constant 1 : index
    %c0_45 = arith.constant 0 : index
    %c0_46 = arith.constant 0 : index
    %59 = vector.load %arg6[%c1_44, %c0_45, %c0_46] : memref<10x1x128xf32, #tpu.memory_space<vmem>>, vector<1x1x128xf32>
    %60 = vector.shape_cast %59 : vector<1x1x128xf32> to vector<1x128xf32>
    %61 = vector.broadcast %60 : vector<1x128xf32> to vector<112x128xf32>
    %62 = arith.addf %58, %61 : vector<112x128xf32>
    %63 = vector.extract_strided_slice %62 {offsets = [0, 0], sizes = [112, 64], strides = [1, 1]} : vector<112x128xf32> to vector<112x64xf32>
    %64 = vector.extract_strided_slice %62 {offsets = [0, 64], sizes = [112, 64], strides = [1, 1]} : vector<112x128xf32> to vector<112x64xf32>
    %65 = arith.negf %64 : vector<112x64xf32>
    %66 = math.exp %65 : vector<112x64xf32>
    %cst_47 = arith.constant 1.000000e+00 : f32
    %67 = vector.broadcast %cst_47 : f32 to vector<112x64xf32>
    %68 = arith.addf %67, %66 : vector<112x64xf32>
    %69 = arith.divf %67, %68 : vector<112x64xf32>
    %70 = arith.mulf %63, %69 : vector<112x64xf32>
    %71 = vector.broadcast %0 : vector<112x1xf32> to vector<112x64xf32>
    %72 = arith.mulf %70, %71 : vector<112x64xf32>
    %c2_i32_48 = arith.constant 2 : i32
    %73 = tpu.dynamic_rotate %72 by %c2_i32_48 dim 0 : vector<112x64xf32>, i32 -> vector<112x64xf32>
    %c0_49 = arith.constant 0 : index
    %c0_50 = arith.constant 0 : index
    %74 = vector.load %arg8[%c0_49, %c0_50] : memref<112x320xf32, #tpu.memory_space<vmem>>, vector<112x64xf32>
    tpu.vector_store %arg8[%c0_49, %c0_50], %73 {strides = array<i32>} : memref<112x320xf32, #tpu.memory_space<vmem>>, vector<112x64xf32>,
    %c1_i32_51 = arith.constant 1 : i32
    %75 = tpu.dynamic_rotate %72 by %c1_i32_51 dim 0 : vector<112x64xf32>, i32 -> vector<112x64xf32>
    %c0_52 = arith.constant 0 : index
    %c64_53 = arith.constant 64 : index
    %76 = vector.load %arg8[%c0_52, %c64_53] : memref<112x320xf32, #tpu.memory_space<vmem>>, vector<112x64xf32>
    tpu.vector_store %arg8[%c0_52, %c64_53], %75 {strides = array<i32>} : memref<112x320xf32, #tpu.memory_space<vmem>>, vector<112x64xf32>,
    %c0_54 = arith.constant 0 : index
    %c128_55 = arith.constant 128 : index
    %77 = vector.load %arg8[%c0_54, %c128_55] : memref<112x320xf32, #tpu.memory_space<vmem>>, vector<112x64xf32>
    tpu.vector_store %arg8[%c0_54, %c128_55], %72 {strides = array<i32>} : memref<112x320xf32, #tpu.memory_space<vmem>>, vector<112x64xf32>,
    %c111_i32_56 = arith.constant 111 : i32
    %78 = tpu.dynamic_rotate %72 by %c111_i32_56 dim 0 : vector<112x64xf32>, i32 -> vector<112x64xf32>
    %c0_57 = arith.constant 0 : index
    %c192_58 = arith.constant 192 : index
    %79 = vector.load %arg8[%c0_57, %c192_58] : memref<112x320xf32, #tpu.memory_space<vmem>>, vector<112x64xf32>
    tpu.vector_store %arg8[%c0_57, %c192_58], %78 {strides = array<i32>} : memref<112x320xf32, #tpu.memory_space<vmem>>, vector<112x64xf32>,
    %c110_i32_59 = arith.constant 110 : i32
    %80 = tpu.dynamic_rotate %72 by %c110_i32_59 dim 0 : vector<112x64xf32>, i32 -> vector<112x64xf32>
    %c0_60 = arith.constant 0 : index
    %c256_61 = arith.constant 256 : index
    %81 = vector.load %arg8[%c0_60, %c256_61] : memref<112x320xf32, #tpu.memory_space<vmem>>, vector<112x64xf32>
    tpu.vector_store %arg8[%c0_60, %c256_61], %80 {strides = array<i32>} : memref<112x320xf32, #tpu.memory_space<vmem>>, vector<112x64xf32>,
    %c0_62 = arith.constant 0 : index
    %c0_63 = arith.constant 0 : index
    %82 = vector.load %arg8[%c0_62, %c0_63] : memref<112x320xf32, #tpu.memory_space<vmem>>, vector<112x320xf32>
    %c2 = arith.constant 2 : index
    %c0_64 = arith.constant 0 : index
    %c0_65 = arith.constant 0 : index
    %83 = vector.load %arg5[%c2, %c0_64, %c0_65] : memref<10x320x128xf32, #tpu.memory_space<vmem>>, vector<1x320x128xf32>
    %84 = vector.shape_cast %83 : vector<1x320x128xf32> to vector<320x128xf32>
    %cst_66 = arith.constant dense<0.000000e+00> : vector<112x128xf32>
    %85 = tpu.matmul %82, %84, %cst_66 {dimension_numbers = #tpu.dot_dimension_numbers<[1], [0], [0], [1], [0, 0, 1, 1], [], []>} : vector<112x320xf32>, vector<320x128xf32>, vector<112x128xf32> -> vector<112x128xf32>
    %c2_67 = arith.constant 2 : index
    %c0_68 = arith.constant 0 : index
    %c0_69 = arith.constant 0 : index
    %86 = vector.load %arg6[%c2_67, %c0_68, %c0_69] : memref<10x1x128xf32, #tpu.memory_space<vmem>>, vector<1x1x128xf32>
    %87 = vector.shape_cast %86 : vector<1x1x128xf32> to vector<1x128xf32>
    %88 = vector.broadcast %87 : vector<1x128xf32> to vector<112x128xf32>
    %89 = arith.addf %85, %88 : vector<112x128xf32>
    %90 = vector.extract_strided_slice %89 {offsets = [0, 0], sizes = [112, 64], strides = [1, 1]} : vector<112x128xf32> to vector<112x64xf32>
    %91 = vector.extract_strided_slice %89 {offsets = [0, 64], sizes = [112, 64], strides = [1, 1]} : vector<112x128xf32> to vector<112x64xf32>
    %92 = arith.negf %91 : vector<112x64xf32>
    %93 = math.exp %92 : vector<112x64xf32>
    %cst_70 = arith.constant 1.000000e+00 : f32
    %94 = vector.broadcast %cst_70 : f32 to vector<112x64xf32>
    %95 = arith.addf %94, %93 : vector<112x64xf32>
    %96 = arith.divf %94, %95 : vector<112x64xf32>
    %97 = arith.mulf %90, %96 : vector<112x64xf32>
    %98 = vector.broadcast %0 : vector<112x1xf32> to vector<112x64xf32>
    %99 = arith.mulf %97, %98 : vector<112x64xf32>
    %c2_i32_71 = arith.constant 2 : i32
    %100 = tpu.dynamic_rotate %99 by %c2_i32_71 dim 0 : vector<112x64xf32>, i32 -> vector<112x64xf32>
    %c0_72 = arith.constant 0 : index
    %c0_73 = arith.constant 0 : index
    %101 = vector.load %arg8[%c0_72, %c0_73] : memref<112x320xf32, #tpu.memory_space<vmem>>, vector<112x64xf32>
    tpu.vector_store %arg8[%c0_72, %c0_73], %100 {strides = array<i32>} : memref<112x320xf32, #tpu.memory_space<vmem>>, vector<112x64xf32>,
    %c1_i32_74 = arith.constant 1 : i32
    %102 = tpu.dynamic_rotate %99 by %c1_i32_74 dim 0 : vector<112x64xf32>, i32 -> vector<112x64xf32>
    %c0_75 = arith.constant 0 : index
    %c64_76 = arith.constant 64 : index
    %103 = vector.load %arg8[%c0_75, %c64_76] : memref<112x320xf32, #tpu.memory_space<vmem>>, vector<112x64xf32>
    tpu.vector_store %arg8[%c0_75, %c64_76], %102 {strides = array<i32>} : memref<112x320xf32, #tpu.memory_space<vmem>>, vector<112x64xf32>,
    %c0_77 = arith.constant 0 : index
    %c128_78 = arith.constant 128 : index
    %104 = vector.load %arg8[%c0_77, %c128_78] : memref<112x320xf32, #tpu.memory_space<vmem>>, vector<112x64xf32>
    tpu.vector_store %arg8[%c0_77, %c128_78], %99 {strides = array<i32>} : memref<112x320xf32, #tpu.memory_space<vmem>>, vector<112x64xf32>,
    %c111_i32_79 = arith.constant 111 : i32
    %105 = tpu.dynamic_rotate %99 by %c111_i32_79 dim 0 : vector<112x64xf32>, i32 -> vector<112x64xf32>
    %c0_80 = arith.constant 0 : index
    %c192_81 = arith.constant 192 : index
    %106 = vector.load %arg8[%c0_80, %c192_81] : memref<112x320xf32, #tpu.memory_space<vmem>>, vector<112x64xf32>
    tpu.vector_store %arg8[%c0_80, %c192_81], %105 {strides = array<i32>} : memref<112x320xf32, #tpu.memory_space<vmem>>, vector<112x64xf32>,
    %c110_i32_82 = arith.constant 110 : i32
    %107 = tpu.dynamic_rotate %99 by %c110_i32_82 dim 0 : vector<112x64xf32>, i32 -> vector<112x64xf32>
    %c0_83 = arith.constant 0 : index
    %c256_84 = arith.constant 256 : index
    %108 = vector.load %arg8[%c0_83, %c256_84] : memref<112x320xf32, #tpu.memory_space<vmem>>, vector<112x64xf32>
    tpu.vector_store %arg8[%c0_83, %c256_84], %107 {strides = array<i32>} : memref<112x320xf32, #tpu.memory_space<vmem>>, vector<112x64xf32>,
    %c0_85 = arith.constant 0 : index
    %c0_86 = arith.constant 0 : index
    %109 = vector.load %arg8[%c0_85, %c0_86] : memref<112x320xf32, #tpu.memory_space<vmem>>, vector<112x320xf32>
    %c3 = arith.constant 3 : index
    %c0_87 = arith.constant 0 : index
    %c0_88 = arith.constant 0 : index
    %110 = vector.load %arg5[%c3, %c0_87, %c0_88] : memref<10x320x128xf32, #tpu.memory_space<vmem>>, vector<1x320x128xf32>
    %111 = vector.shape_cast %110 : vector<1x320x128xf32> to vector<320x128xf32>
    %cst_89 = arith.constant dense<0.000000e+00> : vector<112x128xf32>
    %112 = tpu.matmul %109, %111, %cst_89 {dimension_numbers = #tpu.dot_dimension_numbers<[1], [0], [0], [1], [0, 0, 1, 1], [], []>} : vector<112x320xf32>, vector<320x128xf32>, vector<112x128xf32> -> vector<112x128xf32>
    %c3_90 = arith.constant 3 : index
    %c0_91 = arith.constant 0 : index
    %c0_92 = arith.constant 0 : index
    %113 = vector.load %arg6[%c3_90, %c0_91, %c0_92] : memref<10x1x128xf32, #tpu.memory_space<vmem>>, vector<1x1x128xf32>
    %114 = vector.shape_cast %113 : vector<1x1x128xf32> to vector<1x128xf32>
    %115 = vector.broadcast %114 : vector<1x128xf32> to vector<112x128xf32>
    %116 = arith.addf %112, %115 : vector<112x128xf32>
    %117 = vector.extract_strided_slice %116 {offsets = [0, 0], sizes = [112, 64], strides = [1, 1]} : vector<112x128xf32> to vector<112x64xf32>
    %118 = vector.extract_strided_slice %116 {offsets = [0, 64], sizes = [112, 64], strides = [1, 1]} : vector<112x128xf32> to vector<112x64xf32>
    %119 = arith.negf %118 : vector<112x64xf32>
    %120 = math.exp %119 : vector<112x64xf32>
    %cst_93 = arith.constant 1.000000e+00 : f32
    %121 = vector.broadcast %cst_93 : f32 to vector<112x64xf32>
    %122 = arith.addf %121, %120 : vector<112x64xf32>
    %123 = arith.divf %121, %122 : vector<112x64xf32>
    %124 = arith.mulf %117, %123 : vector<112x64xf32>
    %125 = vector.broadcast %0 : vector<112x1xf32> to vector<112x64xf32>
    %126 = arith.mulf %124, %125 : vector<112x64xf32>
    %c2_i32_94 = arith.constant 2 : i32
    %127 = tpu.dynamic_rotate %126 by %c2_i32_94 dim 0 : vector<112x64xf32>, i32 -> vector<112x64xf32>
    %c0_95 = arith.constant 0 : index
    %c0_96 = arith.constant 0 : index
    %128 = vector.load %arg8[%c0_95, %c0_96] : memref<112x320xf32, #tpu.memory_space<vmem>>, vector<112x64xf32>
    tpu.vector_store %arg8[%c0_95, %c0_96], %127 {strides = array<i32>} : memref<112x320xf32, #tpu.memory_space<vmem>>, vector<112x64xf32>,
    %c1_i32_97 = arith.constant 1 : i32
    %129 = tpu.dynamic_rotate %126 by %c1_i32_97 dim 0 : vector<112x64xf32>, i32 -> vector<112x64xf32>
    %c0_98 = arith.constant 0 : index
    %c64_99 = arith.constant 64 : index
    %130 = vector.load %arg8[%c0_98, %c64_99] : memref<112x320xf32, #tpu.memory_space<vmem>>, vector<112x64xf32>
    tpu.vector_store %arg8[%c0_98, %c64_99], %129 {strides = array<i32>} : memref<112x320xf32, #tpu.memory_space<vmem>>, vector<112x64xf32>,
    %c0_100 = arith.constant 0 : index
    %c128_101 = arith.constant 128 : index
    %131 = vector.load %arg8[%c0_100, %c128_101] : memref<112x320xf32, #tpu.memory_space<vmem>>, vector<112x64xf32>
    tpu.vector_store %arg8[%c0_100, %c128_101], %126 {strides = array<i32>} : memref<112x320xf32, #tpu.memory_space<vmem>>, vector<112x64xf32>,
    %c111_i32_102 = arith.constant 111 : i32
    %132 = tpu.dynamic_rotate %126 by %c111_i32_102 dim 0 : vector<112x64xf32>, i32 -> vector<112x64xf32>
    %c0_103 = arith.constant 0 : index
    %c192_104 = arith.constant 192 : index
    %133 = vector.load %arg8[%c0_103, %c192_104] : memref<112x320xf32, #tpu.memory_space<vmem>>, vector<112x64xf32>
    tpu.vector_store %arg8[%c0_103, %c192_104], %132 {strides = array<i32>} : memref<112x320xf32, #tpu.memory_space<vmem>>, vector<112x64xf32>,
    %c110_i32_105 = arith.constant 110 : i32
    %134 = tpu.dynamic_rotate %126 by %c110_i32_105 dim 0 : vector<112x64xf32>, i32 -> vector<112x64xf32>
    %c0_106 = arith.constant 0 : index
    %c256_107 = arith.constant 256 : index
    %135 = vector.load %arg8[%c0_106, %c256_107] : memref<112x320xf32, #tpu.memory_space<vmem>>, vector<112x64xf32>
    tpu.vector_store %arg8[%c0_106, %c256_107], %134 {strides = array<i32>} : memref<112x320xf32, #tpu.memory_space<vmem>>, vector<112x64xf32>,
    %c0_108 = arith.constant 0 : index
    %c0_109 = arith.constant 0 : index
    %136 = vector.load %arg8[%c0_108, %c0_109] : memref<112x320xf32, #tpu.memory_space<vmem>>, vector<112x320xf32>
    %c4 = arith.constant 4 : index
    %c0_110 = arith.constant 0 : index
    %c0_111 = arith.constant 0 : index
    %137 = vector.load %arg5[%c4, %c0_110, %c0_111] : memref<10x320x128xf32, #tpu.memory_space<vmem>>, vector<1x320x128xf32>
    %138 = vector.shape_cast %137 : vector<1x320x128xf32> to vector<320x128xf32>
    %cst_112 = arith.constant dense<0.000000e+00> : vector<112x128xf32>
    %139 = tpu.matmul %136, %138, %cst_112 {dimension_numbers = #tpu.dot_dimension_numbers<[1], [0], [0], [1], [0, 0, 1, 1], [], []>} : vector<112x320xf32>, vector<320x128xf32>, vector<112x128xf32> -> vector<112x128xf32>
    %c4_113 = arith.constant 4 : index
    %c0_114 = arith.constant 0 : index
    %c0_115 = arith.constant 0 : index
    %140 = vector.load %arg6[%c4_113, %c0_114, %c0_115] : memref<10x1x128xf32, #tpu.memory_space<vmem>>, vector<1x1x128xf32>
    %141 = vector.shape_cast %140 : vector<1x1x128xf32> to vector<1x128xf32>
    %142 = vector.broadcast %141 : vector<1x128xf32> to vector<112x128xf32>
    %143 = arith.addf %139, %142 : vector<112x128xf32>
    %144 = vector.extract_strided_slice %143 {offsets = [0, 0], sizes = [112, 64], strides = [1, 1]} : vector<112x128xf32> to vector<112x64xf32>
    %145 = vector.extract_strided_slice %143 {offsets = [0, 64], sizes = [112, 64], strides = [1, 1]} : vector<112x128xf32> to vector<112x64xf32>
    %146 = arith.negf %145 : vector<112x64xf32>
    %147 = math.exp %146 : vector<112x64xf32>
    %cst_116 = arith.constant 1.000000e+00 : f32
    %148 = vector.broadcast %cst_116 : f32 to vector<112x64xf32>
    %149 = arith.addf %148, %147 : vector<112x64xf32>
    %150 = arith.divf %148, %149 : vector<112x64xf32>
    %151 = arith.mulf %144, %150 : vector<112x64xf32>
    %152 = vector.broadcast %0 : vector<112x1xf32> to vector<112x64xf32>
    %153 = arith.mulf %151, %152 : vector<112x64xf32>
    %c2_i32_117 = arith.constant 2 : i32
    %154 = tpu.dynamic_rotate %153 by %c2_i32_117 dim 0 : vector<112x64xf32>, i32 -> vector<112x64xf32>
    %c0_118 = arith.constant 0 : index
    %c0_119 = arith.constant 0 : index
    %155 = vector.load %arg8[%c0_118, %c0_119] : memref<112x320xf32, #tpu.memory_space<vmem>>, vector<112x64xf32>
    tpu.vector_store %arg8[%c0_118, %c0_119], %154 {strides = array<i32>} : memref<112x320xf32, #tpu.memory_space<vmem>>, vector<112x64xf32>,
    %c1_i32_120 = arith.constant 1 : i32
    %156 = tpu.dynamic_rotate %153 by %c1_i32_120 dim 0 : vector<112x64xf32>, i32 -> vector<112x64xf32>
    %c0_121 = arith.constant 0 : index
    %c64_122 = arith.constant 64 : index
    %157 = vector.load %arg8[%c0_121, %c64_122] : memref<112x320xf32, #tpu.memory_space<vmem>>, vector<112x64xf32>
    tpu.vector_store %arg8[%c0_121, %c64_122], %156 {strides = array<i32>} : memref<112x320xf32, #tpu.memory_space<vmem>>, vector<112x64xf32>,
    %c0_123 = arith.constant 0 : index
    %c128_124 = arith.constant 128 : index
    %158 = vector.load %arg8[%c0_123, %c128_124] : memref<112x320xf32, #tpu.memory_space<vmem>>, vector<112x64xf32>
    tpu.vector_store %arg8[%c0_123, %c128_124], %153 {strides = array<i32>} : memref<112x320xf32, #tpu.memory_space<vmem>>, vector<112x64xf32>,
    %c111_i32_125 = arith.constant 111 : i32
    %159 = tpu.dynamic_rotate %153 by %c111_i32_125 dim 0 : vector<112x64xf32>, i32 -> vector<112x64xf32>
    %c0_126 = arith.constant 0 : index
    %c192_127 = arith.constant 192 : index
    %160 = vector.load %arg8[%c0_126, %c192_127] : memref<112x320xf32, #tpu.memory_space<vmem>>, vector<112x64xf32>
    tpu.vector_store %arg8[%c0_126, %c192_127], %159 {strides = array<i32>} : memref<112x320xf32, #tpu.memory_space<vmem>>, vector<112x64xf32>,
    %c110_i32_128 = arith.constant 110 : i32
    %161 = tpu.dynamic_rotate %153 by %c110_i32_128 dim 0 : vector<112x64xf32>, i32 -> vector<112x64xf32>
    %c0_129 = arith.constant 0 : index
    %c256_130 = arith.constant 256 : index
    %162 = vector.load %arg8[%c0_129, %c256_130] : memref<112x320xf32, #tpu.memory_space<vmem>>, vector<112x64xf32>
    tpu.vector_store %arg8[%c0_129, %c256_130], %161 {strides = array<i32>} : memref<112x320xf32, #tpu.memory_space<vmem>>, vector<112x64xf32>,
    %c0_131 = arith.constant 0 : index
    %c0_132 = arith.constant 0 : index
    %163 = vector.load %arg8[%c0_131, %c0_132] : memref<112x320xf32, #tpu.memory_space<vmem>>, vector<112x320xf32>
    %c5 = arith.constant 5 : index
    %c0_133 = arith.constant 0 : index
    %c0_134 = arith.constant 0 : index
    %164 = vector.load %arg5[%c5, %c0_133, %c0_134] : memref<10x320x128xf32, #tpu.memory_space<vmem>>, vector<1x320x128xf32>
    %165 = vector.shape_cast %164 : vector<1x320x128xf32> to vector<320x128xf32>
    %cst_135 = arith.constant dense<0.000000e+00> : vector<112x128xf32>
    %166 = tpu.matmul %163, %165, %cst_135 {dimension_numbers = #tpu.dot_dimension_numbers<[1], [0], [0], [1], [0, 0, 1, 1], [], []>} : vector<112x320xf32>, vector<320x128xf32>, vector<112x128xf32> -> vector<112x128xf32>
    %c5_136 = arith.constant 5 : index
    %c0_137 = arith.constant 0 : index
    %c0_138 = arith.constant 0 : index
    %167 = vector.load %arg6[%c5_136, %c0_137, %c0_138] : memref<10x1x128xf32, #tpu.memory_space<vmem>>, vector<1x1x128xf32>
    %168 = vector.shape_cast %167 : vector<1x1x128xf32> to vector<1x128xf32>
    %169 = vector.broadcast %168 : vector<1x128xf32> to vector<112x128xf32>
    %170 = arith.addf %166, %169 : vector<112x128xf32>
    %171 = vector.extract_strided_slice %170 {offsets = [0, 0], sizes = [112, 64], strides = [1, 1]} : vector<112x128xf32> to vector<112x64xf32>
    %172 = vector.extract_strided_slice %170 {offsets = [0, 64], sizes = [112, 64], strides = [1, 1]} : vector<112x128xf32> to vector<112x64xf32>
    %173 = arith.negf %172 : vector<112x64xf32>
    %174 = math.exp %173 : vector<112x64xf32>
    %cst_139 = arith.constant 1.000000e+00 : f32
    %175 = vector.broadcast %cst_139 : f32 to vector<112x64xf32>
    %176 = arith.addf %175, %174 : vector<112x64xf32>
    %177 = arith.divf %175, %176 : vector<112x64xf32>
    %178 = arith.mulf %171, %177 : vector<112x64xf32>
    %179 = vector.broadcast %0 : vector<112x1xf32> to vector<112x64xf32>
    %180 = arith.mulf %178, %179 : vector<112x64xf32>
    %181 = arith.addf %180, %45 : vector<112x64xf32>
    %c2_i32_140 = arith.constant 2 : i32
    %182 = tpu.dynamic_rotate %181 by %c2_i32_140 dim 0 : vector<112x64xf32>, i32 -> vector<112x64xf32>
    %c0_141 = arith.constant 0 : index
    %c0_142 = arith.constant 0 : index
    %183 = vector.load %arg8[%c0_141, %c0_142] : memref<112x320xf32, #tpu.memory_space<vmem>>, vector<112x64xf32>
    tpu.vector_store %arg8[%c0_141, %c0_142], %182 {strides = array<i32>} : memref<112x320xf32, #tpu.memory_space<vmem>>, vector<112x64xf32>,
    %c1_i32_143 = arith.constant 1 : i32
    %184 = tpu.dynamic_rotate %181 by %c1_i32_143 dim 0 : vector<112x64xf32>, i32 -> vector<112x64xf32>
    %c0_144 = arith.constant 0 : index
    %c64_145 = arith.constant 64 : index
    %185 = vector.load %arg8[%c0_144, %c64_145] : memref<112x320xf32, #tpu.memory_space<vmem>>, vector<112x64xf32>
    tpu.vector_store %arg8[%c0_144, %c64_145], %184 {strides = array<i32>} : memref<112x320xf32, #tpu.memory_space<vmem>>, vector<112x64xf32>,
    %c0_146 = arith.constant 0 : index
    %c128_147 = arith.constant 128 : index
    %186 = vector.load %arg8[%c0_146, %c128_147] : memref<112x320xf32, #tpu.memory_space<vmem>>, vector<112x64xf32>
    tpu.vector_store %arg8[%c0_146, %c128_147], %181 {strides = array<i32>} : memref<112x320xf32, #tpu.memory_space<vmem>>, vector<112x64xf32>,
    %c111_i32_148 = arith.constant 111 : i32
    %187 = tpu.dynamic_rotate %181 by %c111_i32_148 dim 0 : vector<112x64xf32>, i32 -> vector<112x64xf32>
    %c0_149 = arith.constant 0 : index
    %c192_150 = arith.constant 192 : index
    %188 = vector.load %arg8[%c0_149, %c192_150] : memref<112x320xf32, #tpu.memory_space<vmem>>, vector<112x64xf32>
    tpu.vector_store %arg8[%c0_149, %c192_150], %187 {strides = array<i32>} : memref<112x320xf32, #tpu.memory_space<vmem>>, vector<112x64xf32>,
    %c110_i32_151 = arith.constant 110 : i32
    %189 = tpu.dynamic_rotate %181 by %c110_i32_151 dim 0 : vector<112x64xf32>, i32 -> vector<112x64xf32>
    %c0_152 = arith.constant 0 : index
    %c256_153 = arith.constant 256 : index
    %190 = vector.load %arg8[%c0_152, %c256_153] : memref<112x320xf32, #tpu.memory_space<vmem>>, vector<112x64xf32>
    tpu.vector_store %arg8[%c0_152, %c256_153], %189 {strides = array<i32>} : memref<112x320xf32, #tpu.memory_space<vmem>>, vector<112x64xf32>,
    %c0_154 = arith.constant 0 : index
    %c0_155 = arith.constant 0 : index
    %191 = vector.load %arg8[%c0_154, %c0_155] : memref<112x320xf32, #tpu.memory_space<vmem>>, vector<112x320xf32>
    %c6 = arith.constant 6 : index
    %c0_156 = arith.constant 0 : index
    %c0_157 = arith.constant 0 : index
    %192 = vector.load %arg5[%c6, %c0_156, %c0_157] : memref<10x320x128xf32, #tpu.memory_space<vmem>>, vector<1x320x128xf32>
    %193 = vector.shape_cast %192 : vector<1x320x128xf32> to vector<320x128xf32>
    %cst_158 = arith.constant dense<0.000000e+00> : vector<112x128xf32>
    %194 = tpu.matmul %191, %193, %cst_158 {dimension_numbers = #tpu.dot_dimension_numbers<[1], [0], [0], [1], [0, 0, 1, 1], [], []>} : vector<112x320xf32>, vector<320x128xf32>, vector<112x128xf32> -> vector<112x128xf32>
    %c6_159 = arith.constant 6 : index
    %c0_160 = arith.constant 0 : index
    %c0_161 = arith.constant 0 : index
    %195 = vector.load %arg6[%c6_159, %c0_160, %c0_161] : memref<10x1x128xf32, #tpu.memory_space<vmem>>, vector<1x1x128xf32>
    %196 = vector.shape_cast %195 : vector<1x1x128xf32> to vector<1x128xf32>
    %197 = vector.broadcast %196 : vector<1x128xf32> to vector<112x128xf32>
    %198 = arith.addf %194, %197 : vector<112x128xf32>
    %199 = vector.extract_strided_slice %198 {offsets = [0, 0], sizes = [112, 64], strides = [1, 1]} : vector<112x128xf32> to vector<112x64xf32>
    %200 = vector.extract_strided_slice %198 {offsets = [0, 64], sizes = [112, 64], strides = [1, 1]} : vector<112x128xf32> to vector<112x64xf32>
    %201 = arith.negf %200 : vector<112x64xf32>
    %202 = math.exp %201 : vector<112x64xf32>
    %cst_162 = arith.constant 1.000000e+00 : f32
    %203 = vector.broadcast %cst_162 : f32 to vector<112x64xf32>
    %204 = arith.addf %203, %202 : vector<112x64xf32>
    %205 = arith.divf %203, %204 : vector<112x64xf32>
    %206 = arith.mulf %199, %205 : vector<112x64xf32>
    %207 = vector.broadcast %0 : vector<112x1xf32> to vector<112x64xf32>
    %208 = arith.mulf %206, %207 : vector<112x64xf32>
    %c2_i32_163 = arith.constant 2 : i32
    %209 = tpu.dynamic_rotate %208 by %c2_i32_163 dim 0 : vector<112x64xf32>, i32 -> vector<112x64xf32>
    %c0_164 = arith.constant 0 : index
    %c0_165 = arith.constant 0 : index
    %210 = vector.load %arg8[%c0_164, %c0_165] : memref<112x320xf32, #tpu.memory_space<vmem>>, vector<112x64xf32>
    tpu.vector_store %arg8[%c0_164, %c0_165], %209 {strides = array<i32>} : memref<112x320xf32, #tpu.memory_space<vmem>>, vector<112x64xf32>,
    %c1_i32_166 = arith.constant 1 : i32
    %211 = tpu.dynamic_rotate %208 by %c1_i32_166 dim 0 : vector<112x64xf32>, i32 -> vector<112x64xf32>
    %c0_167 = arith.constant 0 : index
    %c64_168 = arith.constant 64 : index
    %212 = vector.load %arg8[%c0_167, %c64_168] : memref<112x320xf32, #tpu.memory_space<vmem>>, vector<112x64xf32>
    tpu.vector_store %arg8[%c0_167, %c64_168], %211 {strides = array<i32>} : memref<112x320xf32, #tpu.memory_space<vmem>>, vector<112x64xf32>,
    %c0_169 = arith.constant 0 : index
    %c128_170 = arith.constant 128 : index
    %213 = vector.load %arg8[%c0_169, %c128_170] : memref<112x320xf32, #tpu.memory_space<vmem>>, vector<112x64xf32>
    tpu.vector_store %arg8[%c0_169, %c128_170], %208 {strides = array<i32>} : memref<112x320xf32, #tpu.memory_space<vmem>>, vector<112x64xf32>,
    %c111_i32_171 = arith.constant 111 : i32
    %214 = tpu.dynamic_rotate %208 by %c111_i32_171 dim 0 : vector<112x64xf32>, i32 -> vector<112x64xf32>
    %c0_172 = arith.constant 0 : index
    %c192_173 = arith.constant 192 : index
    %215 = vector.load %arg8[%c0_172, %c192_173] : memref<112x320xf32, #tpu.memory_space<vmem>>, vector<112x64xf32>
    tpu.vector_store %arg8[%c0_172, %c192_173], %214 {strides = array<i32>} : memref<112x320xf32, #tpu.memory_space<vmem>>, vector<112x64xf32>,
    %c110_i32_174 = arith.constant 110 : i32
    %216 = tpu.dynamic_rotate %208 by %c110_i32_174 dim 0 : vector<112x64xf32>, i32 -> vector<112x64xf32>
    %c0_175 = arith.constant 0 : index
    %c256_176 = arith.constant 256 : index
    %217 = vector.load %arg8[%c0_175, %c256_176] : memref<112x320xf32, #tpu.memory_space<vmem>>, vector<112x64xf32>
    tpu.vector_store %arg8[%c0_175, %c256_176], %216 {strides = array<i32>} : memref<112x320xf32, #tpu.memory_space<vmem>>, vector<112x64xf32>,
    %c0_177 = arith.constant 0 : index
    %c0_178 = arith.constant 0 : index
    %218 = vector.load %arg8[%c0_177, %c0_178] : memref<112x320xf32, #tpu.memory_space<vmem>>, vector<112x320xf32>
    %c7 = arith.constant 7 : index
    %c0_179 = arith.constant 0 : index
    %c0_180 = arith.constant 0 : index
    %219 = vector.load %arg5[%c7, %c0_179, %c0_180] : memref<10x320x128xf32, #tpu.memory_space<vmem>>, vector<1x320x128xf32>
    %220 = vector.shape_cast %219 : vector<1x320x128xf32> to vector<320x128xf32>
    %cst_181 = arith.constant dense<0.000000e+00> : vector<112x128xf32>
    %221 = tpu.matmul %218, %220, %cst_181 {dimension_numbers = #tpu.dot_dimension_numbers<[1], [0], [0], [1], [0, 0, 1, 1], [], []>} : vector<112x320xf32>, vector<320x128xf32>, vector<112x128xf32> -> vector<112x128xf32>
    %c7_182 = arith.constant 7 : index
    %c0_183 = arith.constant 0 : index
    %c0_184 = arith.constant 0 : index
    %222 = vector.load %arg6[%c7_182, %c0_183, %c0_184] : memref<10x1x128xf32, #tpu.memory_space<vmem>>, vector<1x1x128xf32>
    %223 = vector.shape_cast %222 : vector<1x1x128xf32> to vector<1x128xf32>
    %224 = vector.broadcast %223 : vector<1x128xf32> to vector<112x128xf32>
    %225 = arith.addf %221, %224 : vector<112x128xf32>
    %226 = vector.extract_strided_slice %225 {offsets = [0, 0], sizes = [112, 64], strides = [1, 1]} : vector<112x128xf32> to vector<112x64xf32>
    %227 = vector.extract_strided_slice %225 {offsets = [0, 64], sizes = [112, 64], strides = [1, 1]} : vector<112x128xf32> to vector<112x64xf32>
    %228 = arith.negf %227 : vector<112x64xf32>
    %229 = math.exp %228 : vector<112x64xf32>
    %cst_185 = arith.constant 1.000000e+00 : f32
    %230 = vector.broadcast %cst_185 : f32 to vector<112x64xf32>
    %231 = arith.addf %230, %229 : vector<112x64xf32>
    %232 = arith.divf %230, %231 : vector<112x64xf32>
    %233 = arith.mulf %226, %232 : vector<112x64xf32>
    %234 = vector.broadcast %0 : vector<112x1xf32> to vector<112x64xf32>
    %235 = arith.mulf %233, %234 : vector<112x64xf32>
    %c2_i32_186 = arith.constant 2 : i32
    %236 = tpu.dynamic_rotate %235 by %c2_i32_186 dim 0 : vector<112x64xf32>, i32 -> vector<112x64xf32>
    %c0_187 = arith.constant 0 : index
    %c0_188 = arith.constant 0 : index
    %237 = vector.load %arg8[%c0_187, %c0_188] : memref<112x320xf32, #tpu.memory_space<vmem>>, vector<112x64xf32>
    tpu.vector_store %arg8[%c0_187, %c0_188], %236 {strides = array<i32>} : memref<112x320xf32, #tpu.memory_space<vmem>>, vector<112x64xf32>,
    %c1_i32_189 = arith.constant 1 : i32
    %238 = tpu.dynamic_rotate %235 by %c1_i32_189 dim 0 : vector<112x64xf32>, i32 -> vector<112x64xf32>
    %c0_190 = arith.constant 0 : index
    %c64_191 = arith.constant 64 : index
    %239 = vector.load %arg8[%c0_190, %c64_191] : memref<112x320xf32, #tpu.memory_space<vmem>>, vector<112x64xf32>
    tpu.vector_store %arg8[%c0_190, %c64_191], %238 {strides = array<i32>} : memref<112x320xf32, #tpu.memory_space<vmem>>, vector<112x64xf32>,
    %c0_192 = arith.constant 0 : index
    %c128_193 = arith.constant 128 : index
    %240 = vector.load %arg8[%c0_192, %c128_193] : memref<112x320xf32, #tpu.memory_space<vmem>>, vector<112x64xf32>
    tpu.vector_store %arg8[%c0_192, %c128_193], %235 {strides = array<i32>} : memref<112x320xf32, #tpu.memory_space<vmem>>, vector<112x64xf32>,
    %c111_i32_194 = arith.constant 111 : i32
    %241 = tpu.dynamic_rotate %235 by %c111_i32_194 dim 0 : vector<112x64xf32>, i32 -> vector<112x64xf32>
    %c0_195 = arith.constant 0 : index
    %c192_196 = arith.constant 192 : index
    %242 = vector.load %arg8[%c0_195, %c192_196] : memref<112x320xf32, #tpu.memory_space<vmem>>, vector<112x64xf32>
    tpu.vector_store %arg8[%c0_195, %c192_196], %241 {strides = array<i32>} : memref<112x320xf32, #tpu.memory_space<vmem>>, vector<112x64xf32>,
    %c110_i32_197 = arith.constant 110 : i32
    %243 = tpu.dynamic_rotate %235 by %c110_i32_197 dim 0 : vector<112x64xf32>, i32 -> vector<112x64xf32>
    %c0_198 = arith.constant 0 : index
    %c256_199 = arith.constant 256 : index
    %244 = vector.load %arg8[%c0_198, %c256_199] : memref<112x320xf32, #tpu.memory_space<vmem>>, vector<112x64xf32>
    tpu.vector_store %arg8[%c0_198, %c256_199], %243 {strides = array<i32>} : memref<112x320xf32, #tpu.memory_space<vmem>>, vector<112x64xf32>,
    %c0_200 = arith.constant 0 : index
    %c0_201 = arith.constant 0 : index
    %245 = vector.load %arg8[%c0_200, %c0_201] : memref<112x320xf32, #tpu.memory_space<vmem>>, vector<112x320xf32>
    %c8 = arith.constant 8 : index
    %c0_202 = arith.constant 0 : index
    %c0_203 = arith.constant 0 : index
    %246 = vector.load %arg5[%c8, %c0_202, %c0_203] : memref<10x320x128xf32, #tpu.memory_space<vmem>>, vector<1x320x128xf32>
    %247 = vector.shape_cast %246 : vector<1x320x128xf32> to vector<320x128xf32>
    %cst_204 = arith.constant dense<0.000000e+00> : vector<112x128xf32>
    %248 = tpu.matmul %245, %247, %cst_204 {dimension_numbers = #tpu.dot_dimension_numbers<[1], [0], [0], [1], [0, 0, 1, 1], [], []>} : vector<112x320xf32>, vector<320x128xf32>, vector<112x128xf32> -> vector<112x128xf32>
    %c8_205 = arith.constant 8 : index
    %c0_206 = arith.constant 0 : index
    %c0_207 = arith.constant 0 : index
    %249 = vector.load %arg6[%c8_205, %c0_206, %c0_207] : memref<10x1x128xf32, #tpu.memory_space<vmem>>, vector<1x1x128xf32>
    %250 = vector.shape_cast %249 : vector<1x1x128xf32> to vector<1x128xf32>
    %251 = vector.broadcast %250 : vector<1x128xf32> to vector<112x128xf32>
    %252 = arith.addf %248, %251 : vector<112x128xf32>
    %253 = vector.extract_strided_slice %252 {offsets = [0, 0], sizes = [112, 64], strides = [1, 1]} : vector<112x128xf32> to vector<112x64xf32>
    %254 = vector.extract_strided_slice %252 {offsets = [0, 64], sizes = [112, 64], strides = [1, 1]} : vector<112x128xf32> to vector<112x64xf32>
    %255 = arith.negf %254 : vector<112x64xf32>
    %256 = math.exp %255 : vector<112x64xf32>
    %cst_208 = arith.constant 1.000000e+00 : f32
    %257 = vector.broadcast %cst_208 : f32 to vector<112x64xf32>
    %258 = arith.addf %257, %256 : vector<112x64xf32>
    %259 = arith.divf %257, %258 : vector<112x64xf32>
    %260 = arith.mulf %253, %259 : vector<112x64xf32>
    %261 = vector.broadcast %0 : vector<112x1xf32> to vector<112x64xf32>
    %262 = arith.mulf %260, %261 : vector<112x64xf32>
    %c2_i32_209 = arith.constant 2 : i32
    %263 = tpu.dynamic_rotate %262 by %c2_i32_209 dim 0 : vector<112x64xf32>, i32 -> vector<112x64xf32>
    %c0_210 = arith.constant 0 : index
    %c0_211 = arith.constant 0 : index
    %264 = vector.load %arg8[%c0_210, %c0_211] : memref<112x320xf32, #tpu.memory_space<vmem>>, vector<112x64xf32>
    tpu.vector_store %arg8[%c0_210, %c0_211], %263 {strides = array<i32>} : memref<112x320xf32, #tpu.memory_space<vmem>>, vector<112x64xf32>,
    %c1_i32_212 = arith.constant 1 : i32
    %265 = tpu.dynamic_rotate %262 by %c1_i32_212 dim 0 : vector<112x64xf32>, i32 -> vector<112x64xf32>
    %c0_213 = arith.constant 0 : index
    %c64_214 = arith.constant 64 : index
    %266 = vector.load %arg8[%c0_213, %c64_214] : memref<112x320xf32, #tpu.memory_space<vmem>>, vector<112x64xf32>
    tpu.vector_store %arg8[%c0_213, %c64_214], %265 {strides = array<i32>} : memref<112x320xf32, #tpu.memory_space<vmem>>, vector<112x64xf32>,
    %c0_215 = arith.constant 0 : index
    %c128_216 = arith.constant 128 : index
    %267 = vector.load %arg8[%c0_215, %c128_216] : memref<112x320xf32, #tpu.memory_space<vmem>>, vector<112x64xf32>
    tpu.vector_store %arg8[%c0_215, %c128_216], %262 {strides = array<i32>} : memref<112x320xf32, #tpu.memory_space<vmem>>, vector<112x64xf32>,
    %c111_i32_217 = arith.constant 111 : i32
    %268 = tpu.dynamic_rotate %262 by %c111_i32_217 dim 0 : vector<112x64xf32>, i32 -> vector<112x64xf32>
    %c0_218 = arith.constant 0 : index
    %c192_219 = arith.constant 192 : index
    %269 = vector.load %arg8[%c0_218, %c192_219] : memref<112x320xf32, #tpu.memory_space<vmem>>, vector<112x64xf32>
    tpu.vector_store %arg8[%c0_218, %c192_219], %268 {strides = array<i32>} : memref<112x320xf32, #tpu.memory_space<vmem>>, vector<112x64xf32>,
    %c110_i32_220 = arith.constant 110 : i32
    %270 = tpu.dynamic_rotate %262 by %c110_i32_220 dim 0 : vector<112x64xf32>, i32 -> vector<112x64xf32>
    %c0_221 = arith.constant 0 : index
    %c256_222 = arith.constant 256 : index
    %271 = vector.load %arg8[%c0_221, %c256_222] : memref<112x320xf32, #tpu.memory_space<vmem>>, vector<112x64xf32>
    tpu.vector_store %arg8[%c0_221, %c256_222], %270 {strides = array<i32>} : memref<112x320xf32, #tpu.memory_space<vmem>>, vector<112x64xf32>,
    %c0_223 = arith.constant 0 : index
    %c0_224 = arith.constant 0 : index
    %272 = vector.load %arg8[%c0_223, %c0_224] : memref<112x320xf32, #tpu.memory_space<vmem>>, vector<112x320xf32>
    %c9 = arith.constant 9 : index
    %c0_225 = arith.constant 0 : index
    %c0_226 = arith.constant 0 : index
    %273 = vector.load %arg5[%c9, %c0_225, %c0_226] : memref<10x320x128xf32, #tpu.memory_space<vmem>>, vector<1x320x128xf32>
    %274 = vector.shape_cast %273 : vector<1x320x128xf32> to vector<320x128xf32>
    %cst_227 = arith.constant dense<0.000000e+00> : vector<112x128xf32>
    %275 = tpu.matmul %272, %274, %cst_227 {dimension_numbers = #tpu.dot_dimension_numbers<[1], [0], [0], [1], [0, 0, 1, 1], [], []>} : vector<112x320xf32>, vector<320x128xf32>, vector<112x128xf32> -> vector<112x128xf32>
    %c9_228 = arith.constant 9 : index
    %c0_229 = arith.constant 0 : index
    %c0_230 = arith.constant 0 : index
    %276 = vector.load %arg6[%c9_228, %c0_229, %c0_230] : memref<10x1x128xf32, #tpu.memory_space<vmem>>, vector<1x1x128xf32>
    %277 = vector.shape_cast %276 : vector<1x1x128xf32> to vector<1x128xf32>
    %278 = vector.broadcast %277 : vector<1x128xf32> to vector<112x128xf32>
    %279 = arith.addf %275, %278 : vector<112x128xf32>
    %280 = vector.extract_strided_slice %279 {offsets = [0, 0], sizes = [112, 64], strides = [1, 1]} : vector<112x128xf32> to vector<112x64xf32>
    %281 = vector.extract_strided_slice %279 {offsets = [0, 64], sizes = [112, 64], strides = [1, 1]} : vector<112x128xf32> to vector<112x64xf32>
    %282 = arith.negf %281 : vector<112x64xf32>
    %283 = math.exp %282 : vector<112x64xf32>
    %cst_231 = arith.constant 1.000000e+00 : f32
    %284 = vector.broadcast %cst_231 : f32 to vector<112x64xf32>
    %285 = arith.addf %284, %283 : vector<112x64xf32>
    %286 = arith.divf %284, %285 : vector<112x64xf32>
    %287 = arith.mulf %280, %286 : vector<112x64xf32>
    %288 = vector.broadcast %0 : vector<112x1xf32> to vector<112x64xf32>
    %289 = arith.mulf %287, %288 : vector<112x64xf32>
    %c0_232 = arith.constant 0 : index
    %c0_233 = arith.constant 0 : index
    %c0_234 = arith.constant 0 : index
    %290 = vector.load %arg7[%c0_232, %c0_233, %c0_234] : memref<1x112x64xf32, #tpu.memory_space<vmem>>, vector<1x112x64xf32>
    %291 = vector.shape_cast %290 : vector<1x112x64xf32> to vector<112x64xf32>
    %292 = vector.shape_cast %289 : vector<112x64xf32> to vector<1x112x64xf32>
    tpu.vector_store %arg7[%c0_232, %c0_233, %c0_234], %292 {strides = array<i32>} : memref<1x112x64xf32, #tpu.memory_space<vmem>>, vector<1x112x64xf32>,
    return
  }
  func.func @transform_0(%arg0: i32) -> (i32, i32, i32) {
    %c0_i32 = arith.constant 0 : i32
    %c0_i32_0 = arith.constant 0 : i32
    %c0_i32_1 = arith.constant 0 : i32
    return %arg0, %c0_i32, %c0_i32_0 : i32, i32, i32
  }
  func.func @transform_1(%arg0: i32) -> (i32, i32) {
    %c0_i32 = arith.constant 0 : i32
    %c0_i32_0 = arith.constant 0 : i32
    %c0_i32_1 = arith.constant 0 : i32
    return %c0_i32, %c0_i32_0 : i32, i32
  }
  func.func @transform_2(%arg0: i32) -> (i32, i32) {
    %c0_i32 = arith.constant 0 : i32
    %c0_i32_0 = arith.constant 0 : i32
    %c0_i32_1 = arith.constant 0 : i32
    return %c0_i32, %c0_i32_0 : i32, i32
  }
  func.func @transform_3(%arg0: i32) -> (i32, i32) {
    %c0_i32 = arith.constant 0 : i32
    %c0_i32_0 = arith.constant 0 : i32
    %c0_i32_1 = arith.constant 0 : i32
    return %c0_i32, %c0_i32_0 : i32, i32
  }
  func.func @transform_4(%arg0: i32) -> (i32, i32, i32) {
    %c0_i32 = arith.constant 0 : i32
    %c0_i32_0 = arith.constant 0 : i32
    %c0_i32_1 = arith.constant 0 : i32
    %c0_i32_2 = arith.constant 0 : i32
    return %c0_i32, %c0_i32_0, %c0_i32_1 : i32, i32, i32
  }
  func.func @transform_5(%arg0: i32) -> (i32, i32, i32) {
    %c0_i32 = arith.constant 0 : i32
    %c0_i32_0 = arith.constant 0 : i32
    %c0_i32_1 = arith.constant 0 : i32
    %c0_i32_2 = arith.constant 0 : i32
    return %c0_i32, %c0_i32_0, %c0_i32_1 : i32, i32, i32
  }
  func.func @transform_6(%arg0: i32) -> (i32, i32, i32) {
    %c0_i32 = arith.constant 0 : i32
    %c0_i32_0 = arith.constant 0 : i32
    %c0_i32_1 = arith.constant 0 : i32
    return %arg0, %c0_i32, %c0_i32_0 : i32, i32, i32
  }
}

</mosaic_0001>

<bundles_post_ra>
// kernel: tpu_custom_call.1
= control target key start
LH: loop header
LB: loop body
LE: loop exit
PB: predicated region body
PF: predicated region fallthrough
CT: control target
= control target key end

     0   :  { %11 = vsyncpa [#allocation4], 0  ;;  %s16965_s0 = inlined_call_operand.vmem [shape: f32[1,112,40], index: 0, kind: input, shape index: {}]   ;;  %s16966_s1 = inlined_call_operand.vmem [shape: f32[112,1], index: 1, kind: input, shape index: {}]   ;;  %s16967_s2 = inlined_call_operand.hbm [shape: f32[40,128], index: 2, kind: input, shape index: {}]   ;;  %s16968_s3 = inlined_call_operand.hbm [shape: f32[1,128], index: 3, kind: input, shape index: {}]   ;;  %s16969_s4 = inlined_call_operand.hbm [shape: f32[10,320,128], index: 4, kind: input, shape index: {}]   ;;  %s16970_s5 = inlined_call_operand.hbm [shape: f32[10,1,128], index: 5, kind: input, shape index: {}]   ;;  %s16971_s6 = inlined_call_operand.vmem [shape: f32[1,112,64], index: 6, kind: output, shape index: {}]  }
   0x1   :  { %12 = vsyncpa [#allocation6], 0 }
   0x2   :  { %13 = vsyncpa [#allocation9], 0  ;;  %s11650_s21 = smov [#allocation5]   ;;  %s11651_s23 = smov [#allocation3]  }
   0x3   :  { %s36_s22 = sshll.u32 %s11650_s21, 4  ;;  %s23_s24 = sshll.u32 %s11651_s23, 4  ;;  %s37_s22 = int_to_ptr.vmem [resolvable:$true] %s36_s22  ;;  %s24_s24 = int_to_ptr.vmem [resolvable:$true] %s23_s24 }
   0x4   :  { %s11572_s25 = scalar_lea.vmem %s37_s22, 16  ;;  %s11576_s26 = scalar_lea.vmem %s37_s22, 32 }
   0x5   :  { %p11573_p0 = scmp.ne.s32.totalorder %s37_s22, %s11572_s25  ;;  %p11577_p1 = scmp.lt.s32.totalorder %s37_s22, %s37_s22 }
   0x6   :  { %p11578_p2 = scmp.lt.s32.totalorder %s11576_s26, %s11572_s25 }
   0x8   :  { %p11579_p3 = por %p11578_p2, %p11577_p1 }
   0xa   :  { %p11580_p4 = pnand %p11579_p3, %p11573_p0 }
   0xc   :  { %11583 = shalt.err (!%p11580_p4)
}
   0xd   :  { %39 = dma.hbm_to_vmem [thread:$0]  %s16968_s3, 16, %s37_s22, [#allocation6]  }
   0xe   :  { %s11592_s29 = scalar_lea.vmem %s24_s24, 640  ;;  %p11597_p6 = scmp.lt.s32.totalorder %s24_s24, %s24_s24 }
   0xf   :  { %p11593_p5 = scmp.ne.s32.totalorder %s24_s24, %s11592_s29  ;;  %p11598_p7 = scmp.lt.s32.totalorder %s11592_s29, %s11592_s29 }
  0x11   :  { %p11599_p8 = por %p11598_p7, %p11597_p6 }
  0x13   :  { %p11600_p9 = pnand %p11599_p8, %p11593_p5 }
  0x15   :  { %11603 = shalt.err (!%p11600_p9)
}
  0x16   :  { %s11652_s30 = smov 128   ;;  %s11653_s7 = smov 8  }
  0x17   :  { %29 = dma.hbm_to_vmem [thread:$0]  %s16967_s2, 640, %s24_s24, [#allocation4], %s11652_s30, %s11652_s30, %s11653_s7  }
  0x18   :  { %s11654_s10 = smov [#allocation7]   ;;  %s11655_s12 = smov [#allocation8]  }
  0x19   :  { %s45_s11 = sshll.u32 %s11654_s10, 4  ;;  %s57_s13 = sshll.u32 %s11655_s12, 4  ;;  %s46_s11 = int_to_ptr.vmem [resolvable:$true] %s45_s11  ;;  %s58_s13 = int_to_ptr.vmem [resolvable:$true] %s57_s13 }
  0x1a   :  { %s11612_s3 = scalar_lea.vmem %s46_s11, 51200  ;;  %p11617_p11 = scmp.lt.s32.totalorder %s46_s11, %s46_s11 }
  0x1b   :  { %p11613_p10 = scmp.ne.s32.totalorder %s46_s11, %s11612_s3  ;;  %p11618_p12 = scmp.lt.s32.totalorder %s11612_s3, %s11612_s3 }
  0x1d   :  { %p11619_p13 = por %p11618_p12, %p11617_p11 }
  0x1f   :  { %p11620_p0 = pnand %p11619_p13, %p11613_p10 }
  0x21   :  { %11623 = shalt.err (!%p11620_p0)
}
  0x22   :  { %51 = dma.hbm_to_vmem [thread:$0]  %s16969_s4, 51200, %s46_s11, [#allocation6], %s11652_s30, %s11652_s30, %s11653_s7  }
  0x23   :  { %s11632_s16 = scalar_lea.vmem %s58_s13, 160  ;;  %p11637_p2 = scmp.lt.s32.totalorder %s58_s13, %s58_s13 }
  0x24   :  { %p11633_p1 = scmp.ne.s32.totalorder %s58_s13, %s11632_s16  ;;  %p11638_p3 = scmp.lt.s32.totalorder %s11632_s16, %s11632_s16 }
  0x26   :  { %p11639_p4 = por %p11638_p3, %p11637_p2 }
  0x28   :  { %p11640_p5 = pnand %p11639_p4, %p11633_p1 }
  0x2a   :  { %11643 = shalt.err (!%p11640_p5)
}
  0x2b   :  { %s11656_s2 = smov 16   ;;  %s11657_s17 = smov 1  }
  0x2c   :  { %63 = dma.hbm_to_vmem [thread:$0]  %s16970_s5, 160, %s58_s13, [#allocation9], %s11656_s2, %s11656_s2, %s11657_s17  }
  0x2d   :  { %11644 = dma.done.wait [#allocation4], 640  }
  0x2e   :  { %11645 = vsyncadd [#allocation4], 4294966656 }
  0x2f   :  { %11646 = dma.done.wait [#allocation6], 51216  }
  0x30   :  { %11647 = vsyncadd [#allocation6], 4294916080 }
  0x31   :  { %11648 = dma.done.wait [#allocation9], 160  }
  0x32   :  { %11649 = vsyncadd [#allocation9], 4294967136  ;;  %vm116_vm0 = vcmask 326656   ;;  %v108_v0 = vld [vmem:[#allocation3 + $0x20] sm:$0xff]  ;;  %v107_v1 = vld [vmem:[#allocation3 + $0x18] sm:$0xff]  ;;  %v11658_v19 = vmov 0  }
  0x33   :  { %10535 = vmatprep.subr.mxu0 %v108_v0  ;;  %v90_v2 = vld [vmem:[%s16965_s0] sm:$0xff]  ;;  %v105_v4 = vld [vmem:[#allocation3 + $0x8] sm:$0xff]  ;;  %v104_v5 = vld [vmem:[#allocation3] sm:$0xff]  ;;  %10946 = vset.pattern.permute.xlu0 %v11658_v19  ;;  %vm563_vm1 = vcmask 523264   ;;  %vm663_vm6 = vcmask 1048064  }
  0x34   :  { %10536 = vmatpush3.msra.mxu0 %v108_v0  ;;  %v106_v3 = vld [vmem:[#allocation3 + $0x10] sm:$0xff]  ;;  %10545 = vmatprep.mubr.msk.f32.mxu0 %vm116_vm0, %v90_v2  ;;  %v91_v6 = vld [vmem:[%s16965_s0 + $0x8] sm:$0xff]  ;;  %v92_v7 = vld [vmem:[%s16965_s0 + $0x10] sm:$0xff] }
  0x35   :  { %10537 = vmatprep.subr.mxu0 %v107_v1  ;;  %v93_v8 = vld [vmem:[%s16965_s0 + $0x18] sm:$0xff]  ;;  %v94_v9 = vld [vmem:[%s16965_s0 + $0x20] sm:$0xff]  ;;  %v95_v10 = vld [vmem:[%s16965_s0 + $0x28] sm:$0xff]  ;;  %10947 = vset.pattern.permute.xlu1 %v11658_v19 }
  0x36   :  { %10538 = vmatpush3.msra.mxu0 %v107_v1  ;;  %v96_v11 = vld [vmem:[%s16965_s0 + $0x30] sm:$0xff]  ;;  %v97_v12 = vld [vmem:[%s16965_s0 + $0x38] sm:$0xff]  ;;  %v98_v13 = vld [vmem:[%s16965_s0 + $0x40] sm:$0xff] }
  0x37   :  { %10539 = vmatprep.subr.mxu0 %v106_v3  ;;  %v99_v14 = vld [vmem:[%s16965_s0 + $0x48] sm:$0xff]  ;;  %v100_v15 = vld [vmem:[%s16965_s0 + $0x50] sm:$0xff]  ;;  %v101_v16 = vld [vmem:[%s16965_s0 + $0x58] sm:$0xff] }
  0x38   :  { %10540 = vmatpush3.msra.mxu0 %v106_v3  ;;  %v102_v17 = vld [vmem:[%s16965_s0 + $0x60] sm:$0xff]  ;;  %v103_v18 = vld [vmem:[%s16965_s0 + $0x68] sm:$0xff]  ;;  %v11772_v23 = vld [vmem:[#allocation5] ss:$0 sm:$0xff]  ;;  %s11659_s0 = smov 64  }
  0x39   :  { %10541 = vmatprep.subr.mxu0 %v105_v4  ;;  %v76_v20 = vld [vmem:[%s16966_s1] sm:$0xff]  ;;  %v77_v21 = vld [vmem:[%s16966_s1 + $0x8] sm:$0xff]  ;;  %v78_v56 = vld [vmem:[%s16966_s1 + $0x10] sm:$0xff] }
  0x3a   :  { %10542 = vmatpush3.msra.mxu0 %v105_v4  ;;  %450 = vperm.xlu0 %10946, %v76_v20   ;;  %v89_v22 = vld [vmem:[%s16966_s1 + $0x68] sm:$0xff]  ;;  %v79_v59 = vld [vmem:[%s16966_s1 + $0x18] sm:$0xff]  ;;  %v80_v1 = vld [vmem:[%s16966_s1 + $0x20] sm:$0xff] }
  0x3b   :  { %10543 = vmatprep.subr.mxu0 %v104_v5  ;;  %515 = vperm.xlu1 %10947, %v89_v22   ;;  %v912_v19 = vld [vmem:[#allocation7 + $0x120] sm:$0xff] }
  0x3c   :  { %10544 = vmatpush3.msra.mxu0 %v104_v5  ;;  %v83_v20 = vld [vmem:[%s16966_s1 + $0x38] sm:$0xff] }
  0x3d   :  { %10546 = vmatmul.mubr.msk.f32.vlgmr.msra.gmra.mxu0 %vm116_vm0, %v91_v6  ;;  %v81_v6 = vld [vmem:[%s16966_s1 + $0x28] sm:$0xff] }
  0x3e   :  { %10548 = vmatprep.mubr.msk.f32.mxu0 %vm116_vm0, %v92_v7  ;;  %455 = vperm.xlu0 %10946, %v77_v21  }
  0x41   :  { %10549 = vmatmul.mubr.msk.f32.gmra.mxu0 %vm116_vm0, %v93_v8 }
  0x42   :  { %10551 = vmatprep.mubr.msk.f32.mxu0 %vm116_vm0, %v94_v9  ;;  %v915_v9 = vld [vmem:[#allocation7 + $0x138] sm:$0xff] }
  0x43   :  { %10566 = vmatprep.subr.mxu0 %v915_v9 }
  0x44   :  { %10567 = vmatpush3.msra.mxu0 %v915_v9 }
  0x45   :  { %10552 = vmatmul.mubr.msk.f32.gmra.mxu0 %vm116_vm0, %v95_v10 }
  0x46   :  { %10554 = vmatprep.mubr.msk.f32.mxu0 %vm116_vm0, %v96_v11 }
  0x49   :  { %10555 = vmatmul.mubr.msk.f32.gmra.mxu0 %vm116_vm0, %v97_v12  ;;  %v914_v12 = vld [vmem:[#allocation7 + $0x130] sm:$0xff] }
  0x4a   :  { %10557 = vmatprep.mubr.msk.f32.mxu0 %vm116_vm0, %v98_v13  ;;  %v82_v13 = vld [vmem:[%s16966_s1 + $0x30] sm:$0xff]  ;;  %10568 = vmatprep.subr.mxu0 %v914_v12 }
  0x4b   :  { %10569 = vmatpush3.msra.mxu0 %v914_v12 }
  0x4d   :  { %10558 = vmatmul.mubr.msk.f32.gmra.mxu0 %vm116_vm0, %v99_v14 }
  0x4e   :  { %10560 = vmatprep.mubr.msk.f32.mxu0 %vm116_vm0, %v100_v15 }
  0x51   :  { %10561 = vmatmul.mubr.msk.f32.gmra.mxu0 %vm116_vm0, %v101_v16  ;;  %v913_v16 = vld [vmem:[#allocation7 + $0x128] sm:$0xff] }
  0x52   :  { %10563 = vmatprep.mubr.msk.f32.mxu0 %vm116_vm0, %v102_v17  ;;  %10570 = vmatprep.subr.mxu0 %v913_v16 }
  0x53   :  { %10571 = vmatpush3.msra.mxu0 %v913_v16  ;;  %v906_v16 = vld [vmem:[#allocation7 + $0xf0] sm:$0xff] }
  0x54   :  { %10572 = vmatprep.subr.mxu0 %v912_v19 }
  0x55   :  { %10564 = vmatmul.mubr.msk.f32.gmra.mxu0 %vm116_vm0, %v103_v18 }
  0x56   :  { %10573 = vmatpush3.msra.mxu0 %v912_v19  ;;  %v546_v19 = vlaneseq }
  0xb5   :  { %v11880_v12 = vpop.permute.xlu0 %450 }
  0xfd   :  { %v10547_v24 = vpop.f32.mrf.mxu0 }
  0xfe   :  { %v11775_v25 = vadd.f32 %v10547_v24, %v11772_v23  ;;  %v911_v24 = vld [vmem:[#allocation7 + $0x118] sm:$0xff] }
  0xff   :  { %v225_v26 = vpop.f32.mrf.mxu0  ;;  %10574 = vmatprep.subr.mxu0 %v911_v24 }
 0x100   :  { %v9253_v27 = vmul.f32 -1.442695, %v11775_v25  ;;  %v11779_v28 = vadd.f32 %v11772_v23, %v225_v26  ;;  %10575 = vmatpush3.msra.mxu0 %v911_v24 }
 0x101   :  { %v10550_v29 = vpop.f32.mrf.mxu0 }
 0x102   :  { %10948 = vpow2.f32 %v9253_v27  ;;  %v9252_v30 = vmul.f32 -1.442695, %v11779_v28  ;;  %v11792_v48 = vadd.f32 %v10550_v29, %v11772_v23 }
 0x103   :  { %v235_v31 = vpop.f32.mrf.mxu0 }
 0x104   :  { %10950 = vpow2.f32 %v9252_v30  ;;  %v11785_v43 = vadd.f32 %v11772_v23, %v235_v31  ;;  %v9255_v50 = vmul.f32 -1.442695, %v11792_v48  ;;  %v910_v31 = vld [vmem:[#allocation7 + $0x110] sm:$0xff] }
 0x105   :  { %v10553_v32 = vpop.f32.mrf.mxu0  ;;  %10576 = vmatprep.subr.mxu0 %v910_v31 }
 0x106   :  { %v9254_v46 = vmul.f32 -1.442695, %v11785_v43  ;;  %v11800_v53 = vadd.f32 %v10553_v32, %v11772_v23  ;;  %v84_v32 = vld [vmem:[%s16966_s1 + $0x40] sm:$0xff]  ;;  %10577 = vmatpush3.msra.mxu0 %v910_v31 }
 0x107   :  { %v245_v33 = vpop.f32.mrf.mxu0 }
 0x108   :  { %v11797_v51 = vadd.f32 %v11772_v23, %v245_v33  ;;  %v9257_v58 = vmul.f32 -1.442695, %v11800_v53 }
 0x109   :  { %v10556_v34 = vpop.f32.mrf.mxu0 }
 0x10a   :  { %v9256_v54 = vmul.f32 -1.442695, %v11797_v51  ;;  %v11816_v60 = vadd.f32 %v10556_v34, %v11772_v23 }
 0x10b   :  { %v255_v35 = vpop.f32.mrf.mxu0 }
 0x10c   :  { %v11808_v57 = vadd.f32 %v11772_v23, %v255_v35  ;;  %v9259_v2 = vmul.f32 -1.442695, %v11816_v60  ;;  %v909_v35 = vld [vmem:[#allocation7 + $0x108] sm:$0xff] }
 0x10d   :  { %v10559_v36 = vpop.f32.mrf.mxu0  ;;  %10578 = vmatprep.subr.mxu0 %v909_v35 }
 0x10e   :  { %v9258_v61 = vmul.f32 -1.442695, %v11808_v57  ;;  %v11830_v7 = vadd.f32 %v10559_v36, %v11772_v23  ;;  %10579 = vmatpush3.msra.mxu0 %v909_v35 }
 0x10f   :  { %v10949_v37 = vpop.eup %10948  ;;  %v265_v38 = vpop.f32.mrf.mxu0 }
 0x110   :  { %v337_v39 = vadd.f32 1.0, %v10949_v37  ;;  %v11824_v3 = vadd.f32 %v11772_v23, %v265_v38  ;;  %v9261_v14 = vmul.f32 -1.442695, %v11830_v7 }
 0x111   :  { %v10951_v40 = vpop.eup %10950  ;;  %v11782_v41 = vpop.f32.mrf.mxu0 }
 0x112   :  { %10952 = vrcp.f32 %v337_v39  ;;  %v336_v42 = vadd.f32 1.0, %v10951_v40  ;;  %v9260_v8 = vmul.f32 -1.442695, %v11824_v3  ;;  %v11845_v21 = vadd.f32 %v11782_v41, %v11772_v23  ;;  %v908_v39 = vld [vmem:[#allocation7 + $0x100] sm:$0xff]  ;;  %v85_v40 = vld [vmem:[%s16966_s1 + $0x48] sm:$0xff] }
 0x113   :  { %v275_v44 = vpop.f32.mrf.mxu0  ;;  %10580 = vmatprep.subr.mxu0 %v908_v39 }
 0x114   :  { %10954 = vrcp.f32 %v336_v42  ;;  %v11838_v15 = vadd.f32 %v11772_v23, %v275_v44  ;;  %v9263_v33 = vmul.f32 -1.442695, %v11845_v21  ;;  %10581 = vmatpush3.msra.mxu0 %v908_v39  ;;  %v885_v39 = vld [vmem:[#allocation7 + $0x48] sm:$0xff] }
 0x115   :  { %v10565_v45 = vpop.f32.mrf.mxu0  ;;  %10956 = vpow2.f32 %v9254_v46 }
 0x116   :  { %v11789_v47 = vadd.f32 %v10565_v45, %v11772_v23  ;;  %v9262_v22 = vmul.f32 -1.442695, %v11838_v15  ;;  %v86_v45 = vld [vmem:[%s16966_s1 + $0x50] sm:$0xff] }
 0x117   :  { %v285_v29 = vpop.f32.mrf.mxu0 }
 0x118   :  { %v9265_v49 = vmul.f32 -1.442695, %v11789_v47  ;;  %v11854_v34 = vadd.f32 %v11772_v23, %v285_v29  ;;  %v903_v29 = vld [vmem:[#allocation7 + $0xd8] sm:$0xff] }
 0x11a   :  { %10958 = vpow2.f32 %v9265_v49  ;;  %v9264_v23 = vmul.f32 -1.442695, %v11854_v34 }
 0x11b   :  { %10960 = vpow2.f32 %v9255_v50 }
 0x11c   :  { %10962 = vpow2.f32 %v9256_v54 }
 0x11d   :  { %10964 = vpow2.f32 %v9257_v58  ;;  %v88_v58 = vld [vmem:[%s16966_s1 + $0x60] sm:$0xff] }
 0x11e   :  { %10966 = vpow2.f32 %v9258_v61 }
 0x11f   :  { %v10953_v52 = vpop.eup %10952 }
 0x120   :  { %394 = vrot.lane.b32.xlu0 %v10953_v52, %s11659_s0  ;;  %v87_v52 = vld [vmem:[%s16966_s1 + $0x58] sm:$0xff] }
 0x121   :  { %v10955_v55 = vpop.eup %10954 }
 0x122   :  { %392 = vrot.lane.b32.xlu1 %v10955_v55, %s11659_s0  ;;  %v10957_v62 = vpop.eup %10956 }
 0x123   :  { %v338_v4 = vadd.f32 1.0, %v10957_v62 }
 0x124   :  { %460 = vperm.xlu0 %10946, %v78_v56  }
 0x127   :  { %v10959_v63 = vpop.eup %10958 }
 0x128   :  { %465 = vperm.xlu0 %10946, %v79_v59   ;;  %v349_v0 = vadd.f32 1.0, %v10959_v63  ;;  %v10961_v5 = vpop.eup %10960 }
 0x129   :  { %v339_v10 = vadd.f32 1.0, %v10961_v5  ;;  %v10963_v11 = vpop.eup %10962 }
 0x12a   :  { %10968 = vrcp.f32 %v349_v0  ;;  %v340_v17 = vadd.f32 1.0, %v10963_v11  ;;  %v10965_v18 = vpop.eup %10964  ;;  %v891_v11 = vld [vmem:[#allocation7 + $0x78] sm:$0xff] }
 0x12b   :  { %10970 = vpow2.f32 %v9259_v2  ;;  %v10967_v26 = vpop.eup %10966  ;;  %v341_v27 = vadd.f32 1.0, %v10965_v18  ;;  %v905_v18 = vld [vmem:[#allocation7 + $0xe8] sm:$0xff] }
 0x12c   :  { %470 = vperm.xlu0 %10946, %v80_v1   ;;  %10972 = vrcp.f32 %v338_v4  ;;  %v342_v37 = vadd.f32 1.0, %v10967_v26  ;;  %v888_v26 = vld [vmem:[#allocation7 + $0x60] sm:$0xff] }
 0x12d   :  { %10974 = vpow2.f32 %v9260_v8 }
 0x12e   :  { %10976 = vrcp.f32 %v339_v10  ;;  %v907_v10 = vld [vmem:[#allocation7 + $0xf8] sm:$0xff] }
 0x12f   :  { %10978 = vpow2.f32 %v9261_v14  ;;  %9575 = vmatprep.subr.mxu1 %v907_v10  ;;  %v11884_v14 = vpop.permute.xlu1 %515  ;;  %v893_v10 = vld [vmem:[#allocation7 + $0x88] sm:$0xff] }
 0x130   :  { %475 = vperm.xlu0 %10946, %v81_v6   ;;  %10980 = vrcp.f32 %v340_v17  ;;  %9576 = vmatpush3.msra.mxu1 %v891_v11  ;;  %v890_v17 = vld [vmem:[#allocation7 + $0x70] sm:$0xff]  ;;  %v877_v11 = vld [vmem:[#allocation7 + $0x8] sm:$0xff] }
 0x131   :  { %10982 = vpow2.f32 %v9262_v22  ;;  %9577 = vmatprep.subr.mxu1 %v906_v16  ;;  %v904_v22 = vld [vmem:[#allocation7 + $0xe0] sm:$0xff] }
 0x132   :  { %10984 = vrcp.f32 %v341_v27  ;;  %9578 = vmatpush3.msra.mxu1 %v890_v17  ;;  %v892_v16 = vld [vmem:[#allocation7 + $0x80] sm:$0xff] }
 0x133   :  { %10986 = vpow2.f32 %v9263_v33  ;;  %9579 = vmatprep.subr.mxu1 %v905_v18  ;;  %v876_v18 = vld [vmem:[#allocation7] sm:$0xff] }
 0x134   :  { %480 = vperm.xlu0 %10946, %v82_v13   ;;  %10988 = vrcp.f32 %v342_v37  ;;  %v11882_v13 = vpop.permute.xlu0 %455 }
 0x135   :  { %10990 = vpow2.f32 %v9264_v23 }
 0x137   :  { %v10969_v30 = vpop.eup %10968 }
 0x138   :  { %485 = vperm.xlu0 %10946, %v83_v20   ;;  %418 = vrot.lane.b32.xlu1 %v10969_v30, %s11659_s0  ;;  %v10971_v36 = vpop.eup %10970  ;;  %v889_v20 = vld [vmem:[#allocation7 + $0x68] sm:$0xff]  ;;  %v11887_v30 = vshrl.u32 %v546_v19, 7 }
 0x139   :  { %v10973_v38 = vpop.eup %10972  ;;  %v343_v42 = vadd.f32 1.0, %v10971_v36  ;;  %9580 = vmatpush3.msra.mxu1 %v889_v20  ;;  %v902_v36 = vld [vmem:[#allocation7 + $0xd0] sm:$0xff] }
 0x13a   :  { %v10975_v41 = vpop.eup %10974  ;;  %9581 = vmatprep.subr.mxu1 %v904_v22  ;;  %vm805_vm2 = vcmp.lt.s32.totalorder %v11887_v30, 6  ;;  %vm706_vm3 = vcmp.lt.s32.totalorder %v11887_v30, 7  ;;  %vm548_vm4 = vcmp.lt.s32.totalorder %v11887_v30, 2  ;;  %vm592_vm5 = vcmp.lt.s32.totalorder %v11887_v30, 1 }
 0x13b   :  { %v10977_v44 = vpop.eup %10976  ;;  %10992 = vrcp.f32 %v343_v42  ;;  %v344_v49 = vadd.f32 1.0, %v10975_v41  ;;  %9582 = vmatpush3.msra.mxu1 %v888_v26  ;;  %v900_v42 = vld [vmem:[#allocation7 + $0xc0] sm:$0xff] }
 0x13c   :  { %490 = vperm.xlu0 %10946, %v84_v32   ;;  %396 = vrot.lane.b32.xlu1 %v10973_v38, %s11659_s0  ;;  %v10979_v46 = vpop.eup %10978  ;;  %v887_v32 = vld [vmem:[#allocation7 + $0x58] sm:$0xff]  ;;  %v901_v38 = vld [vmem:[#allocation7 + $0xc8] sm:$0xff] }
 0x13d   :  { %v10981_v50 = vpop.eup %10980  ;;  %v345_v55 = vadd.f32 1.0, %v10979_v46  ;;  %10994 = vrcp.f32 %v344_v49  ;;  %9583 = vmatprep.subr.mxu1 %v903_v29 }
 0x13e   :  { %v10983_v54 = vpop.eup %10982  ;;  %9584 = vmatpush3.msra.mxu1 %v887_v32 }
 0x13f   :  { %v10985_v56 = vpop.eup %10984  ;;  %10996 = vrcp.f32 %v345_v55  ;;  %v346_v61 = vadd.f32 1.0, %v10983_v54  ;;  %9585 = vmatprep.subr.mxu1 %v902_v36  ;;  %v883_v54 = vld [vmem:[#allocation7 + $0x38] sm:$0xff] }
 0x140   :  { %495 = vperm.xlu0 %10946, %v85_v40   ;;  %398 = vrot.lane.b32.xlu1 %v10977_v44, %s11659_s0  ;;  %v10987_v59 = vpop.eup %10986  ;;  %v884_v44 = vld [vmem:[#allocation7 + $0x40] sm:$0xff] }
 0x141   :  { %v10989_v62 = vpop.eup %10988  ;;  %v347_v0 = vadd.f32 1.0, %v10987_v59  ;;  %10998 = vrcp.f32 %v346_v61  ;;  %v897_v61 = vld [vmem:[#allocation7 + $0xa8] sm:$0xff] }
 0x142   :  { %v10991_v63 = vpop.eup %10990 }
 0x143   :  { %11000 = vrcp.f32 %v347_v0  ;;  %v348_v2 = vadd.f32 1.0, %v10991_v63  ;;  %v896_v63 = vld [vmem:[#allocation7 + $0xa0] sm:$0xff] }
 0x144   :  { %500 = vperm.xlu0 %10946, %v86_v45   ;;  %400 = vrot.lane.b32.xlu1 %v10981_v50, %s11659_s0  ;;  %v880_v0 = vld [vmem:[#allocation7 + $0x20] sm:$0xff] }
 0x145   :  { %11002 = vrcp.f32 %v348_v2 }
 0x148   :  { %505 = vperm.xlu0 %10946, %v87_v52   ;;  %402 = vrot.lane.b32.xlu1 %v10985_v56, %s11659_s0  ;;  %v10993_v1 = vpop.eup %10992  ;;  %v899_v52 = vld [vmem:[#allocation7 + $0xb8] sm:$0xff]  ;;  %v898_v56 = vld [vmem:[#allocation7 + $0xb0] sm:$0xff] }
 0x14a   :  { %v10995_v4 = vpop.eup %10994 }
 0x14c   :  { %510 = vperm.xlu0 %10946, %v88_v58   ;;  %404 = vrot.lane.b32.xlu1 %v10989_v62, %s11659_s0  ;;  %v10997_v5 = vpop.eup %10996  ;;  %v882_v58 = vld [vmem:[#allocation7 + $0x30] sm:$0xff]  ;;  %v881_v62 = vld [vmem:[#allocation7 + $0x28] sm:$0xff] }
 0x14e   :  { %v10999_v6 = vpop.eup %10998 }
 0x150   :  { %406 = vrot.lane.b32.xlu1 %v10993_v1, %s11659_s0  ;;  %v11001_v8 = vpop.eup %11000 }
 0x152   :  { %v11003_v9 = vpop.eup %11002 }
 0x154   :  { %408 = vrot.lane.b32.xlu1 %v10995_v4, %s11659_s0  ;;  %v895_v4 = vld [vmem:[#allocation7 + $0x98] sm:$0xff] }
 0x158   :  { %410 = vrot.lane.b32.xlu1 %v10997_v5, %s11659_s0  ;;  %v879_v5 = vld [vmem:[#allocation7 + $0x18] sm:$0xff] }
 0x15c   :  { %412 = vrot.lane.b32.xlu1 %v10999_v6, %s11659_s0  ;;  %v894_v6 = vld [vmem:[#allocation7 + $0x90] sm:$0xff] }
 0x160   :  { %414 = vrot.lane.b32.xlu1 %v11001_v8, %s11659_s0  ;;  %v878_v8 = vld [vmem:[#allocation7 + $0x10] sm:$0xff] }
 0x164   :  { %416 = vrot.lane.b32.xlu1 %v11003_v9, %s11659_s0 }
 0x192   :  { %v395_v24 = vpop.permute.xlu0 %394 }
 0x193   :  { %v435_v27 = vmul.f32 %v395_v24, %v11775_v25  ;;  %v886_v25 = vld [vmem:[#allocation7 + $0x50] sm:$0xff] }
 0x194   :  { %v393_v31 = vpop.permute.xlu1 %392  ;;  %9586 = vmatpush3.msra.mxu1 %v886_v25 }
 0x195   :  { %v11890_v33 = vmul.f32 %v11882_v13, %v435_v27  ;;  %v434_v35 = vmul.f32 %v393_v31, %v11779_v28  ;;  %9587 = vmatprep.subr.mxu1 %v901_v38 }
 0x196   :  { %9588 = vmatpush3.msra.mxu1 %v885_v39 }
 0x197   :  { %v11894_v37 = vmul.f32 %v11880_v12, %v434_v35  ;;  %679 = vst.msk [vmem:[#allocation2 + $0x20] sm:$0xff] %vm563_vm1, %v11890_v33  ;;  %v792_v28 = vrot.slane %v11890_v33, 2  ;;  %v693_v41 = vrot.slane %v11890_v33, 1  ;;  %v533_v46 = vrot.slane %v11890_v33, 6  ;;  %9589 = vmatprep.subr.mxu1 %v900_v42 }
 0x198   :  { %9590 = vmatpush3.msra.mxu1 %v884_v44  ;;  %v579_v25 = vrot.slane %v11890_v33, 7 }
 0x199   :  { %v791_v40 = vrot.slane %v11894_v37, 2  ;;  %678 = vst.msk [vmem:[#allocation2 + $0x8] sm:$0xff] %vm563_vm1, %v11894_v37  ;;  %v692_v23 = vrot.slane %v11894_v37, 1  ;;  %v532_v45 = vrot.slane %v11894_v37, 6  ;;  %9591 = vmatprep.subr.mxu1 %v899_v52  ;;  %v578_v29 = vrot.slane %v11894_v37, 7 }
 0x19a   :  { %9592 = vmatpush3.msra.mxu1 %v883_v54 }
 0x19b   :  { %v818_v49 = vsel %vm805_vm2, %v791_v40, %v792_v28  ;;  %v719_v50 = vsel %vm706_vm3, %v692_v23, %v693_v41  ;;  %v561_v55 = vsel %vm548_vm4, %v532_v45, %v533_v46  ;;  %9593 = vmatprep.subr.mxu1 %v898_v56 }
 0x19c   :  { %820 = vst.msk [vmem:[#allocation2 + $0x10] sm:$0xff] %vm563_vm1, %v818_v49  ;;  %735 = vrot.lane.b32.xlu0 %v719_v50, %s11659_s0  ;;  %565 = vst.msk [vmem:[#allocation2 + $0x18] sm:$0xff] %vm563_vm1, %v561_v55  ;;  %9594 = vmatpush3.msra.mxu1 %v882_v58  ;;  %v605_v49 = vsel %vm592_vm5, %v578_v29, %v579_v25 }
 0x19d   :  { %9595 = vmatprep.subr.mxu1 %v897_v61 }
 0x19e   :  { %9596 = vmatpush3.msra.mxu1 %v881_v62 }
 0x19f   :  { %v11930_v59 = vpop.permute.xlu0 %460  ;;  %9597 = vmatprep.subr.mxu1 %v896_v63 }
 0x1a0   :  { %9598 = vmatpush3.msra.mxu1 %v880_v0 }
 0x1a1   :  { %9599 = vmatprep.subr.mxu1 %v895_v4 }
 0x1a2   :  { %9600 = vmatpush3.msra.mxu1 %v879_v5 }
 0x1a3   :  { %v11932_v1 = vpop.permute.xlu0 %465  ;;  %v836_v2 = vld [vmem:[#allocation2 + $0x10] sm:$0xff]  ;;  %9601 = vmatprep.subr.mxu1 %v894_v6 }
 0x1a4   :  { %10582 = vmatprep.mubr.msk.f32.mxu0 %vm563_vm1, %v836_v2  ;;  %9602 = vmatpush3.msra.mxu1 %v878_v8 }
 0x1a5   :  { %9603 = vmatprep.subr.mxu1 %v893_v10 }
 0x1a6   :  { %9604 = vmatpush3.msra.mxu1 %v877_v11 }
 0x1a7   :  { %v11935_v9 = vpop.permute.xlu0 %470  ;;  %9605 = vmatprep.subr.mxu1 %v892_v16 }
 0x1a8   :  { %9606 = vmatpush3.msra.mxu1 %v876_v18 }
 0x1aa   :  { %v419_v17 = vpop.permute.xlu1 %418 }
 0x1ab   :  { %v447_v19 = vmul.f32 %v419_v17, %v11789_v47  ;;  %v11941_v22 = vpop.permute.xlu0 %475 }
 0x1ad   :  { %v11939_v20 = vmul.f32 %v11884_v14, %v447_v19 }
 0x1ae   :  { %v397_v24 = vpop.permute.xlu1 %396 }
 0x1af   :  { %v804_v26 = vrot.slane %v11939_v20, 2  ;;  %691 = vst.msk [vmem:[#allocation2 + $0x140] sm:$0xff] %vm563_vm1, %v11939_v20  ;;  %v436_v27 = vmul.f32 %v397_v24, %v11785_v43  ;;  %v591_v47 = vrot.slane %v11939_v20, 7  ;;  %v545_v31 = vrot.slane %v11939_v20, 6  ;;  %v11979_v44 = vpop.permute.xlu0 %480 }
 0x1b1   :  { %v819_v32 = vsel %vm805_vm2, %v804_v26, %v791_v40  ;;  %v11958_v35 = vmul.f32 %v11930_v59, %v436_v27  ;;  %v606_v43 = vsel %vm592_vm5, %v591_v47, %v578_v29  ;;  %v562_v38 = vsel %vm548_vm4, %v545_v31, %v532_v45 }
 0x1b2   :  { %833 = vst.msk [vmem:[#allocation2 + $0x148] sm:$0xff] %vm563_vm1, %v819_v32  ;;  %v399_v36 = vpop.permute.xlu1 %398  ;;  %621 = vrot.lane.b32.xlu1 %v606_v43, %s11659_s0  ;;  %564 = vst.msk [vmem:[#allocation2] sm:$0xff] %vm563_vm1, %v562_v38 }
 0x1b3   :  { %v793_v39 = vrot.slane %v11958_v35, 2  ;;  %680 = vst.msk [vmem:[#allocation2 + $0x38] sm:$0xff] %vm563_vm1, %v11958_v35  ;;  %v437_v40 = vmul.f32 %v399_v36, %v11792_v48  ;;  %v694_v42 = vrot.slane %v11958_v35, 1  ;;  %v534_v50 = vrot.slane %v11958_v35, 6  ;;  %v12021_v2 = vpop.permute.xlu0 %485 }
 0x1b4   :  { %v580_v54 = vrot.slane %v11958_v35, 7 }
 0x1b5   :  { %v817_v45 = vsel %vm805_vm2, %v792_v28, %v793_v39  ;;  %v11989_v52 = vmul.f32 %v11932_v1, %v437_v40  ;;  %v718_v48 = vsel %vm706_vm3, %v693_v41, %v694_v42  ;;  %v560_v28 = vsel %vm548_vm4, %v533_v46, %v534_v50 }
 0x1b6   :  { %821 = vst.msk [vmem:[#allocation2 + $0x28] sm:$0xff] %vm563_vm1, %v817_v45  ;;  %v401_v55 = vpop.permute.xlu1 %400  ;;  %623 = vrot.lane.b32.xlu1 %v605_v49, %s11659_s0  ;;  %737 = vrot.lane.b32.xlu0 %v718_v48, %s11659_s0  ;;  %566 = vst.msk [vmem:[#allocation2 + $0x30] sm:$0xff] %vm563_vm1, %v560_v28  ;;  %v604_v0 = vsel %vm592_vm5, %v579_v25, %v580_v54 }
 0x1b7   :  { %v794_v56 = vrot.slane %v11989_v52, 2  ;;  %681 = vst.msk [vmem:[#allocation2 + $0x50] sm:$0xff] %vm563_vm1, %v11989_v52  ;;  %v438_v41 = vmul.f32 %v401_v55, %v11797_v51  ;;  %v695_v58 = vrot.slane %v11989_v52, 1  ;;  %v581_v61 = vrot.slane %v11989_v52, 7  ;;  %v12056_v25 = vpop.permute.xlu0 %490 }
 0x1b8   :  { %v535_v62 = vrot.slane %v11989_v52, 6 }
 0x1b9   :  { %v816_v63 = vsel %vm805_vm2, %v793_v39, %v794_v56  ;;  %v12014_v46 = vmul.f32 %v11935_v9, %v438_v41  ;;  %v717_v51 = vsel %vm706_vm3, %v694_v42, %v695_v58  ;;  %v603_v11 = vsel %vm592_vm5, %v580_v54, %v581_v61 }
 0x1ba   :  { %822 = vst.msk [vmem:[#allocation2 + $0x40] sm:$0xff] %vm563_vm1, %v816_v63  ;;  %v403_v4 = vpop.permute.xlu1 %402  ;;  %625 = vrot.lane.b32.xlu1 %v604_v0, %s11659_s0  ;;  %739 = vrot.lane.b32.xlu0 %v717_v51, %s11659_s0  ;;  %v559_v5 = vsel %vm548_vm4, %v534_v50, %v535_v62 }
 0x1bb   :  { %v795_v6 = vrot.slane %v12014_v46, 2  ;;  %682 = vst.msk [vmem:[#allocation2 + $0x68] sm:$0xff] %vm563_vm1, %v12014_v46  ;;  %v439_v8 = vmul.f32 %v403_v4, %v11800_v53  ;;  %v696_v10 = vrot.slane %v12014_v46, 1  ;;  %567 = vst.msk [vmem:[#allocation2 + $0x48] sm:$0xff] %vm563_vm1, %v559_v5  ;;  %v536_v16 = vrot.slane %v12014_v46, 6  ;;  %v12092_v0 = vpop.permute.xlu0 %495 }
 0x1bc   :  { %v582_v53 = vrot.slane %v12014_v46, 7 }
 0x1bd   :  { %v815_v17 = vsel %vm805_vm2, %v794_v56, %v795_v6  ;;  %v12039_v18 = vmul.f32 %v11941_v22, %v439_v8  ;;  %v839_v19 = vld [vmem:[#allocation2 + $0x28] sm:$0xff]  ;;  %v716_v24 = vsel %vm706_vm3, %v695_v58, %v696_v10  ;;  %v558_v29 = vsel %vm548_vm4, %v535_v62, %v536_v16 }
 0x1be   :  { %823 = vst.msk [vmem:[#allocation2 + $0x58] sm:$0xff] %vm563_vm1, %v815_v17  ;;  %v405_v27 = vpop.permute.xlu1 %404  ;;  %10583 = vmatmul.mubr.msk.f32.vlgmr.msra.gmra.mxu0 %vm563_vm1, %v839_v19  ;;  %627 = vrot.lane.b32.xlu1 %v603_v11, %s11659_s0  ;;  %568 = vst.msk [vmem:[#allocation2 + $0x60] sm:$0xff] %vm563_vm1, %v558_v29 }
 0x1bf   :  { %v796_v32 = vrot.slane %v12039_v18, 2  ;;  %683 = vst.msk [vmem:[#allocation2 + $0x80] sm:$0xff] %vm563_vm1, %v12039_v18  ;;  %v440_v43 = vmul.f32 %v405_v27, %v11808_v57  ;;  %741 = vrot.lane.b32.xlu0 %v716_v24, %s11659_s0  ;;  %v697_v36 = vrot.slane %v12039_v18, 1  ;;  %v583_v38 = vrot.slane %v12039_v18, 7 }
 0x1c0   :  { %v537_v39 = vrot.slane %v12039_v18, 6  ;;  %v602_v57 = vsel %vm592_vm5, %v581_v61, %v582_v53 }
 0x1c1   :  { %v814_v40 = vsel %vm805_vm2, %v795_v6, %v796_v32  ;;  %v12063_v42 = vmul.f32 %v11979_v44, %v440_v43  ;;  %v842_v49 = vld [vmem:[#allocation2 + $0x40] sm:$0xff]  ;;  %v715_v50 = vsel %vm706_vm3, %v696_v10, %v697_v36  ;;  %v601_v56 = vsel %vm592_vm5, %v582_v53, %v583_v38 }
 0x1c2   :  { %824 = vst.msk [vmem:[#allocation2 + $0x70] sm:$0xff] %vm563_vm1, %v814_v40  ;;  %v407_v45 = vpop.permute.xlu1 %406  ;;  %10585 = vmatprep.mubr.msk.f32.mxu0 %vm563_vm1, %v842_v49  ;;  %629 = vrot.lane.b32.xlu1 %v602_v57, %s11659_s0  ;;  %v557_v48 = vsel %vm548_vm4, %v536_v16, %v537_v39 }
 0x1c3   :  { %v797_v54 = vrot.slane %v12063_v42, 2  ;;  %684 = vst.msk [vmem:[#allocation2 + $0x98] sm:$0xff] %vm563_vm1, %v12063_v42  ;;  %v441_v55 = vmul.f32 %v407_v45, %v11816_v60  ;;  %743 = vrot.lane.b32.xlu0 %v715_v50, %s11659_s0  ;;  %v698_v28 = vrot.slane %v12063_v42, 1  ;;  %569 = vst.msk [vmem:[#allocation2 + $0x78] sm:$0xff] %vm563_vm1, %v557_v48  ;;  %v538_v41 = vrot.slane %v12063_v42, 6 }
 0x1c4   :  { %v584_v63 = vrot.slane %v12063_v42, 7 }
 0x1c5   :  { %v813_v58 = vsel %vm805_vm2, %v796_v32, %v797_v54  ;;  %v12087_v61 = vmul.f32 %v12021_v2, %v441_v55  ;;  %v845_v62 = vld [vmem:[#allocation2 + $0x58] sm:$0xff]  ;;  %v714_v60 = vsel %vm706_vm3, %v697_v36, %v698_v28  ;;  %v556_v4 = vsel %vm548_vm4, %v537_v39, %v538_v41  ;;  %v12129_v36 = vpop.permute.xlu0 %500 }
 0x1c6   :  { %825 = vst.msk [vmem:[#allocation2 + $0x88] sm:$0xff] %vm563_vm1, %v813_v58  ;;  %v409_v51 = vpop.permute.xlu1 %408  ;;  %10586 = vmatmul.mubr.msk.f32.gmra.mxu0 %vm563_vm1, %v845_v62  ;;  %631 = vrot.lane.b32.xlu1 %v601_v56, %s11659_s0  ;;  %570 = vst.msk [vmem:[#allocation2 + $0x90] sm:$0xff] %vm563_vm1, %v556_v4 }
 0x1c7   :  { %v798_v5 = vrot.slane %v12087_v61, 2  ;;  %685 = vst.msk [vmem:[#allocation2 + $0xb0] sm:$0xff] %vm563_vm1, %v12087_v61  ;;  %v442_v6 = vmul.f32 %v409_v51, %v11824_v3  ;;  %745 = vrot.lane.b32.xlu0 %v714_v60, %s11659_s0  ;;  %v699_v8 = vrot.slane %v12087_v61, 1  ;;  %v585_v10 = vrot.slane %v12087_v61, 7 }
 0x1c8   :  { %v539_v11 = vrot.slane %v12087_v61, 6  ;;  %v600_v3 = vsel %vm592_vm5, %v583_v38, %v584_v63 }
 0x1c9   :  { %v812_v16 = vsel %vm805_vm2, %v797_v54, %v798_v5  ;;  %v12111_v17 = vmul.f32 %v12056_v25, %v442_v6  ;;  %v848_v19 = vld [vmem:[#allocation2 + $0x70] sm:$0xff]  ;;  %v713_v24 = vsel %vm706_vm3, %v698_v28, %v699_v8  ;;  %v599_v38 = vsel %vm592_vm5, %v584_v63, %v585_v10  ;;  %v12165_v51 = vpop.permute.xlu0 %505 }
 0x1ca   :  { %826 = vst.msk [vmem:[#allocation2 + $0xa0] sm:$0xff] %vm563_vm1, %v812_v16  ;;  %v411_v53 = vpop.permute.xlu1 %410  ;;  %10588 = vmatprep.mubr.msk.f32.mxu0 %vm563_vm1, %v848_v19  ;;  %633 = vrot.lane.b32.xlu1 %v600_v3, %s11659_s0  ;;  %v555_v27 = vsel %vm548_vm4, %v538_v41, %v539_v11  ;;  %16980 = vst [vmem:[#allocation14_spill] sm:$0xff] %v12165_v51 }
 0x1cb   :  { %v799_v29 = vrot.slane %v12111_v17, 2  ;;  %686 = vst.msk [vmem:[#allocation2 + $0xc8] sm:$0xff] %vm563_vm1, %v12111_v17  ;;  %v443_v32 = vmul.f32 %v411_v53, %v11830_v7  ;;  %747 = vrot.lane.b32.xlu0 %v713_v24, %s11659_s0  ;;  %v700_v43 = vrot.slane %v12111_v17, 1  ;;  %571 = vst.msk [vmem:[#allocation2 + $0xa8] sm:$0xff] %vm563_vm1, %v555_v27  ;;  %v540_v39 = vrot.slane %v12111_v17, 6 }
 0x1cc   :  { %v586_v50 = vrot.slane %v12111_v17, 7 }
 0x1cd   :  { %v811_v40 = vsel %vm805_vm2, %v798_v5, %v799_v29  ;;  %v12137_v49 = vmul.f32 %v12092_v0, %v443_v32  ;;  %v851_v7 = vld [vmem:[#allocation2 + $0x88] sm:$0xff]  ;;  %v712_v57 = vsel %vm706_vm3, %v699_v8, %v700_v43  ;;  %v554_v48 = vsel %vm548_vm4, %v539_v11, %v540_v39 }
 0x1ce   :  { %827 = vst.msk [vmem:[#allocation2 + $0xb8] sm:$0xff] %vm563_vm1, %v811_v40  ;;  %v413_v45 = vpop.permute.xlu1 %412  ;;  %10589 = vmatmul.mubr.msk.f32.gmra.mxu0 %vm563_vm1, %v851_v7  ;;  %635 = vrot.lane.b32.xlu1 %v599_v38, %s11659_s0  ;;  %572 = vst.msk [vmem:[#allocation2 + $0xc0] sm:$0xff] %vm563_vm1, %v554_v48 }
 0x1cf   :  { %16979 = vst [vmem:[#allocation13_spill] sm:$0xff] %v12137_v49  ;;  %v800_v54 = vrot.slane %v12137_v49, 2  ;;  %687 = vst.msk [vmem:[#allocation2 + $0xe0] sm:$0xff] %vm563_vm1, %v12137_v49  ;;  %v444_v55 = vmul.f32 %v413_v45, %v11838_v15  ;;  %749 = vrot.lane.b32.xlu0 %v712_v57, %s11659_s0  ;;  %v701_v28 = vrot.slane %v12137_v49, 1  ;;  %v587_v56 = vrot.slane %v12137_v49, 7 }
 0x1d0   :  { %v541_v41 = vrot.slane %v12137_v49, 6  ;;  %v598_v15 = vsel %vm592_vm5, %v585_v10, %v586_v50 }
 0x1d1   :  { %v810_v58 = vsel %vm805_vm2, %v799_v29, %v800_v54  ;;  %v12159_v62 = vmul.f32 %v12129_v36, %v444_v55  ;;  %v854_v60 = vld [vmem:[#allocation2 + $0xa0] sm:$0xff]  ;;  %v711_v63 = vsel %vm706_vm3, %v700_v43, %v701_v28  ;;  %v597_v11 = vsel %vm592_vm5, %v586_v50, %v587_v56 }
 0x1d2   :  { %828 = vst.msk [vmem:[#allocation2 + $0xd0] sm:$0xff] %vm563_vm1, %v810_v58  ;;  %v415_v4 = vpop.permute.xlu1 %414  ;;  %10591 = vmatprep.mubr.msk.f32.mxu0 %vm563_vm1, %v854_v60  ;;  %637 = vrot.lane.b32.xlu1 %v598_v15, %s11659_s0  ;;  %v553_v5 = vsel %vm548_vm4, %v540_v39, %v541_v41  ;;  %v12202_v39 = vpop.permute.xlu0 %510 }
 0x1d3   :  { %v801_v6 = vrot.slane %v12159_v62, 2  ;;  %688 = vst.msk [vmem:[#allocation2 + $0xf8] sm:$0xff] %vm563_vm1, %v12159_v62  ;;  %v445_v8 = vmul.f32 %v415_v4, %v11845_v21  ;;  %751 = vrot.lane.b32.xlu0 %v711_v63, %s11659_s0  ;;  %v702_v10 = vrot.slane %v12159_v62, 1  ;;  %573 = vst.msk [vmem:[#allocation2 + $0xd8] sm:$0xff] %vm563_vm1, %v553_v5  ;;  %v542_v16 = vrot.slane %v12159_v62, 6 }
 0x1d4   :  { %v588_v53 = vrot.slane %v12159_v62, 7 }
 0x1d5   :  { %v809_v19 = vsel %vm805_vm2, %v800_v54, %v801_v6  ;;  %v12185_v3 = vmul.f32 %v12165_v51, %v445_v8  ;;  %v857_v24 = vld [vmem:[#allocation2 + $0xb8] sm:$0xff]  ;;  %v710_v21 = vsel %vm706_vm3, %v701_v28, %v702_v10  ;;  %v552_v29 = vsel %vm548_vm4, %v541_v41, %v542_v16 }
 0x1d6   :  { %829 = vst.msk [vmem:[#allocation2 + $0xe8] sm:$0xff] %vm563_vm1, %v809_v19  ;;  %v417_v27 = vpop.permute.xlu1 %416  ;;  %10592 = vmatmul.mubr.msk.f32.gmra.mxu0 %vm563_vm1, %v857_v24  ;;  %639 = vrot.lane.b32.xlu1 %v597_v11, %s11659_s0  ;;  %574 = vst.msk [vmem:[#allocation2 + $0xf0] sm:$0xff] %vm563_vm1, %v552_v29 }
 0x1d7   :  { %16981 = vst [vmem:[#allocation15_spill] sm:$0xff] %v12185_v3  ;;  %v802_v32 = vrot.slane %v12185_v3, 2  ;;  %689 = vst.msk [vmem:[#allocation2 + $0x110] sm:$0xff] %vm563_vm1, %v12185_v3  ;;  %v446_v43 = vmul.f32 %v417_v27, %v11854_v34  ;;  %753 = vrot.lane.b32.xlu0 %v710_v21, %s11659_s0  ;;  %v703_v38 = vrot.slane %v12185_v3, 1  ;;  %v589_v40 = vrot.slane %v12185_v3, 7  ;;  %v875_v21 = vld [vmem:[#allocation2 + $0x148] sm:$0xff] }
 0x1d8   :  { %v543_v7 = vrot.slane %v12185_v3, 6  ;;  %v596_v34 = vsel %vm592_vm5, %v587_v56, %v588_v53  ;;  %v1786_v3 = vld [vmem:[#allocation7 + $0x240] sm:$0xff] }
 0x1d9   :  { %v808_v57 = vsel %vm805_vm2, %v801_v6, %v802_v32  ;;  %v12209_v50 = vmul.f32 %v12202_v39, %v446_v43  ;;  %v860_v45 = vld [vmem:[#allocation2 + $0xd0] sm:$0xff]  ;;  %v709_v48 = vsel %vm706_vm3, %v702_v10, %v703_v38  ;;  %v595_v41 = vsel %vm592_vm5, %v588_v53, %v589_v40 }
 0x1da   :  { %830 = vst.msk [vmem:[#allocation2 + $0x100] sm:$0xff] %vm563_vm1, %v808_v57  ;;  %10594 = vmatprep.mubr.msk.f32.mxu0 %vm563_vm1, %v860_v45  ;;  %641 = vrot.lane.b32.xlu1 %v596_v34, %s11659_s0  ;;  %v551_v54 = vsel %vm548_vm4, %v542_v16, %v543_v7  ;;  %v705_v6 = vrot.slane %v11939_v20, 1 }
 0x1db   :  { %v803_v55 = vrot.slane %v12209_v50, 2  ;;  %690 = vst.msk [vmem:[#allocation2 + $0x128] sm:$0xff] %vm563_vm1, %v12209_v50  ;;  %755 = vrot.lane.b32.xlu0 %v709_v48, %s11659_s0  ;;  %v704_v28 = vrot.slane %v12209_v50, 1  ;;  %575 = vst.msk [vmem:[#allocation2 + $0x108] sm:$0xff] %vm563_vm1, %v551_v54  ;;  %v544_v56 = vrot.slane %v12209_v50, 6  ;;  %v590_v4 = vrot.slane %v12209_v50, 7 }
 0x1dc   :  { %v720_v24 = vsel %vm706_vm3, %v705_v6, %v692_v23 }
 0x1dd   :  { %v806_v58 = vsel %vm805_vm2, %v803_v55, %v804_v26  ;;  %v807_v60 = vsel %vm805_vm2, %v802_v32, %v803_v55  ;;  %v863_v15 = vld [vmem:[#allocation2 + $0xe8] sm:$0xff]  ;;  %v708_v63 = vsel %vm706_vm3, %v703_v38, %v704_v28  ;;  %v550_v26 = vsel %vm548_vm4, %v543_v7, %v544_v56 }
 0x1de   :  { %831 = vst.msk [vmem:[#allocation2 + $0x118] sm:$0xff] %vm563_vm1, %v807_v60  ;;  %832 = vst.msk [vmem:[#allocation2 + $0x130] sm:$0xff] %vm563_vm1, %v806_v58  ;;  %10595 = vmatmul.mubr.msk.f32.gmra.mxu0 %vm563_vm1, %v863_v15  ;;  %643 = vrot.lane.b32.xlu1 %v595_v41, %s11659_s0  ;;  %v549_v5 = vsel %vm548_vm4, %v544_v56, %v545_v31  ;;  %v594_v10 = vsel %vm592_vm5, %v589_v40, %v590_v4 }
 0x1df   :  { %757 = vrot.lane.b32.xlu0 %v708_v63, %s11659_s0  ;;  %576 = vst.msk [vmem:[#allocation2 + $0x120] sm:$0xff] %vm563_vm1, %v550_v26  ;;  %577 = vst.msk [vmem:[#allocation2 + $0x138] sm:$0xff] %vm563_vm1, %v549_v5  ;;  %v707_v11 = vsel %vm706_vm3, %v704_v28, %v705_v6  ;;  %v593_v31 = vsel %vm592_vm5, %v590_v4, %v591_v47 }
 0x1e1   :  { %v866_v8 = vld [vmem:[#allocation2 + $0x100] sm:$0xff] }
 0x1e2   :  { %10597 = vmatprep.mubr.msk.f32.mxu0 %vm563_vm1, %v866_v8  ;;  %645 = vrot.lane.b32.xlu1 %v594_v10, %s11659_s0 }
 0x1e3   :  { %759 = vrot.lane.b32.xlu0 %v707_v11, %s11659_s0 }
 0x1e5   :  { %v869_v16 = vld [vmem:[#allocation2 + $0x118] sm:$0xff]  ;;  %v872_v19 = vld [vmem:[#allocation2 + $0x130] sm:$0xff] }
 0x1e6   :  { %10598 = vmatmul.mubr.msk.f32.gmra.mxu0 %vm563_vm1, %v869_v16  ;;  %647 = vrot.lane.b32.xlu1 %v593_v31, %s11659_s0 }
 0x1e7   :  { %761 = vrot.lane.b32.xlu0 %v720_v24, %s11659_s0  ;;  %10600 = vmatprep.mubr.msk.f32.mxu0 %vm563_vm1, %v872_v19 }
 0x1ea   :  { %10601 = vmatmul.mubr.msk.f32.gmra.mxu0 %vm563_vm1, %v875_v21 }
 0x20e   :  { %v736_v53 = vpop.permute.xlu0 %735 }
 0x20f   :  { %777 = vst.msk [vmem:[#allocation2 + $0x8] sm:$0xff] %vm663_vm6, %v736_v53 }
 0x216   :  { %v835_v47 = vld [vmem:[#allocation2 + $0x8] sm:$0xff] }
 0x217   :  { %1029 = vmatprep.mubr.f32.mxu1 %v835_v47 }
 0x224   :  { %v622_v27 = vpop.permute.xlu1 %621 }
 0x225   :  { %664 = vst.msk [vmem:[#allocation2] sm:$0xff] %vm663_vm6, %v622_v27 }
 0x228   :  { %v624_v29 = vpop.permute.xlu1 %623  ;;  %v738_v23 = vpop.permute.xlu0 %737 }
 0x229   :  { %665 = vst.msk [vmem:[#allocation2 + $0x18] sm:$0xff] %vm663_vm6, %v624_v29  ;;  %778 = vst.msk [vmem:[#allocation2 + $0x20] sm:$0xff] %vm663_vm6, %v738_v23 }
 0x22c   :  { %v626_v32 = vpop.permute.xlu1 %625  ;;  %v740_v43 = vpop.permute.xlu0 %739  ;;  %v834_v38 = vld [vmem:[#allocation2] sm:$0xff] }
 0x22d   :  { %666 = vst.msk [vmem:[#allocation2 + $0x30] sm:$0xff] %vm663_vm6, %v626_v32  ;;  %779 = vst.msk [vmem:[#allocation2 + $0x38] sm:$0xff] %vm663_vm6, %v740_v43  ;;  %1030 = vmatmul.mubr.f32.vlgmr.msra.gmra.mxu1 %v834_v38 }
 0x230   :  { %v628_v40 = vpop.permute.xlu1 %627  ;;  %v838_v7 = vld [vmem:[#allocation2 + $0x20] sm:$0xff]  ;;  %v837_v57 = vld [vmem:[#allocation2 + $0x18] sm:$0xff] }
 0x231   :  { %667 = vst.msk [vmem:[#allocation2 + $0x48] sm:$0xff] %vm663_vm6, %v628_v40  ;;  %v742_v45 = vpop.permute.xlu0 %741  ;;  %1034 = vmatprep.mubr.f32.mxu1 %v838_v7 }
 0x232   :  { %780 = vst.msk [vmem:[#allocation2 + $0x50] sm:$0xff] %vm663_vm6, %v742_v45  ;;  %1035 = vmatmul.mubr.f32.gmra.mxu1 %v837_v57 }
 0x234   :  { %v630_v34 = vpop.permute.xlu1 %629  ;;  %v841_v48 = vld [vmem:[#allocation2 + $0x38] sm:$0xff]  ;;  %v840_v54 = vld [vmem:[#allocation2 + $0x30] sm:$0xff] }
 0x235   :  { %668 = vst.msk [vmem:[#allocation2 + $0x60] sm:$0xff] %vm663_vm6, %v630_v34  ;;  %v744_v55 = vpop.permute.xlu0 %743  ;;  %1039 = vmatprep.mubr.f32.mxu1 %v841_v48 }
 0x236   :  { %781 = vst.msk [vmem:[#allocation2 + $0x68] sm:$0xff] %vm663_vm6, %v744_v55  ;;  %1040 = vmatmul.mubr.f32.gmra.mxu1 %v840_v54 }
 0x238   :  { %v632_v28 = vpop.permute.xlu1 %631  ;;  %v843_v56 = vld [vmem:[#allocation2 + $0x48] sm:$0xff] }
 0x239   :  { %669 = vst.msk [vmem:[#allocation2 + $0x78] sm:$0xff] %vm663_vm6, %v632_v28  ;;  %v746_v41 = vpop.permute.xlu0 %745  ;;  %v844_v58 = vld [vmem:[#allocation2 + $0x50] sm:$0xff] }
 0x23a   :  { %782 = vst.msk [vmem:[#allocation2 + $0x80] sm:$0xff] %vm663_vm6, %v746_v41  ;;  %1044 = vmatprep.mubr.f32.mxu1 %v844_v58 }
 0x23b   :  { %1045 = vmatmul.mubr.f32.gmra.mxu1 %v843_v56 }
 0x23c   :  { %v634_v60 = vpop.permute.xlu1 %633  ;;  %v846_v15 = vld [vmem:[#allocation2 + $0x60] sm:$0xff] }
 0x23d   :  { %670 = vst.msk [vmem:[#allocation2 + $0x90] sm:$0xff] %vm663_vm6, %v634_v60  ;;  %v748_v63 = vpop.permute.xlu0 %747  ;;  %v847_v4 = vld [vmem:[#allocation2 + $0x68] sm:$0xff] }
 0x23e   :  { %783 = vst.msk [vmem:[#allocation2 + $0x98] sm:$0xff] %vm663_vm6, %v748_v63  ;;  %1049 = vmatprep.mubr.f32.mxu1 %v847_v4  ;;  %v12300_v4 = vld [vmem:[#allocation8] ss:$0 sm:$0xff] }
 0x23f   :  { %1050 = vmatmul.mubr.f32.gmra.mxu1 %v846_v15 }
 0x240   :  { %v636_v26 = vpop.permute.xlu1 %635  ;;  %v849_v5 = vld [vmem:[#allocation2 + $0x78] sm:$0xff] }
 0x241   :  { %671 = vst.msk [vmem:[#allocation2 + $0xa8] sm:$0xff] %vm663_vm6, %v636_v26  ;;  %v750_v6 = vpop.permute.xlu0 %749  ;;  %v850_v8 = vld [vmem:[#allocation2 + $0x80] sm:$0xff] }
 0x242   :  { %784 = vst.msk [vmem:[#allocation2 + $0xb0] sm:$0xff] %vm663_vm6, %v750_v6  ;;  %1054 = vmatprep.mubr.f32.mxu1 %v850_v8 }
 0x243   :  { %1055 = vmatmul.mubr.f32.gmra.mxu1 %v849_v5 }
 0x244   :  { %v638_v10 = vpop.permute.xlu1 %637  ;;  %v852_v11 = vld [vmem:[#allocation2 + $0x90] sm:$0xff] }
 0x245   :  { %672 = vst.msk [vmem:[#allocation2 + $0xc0] sm:$0xff] %vm663_vm6, %v638_v10  ;;  %v752_v16 = vpop.permute.xlu0 %751  ;;  %v853_v31 = vld [vmem:[#allocation2 + $0x98] sm:$0xff] }
 0x246   :  { %785 = vst.msk [vmem:[#allocation2 + $0xc8] sm:$0xff] %vm663_vm6, %v752_v16  ;;  %1059 = vmatprep.mubr.f32.mxu1 %v853_v31 }
 0x247   :  { %1060 = vmatmul.mubr.f32.gmra.mxu1 %v852_v11 }
 0x248   :  { %v640_v19 = vpop.permute.xlu1 %639  ;;  %v855_v24 = vld [vmem:[#allocation2 + $0xa8] sm:$0xff] }
 0x249   :  { %673 = vst.msk [vmem:[#allocation2 + $0xd8] sm:$0xff] %vm663_vm6, %v640_v19  ;;  %v754_v21 = vpop.permute.xlu0 %753  ;;  %v856_v53 = vld [vmem:[#allocation2 + $0xb0] sm:$0xff] }
 0x24a   :  { %786 = vst.msk [vmem:[#allocation2 + $0xe0] sm:$0xff] %vm663_vm6, %v754_v21  ;;  %1064 = vmatprep.mubr.f32.mxu1 %v856_v53 }
 0x24b   :  { %1065 = vmatmul.mubr.f32.gmra.mxu1 %v855_v24 }
 0x24c   :  { %v642_v47 = vpop.permute.xlu1 %641  ;;  %v858_v27 = vld [vmem:[#allocation2 + $0xc0] sm:$0xff] }
 0x24d   :  { %674 = vst.msk [vmem:[#allocation2 + $0xf0] sm:$0xff] %vm663_vm6, %v642_v47  ;;  %v756_v29 = vpop.permute.xlu0 %755  ;;  %v859_v23 = vld [vmem:[#allocation2 + $0xc8] sm:$0xff] }
 0x24e   :  { %787 = vst.msk [vmem:[#allocation2 + $0xf8] sm:$0xff] %vm663_vm6, %v756_v29  ;;  %1069 = vmatprep.mubr.f32.mxu1 %v859_v23 }
 0x24f   :  { %1070 = vmatmul.mubr.f32.gmra.mxu1 %v858_v27 }
 0x250   :  { %v644_v32 = vpop.permute.xlu1 %643  ;;  %v861_v43 = vld [vmem:[#allocation2 + $0xd8] sm:$0xff] }
 0x251   :  { %675 = vst.msk [vmem:[#allocation2 + $0x108] sm:$0xff] %vm663_vm6, %v644_v32  ;;  %v758_v38 = vpop.permute.xlu0 %757  ;;  %v862_v40 = vld [vmem:[#allocation2 + $0xe0] sm:$0xff] }
 0x252   :  { %788 = vst.msk [vmem:[#allocation2 + $0x110] sm:$0xff] %vm663_vm6, %v758_v38  ;;  %1074 = vmatprep.mubr.f32.mxu1 %v862_v40 }
 0x253   :  { %1075 = vmatmul.mubr.f32.gmra.mxu1 %v861_v43 }
 0x254   :  { %v646_v7 = vpop.permute.xlu1 %645  ;;  %v864_v57 = vld [vmem:[#allocation2 + $0xf0] sm:$0xff] }
 0x255   :  { %676 = vst.msk [vmem:[#allocation2 + $0x120] sm:$0xff] %vm663_vm6, %v646_v7  ;;  %v760_v45 = vpop.permute.xlu0 %759  ;;  %v865_v34 = vld [vmem:[#allocation2 + $0xf8] sm:$0xff] }
 0x256   :  { %789 = vst.msk [vmem:[#allocation2 + $0x128] sm:$0xff] %vm663_vm6, %v760_v45  ;;  %1079 = vmatprep.mubr.f32.mxu1 %v865_v34 }
 0x257   :  { %1080 = vmatmul.mubr.f32.gmra.mxu1 %v864_v57 }
 0x258   :  { %v648_v48 = vpop.permute.xlu1 %647  ;;  %v867_v54 = vld [vmem:[#allocation2 + $0x108] sm:$0xff] }
 0x259   :  { %677 = vst.msk [vmem:[#allocation2 + $0x138] sm:$0xff] %vm663_vm6, %v648_v48  ;;  %v762_v55 = vpop.permute.xlu0 %761  ;;  %v868_v28 = vld [vmem:[#allocation2 + $0x110] sm:$0xff] }
 0x25a   :  { %790 = vst.msk [vmem:[#allocation2 + $0x140] sm:$0xff] %vm663_vm6, %v762_v55  ;;  %1084 = vmatprep.mubr.f32.mxu1 %v868_v28 }
 0x25b   :  { %1085 = vmatmul.mubr.f32.gmra.mxu1 %v867_v54 }
 0x25c   :  { %v870_v56 = vld [vmem:[#allocation2 + $0x120] sm:$0xff] }
 0x25d   :  { %v871_v41 = vld [vmem:[#allocation2 + $0x128] sm:$0xff] }
 0x25e   :  { %1089 = vmatprep.mubr.f32.mxu1 %v871_v41 }
 0x25f   :  { %1090 = vmatmul.mubr.f32.gmra.mxu1 %v870_v56 }
 0x260   :  { %v873_v58 = vld [vmem:[#allocation2 + $0x138] sm:$0xff] }
 0x261   :  { %v874_v60 = vld [vmem:[#allocation2 + $0x140] sm:$0xff] }
 0x262   :  { %1094 = vmatprep.mubr.f32.mxu1 %v874_v60 }
 0x263   :  { %1095 = vmatmul.mubr.f32.gmra.mxu1 %v873_v58 }
 0x27e   :  { %v10584_v63 = vpop.f32.mrf.mxu0 }
 0x280   :  { %v1166_v10 = vpop.f32.mrf.mxu0 }
 0x286   :  { %v12307_v53 = vpop.f32.mrf.mxu0 }
 0x288   :  { %v1176_v38 = vpop.f32.mrf.mxu0 }
 0x28e   :  { %v12320_v34 = vpop.f32.mrf.mxu0 }
 0x290   :  { %v1186_v41 = vpop.f32.mrf.mxu0 }
 0x2ed   :  { %v9607_v15 = vpop.f32.mrf.mxu1 }
 0x2ef   :  { %v9608_v26 = vpop.f32.mrf.mxu1 }
 0x2f0   :  { %v9609_v5 = vadd.f32 %v9608_v26, %v9607_v15 }
 0x2f2   :  { %v1032_v6 = vadd.f32 %v9609_v5, %v12300_v4  ;;  %v9610_v8 = vpop.f32.mrf.mxu1  ;;  %v12330_v5 = vpop.f32.mrf.mxu0 }
 0x2f4   :  { %v12303_v11 = vadd.f32 %v1166_v10, %v1032_v6  ;;  %v9611_v16 = vpop.f32.mrf.mxu1 }
 0x2f5   :  { %v9612_v31 = vadd.f32 %v9611_v16, %v9610_v8 }
 0x2f6   :  { %v9281_v19 = vmul.f32 -1.442695, %v12303_v11  ;;  %v9613_v24 = vpop.f32.mrf.mxu1 }
 0x2f7   :  { %v1037_v21 = vadd.f32 %v9612_v31, %v12300_v4 }
 0x2f8   :  { %11004 = vpow2.f32 %v9281_v19  ;;  %v9614_v47 = vpop.f32.mrf.mxu1 }
 0x2f9   :  { %v12309_v27 = vadd.f32 %v10584_v63, %v1037_v21  ;;  %v9615_v29 = vadd.f32 %v9614_v47, %v9613_v24  ;;  %v1196_v24 = vpop.f32.mrf.mxu0 }
 0x2fb   :  { %v9282_v23 = vmul.f32 -1.442695, %v12309_v27  ;;  %v1042_v32 = vadd.f32 %v9615_v29, %v12300_v4  ;;  %v12313_v43 = vpop.f32.mrf.mxu1 }
 0x2fd   :  { %11006 = vpow2.f32 %v9282_v23  ;;  %v12315_v40 = vadd.f32 %v1176_v38, %v1042_v32  ;;  %v12317_v7 = vpop.f32.mrf.mxu1 }
 0x2ff   :  { %v9283_v57 = vmul.f32 -1.442695, %v12315_v40  ;;  %v9619_v45 = vpop.f32.mrf.mxu1 }
 0x301   :  { %11008 = vpow2.f32 %v9283_v57  ;;  %v9620_v48 = vpop.f32.mrf.mxu1  ;;  %v12340_v57 = vpop.f32.mrf.mxu0 }
 0x302   :  { %v9621_v54 = vadd.f32 %v9620_v48, %v9619_v45 }
 0x303   :  { %v12322_v55 = vpop.f32.mrf.mxu1 }
 0x304   :  { %v1052_v28 = vadd.f32 %v9621_v54, %v12300_v4 }
 0x305   :  { %v11005_v56 = vpop.eup %11004  ;;  %v12325_v58 = vpop.f32.mrf.mxu1 }
 0x306   :  { %v1277_v60 = vadd.f32 1.0, %v11005_v56  ;;  %v12327_v15 = vadd.f32 %v1186_v41, %v1052_v28  ;;  %v1793_v56 = vld [vmem:[#allocation7 + $0x278] sm:$0xff] }
 0x307   :  { %v9625_v63 = vpop.f32.mrf.mxu1  ;;  %10603 = vmatprep.subr.mxu1 %v1793_v56 }
 0x308   :  { %11010 = vrcp.f32 %v1277_v60  ;;  %v9285_v26 = vmul.f32 -1.442695, %v12327_v15  ;;  %v1206_v60 = vpop.f32.mrf.mxu0  ;;  %10604 = vmatpush3.msra.mxu1 %v1793_v56  ;;  %v1789_v56 = vld [vmem:[#allocation7 + $0x258] sm:$0xff] }
 0x309   :  { %v9626_v6 = vpop.f32.mrf.mxu1 }
 0x30a   :  { %v11007_v8 = vpop.eup %11006  ;;  %11012 = vpow2.f32 %v9285_v26  ;;  %v9627_v10 = vadd.f32 %v9626_v6, %v9625_v63  ;;  %v1792_v6 = vld [vmem:[#allocation7 + $0x270] sm:$0xff] }
 0x30b   :  { %v1278_v16 = vadd.f32 1.0, %v11007_v8  ;;  %v12332_v31 = vpop.f32.mrf.mxu1  ;;  %10605 = vmatprep.subr.mxu1 %v1792_v6 }
 0x30c   :  { %v1062_v19 = vadd.f32 %v9627_v10, %v12300_v4  ;;  %10606 = vmatpush3.msra.mxu1 %v1792_v6 }
 0x30d   :  { %11014 = vrcp.f32 %v1278_v16  ;;  %v12335_v21 = vpop.f32.mrf.mxu1 }
 0x30e   :  { %v11009_v47 = vpop.eup %11008  ;;  %v12337_v29 = vadd.f32 %v1196_v24, %v1062_v19  ;;  %v1791_v24 = vld [vmem:[#allocation7 + $0x268] sm:$0xff]  ;;  %v9630_v49 = vadd.f32 %v12335_v21, %v12332_v31 }
 0x30f   :  { %v1279_v23 = vadd.f32 1.0, %v11009_v47  ;;  %v9631_v32 = vpop.f32.mrf.mxu1  ;;  %v12351_v47 = vpop.f32.mrf.mxu0  ;;  %10607 = vmatprep.subr.mxu1 %v1791_v24 }
 0x310   :  { %v9287_v38 = vmul.f32 -1.442695, %v12337_v29  ;;  %10608 = vmatpush3.msra.mxu1 %v1791_v24  ;;  %v1067_v31 = vadd.f32 %v9630_v49, %v12300_v4 }
 0x311   :  { %11016 = vrcp.f32 %v1279_v23  ;;  %v9632_v45 = vpop.f32.mrf.mxu1 }
 0x312   :  { %11018 = vpow2.f32 %v9287_v38  ;;  %v9633_v48 = vadd.f32 %v9632_v45, %v9631_v32  ;;  %v1790_v45 = vld [vmem:[#allocation7 + $0x260] sm:$0xff] }
 0x313   :  { %v12342_v54 = vpop.f32.mrf.mxu1  ;;  %10609 = vmatprep.subr.mxu1 %v1790_v45 }
 0x314   :  { %v1072_v28 = vadd.f32 %v9633_v48, %v12300_v4  ;;  %10610 = vmatpush3.msra.mxu1 %v1790_v45 }
 0x315   :  { %v11011_v41 = vpop.eup %11010  ;;  %v12345_v63 = vpop.f32.mrf.mxu1  ;;  %10611 = vmatprep.subr.mxu1 %v1789_v56 }
 0x316   :  { %v12347_v26 = vadd.f32 %v1206_v60, %v1072_v28  ;;  %1333 = vrot.lane.b32.xlu0 %v11011_v41, %s11659_s0  ;;  %v1216_v41 = vpop.f32.mrf.mxu0  ;;  %v9618_v60 = vadd.f32 %v12317_v7, %v12313_v43  ;;  %10612 = vmatpush3.msra.mxu1 %v1789_v56 }
 0x317   :  { %v11013_v8 = vpop.eup %11012  ;;  %v9637_v10 = vpop.f32.mrf.mxu1 }
 0x318   :  { %v1281_v16 = vadd.f32 1.0, %v11013_v8  ;;  %v9289_v19 = vmul.f32 -1.442695, %v12347_v26  ;;  %v10602_v45 = vpop.f32.mrf.mxu0  ;;  %v1047_v43 = vadd.f32 %v9618_v60, %v12300_v4 }
 0x319   :  { %v9638_v23 = vpop.f32.mrf.mxu1 }
 0x31a   :  { %v11015_v32 = vpop.eup %11014  ;;  %11020 = vrcp.f32 %v1281_v16  ;;  %v9639_v38 = vadd.f32 %v9638_v23, %v9637_v10  ;;  %v1788_v10 = vld [vmem:[#allocation7 + $0x250] sm:$0xff] }
 0x31b   :  { %11022 = vpow2.f32 %v9289_v19  ;;  %v9640_v48 = vpop.f32.mrf.mxu1  ;;  %1335 = vrot.lane.b32.xlu1 %v11015_v32, %s11659_s0  ;;  %10613 = vmatprep.subr.mxu1 %v1788_v10 }
 0x31c   :  { %v1082_v28 = vadd.f32 %v9639_v38, %v12300_v4  ;;  %10614 = vmatpush3.msra.mxu1 %v1788_v10  ;;  %v1787_v38 = vld [vmem:[#allocation7 + $0x248] sm:$0xff]  ;;  %v1226_v10 = vpop.f32.mrf.mxu0 }
 0x31d   :  { %v9641_v6 = vpop.f32.mrf.mxu1  ;;  %10615 = vmatprep.subr.mxu1 %v1787_v38 }
 0x31e   :  { %v11017_v8 = vpop.eup %11016  ;;  %v12357_v16 = vadd.f32 %v1216_v41, %v1082_v28  ;;  %v9624_v28 = vadd.f32 %v12325_v58, %v12322_v55  ;;  %10616 = vmatpush3.msra.mxu1 %v1787_v38 }
 0x31f   :  { %v11019_v19 = vpop.eup %11018  ;;  %v9643_v24 = vpop.f32.mrf.mxu1  ;;  %1337 = vrot.lane.b32.xlu1 %v11017_v8, %s11659_s0  ;;  %10617 = vmatprep.subr.mxu1 %v1786_v3 }
 0x320   :  { %v1283_v23 = vadd.f32 1.0, %v11019_v19  ;;  %v9291_v32 = vmul.f32 -1.442695, %v12357_v16  ;;  %10618 = vmatpush3.msra.mxu1 %v1786_v3  ;;  %v12366_v19 = vadd.f32 %v12307_v53, %v1047_v43  ;;  %v1057_v51 = vadd.f32 %v9624_v28, %v12300_v4 }
 0x321   :  { %v9644_v7 = vpop.f32.mrf.mxu1  ;;  %v9636_v43 = vadd.f32 %v12345_v63, %v12342_v54 }
 0x322   :  { %11024 = vrcp.f32 %v1283_v23  ;;  %v9645_v56 = vadd.f32 %v9644_v7, %v9643_v24  ;;  %v9284_v3 = vmul.f32 -1.442695, %v12366_v19  ;;  %v12380_v7 = vadd.f32 %v12320_v34, %v1057_v51 }
 0x323   :  { %11026 = vpow2.f32 %v9291_v32  ;;  %v9646_v41 = vpop.f32.mrf.mxu1 }
 0x324   :  { %v1092_v8 = vadd.f32 %v9645_v56, %v12300_v4  ;;  %v1077_v56 = vadd.f32 %v9636_v43, %v12300_v4 }
 0x325   :  { %v9647_v60 = vpop.f32.mrf.mxu1 }
 0x326   :  { %v12371_v55 = vadd.f32 %v1226_v10, %v1092_v8  ;;  %v9648_v58 = vadd.f32 %v9647_v60, %v9646_v41  ;;  %v9642_v41 = vadd.f32 %v9641_v6, %v9640_v48  ;;  %v9286_v8 = vmul.f32 -1.442695, %v12380_v7 }
 0x327   :  { %v11021_v24 = vpop.eup %11020  ;;  %v12389_v10 = vadd.f32 %v12330_v5, %v1067_v31  ;;  %v12393_v49 = vadd.f32 %v12340_v57, %v1077_v56 }
 0x328   :  { %v11023_v23 = vpop.eup %11022  ;;  %v9293_v32 = vmul.f32 -1.442695, %v12371_v55  ;;  %v1097_v38 = vadd.f32 %v9648_v58, %v12300_v4  ;;  %1341 = vrot.lane.b32.xlu1 %v11021_v24, %s11659_s0  ;;  %v1087_v63 = vadd.f32 %v9642_v41, %v12300_v4 }
 0x329   :  { %v1285_v53 = vadd.f32 1.0, %v11023_v23  ;;  %v9290_v48 = vmul.f32 -1.442695, %v12393_v49 }
 0x32a   :  { %11028 = vpow2.f32 %v9293_v32  ;;  %v12383_v21 = vadd.f32 %v10602_v45, %v1097_v38  ;;  %v9288_v45 = vmul.f32 -1.442695, %v12389_v10  ;;  %v12399_v5 = vadd.f32 %v12351_v47, %v1087_v63 }
 0x32b   :  { %11030 = vrcp.f32 %v1285_v53 }
 0x32c   :  { %v9294_v28 = vmul.f32 -1.442695, %v12383_v21  ;;  %11032 = vpow2.f32 %v9284_v3  ;;  %v9292_v57 = vmul.f32 -1.442695, %v12399_v5 }
 0x32e   :  { %11034 = vpow2.f32 %v9294_v28 }
 0x32f   :  { %v11025_v51 = vpop.eup %11024  ;;  %11036 = vpow2.f32 %v9286_v8 }
 0x330   :  { %v11027_v34 = vpop.eup %11026  ;;  %1345 = vrot.lane.b32.xlu1 %v11025_v51, %s11659_s0 }
 0x331   :  { %v1287_v54 = vadd.f32 1.0, %v11027_v34 }
 0x333   :  { %11038 = vrcp.f32 %v1287_v54 }
 0x334   :  { %11040 = vpow2.f32 %v9288_v45 }
 0x335   :  { %11042 = vpow2.f32 %v9290_v48 }
 0x337   :  { %v11029_v6 = vpop.eup %11028 }
 0x338   :  { %v11031_v60 = vpop.eup %11030  ;;  %v1289_v58 = vadd.f32 1.0, %v11029_v6 }
 0x339   :  { %1349 = vrot.lane.b32.xlu1 %v11031_v60, %s11659_s0  ;;  %v11033_v24 = vpop.eup %11032 }
 0x33a   :  { %11044 = vrcp.f32 %v1289_v58  ;;  %v1280_v32 = vadd.f32 1.0, %v11033_v24 }
 0x33b   :  { %v11035_v4 = vpop.eup %11034  ;;  %11046 = vpow2.f32 %v9292_v57 }
 0x33c   :  { %v1290_v23 = vadd.f32 1.0, %v11035_v4  ;;  %v11037_v38 = vpop.eup %11036 }
 0x33d   :  { %v1282_v47 = vadd.f32 1.0, %v11037_v38 }
 0x33e   :  { %11048 = vrcp.f32 %v1290_v23 }
 0x33f   :  { %11050 = vrcp.f32 %v1280_v32 }
 0x340   :  { %v11039_v3 = vpop.eup %11038  ;;  %11052 = vrcp.f32 %v1282_v47  ;;  %v1769_v47 = vld [vmem:[#allocation7 + $0x1b8] sm:$0xff] }
 0x341   :  { %1353 = vrot.lane.b32.xlu1 %v11039_v3, %s11659_s0  ;;  %v11041_v53 = vpop.eup %11040 }
 0x342   :  { %v11043_v43 = vpop.eup %11042  ;;  %v1284_v31 = vadd.f32 1.0, %v11041_v53  ;;  %v1784_v53 = vld [vmem:[#allocation7 + $0x230] sm:$0xff] }
 0x343   :  { %v1286_v41 = vadd.f32 1.0, %v11043_v43  ;;  %v1768_v43 = vld [vmem:[#allocation7 + $0x1b0] sm:$0xff] }
 0x344   :  { %11054 = vrcp.f32 %v1284_v31 }
 0x345   :  { %11056 = vrcp.f32 %v1286_v41 }
 0x347   :  { %v11045_v28 = vpop.eup %11044 }
 0x348   :  { %1357 = vrot.lane.b32.xlu1 %v11045_v28, %s11659_s0  ;;  %v11047_v56 = vpop.eup %11046 }
 0x349   :  { %v1288_v51 = vadd.f32 1.0, %v11047_v56  ;;  %v1767_v56 = vld [vmem:[#allocation7 + $0x1a8] sm:$0xff] }
 0x34b   :  { %v11049_v8 = vpop.eup %11048  ;;  %11058 = vrcp.f32 %v1288_v51 }
 0x34c   :  { %1359 = vrot.lane.b32.xlu0 %v11049_v8, %s11659_s0  ;;  %v11051_v34 = vpop.eup %11050 }
 0x34d   :  { %v11053_v54 = vpop.eup %11052 }
 0x350   :  { %1339 = vrot.lane.b32.xlu0 %v11051_v34, %s11659_s0 }
 0x351   :  { %v11055_v63 = vpop.eup %11054 }
 0x352   :  { %v11057_v45 = vpop.eup %11056 }
 0x354   :  { %1343 = vrot.lane.b32.xlu0 %v11053_v54, %s11659_s0 }
 0x358   :  { %1347 = vrot.lane.b32.xlu0 %v11055_v63, %s11659_s0  ;;  %v11059_v48 = vpop.eup %11058  ;;  %v1782_v63 = vld [vmem:[#allocation7 + $0x220] sm:$0xff] }
 0x35c   :  { %1351 = vrot.lane.b32.xlu0 %v11057_v45, %s11659_s0  ;;  %v1766_v45 = vld [vmem:[#allocation7 + $0x1a0] sm:$0xff] }
 0x360   :  { %1355 = vrot.lane.b32.xlu0 %v11059_v48, %s11659_s0 }
 0x388   :  { %v1334_v6 = vpop.permute.xlu0 %1333 }
 0x389   :  { %v1375_v60 = vmul.f32 %v1334_v6, %v12303_v11  ;;  %v1785_v11 = vld [vmem:[#allocation7 + $0x238] sm:$0xff] }
 0x38a   :  { %9671 = vmatprep.subr.mxu0 %v1785_v11 }
 0x38b   :  { %v1389_v58 = vmul.f32 %v1375_v60, %v11880_v12  ;;  %9672 = vmatpush3.msra.mxu0 %v1769_v47  ;;  %v1781_v60 = vld [vmem:[#allocation7 + $0x218] sm:$0xff]  ;;  %v1764_v47 = vld [vmem:[#allocation7 + $0x190] sm:$0xff] }
 0x38c   :  { %9673 = vmatprep.subr.mxu0 %v1784_v53 }
 0x38d   :  { %v12414_v57 = vadd.f32 %v1389_v58, %v11894_v37  ;;  %v1336_v24 = vpop.permute.xlu1 %1335  ;;  %9674 = vmatpush3.msra.mxu0 %v1768_v43  ;;  %v1765_v58 = vld [vmem:[#allocation7 + $0x198] sm:$0xff]  ;;  %v1779_v43 = vld [vmem:[#allocation7 + $0x208] sm:$0xff] }
 0x38e   :  { %v1376_v4 = vmul.f32 %v1336_v24, %v12309_v27 }
 0x38f   :  { %1557 = vst.msk [vmem:[#allocation2 + $0x8] sm:$0xff] %vm563_vm1, %v12414_v57  ;;  %v1669_v37 = vrot.slane %v12414_v57, 2  ;;  %v1571_v28 = vrot.slane %v12414_v57, 1  ;;  %v1417_v41 = vrot.slane %v12414_v57, 6 }
 0x390   :  { %v1390_v23 = vmul.f32 %v1376_v4, %v11882_v13 }
 0x391   :  { %v1338_v32 = vpop.permute.xlu1 %1337 }
 0x392   :  { %v12421_v38 = vadd.f32 %v1390_v23, %v11890_v33  ;;  %v1377_v3 = vmul.f32 %v1338_v32, %v12315_v40  ;;  %v1783_v40 = vld [vmem:[#allocation7 + $0x228] sm:$0xff] }
 0x393   :  { %9675 = vmatprep.subr.mxu0 %v1783_v40 }
 0x394   :  { %v1670_v27 = vrot.slane %v12421_v38, 2  ;;  %1558 = vst.msk [vmem:[#allocation2 + $0x20] sm:$0xff] %vm563_vm1, %v12421_v38  ;;  %v1391_v31 = vmul.f32 %v1377_v3, %v11930_v59  ;;  %v1572_v33 = vrot.slane %v12421_v38, 1  ;;  %v1418_v8 = vrot.slane %v12421_v38, 6  ;;  %9676 = vmatpush3.msra.mxu0 %v1767_v56  ;;  %v1780_v3 = vld [vmem:[#allocation7 + $0x210] sm:$0xff]  ;;  %v1762_v56 = vld [vmem:[#allocation7 + $0x180] sm:$0xff] }
 0x395   :  { %9677 = vmatprep.subr.mxu0 %v1782_v63 }
 0x396   :  { %v1695_v51 = vsel %vm805_vm2, %v1669_v37, %v1670_v27  ;;  %v12438_v34 = vadd.f32 %v1391_v31, %v11958_v35  ;;  %v1597_v54 = vsel %vm706_vm3, %v1571_v28, %v1572_v33  ;;  %v1443_v48 = vsel %vm548_vm4, %v1417_v41, %v1418_v8  ;;  %9678 = vmatpush3.msra.mxu0 %v1766_v45  ;;  %v1763_v31 = vld [vmem:[#allocation7 + $0x188] sm:$0xff]  ;;  %v1776_v45 = vld [vmem:[#allocation7 + $0x1f0] sm:$0xff] }
 0x397   :  { %1697 = vst.msk [vmem:[#allocation2 + $0x10] sm:$0xff] %vm563_vm1, %v1695_v51  ;;  %1613 = vrot.lane.b32.xlu0 %v1597_v54, %s11659_s0  ;;  %1446 = vst.msk [vmem:[#allocation2 + $0x18] sm:$0xff] %vm563_vm1, %v1443_v48  ;;  %9679 = vmatprep.subr.mxu0 %v1781_v60  ;;  %v1761_v51 = vld [vmem:[#allocation7 + $0x178] sm:$0xff]  ;;  %v1775_v60 = vld [vmem:[#allocation7 + $0x1e8] sm:$0xff] }
 0x398   :  { %v1671_v35 = vrot.slane %v12438_v34, 2  ;;  %1559 = vst.msk [vmem:[#allocation2 + $0x38] sm:$0xff] %vm563_vm1, %v12438_v34  ;;  %v1573_v6 = vrot.slane %v12438_v34, 1  ;;  %v1419_v24 = vrot.slane %v12438_v34, 6  ;;  %9680 = vmatpush3.msra.mxu0 %v1765_v58 }
 0x399   :  { %9681 = vmatprep.subr.mxu0 %v1780_v3  ;;  %v1758_v3 = vld [vmem:[#allocation7 + $0x160] sm:$0xff] }
 0x39a   :  { %v1694_v4 = vsel %vm805_vm2, %v1670_v27, %v1671_v35  ;;  %v1342_v23 = vpop.permute.xlu1 %1341  ;;  %v1596_v32 = vsel %vm706_vm3, %v1572_v33, %v1573_v6  ;;  %v1442_v53 = vsel %vm548_vm4, %v1418_v8, %v1419_v24  ;;  %9682 = vmatpush3.msra.mxu0 %v1764_v47  ;;  %v1777_v8 = vld [vmem:[#allocation7 + $0x1f8] sm:$0xff] }
 0x39b   :  { %1698 = vst.msk [vmem:[#allocation2 + $0x28] sm:$0xff] %vm563_vm1, %v1694_v4  ;;  %v1379_v11 = vmul.f32 %v1342_v23, %v12327_v15  ;;  %1615 = vrot.lane.b32.xlu0 %v1596_v32, %s11659_s0  ;;  %1447 = vst.msk [vmem:[#allocation2 + $0x30] sm:$0xff] %vm563_vm1, %v1442_v53  ;;  %v1778_v15 = vld [vmem:[#allocation7 + $0x200] sm:$0xff]  ;;  %9683 = vmatprep.subr.mxu0 %v1779_v43  ;;  %v1759_v4 = vld [vmem:[#allocation7 + $0x168] sm:$0xff] }
 0x39c   :  { %9684 = vmatpush3.msra.mxu0 %v1763_v31  ;;  %v1774_v23 = vld [vmem:[#allocation7 + $0x1e0] sm:$0xff] }
 0x39d   :  { %v1393_v27 = vmul.f32 %v1379_v11, %v11935_v9  ;;  %9685 = vmatprep.subr.mxu0 %v1778_v15  ;;  %v1773_v15 = vld [vmem:[#allocation7 + $0x1d8] sm:$0xff] }
 0x39e   :  { %v1713_v33 = vld [vmem:[#allocation2 + $0x10] sm:$0xff]  ;;  %9686 = vmatpush3.msra.mxu0 %v1762_v56 }
 0x39f   :  { %v12474_v40 = vadd.f32 %v1393_v27, %v12014_v46  ;;  %10619 = vmatprep.mubr.msk.f32.mxu1 %vm563_vm1, %v1713_v33  ;;  %9687 = vmatprep.subr.mxu0 %v1777_v8  ;;  %v1760_v46 = vld [vmem:[#allocation7 + $0x170] sm:$0xff] }
 0x3a0   :  { %9688 = vmatpush3.msra.mxu0 %v1761_v51  ;;  %v1772_v56 = vld [vmem:[#allocation7 + $0x1d0] sm:$0xff] }
 0x3a1   :  { %1561 = vst.msk [vmem:[#allocation2 + $0x68] sm:$0xff] %vm563_vm1, %v12474_v40  ;;  %9689 = vmatprep.subr.mxu0 %v1776_v45  ;;  %v1756_v51 = vld [vmem:[#allocation7 + $0x150] sm:$0xff]  ;;  %v1755_v45 = vld [vmem:[#allocation7 + $0x148] sm:$0xff] }
 0x3a2   :  { %v1346_v54 = vpop.permute.xlu1 %1345  ;;  %v1716_v63 = vld [vmem:[#allocation2 + $0x28] sm:$0xff]  ;;  %9690 = vmatpush3.msra.mxu0 %v1760_v46  ;;  %v1754_v46 = vld [vmem:[#allocation7 + $0x140] sm:$0xff] }
 0x3a3   :  { %v1381_v48 = vmul.f32 %v1346_v54, %v12337_v29  ;;  %10620 = vmatmul.mubr.msk.f32.vlgmr.msra.gmra.mxu1 %vm563_vm1, %v1716_v63  ;;  %9691 = vmatprep.subr.mxu0 %v1775_v60  ;;  %v1771_v63 = vld [vmem:[#allocation7 + $0x1c8] sm:$0xff] }
 0x3a4   :  { %9692 = vmatpush3.msra.mxu0 %v1759_v4 }
 0x3a5   :  { %v1395_v58 = vmul.f32 %v1381_v48, %v11979_v44  ;;  %9693 = vmatprep.subr.mxu0 %v1774_v23  ;;  %v1770_v48 = vld [vmem:[#allocation7 + $0x1c0] sm:$0xff] }
 0x3a6   :  { %9694 = vmatpush3.msra.mxu0 %v1758_v3 }
 0x3a7   :  { %v12483_v32 = vadd.f32 %v1395_v58, %v12063_v42  ;;  %9695 = vmatprep.subr.mxu0 %v1773_v15 }
 0x3a9   :  { %1563 = vst.msk [vmem:[#allocation2 + $0x98] sm:$0xff] %vm563_vm1, %v12483_v32 }
 0x3ab   :  { %v1350_v29 = vpop.permute.xlu1 %1349 }
 0x3ac   :  { %v1383_v11 = vmul.f32 %v1350_v29, %v12347_v26 }
 0x3ae   :  { %v1397_v47 = vmul.f32 %v1383_v11, %v12056_v25  ;;  %v1459_v11 = vrot.slane %v12414_v57, 7 }
 0x3b0   :  { %v12490_v53 = vadd.f32 %v1397_v47, %v12111_v17  ;;  %v1757_v17 = vld [vmem:[#allocation7 + $0x158] sm:$0xff] }
 0x3b1   :  { %9696 = vmatpush3.msra.mxu0 %v1757_v17 }
 0x3b2   :  { %1565 = vst.msk [vmem:[#allocation2 + $0xc8] sm:$0xff] %vm563_vm1, %v12490_v53  ;;  %9697 = vmatprep.subr.mxu0 %v1772_v56 }
 0x3b3   :  { %v1354_v42 = vpop.permute.xlu1 %1353  ;;  %9698 = vmatpush3.msra.mxu0 %v1756_v51 }
 0x3b4   :  { %v1385_v43 = vmul.f32 %v1354_v42, %v12357_v16  ;;  %9699 = vmatprep.subr.mxu0 %v1771_v63 }
 0x3b5   :  { %9700 = vmatpush3.msra.mxu0 %v1755_v45 }
 0x3b6   :  { %v1399_v27 = vmul.f32 %v1385_v43, %v12129_v36  ;;  %9701 = vmatprep.subr.mxu0 %v1770_v48 }
 0x3b7   :  { %9702 = vmatpush3.msra.mxu0 %v1754_v46 }
 0x3b8   :  { %v12497_v31 = vadd.f32 %v1399_v27, %v12159_v62 }
 0x3ba   :  { %1567 = vst.msk [vmem:[#allocation2 + $0xf8] sm:$0xff] %vm563_vm1, %v12497_v31  ;;  %v1358_v26 = vpop.permute.xlu1 %1357 }
 0x3bb   :  { %v1387_v33 = vmul.f32 %v1358_v26, %v12371_v55  ;;  %v1460_v26 = vrot.slane %v12421_v38, 7 }
 0x3bd   :  { %v1401_v8 = vmul.f32 %v1387_v33, %v12202_v39  ;;  %v1461_v33 = vrot.slane %v12438_v34, 7  ;;  %v1485_v48 = vsel %vm592_vm5, %v1459_v11, %v1460_v26 }
 0x3be   :  { %v1360_v54 = vpop.permute.xlu0 %1359 }
 0x3bf   :  { %v12504_v16 = vadd.f32 %v1401_v8, %v12209_v50  ;;  %v1388_v62 = vmul.f32 %v1360_v54, %v12383_v21 }
 0x3c1   :  { %1569 = vst.msk [vmem:[#allocation2 + $0x128] sm:$0xff] %vm563_vm1, %v12504_v16  ;;  %v1402_v55 = vmul.f32 %v1388_v62, %v11884_v14  ;;  %v1681_v21 = vrot.slane %v12504_v16, 2 }
 0x3c2   :  { %v1340_v60 = vpop.permute.xlu0 %1339 }
 0x3c3   :  { %v12511_v58 = vadd.f32 %v1402_v55, %v11939_v20  ;;  %v1378_v50 = vmul.f32 %v1340_v60, %v12366_v19 }
 0x3c5   :  { %v1682_v4 = vrot.slane %v12511_v58, 2  ;;  %1570 = vst.msk [vmem:[#allocation2 + $0x140] sm:$0xff] %vm563_vm1, %v12511_v58  ;;  %v1392_v23 = vmul.f32 %v1378_v50, %v11932_v1  ;;  %v1472_v3 = vrot.slane %v12511_v58, 7  ;;  %v1430_v20 = vrot.slane %v12511_v58, 6 }
 0x3c6   :  { %v1344_v29 = vpop.permute.xlu0 %1343  ;;  %v1575_v50 = vrot.slane %v12474_v40, 1 }
 0x3c7   :  { %v1683_v19 = vsel %vm805_vm2, %v1681_v21, %v1682_v4  ;;  %v1696_v47 = vsel %vm805_vm2, %v1682_v4, %v1669_v37  ;;  %v12531_v42 = vadd.f32 %v1392_v23, %v11989_v52  ;;  %v1380_v43 = vmul.f32 %v1344_v29, %v12380_v7 }
 0x3c8   :  { %1709 = vst.msk [vmem:[#allocation2 + $0x130] sm:$0xff] %vm563_vm1, %v1683_v19  ;;  %1710 = vst.msk [vmem:[#allocation2 + $0x148] sm:$0xff] %vm563_vm1, %v1696_v47  ;;  %v1486_v27 = vsel %vm592_vm5, %v1472_v3, %v1459_v11  ;;  %v1429_v37 = vrot.slane %v12504_v16, 6  ;;  %v1673_v52 = vrot.slane %v12474_v40, 2  ;;  %v1444_v8 = vsel %vm548_vm4, %v1430_v20, %v1417_v41 }
 0x3c9   :  { %v1672_v15 = vrot.slane %v12531_v42, 2  ;;  %1560 = vst.msk [vmem:[#allocation2 + $0x50] sm:$0xff] %vm563_vm1, %v12531_v42  ;;  %v1394_v7 = vmul.f32 %v1380_v43, %v11941_v22  ;;  %1501 = vrot.lane.b32.xlu1 %v1486_v27, %s11659_s0  ;;  %v1574_v17 = vrot.slane %v12531_v42, 1  ;;  %v1420_v51 = vrot.slane %v12531_v42, 6  ;;  %1445 = vst.msk [vmem:[#allocation2] sm:$0xff] %vm563_vm1, %v1444_v8 }
 0x3ca   :  { %v1348_v56 = vpop.permute.xlu0 %1347  ;;  %v1431_v54 = vsel %vm548_vm4, %v1429_v37, %v1430_v20  ;;  %v1462_v43 = vrot.slane %v12531_v42, 7 }
 0x3cb   :  { %v1692_v62 = vsel %vm805_vm2, %v1672_v15, %v1673_v52  ;;  %v1693_v63 = vsel %vm805_vm2, %v1671_v35, %v1672_v15  ;;  %v12566_v45 = vadd.f32 %v1394_v7, %v12039_v18  ;;  %v1382_v41 = vmul.f32 %v1348_v56, %v12389_v10  ;;  %1458 = vst.msk [vmem:[#allocation2 + $0x138] sm:$0xff] %vm563_vm1, %v1431_v54  ;;  %v16983_v54 = vld [vmem:[#allocation13_spill] sm:$0xff] }
 0x3cc   :  { %1699 = vst.msk [vmem:[#allocation2 + $0x40] sm:$0xff] %vm563_vm1, %v1693_v63  ;;  %1700 = vst.msk [vmem:[#allocation2 + $0x58] sm:$0xff] %vm563_vm1, %v1692_v62  ;;  %v1595_v35 = vsel %vm706_vm3, %v1573_v6, %v1574_v17  ;;  %v1421_v18 = vrot.slane %v12474_v40, 6  ;;  %v1675_v10 = vrot.slane %v12483_v32, 2  ;;  %v1484_v6 = vsel %vm592_vm5, %v1460_v26, %v1461_v33 }
 0x3cd   :  { %v1674_v55 = vrot.slane %v12566_v45, 2  ;;  %1562 = vst.msk [vmem:[#allocation2 + $0x80] sm:$0xff] %vm563_vm1, %v12566_v45  ;;  %v1396_v46 = vmul.f32 %v1382_v41, %v12021_v2  ;;  %1503 = vrot.lane.b32.xlu1 %v1485_v48, %s11659_s0  ;;  %1617 = vrot.lane.b32.xlu0 %v1595_v35, %s11659_s0  ;;  %v1441_v4 = vsel %vm548_vm4, %v1419_v24, %v1420_v51  ;;  %v1422_v29 = vrot.slane %v12566_v45, 6 }
 0x3ce   :  { %v1352_v60 = vpop.permute.xlu0 %1351  ;;  %v1440_v23 = vsel %vm548_vm4, %v1420_v51, %v1421_v18  ;;  %1448 = vst.msk [vmem:[#allocation2 + $0x48] sm:$0xff] %vm563_vm1, %v1441_v4  ;;  %v1594_v24 = vsel %vm706_vm3, %v1574_v17, %v1575_v50  ;;  %v1576_v27 = vrot.slane %v12566_v45, 1  ;;  %v1677_v26 = vrot.slane %v12490_v53, 2 }
 0x3cf   :  { %v1690_v11 = vsel %vm805_vm2, %v1674_v55, %v1675_v10  ;;  %v1691_v20 = vsel %vm805_vm2, %v1673_v52, %v1674_v55  ;;  %v12604_v19 = vadd.f32 %v1396_v46, %v12087_v61  ;;  %v1384_v47 = vmul.f32 %v1352_v60, %v12393_v49  ;;  %1449 = vst.msk [vmem:[#allocation2 + $0x60] sm:$0xff] %vm563_vm1, %v1440_v23 }
 0x3d0   :  { %1701 = vst.msk [vmem:[#allocation2 + $0x70] sm:$0xff] %vm563_vm1, %v1691_v20  ;;  %1702 = vst.msk [vmem:[#allocation2 + $0x88] sm:$0xff] %vm563_vm1, %v1690_v11  ;;  %v1423_v61 = vrot.slane %v12483_v32, 6  ;;  %v1439_v7 = vsel %vm548_vm4, %v1421_v18, %v1422_v29  ;;  %v1483_v35 = vsel %vm592_vm5, %v1461_v33, %v1462_v43  ;;  %v1463_v18 = vrot.slane %v12474_v40, 7 }
 0x3d1   :  { %16982 = vst [vmem:[#allocation16_spill] sm:$0xff] %v12604_v19  ;;  %v1676_v49 = vrot.slane %v12604_v19, 2  ;;  %1564 = vst.msk [vmem:[#allocation2 + $0xb0] sm:$0xff] %vm563_vm1, %v12604_v19  ;;  %v1398_v52 = vmul.f32 %v1384_v47, %v12092_v0  ;;  %1505 = vrot.lane.b32.xlu1 %v1484_v6, %s11659_s0  ;;  %1619 = vrot.lane.b32.xlu0 %v1594_v24, %s11659_s0  ;;  %v1424_v56 = vrot.slane %v12604_v19, 6  ;;  %v1679_v55 = vrot.slane %v12497_v31, 2  ;;  %v16985_v6 = vld [vmem:[#allocation14_spill] sm:$0xff] }
 0x3d2   :  { %v1356_v15 = vpop.permute.xlu0 %1355  ;;  %v1438_v17 = vsel %vm548_vm4, %v1422_v29, %v1423_v61  ;;  %1450 = vst.msk [vmem:[#allocation2 + $0x78] sm:$0xff] %vm563_vm1, %v1439_v7  ;;  %v1577_v33 = vrot.slane %v12483_v32, 1  ;;  %v1427_v29 = vrot.slane %v12497_v31, 6  ;;  %v16986_v47 = vld [vmem:[#allocation15_spill] sm:$0xff]  ;;  %v1578_v7 = vrot.slane %v12604_v19, 1 }
 0x3d3   :  { %v1688_v8 = vsel %vm805_vm2, %v1676_v49, %v1677_v26  ;;  %v1689_v51 = vsel %vm805_vm2, %v1675_v10, %v1676_v49  ;;  %v12633_v62 = vadd.f32 %v1398_v52, %v16983_v54  ;;  %v1386_v63 = vmul.f32 %v1356_v15, %v12399_v5  ;;  %v1719_v41 = vld [vmem:[#allocation2 + $0x40] sm:$0xff]  ;;  %v1722_v48 = vld [vmem:[#allocation2 + $0x58] sm:$0xff]  ;;  %1451 = vst.msk [vmem:[#allocation2 + $0x90] sm:$0xff] %vm563_vm1, %v1438_v17 }
 0x3d4   :  { %1703 = vst.msk [vmem:[#allocation2 + $0xa0] sm:$0xff] %vm563_vm1, %v1689_v51  ;;  %1704 = vst.msk [vmem:[#allocation2 + $0xb8] sm:$0xff] %vm563_vm1, %v1688_v8  ;;  %10622 = vmatprep.mubr.msk.f32.mxu1 %vm563_vm1, %v1719_v41  ;;  %v1593_v5 = vsel %vm706_vm3, %v1575_v50, %v1576_v27  ;;  %v1425_v10 = vrot.slane %v12490_v53, 6  ;;  %v1437_v50 = vsel %vm548_vm4, %v1423_v61, %v1424_v56  ;;  %v1464_v15 = vrot.slane %v12566_v45, 7 }
 0x3d5   :  { %16984 = vst [vmem:[#allocation13_spill] sm:$0xff] %v12633_v62  ;;  %v1678_v46 = vrot.slane %v12633_v62, 2  ;;  %1566 = vst.msk [vmem:[#allocation2 + $0xe0] sm:$0xff] %vm563_vm1, %v12633_v62  ;;  %v1400_v60 = vmul.f32 %v1386_v63, %v16985_v6  ;;  %1507 = vrot.lane.b32.xlu1 %v1483_v35, %s11659_s0  ;;  %1621 = vrot.lane.b32.xlu0 %v1593_v5, %s11659_s0  ;;  %v1426_v23 = vrot.slane %v12633_v62, 6  ;;  %v1465_v5 = vrot.slane %v12483_v32, 7 }
 0x3d6   :  { %10623 = vmatmul.mubr.msk.f32.gmra.mxu1 %vm563_vm1, %v1722_v48  ;;  %v1436_v4 = vsel %vm548_vm4, %v1424_v56, %v1425_v10  ;;  %v1482_v49 = vsel %vm592_vm5, %v1462_v43, %v1463_v18  ;;  %1452 = vst.msk [vmem:[#allocation2 + $0xa8] sm:$0xff] %vm563_vm1, %v1437_v50  ;;  %v1481_v41 = vsel %vm592_vm5, %v1463_v18, %v1464_v15  ;;  %v1579_v18 = vrot.slane %v12490_v53, 1 }
 0x3d7   :  { %v1686_v11 = vsel %vm805_vm2, %v1678_v46, %v1679_v55  ;;  %v1687_v20 = vsel %vm805_vm2, %v1677_v26, %v1678_v46  ;;  %v12669_v24 = vadd.f32 %v1400_v60, %v16986_v47  ;;  %v1725_v61 = vld [vmem:[#allocation2 + $0x70] sm:$0xff]  ;;  %v1728_v52 = vld [vmem:[#allocation2 + $0x88] sm:$0xff]  ;;  %1453 = vst.msk [vmem:[#allocation2 + $0xc0] sm:$0xff] %vm563_vm1, %v1436_v4  ;;  %v1592_v26 = vsel %vm706_vm3, %v1576_v27, %v1577_v33 }
 0x3d8   :  { %1705 = vst.msk [vmem:[#allocation2 + $0xd0] sm:$0xff] %vm563_vm1, %v1687_v20  ;;  %1706 = vst.msk [vmem:[#allocation2 + $0xe8] sm:$0xff] %vm563_vm1, %v1686_v11  ;;  %10625 = vmatprep.mubr.msk.f32.mxu1 %vm563_vm1, %v1725_v61  ;;  %v1435_v43 = vsel %vm548_vm4, %v1425_v10, %v1426_v23  ;;  %v1434_v27 = vsel %vm548_vm4, %v1426_v23, %v1427_v29  ;;  %v1591_v48 = vsel %vm706_vm3, %v1577_v33, %v1578_v7  ;;  %v1749_v11 = vld [vmem:[#allocation2 + $0x130] sm:$0xff] }
 0x3d9   :  { %16987 = vst [vmem:[#allocation14_spill] sm:$0xff] %v12669_v24  ;;  %v1680_v17 = vrot.slane %v12669_v24, 2  ;;  %1568 = vst.msk [vmem:[#allocation2 + $0x110] sm:$0xff] %vm563_vm1, %v12669_v24  ;;  %1509 = vrot.lane.b32.xlu1 %v1482_v49, %s11659_s0  ;;  %1623 = vrot.lane.b32.xlu0 %v1592_v26, %s11659_s0  ;;  %v1428_v56 = vrot.slane %v12669_v24, 6  ;;  %v1480_v46 = vsel %vm592_vm5, %v1464_v15, %v1465_v5  ;;  %v1466_v60 = vrot.slane %v12604_v19, 7  ;;  %v1752_v15 = vld [vmem:[#allocation2 + $0x148] sm:$0xff] }
 0x3da   :  { %1454 = vst.msk [vmem:[#allocation2 + $0xd8] sm:$0xff] %vm563_vm1, %v1435_v43  ;;  %10626 = vmatmul.mubr.msk.f32.gmra.mxu1 %vm563_vm1, %v1728_v52  ;;  %1455 = vst.msk [vmem:[#allocation2 + $0xf0] sm:$0xff] %vm563_vm1, %v1434_v27  ;;  %v1580_v33 = vrot.slane %v12633_v62, 1  ;;  %v1467_v20 = vrot.slane %v12490_v53, 7  ;;  %v1581_v47 = vrot.slane %v12497_v31, 1  ;;  %v1468_v52 = vrot.slane %v12633_v62, 7 }
 0x3db   :  { %v1684_v8 = vsel %vm805_vm2, %v1680_v17, %v1681_v21  ;;  %v1685_v51 = vsel %vm805_vm2, %v1679_v55, %v1680_v17  ;;  %v1731_v54 = vld [vmem:[#allocation2 + $0xa0] sm:$0xff]  ;;  %v1734_v63 = vld [vmem:[#allocation2 + $0xb8] sm:$0xff]  ;;  %v1433_v21 = vsel %vm548_vm4, %v1427_v29, %v1428_v56  ;;  %v1432_v35 = vsel %vm548_vm4, %v1428_v56, %v1429_v37 }
 0x3dc   :  { %1707 = vst.msk [vmem:[#allocation2 + $0x100] sm:$0xff] %vm563_vm1, %v1685_v51  ;;  %1708 = vst.msk [vmem:[#allocation2 + $0x118] sm:$0xff] %vm563_vm1, %v1684_v8  ;;  %10628 = vmatprep.mubr.msk.f32.mxu1 %vm563_vm1, %v1731_v54  ;;  %v1590_v37 = vsel %vm706_vm3, %v1578_v7, %v1579_v18  ;;  %v1479_v23 = vsel %vm592_vm5, %v1465_v5, %v1466_v60  ;;  %v1589_v29 = vsel %vm706_vm3, %v1579_v18, %v1580_v33 }
 0x3dd   :  { %1511 = vrot.lane.b32.xlu1 %v1481_v41, %s11659_s0  ;;  %1625 = vrot.lane.b32.xlu0 %v1591_v48, %s11659_s0  ;;  %1456 = vst.msk [vmem:[#allocation2 + $0x108] sm:$0xff] %vm563_vm1, %v1433_v21  ;;  %1457 = vst.msk [vmem:[#allocation2 + $0x120] sm:$0xff] %vm563_vm1, %v1432_v35  ;;  %v1478_v49 = vsel %vm592_vm5, %v1466_v60, %v1467_v20  ;;  %v1588_v61 = vsel %vm706_vm3, %v1580_v33, %v1581_v47  ;;  %v1582_v26 = vrot.slane %v12669_v24, 1 }
 0x3de   :  { %10629 = vmatmul.mubr.msk.f32.gmra.mxu1 %vm563_vm1, %v1734_v63  ;;  %v1477_v7 = vsel %vm592_vm5, %v1467_v20, %v1468_v52  ;;  %v1469_v17 = vrot.slane %v12497_v31, 7  ;;  %v1583_v27 = vrot.slane %v12504_v16, 1  ;;  %v1584_v51 = vrot.slane %v12511_v58, 1 }
 0x3df   :  { %v1737_v10 = vld [vmem:[#allocation2 + $0xd0] sm:$0xff]  ;;  %v1740_v55 = vld [vmem:[#allocation2 + $0xe8] sm:$0xff]  ;;  %v1587_v43 = vsel %vm706_vm3, %v1581_v47, %v1582_v26  ;;  %v1470_v54 = vrot.slane %v12669_v24, 7  ;;  %v1471_v48 = vrot.slane %v12504_v16, 7 }
 0x3e0   :  { %10631 = vmatprep.mubr.msk.f32.mxu1 %vm563_vm1, %v1737_v10  ;;  %v1476_v56 = vsel %vm592_vm5, %v1468_v52, %v1469_v17  ;;  %v1586_v8 = vsel %vm706_vm3, %v1582_v26, %v1583_v27  ;;  %v1585_v63 = vsel %vm706_vm3, %v1583_v27, %v1584_v51  ;;  %v1598_v21 = vsel %vm706_vm3, %v1584_v51, %v1571_v28 }
 0x3e1   :  { %1513 = vrot.lane.b32.xlu1 %v1480_v46, %s11659_s0  ;;  %1627 = vrot.lane.b32.xlu0 %v1590_v37, %s11659_s0  ;;  %v1475_v41 = vsel %vm592_vm5, %v1469_v17, %v1470_v54  ;;  %v1474_v35 = vsel %vm592_vm5, %v1470_v54, %v1471_v48  ;;  %v1473_v5 = vsel %vm592_vm5, %v1471_v48, %v1472_v3 }
 0x3e2   :  { %10632 = vmatmul.mubr.msk.f32.gmra.mxu1 %vm563_vm1, %v1740_v55 }
 0x3e3   :  { %v1743_v50 = vld [vmem:[#allocation2 + $0x100] sm:$0xff]  ;;  %v1746_v4 = vld [vmem:[#allocation2 + $0x118] sm:$0xff] }
 0x3e4   :  { %10634 = vmatprep.mubr.msk.f32.mxu1 %vm563_vm1, %v1743_v50 }
 0x3e5   :  { %1515 = vrot.lane.b32.xlu1 %v1479_v23, %s11659_s0  ;;  %1629 = vrot.lane.b32.xlu0 %v1589_v29, %s11659_s0 }
 0x3e6   :  { %10635 = vmatmul.mubr.msk.f32.gmra.mxu1 %vm563_vm1, %v1746_v4 }
 0x3e7   :  { %10637 = vmatprep.mubr.msk.f32.mxu1 %vm563_vm1, %v1749_v11 }
 0x3e9   :  { %1517 = vrot.lane.b32.xlu1 %v1478_v49, %s11659_s0  ;;  %1631 = vrot.lane.b32.xlu0 %v1588_v61, %s11659_s0 }
 0x3ea   :  { %10638 = vmatmul.mubr.msk.f32.gmra.mxu1 %vm563_vm1, %v1752_v15 }
 0x3ed   :  { %1519 = vrot.lane.b32.xlu1 %v1477_v7, %s11659_s0  ;;  %1633 = vrot.lane.b32.xlu0 %v1587_v43, %s11659_s0 }
 0x3f1   :  { %1521 = vrot.lane.b32.xlu1 %v1476_v56, %s11659_s0  ;;  %1635 = vrot.lane.b32.xlu0 %v1586_v8, %s11659_s0 }
 0x3f5   :  { %1637 = vrot.lane.b32.xlu0 %v1585_v63, %s11659_s0  ;;  %1523 = vrot.lane.b32.xlu1 %v1475_v41, %s11659_s0 }
 0x3f9   :  { %1639 = vrot.lane.b32.xlu0 %v1598_v21, %s11659_s0  ;;  %1525 = vrot.lane.b32.xlu1 %v1474_v35, %s11659_s0 }
 0x3fd   :  { %1527 = vrot.lane.b32.xlu1 %v1473_v5, %s11659_s0 }
 0x409   :  { %v1614_v18 = vpop.permute.xlu0 %1613 }
 0x40a   :  { %1655 = vst.msk [vmem:[#allocation2 + $0x8] sm:$0xff] %vm663_vm6, %v1614_v18 }
 0x40d   :  { %v1616_v10 = vpop.permute.xlu0 %1615 }
 0x40e   :  { %1656 = vst.msk [vmem:[#allocation2 + $0x20] sm:$0xff] %vm663_vm6, %v1616_v10 }
 0x411   :  { %v1712_v28 = vld [vmem:[#allocation2 + $0x8] sm:$0xff] }
 0x412   :  { %1908 = vmatprep.mubr.f32.mxu0 %v1712_v28 }
 0x415   :  { %v1715_v50 = vld [vmem:[#allocation2 + $0x20] sm:$0xff] }
 0x43b   :  { %v1502_v55 = vpop.permute.xlu1 %1501 }
 0x43c   :  { %1543 = vst.msk [vmem:[#allocation2] sm:$0xff] %vm663_vm6, %v1502_v55 }
 0x43f   :  { %v1504_v46 = vpop.permute.xlu1 %1503  ;;  %v1618_v37 = vpop.permute.xlu0 %1617 }
 0x440   :  { %1544 = vst.msk [vmem:[#allocation2 + $0x18] sm:$0xff] %vm663_vm6, %v1504_v46  ;;  %1657 = vst.msk [vmem:[#allocation2 + $0x38] sm:$0xff] %vm663_vm6, %v1618_v37 }
 0x443   :  { %v1506_v3 = vpop.permute.xlu1 %1505  ;;  %v1620_v60 = vpop.permute.xlu0 %1619  ;;  %v1711_v33 = vld [vmem:[#allocation2] sm:$0xff] }
 0x444   :  { %1545 = vst.msk [vmem:[#allocation2 + $0x30] sm:$0xff] %vm663_vm6, %v1506_v3  ;;  %1658 = vst.msk [vmem:[#allocation2 + $0x50] sm:$0xff] %vm663_vm6, %v1620_v60  ;;  %1909 = vmatmul.mubr.f32.vlgmr.msra.gmra.mxu0 %v1711_v33 }
 0x445   :  { %1913 = vmatprep.mubr.f32.mxu0 %v1715_v50 }
 0x447   :  { %v1508_v4 = vpop.permute.xlu1 %1507  ;;  %v1622_v23 = vpop.permute.xlu0 %1621  ;;  %v1714_v29 = vld [vmem:[#allocation2 + $0x18] sm:$0xff] }
 0x448   :  { %v1718_v11 = vld [vmem:[#allocation2 + $0x38] sm:$0xff]  ;;  %1546 = vst.msk [vmem:[#allocation2 + $0x48] sm:$0xff] %vm663_vm6, %v1508_v4  ;;  %1659 = vst.msk [vmem:[#allocation2 + $0x68] sm:$0xff] %vm663_vm6, %v1622_v23  ;;  %1914 = vmatmul.mubr.f32.gmra.mxu0 %v1714_v29 }
 0x449   :  { %1918 = vmatprep.mubr.f32.mxu0 %v1718_v11 }
 0x44b   :  { %v1510_v20 = vpop.permute.xlu1 %1509  ;;  %v1624_v47 = vpop.permute.xlu0 %1623  ;;  %v1717_v49 = vld [vmem:[#allocation2 + $0x30] sm:$0xff] }
 0x44c   :  { %v1721_v61 = vld [vmem:[#allocation2 + $0x50] sm:$0xff]  ;;  %1547 = vst.msk [vmem:[#allocation2 + $0x60] sm:$0xff] %vm663_vm6, %v1510_v20  ;;  %1660 = vst.msk [vmem:[#allocation2 + $0x80] sm:$0xff] %vm663_vm6, %v1624_v47  ;;  %1919 = vmatmul.mubr.f32.gmra.mxu0 %v1717_v49 }
 0x44d   :  { %1923 = vmatprep.mubr.f32.mxu0 %v1721_v61 }
 0x44f   :  { %v1512_v52 = vpop.permute.xlu1 %1511  ;;  %v1626_v26 = vpop.permute.xlu0 %1625  ;;  %v1720_v15 = vld [vmem:[#allocation2 + $0x48] sm:$0xff] }
 0x450   :  { %v1724_v7 = vld [vmem:[#allocation2 + $0x68] sm:$0xff]  ;;  %1548 = vst.msk [vmem:[#allocation2 + $0x78] sm:$0xff] %vm663_vm6, %v1512_v52  ;;  %1661 = vst.msk [vmem:[#allocation2 + $0x98] sm:$0xff] %vm663_vm6, %v1626_v26  ;;  %1924 = vmatmul.mubr.f32.gmra.mxu0 %v1720_v15 }
 0x451   :  { %1928 = vmatprep.mubr.f32.mxu0 %v1724_v7 }
 0x453   :  { %v1514_v43 = vpop.permute.xlu1 %1513  ;;  %v1628_v17 = vpop.permute.xlu0 %1627  ;;  %v1723_v27 = vld [vmem:[#allocation2 + $0x60] sm:$0xff] }
 0x454   :  { %v1727_v56 = vld [vmem:[#allocation2 + $0x80] sm:$0xff]  ;;  %1549 = vst.msk [vmem:[#allocation2 + $0x90] sm:$0xff] %vm663_vm6, %v1514_v43  ;;  %1662 = vst.msk [vmem:[#allocation2 + $0xb0] sm:$0xff] %vm663_vm6, %v1628_v17  ;;  %1929 = vmatmul.mubr.f32.gmra.mxu0 %v1723_v27  ;;  %v12815_v17 = vld [vmem:[#allocation8 + $0x1] ss:$0 sm:$0xff] }
 0x455   :  { %1933 = vmatprep.mubr.f32.mxu0 %v1727_v56 }
 0x457   :  { %v1516_v8 = vpop.permute.xlu1 %1515  ;;  %v1630_v51 = vpop.permute.xlu0 %1629  ;;  %v1726_v54 = vld [vmem:[#allocation2 + $0x78] sm:$0xff] }
 0x458   :  { %v1730_v63 = vld [vmem:[#allocation2 + $0x98] sm:$0xff]  ;;  %1550 = vst.msk [vmem:[#allocation2 + $0xa8] sm:$0xff] %vm663_vm6, %v1516_v8  ;;  %1663 = vst.msk [vmem:[#allocation2 + $0xc8] sm:$0xff] %vm663_vm6, %v1630_v51  ;;  %1934 = vmatmul.mubr.f32.gmra.mxu0 %v1726_v54 }
 0x459   :  { %1938 = vmatprep.mubr.f32.mxu0 %v1730_v63 }
 0x45b   :  { %v1518_v41 = vpop.permute.xlu1 %1517  ;;  %v1632_v48 = vpop.permute.xlu0 %1631  ;;  %v1729_v21 = vld [vmem:[#allocation2 + $0x90] sm:$0xff] }
 0x45c   :  { %v1733_v35 = vld [vmem:[#allocation2 + $0xb0] sm:$0xff]  ;;  %1551 = vst.msk [vmem:[#allocation2 + $0xc0] sm:$0xff] %vm663_vm6, %v1518_v41  ;;  %1664 = vst.msk [vmem:[#allocation2 + $0xe0] sm:$0xff] %vm663_vm6, %v1632_v48  ;;  %1939 = vmatmul.mubr.f32.gmra.mxu0 %v1729_v21 }
 0x45d   :  { %1943 = vmatprep.mubr.f32.mxu0 %v1733_v35 }
 0x45f   :  { %v1520_v5 = vpop.permute.xlu1 %1519  ;;  %v1634_v18 = vpop.permute.xlu0 %1633  ;;  %v1732_v10 = vld [vmem:[#allocation2 + $0xa8] sm:$0xff] }
 0x460   :  { %v1736_v28 = vld [vmem:[#allocation2 + $0xc8] sm:$0xff]  ;;  %1552 = vst.msk [vmem:[#allocation2 + $0xd8] sm:$0xff] %vm663_vm6, %v1520_v5  ;;  %1665 = vst.msk [vmem:[#allocation2 + $0xf8] sm:$0xff] %vm663_vm6, %v1634_v18  ;;  %1944 = vmatmul.mubr.f32.gmra.mxu0 %v1732_v10 }
 0x461   :  { %1948 = vmatprep.mubr.f32.mxu0 %v1736_v28 }
 0x463   :  { %v1522_v55 = vpop.permute.xlu1 %1521  ;;  %v1636_v46 = vpop.permute.xlu0 %1635  ;;  %v1735_v37 = vld [vmem:[#allocation2 + $0xc0] sm:$0xff] }
 0x464   :  { %v1739_v3 = vld [vmem:[#allocation2 + $0xe0] sm:$0xff]  ;;  %1553 = vst.msk [vmem:[#allocation2 + $0xf0] sm:$0xff] %vm663_vm6, %v1522_v55  ;;  %1666 = vst.msk [vmem:[#allocation2 + $0x110] sm:$0xff] %vm663_vm6, %v1636_v46  ;;  %1949 = vmatmul.mubr.f32.gmra.mxu0 %v1735_v37  ;;  %v10621_v43 = vpop.f32.mrf.mxu1 }
 0x465   :  { %1953 = vmatprep.mubr.f32.mxu0 %v1739_v3 }
 0x466   :  { %v2045_v54 = vpop.f32.mrf.mxu1 }
 0x467   :  { %v1524_v60 = vpop.permute.xlu1 %1523  ;;  %v1638_v33 = vpop.permute.xlu0 %1637  ;;  %v1738_v50 = vld [vmem:[#allocation2 + $0xd8] sm:$0xff] }
 0x468   :  { %v1742_v4 = vld [vmem:[#allocation2 + $0xf8] sm:$0xff]  ;;  %1554 = vst.msk [vmem:[#allocation2 + $0x108] sm:$0xff] %vm663_vm6, %v1524_v60  ;;  %1667 = vst.msk [vmem:[#allocation2 + $0x128] sm:$0xff] %vm663_vm6, %v1638_v33  ;;  %1954 = vmatmul.mubr.f32.gmra.mxu0 %v1738_v50 }
 0x469   :  { %1958 = vmatprep.mubr.f32.mxu0 %v1742_v4 }
 0x46b   :  { %v1526_v23 = vpop.permute.xlu1 %1525  ;;  %v1640_v29 = vpop.permute.xlu0 %1639  ;;  %v1741_v11 = vld [vmem:[#allocation2 + $0xf0] sm:$0xff] }
 0x46c   :  { %v1745_v20 = vld [vmem:[#allocation2 + $0x110] sm:$0xff]  ;;  %1555 = vst.msk [vmem:[#allocation2 + $0x120] sm:$0xff] %vm663_vm6, %v1526_v23  ;;  %1668 = vst.msk [vmem:[#allocation2 + $0x140] sm:$0xff] %vm663_vm6, %v1640_v29  ;;  %1959 = vmatmul.mubr.f32.gmra.mxu0 %v1741_v11 }
 0x46d   :  { %1963 = vmatprep.mubr.f32.mxu0 %v1745_v20 }
 0x46f   :  { %v1528_v47 = vpop.permute.xlu1 %1527  ;;  %v1744_v49 = vld [vmem:[#allocation2 + $0x108] sm:$0xff] }
 0x470   :  { %v1748_v61 = vld [vmem:[#allocation2 + $0x128] sm:$0xff]  ;;  %1556 = vst.msk [vmem:[#allocation2 + $0x138] sm:$0xff] %vm663_vm6, %v1528_v47  ;;  %1964 = vmatmul.mubr.f32.gmra.mxu0 %v1744_v49 }
 0x471   :  { %1968 = vmatprep.mubr.f32.mxu0 %v1748_v61 }
 0x473   :  { %v1747_v52 = vld [vmem:[#allocation2 + $0x120] sm:$0xff] }
 0x474   :  { %v1751_v26 = vld [vmem:[#allocation2 + $0x140] sm:$0xff]  ;;  %1969 = vmatmul.mubr.f32.gmra.mxu0 %v1747_v52 }
 0x475   :  { %1973 = vmatprep.mubr.f32.mxu0 %v1751_v26 }
 0x477   :  { %v1750_v15 = vld [vmem:[#allocation2 + $0x138] sm:$0xff] }
 0x478   :  { %1974 = vmatmul.mubr.f32.gmra.mxu0 %v1750_v15 }
 0x496   :  { %v12822_v18 = vpop.f32.mrf.mxu1 }
 0x498   :  { %v2055_v60 = vpop.f32.mrf.mxu1 }
 0x49a   :  { %v12835_v29 = vpop.f32.mrf.mxu1 }
 0x49c   :  { %v2065_v61 = vpop.f32.mrf.mxu1 }
 0x504   :  { %v9703_v7 = vpop.f32.mrf.mxu0 }
 0x506   :  { %v9704_v27 = vpop.f32.mrf.mxu0 }
 0x507   :  { %v9705_v56 = vadd.f32 %v9704_v27, %v9703_v7 }
 0x508   :  { %v9706_v8 = vpop.f32.mrf.mxu0 }
 0x509   :  { %v1911_v51 = vadd.f32 %v9705_v56, %v12815_v17  ;;  %v12845_v56 = vpop.f32.mrf.mxu1 }
 0x50a   :  { %v9707_v63 = vpop.f32.mrf.mxu0 }
 0x50b   :  { %v12818_v41 = vadd.f32 %v2045_v54, %v1911_v51  ;;  %v9708_v48 = vadd.f32 %v9707_v63, %v9706_v8 }
 0x50c   :  { %v9709_v21 = vpop.f32.mrf.mxu0 }
 0x50d   :  { %v9310_v35 = vmul.f32 -1.442695, %v12818_v41  ;;  %v1916_v5 = vadd.f32 %v9708_v48, %v12815_v17 }
 0x50e   :  { %v9710_v10 = vpop.f32.mrf.mxu0 }
 0x50f   :  { %11060 = vpow2.f32 %v9310_v35  ;;  %v12824_v28 = vadd.f32 %v10621_v43, %v1916_v5  ;;  %v9711_v55 = vadd.f32 %v9710_v10, %v9709_v21  ;;  %v2075_v35 = vpop.f32.mrf.mxu1 }
 0x510   :  { %v12826_v46 = vpop.f32.mrf.mxu0 }
 0x511   :  { %v9311_v37 = vmul.f32 -1.442695, %v12824_v28  ;;  %v1921_v3 = vadd.f32 %v9711_v55, %v12815_v17 }
 0x512   :  { %v12830_v33 = vpop.f32.mrf.mxu0 }
 0x513   :  { %11062 = vpow2.f32 %v9311_v37  ;;  %v12832_v50 = vadd.f32 %v2055_v60, %v1921_v3 }
 0x514   :  { %v9715_v4 = vpop.f32.mrf.mxu0 }
 0x515   :  { %v9312_v23 = vmul.f32 -1.442695, %v12832_v50 }
 0x516   :  { %v9716_v11 = vpop.f32.mrf.mxu0 }
 0x517   :  { %11064 = vpow2.f32 %v9312_v23  ;;  %v9717_v20 = vadd.f32 %v9716_v11, %v9715_v4  ;;  %v12855_v4 = vpop.f32.mrf.mxu1 }
 0x518   :  { %v12837_v47 = vpop.f32.mrf.mxu0 }
 0x519   :  { %v1931_v49 = vadd.f32 %v9717_v20, %v12815_v17 }
 0x51a   :  { %v12840_v52 = vpop.f32.mrf.mxu0 }
 0x51b   :  { %v12842_v26 = vadd.f32 %v2065_v61, %v1931_v49  ;;  %v2658_v49 = vld [vmem:[#allocation7 + $0x3b8] sm:$0xff] }
 0x51c   :  { %v11061_v15 = vpop.eup %11060  ;;  %v9721_v7 = vpop.f32.mrf.mxu0  ;;  %10640 = vmatprep.subr.mxu0 %v2658_v49 }
 0x51d   :  { %v2156_v43 = vadd.f32 1.0, %v11061_v15  ;;  %v9314_v27 = vmul.f32 -1.442695, %v12842_v26  ;;  %v2085_v15 = vpop.f32.mrf.mxu1  ;;  %10641 = vmatpush3.msra.mxu0 %v2658_v49 }
 0x51e   :  { %v9722_v8 = vpop.f32.mrf.mxu0 }
 0x51f   :  { %11066 = vrcp.f32 %v2156_v43  ;;  %v9723_v51 = vadd.f32 %v9722_v8, %v9721_v7  ;;  %v2657_v43 = vld [vmem:[#allocation7 + $0x3b0] sm:$0xff] }
 0x520   :  { %v11063_v54 = vpop.eup %11062  ;;  %11068 = vpow2.f32 %v9314_v27  ;;  %v12847_v63 = vpop.f32.mrf.mxu0  ;;  %10642 = vmatprep.subr.mxu0 %v2657_v43 }
 0x521   :  { %v2157_v48 = vadd.f32 1.0, %v11063_v54  ;;  %v1941_v21 = vadd.f32 %v9723_v51, %v12815_v17  ;;  %10643 = vmatpush3.msra.mxu0 %v2657_v43  ;;  %v2656_v54 = vld [vmem:[#allocation7 + $0x3a8] sm:$0xff] }
 0x522   :  { %v12850_v5 = vpop.f32.mrf.mxu0  ;;  %10644 = vmatprep.subr.mxu0 %v2656_v54 }
 0x523   :  { %11070 = vrcp.f32 %v2157_v48  ;;  %v12852_v10 = vadd.f32 %v2075_v35, %v1941_v21  ;;  %v12866_v35 = vpop.f32.mrf.mxu1  ;;  %10645 = vmatpush3.msra.mxu0 %v2656_v54  ;;  %v9714_v54 = vadd.f32 %v12830_v33, %v12826_v46 }
 0x524   :  { %v11065_v55 = vpop.eup %11064  ;;  %v9727_v37 = vpop.f32.mrf.mxu0 }
 0x525   :  { %v2158_v3 = vadd.f32 1.0, %v11065_v55  ;;  %v9316_v60 = vmul.f32 -1.442695, %v12852_v10  ;;  %v1926_v46 = vadd.f32 %v9714_v54, %v12815_v17 }
 0x526   :  { %v9728_v23 = vpop.f32.mrf.mxu0 }
 0x527   :  { %11072 = vrcp.f32 %v2158_v3  ;;  %v9729_v11 = vadd.f32 %v9728_v23, %v9727_v37  ;;  %v2655_v3 = vld [vmem:[#allocation7 + $0x3a0] sm:$0xff]  ;;  %v2654_v23 = vld [vmem:[#allocation7 + $0x398] sm:$0xff]  ;;  %v12881_v19 = vadd.f32 %v12822_v18, %v1926_v46 }
 0x528   :  { %11074 = vpow2.f32 %v9316_v60  ;;  %v12857_v20 = vpop.f32.mrf.mxu0  ;;  %10646 = vmatprep.subr.mxu0 %v2655_v3 }
 0x529   :  { %v1951_v61 = vadd.f32 %v9729_v11, %v12815_v17  ;;  %10647 = vmatpush3.msra.mxu0 %v2655_v3  ;;  %v9313_v18 = vmul.f32 -1.442695, %v12881_v19 }
 0x52a   :  { %v12860_v7 = vpop.f32.mrf.mxu0  ;;  %10648 = vmatprep.subr.mxu0 %v2654_v23 }
 0x52b   :  { %v12862_v27 = vadd.f32 %v2085_v15, %v1951_v61  ;;  %v2095_v15 = vpop.f32.mrf.mxu1  ;;  %10649 = vmatpush3.msra.mxu0 %v2654_v23 }
 0x52c   :  { %v11067_v8 = vpop.eup %11066  ;;  %v9733_v51 = vpop.f32.mrf.mxu0 }
 0x52d   :  { %v11069_v48 = vpop.eup %11068  ;;  %v9318_v21 = vmul.f32 -1.442695, %v12862_v27  ;;  %2212 = vrot.lane.b32.xlu0 %v11067_v8, %s11659_s0  ;;  %v2653_v8 = vld [vmem:[#allocation7 + $0x390] sm:$0xff] }
 0x52e   :  { %v2160_v55 = vadd.f32 1.0, %v11069_v48  ;;  %v9734_v37 = vpop.f32.mrf.mxu0  ;;  %10650 = vmatprep.subr.mxu0 %v2653_v8 }
 0x52f   :  { %11076 = vpow2.f32 %v9318_v21  ;;  %v9735_v60 = vadd.f32 %v9734_v37, %v9733_v51  ;;  %10651 = vmatpush3.msra.mxu0 %v2653_v8 }
 0x530   :  { %v11071_v11 = vpop.eup %11070  ;;  %11078 = vrcp.f32 %v2160_v55  ;;  %v9736_v49 = vpop.f32.mrf.mxu0  ;;  %v2652_v55 = vld [vmem:[#allocation7 + $0x388] sm:$0xff] }
 0x531   :  { %v1961_v61 = vadd.f32 %v9735_v60, %v12815_v17  ;;  %2214 = vrot.lane.b32.xlu1 %v11071_v11, %s11659_s0  ;;  %10652 = vmatprep.subr.mxu0 %v2652_v55  ;;  %v2651_v60 = vld [vmem:[#allocation7 + $0x380] sm:$0xff]  ;;  %v10639_v11 = vpop.f32.mrf.mxu1 }
 0x532   :  { %v9737_v43 = vpop.f32.mrf.mxu0  ;;  %10653 = vmatpush3.msra.mxu0 %v2652_v55 }
 0x533   :  { %v12872_v48 = vadd.f32 %v2095_v15, %v1961_v61  ;;  %10654 = vmatprep.subr.mxu0 %v2651_v60  ;;  %v9720_v61 = vadd.f32 %v12840_v52, %v12837_v47 }
 0x534   :  { %v11073_v51 = vpop.eup %11072  ;;  %v9739_v21 = vpop.f32.mrf.mxu0  ;;  %10655 = vmatpush3.msra.mxu0 %v2651_v60 }
 0x535   :  { %v11075_v37 = vpop.eup %11074  ;;  %v9320_v3 = vmul.f32 -1.442695, %v12872_v48  ;;  %2216 = vrot.lane.b32.xlu1 %v11073_v51, %s11659_s0  ;;  %v2105_v51 = vpop.f32.mrf.mxu1 }
 0x536   :  { %v2162_v23 = vadd.f32 1.0, %v11075_v37  ;;  %v9740_v24 = vpop.f32.mrf.mxu0 }
 0x537   :  { %11080 = vpow2.f32 %v9320_v3  ;;  %v9741_v33 = vadd.f32 %v9740_v24, %v9739_v21  ;;  %v1936_v24 = vadd.f32 %v9720_v61, %v12815_v17  ;;  %v9726_v21 = vadd.f32 %v12850_v5, %v12847_v63 }
 0x538   :  { %11082 = vrcp.f32 %v2162_v23  ;;  %v9742_v15 = vpop.f32.mrf.mxu0  ;;  %v9738_v61 = vadd.f32 %v9737_v43, %v9736_v49 }
 0x539   :  { %v1971_v8 = vadd.f32 %v9741_v33, %v12815_v17  ;;  %v12897_v46 = vadd.f32 %v12835_v29, %v1936_v24  ;;  %v1946_v63 = vadd.f32 %v9726_v21, %v12815_v17 }
 0x53a   :  { %v9743_v62 = vpop.f32.mrf.mxu0 }
 0x53b   :  { %v12883_v37 = vadd.f32 %v2105_v51, %v1971_v8  ;;  %v9744_v55 = vadd.f32 %v9743_v62, %v9742_v15  ;;  %v9732_v62 = vadd.f32 %v12860_v7, %v12857_v20  ;;  %v9315_v8 = vmul.f32 -1.442695, %v12897_v46 }
 0x53c   :  { %v11077_v54 = vpop.eup %11076  ;;  %v12904_v51 = vadd.f32 %v12845_v56, %v1946_v63 }
 0x53d   :  { %v11079_v47 = vpop.eup %11078  ;;  %v2164_v52 = vadd.f32 1.0, %v11077_v54  ;;  %v9322_v3 = vmul.f32 -1.442695, %v12883_v37  ;;  %v1976_v60 = vadd.f32 %v9744_v55, %v12815_v17  ;;  %v1956_v33 = vadd.f32 %v9732_v62, %v12815_v17 }
 0x53e   :  { %2220 = vrot.lane.b32.xlu1 %v11079_v47, %s11659_s0  ;;  %v9317_v49 = vmul.f32 -1.442695, %v12904_v51 }
 0x53f   :  { %11084 = vrcp.f32 %v2164_v52  ;;  %v12894_v23 = vadd.f32 %v10639_v11, %v1976_v60  ;;  %v12908_v29 = vadd.f32 %v12855_v4, %v1956_v33  ;;  %v1966_v11 = vadd.f32 %v9738_v61, %v12815_v17 }
 0x540   :  { %11086 = vpow2.f32 %v9322_v3 }
 0x541   :  { %v9323_v5 = vmul.f32 -1.442695, %v12894_v23  ;;  %11088 = vpow2.f32 %v9313_v18  ;;  %v9319_v43 = vmul.f32 -1.442695, %v12908_v29  ;;  %v12914_v55 = vadd.f32 %v12866_v35, %v1966_v11 }
 0x543   :  { %11090 = vpow2.f32 %v9323_v5  ;;  %v9321_v4 = vmul.f32 -1.442695, %v12914_v55 }
 0x544   :  { %v11081_v15 = vpop.eup %11080 }
 0x545   :  { %v11083_v20 = vpop.eup %11082  ;;  %v2166_v7 = vadd.f32 1.0, %v11081_v15 }
 0x546   :  { %2224 = vrot.lane.b32.xlu1 %v11083_v20, %s11659_s0 }
 0x547   :  { %11092 = vrcp.f32 %v2166_v7 }
 0x548   :  { %11094 = vpow2.f32 %v9315_v8 }
 0x549   :  { %11096 = vpow2.f32 %v9317_v49 }
 0x54a   :  { %11098 = vpow2.f32 %v9319_v43 }
 0x54c   :  { %v11085_v56 = vpop.eup %11084 }
 0x54d   :  { %v11087_v54 = vpop.eup %11086  ;;  %2228 = vrot.lane.b32.xlu1 %v11085_v56, %s11659_s0 }
 0x54e   :  { %v2168_v24 = vadd.f32 1.0, %v11087_v54  ;;  %v11089_v21 = vpop.eup %11088 }
 0x54f   :  { %v2159_v3 = vadd.f32 1.0, %v11089_v21 }
 0x550   :  { %11100 = vrcp.f32 %v2168_v24  ;;  %v11091_v17 = vpop.eup %11090 }
 0x551   :  { %v2169_v47 = vadd.f32 1.0, %v11091_v17  ;;  %11102 = vpow2.f32 %v9321_v4 }
 0x553   :  { %11104 = vrcp.f32 %v2169_v47  ;;  %v2650_v47 = vld [vmem:[#allocation7 + $0x378] sm:$0xff] }
 0x554   :  { %v11093_v52 = vpop.eup %11092  ;;  %11106 = vrcp.f32 %v2159_v3  ;;  %v2649_v3 = vld [vmem:[#allocation7 + $0x370] sm:$0xff]  ;;  %9767 = vmatprep.subr.mxu1 %v2650_v47 }
 0x555   :  { %v11095_v60 = vpop.eup %11094  ;;  %2232 = vrot.lane.b32.xlu1 %v11093_v52, %s11659_s0  ;;  %v2634_v52 = vld [vmem:[#allocation7 + $0x2f8] sm:$0xff] }
 0x556   :  { %v2161_v35 = vadd.f32 1.0, %v11095_v60  ;;  %v11097_v18 = vpop.eup %11096  ;;  %9768 = vmatpush3.msra.mxu1 %v2634_v52 }
 0x557   :  { %v11099_v62 = vpop.eup %11098  ;;  %v2163_v63 = vadd.f32 1.0, %v11097_v18  ;;  %9769 = vmatprep.subr.mxu1 %v2649_v3  ;;  %v2645_v3 = vld [vmem:[#allocation7 + $0x350] sm:$0xff] }
 0x558   :  { %11108 = vrcp.f32 %v2161_v35  ;;  %v2165_v61 = vadd.f32 1.0, %v11099_v62  ;;  %v2633_v62 = vld [vmem:[#allocation7 + $0x2f0] sm:$0xff] }
 0x559   :  { %11110 = vrcp.f32 %v2163_v63  ;;  %9770 = vmatpush3.msra.mxu1 %v2633_v62  ;;  %v2629_v62 = vld [vmem:[#allocation7 + $0x2d0] sm:$0xff] }
 0x55a   :  { %11112 = vrcp.f32 %v2165_v61  ;;  %v2648_v61 = vld [vmem:[#allocation7 + $0x368] sm:$0xff] }
 0x55b   :  { %9771 = vmatprep.subr.mxu1 %v2648_v61  ;;  %v2628_v61 = vld [vmem:[#allocation7 + $0x2c8] sm:$0xff] }
 0x55d   :  { %v11101_v5 = vpop.eup %11100 }
 0x55e   :  { %2236 = vrot.lane.b32.xlu1 %v11101_v5, %s11659_s0  ;;  %v11103_v33 = vpop.eup %11102 }
 0x55f   :  { %v2167_v8 = vadd.f32 1.0, %v11103_v33 }
 0x560   :  { %v11105_v15 = vpop.eup %11104 }
 0x561   :  { %2238 = vrot.lane.b32.xlu0 %v11105_v15, %s11659_s0  ;;  %v11107_v20 = vpop.eup %11106  ;;  %11114 = vrcp.f32 %v2167_v8  ;;  %v2632_v15 = vld [vmem:[#allocation7 + $0x2e8] sm:$0xff] }
 0x562   :  { %9772 = vmatpush3.msra.mxu1 %v2632_v15 }
 0x565   :  { %2218 = vrot.lane.b32.xlu0 %v11107_v20, %s11659_s0  ;;  %v11109_v7 = vpop.eup %11108 }
 0x566   :  { %v11111_v11 = vpop.eup %11110 }
 0x567   :  { %v11113_v49 = vpop.eup %11112 }
 0x569   :  { %2222 = vrot.lane.b32.xlu0 %v11109_v7, %s11659_s0 }
 0x56d   :  { %2226 = vrot.lane.b32.xlu0 %v11111_v11, %s11659_s0 }
 0x56e   :  { %v11115_v43 = vpop.eup %11114 }
 0x571   :  { %2230 = vrot.lane.b32.xlu0 %v11113_v49, %s11659_s0  ;;  %v2631_v49 = vld [vmem:[#allocation7 + $0x2e0] sm:$0xff] }
 0x575   :  { %2234 = vrot.lane.b32.xlu0 %v11115_v43, %s11659_s0 }
 0x59f   :  { %v2213_v56 = vpop.permute.xlu0 %2212 }
 0x5a0   :  { %v2254_v54 = vmul.f32 %v2213_v56, %v12818_v41 }
 0x5a2   :  { %v12928_v24 = vmul.f32 %v2254_v54, %v11880_v12 }
 0x5a3   :  { %v2215_v4 = vpop.permute.xlu1 %2214 }
 0x5a4   :  { %2422 = vst.msk [vmem:[#allocation2 + $0x8] sm:$0xff] %vm563_vm1, %v12928_v24  ;;  %v2255_v21 = vmul.f32 %v2215_v4, %v12824_v28  ;;  %v2282_v60 = vrot.slane %v12928_v24, 6  ;;  %v2534_v35 = vrot.slane %v12928_v24, 2  ;;  %v2436_v18 = vrot.slane %v12928_v24, 1  ;;  %v2646_v4 = vld [vmem:[#allocation7 + $0x358] sm:$0xff] }
 0x5a6   :  { %v12934_v17 = vmul.f32 %v2255_v21, %v11882_v13  ;;  %v2630_v21 = vld [vmem:[#allocation7 + $0x2d8] sm:$0xff] }
 0x5a7   :  { %v2217_v41 = vpop.permute.xlu1 %2216 }
 0x5a8   :  { %v2283_v63 = vrot.slane %v12934_v17, 6  ;;  %v2535_v5 = vrot.slane %v12934_v17, 2  ;;  %2423 = vst.msk [vmem:[#allocation2 + $0x20] sm:$0xff] %vm563_vm1, %v12934_v17  ;;  %v2256_v28 = vmul.f32 %v2217_v41, %v12832_v50  ;;  %v2437_v33 = vrot.slane %v12934_v17, 1  ;;  %v2647_v50 = vld [vmem:[#allocation7 + $0x360] sm:$0xff] }
 0x5a9   :  { %9773 = vmatprep.subr.mxu1 %v2647_v50  ;;  %v2642_v50 = vld [vmem:[#allocation7 + $0x338] sm:$0xff] }
 0x5aa   :  { %v2560_v8 = vsel %vm805_vm2, %v2534_v35, %v2535_v5  ;;  %v12950_v20 = vmul.f32 %v2256_v28, %v11930_v59  ;;  %v2462_v7 = vsel %vm706_vm3, %v2436_v18, %v2437_v33  ;;  %v2308_v11 = vsel %vm548_vm4, %v2282_v60, %v2283_v63  ;;  %9774 = vmatpush3.msra.mxu1 %v2631_v49  ;;  %v2644_v28 = vld [vmem:[#allocation7 + $0x348] sm:$0xff]  ;;  %v2641_v49 = vld [vmem:[#allocation7 + $0x330] sm:$0xff] }
 0x5ab   :  { %2562 = vst.msk [vmem:[#allocation2 + $0x10] sm:$0xff] %vm563_vm1, %v2560_v8  ;;  %2478 = vrot.lane.b32.xlu0 %v2462_v7, %s11659_s0  ;;  %2311 = vst.msk [vmem:[#allocation2 + $0x18] sm:$0xff] %vm563_vm1, %v2308_v11  ;;  %9775 = vmatprep.subr.mxu1 %v2646_v4  ;;  %v2643_v8 = vld [vmem:[#allocation7 + $0x340] sm:$0xff]  ;;  %v2626_v11 = vld [vmem:[#allocation7 + $0x2b8] sm:$0xff] }
 0x5ac   :  { %v2284_v43 = vrot.slane %v12950_v20, 6  ;;  %v2536_v56 = vrot.slane %v12950_v20, 2  ;;  %2424 = vst.msk [vmem:[#allocation2 + $0x38] sm:$0xff] %vm563_vm1, %v12950_v20  ;;  %v2438_v54 = vrot.slane %v12950_v20, 1  ;;  %9776 = vmatpush3.msra.mxu1 %v2630_v21  ;;  %v2627_v7 = vld [vmem:[#allocation7 + $0x2c0] sm:$0xff]  ;;  %v2625_v4 = vld [vmem:[#allocation7 + $0x2b0] sm:$0xff] }
 0x5ad   :  { %9777 = vmatprep.subr.mxu1 %v2645_v3  ;;  %v2624_v3 = vld [vmem:[#allocation7 + $0x2a8] sm:$0xff] }
 0x5ae   :  { %v2559_v47 = vsel %vm805_vm2, %v2535_v5, %v2536_v56  ;;  %v2461_v52 = vsel %vm706_vm3, %v2437_v33, %v2438_v54  ;;  %v2307_v41 = vsel %vm548_vm4, %v2283_v63, %v2284_v43  ;;  %9778 = vmatpush3.msra.mxu1 %v2629_v62 }
 0x5af   :  { %2563 = vst.msk [vmem:[#allocation2 + $0x28] sm:$0xff] %vm563_vm1, %v2559_v47  ;;  %2480 = vrot.lane.b32.xlu0 %v2461_v52, %s11659_s0  ;;  %2312 = vst.msk [vmem:[#allocation2 + $0x30] sm:$0xff] %vm563_vm1, %v2307_v41  ;;  %9779 = vmatprep.subr.mxu1 %v2644_v28  ;;  %v2640_v47 = vld [vmem:[#allocation7 + $0x328] sm:$0xff]  ;;  %v2639_v41 = vld [vmem:[#allocation7 + $0x320] sm:$0xff] }
 0x5b0   :  { %v2221_v5 = vpop.permute.xlu1 %2220  ;;  %9780 = vmatpush3.msra.mxu1 %v2628_v61 }
 0x5b1   :  { %v2258_v33 = vmul.f32 %v2221_v5, %v12842_v26  ;;  %9781 = vmatprep.subr.mxu1 %v2643_v8  ;;  %v2623_v5 = vld [vmem:[#allocation7 + $0x2a0] sm:$0xff] }
 0x5b2   :  { %v2578_v15 = vld [vmem:[#allocation2 + $0x10] sm:$0xff]  ;;  %9782 = vmatpush3.msra.mxu1 %v2627_v7 }
 0x5b3   :  { %v12985_v63 = vmul.f32 %v2258_v33, %v11935_v9  ;;  %10656 = vmatprep.mubr.msk.f32.mxu0 %vm563_vm1, %v2578_v15  ;;  %9783 = vmatprep.subr.mxu1 %v2642_v50  ;;  %v2638_v7 = vld [vmem:[#allocation7 + $0x318] sm:$0xff] }
 0x5b4   :  { %9784 = vmatpush3.msra.mxu1 %v2626_v11  ;;  %v2622_v50 = vld [vmem:[#allocation7 + $0x298] sm:$0xff]  ;;  %v2637_v11 = vld [vmem:[#allocation7 + $0x310] sm:$0xff] }
 0x5b5   :  { %2426 = vst.msk [vmem:[#allocation2 + $0x68] sm:$0xff] %vm563_vm1, %v12985_v63  ;;  %9785 = vmatprep.subr.mxu1 %v2641_v49 }
 0x5b6   :  { %v2581_v26 = vld [vmem:[#allocation2 + $0x28] sm:$0xff]  ;;  %9786 = vmatpush3.msra.mxu1 %v2625_v4 }
 0x5b7   :  { %10657 = vmatmul.mubr.msk.f32.vlgmr.msra.gmra.mxu0 %vm563_vm1, %v2581_v26  ;;  %9787 = vmatprep.subr.mxu1 %v2640_v47  ;;  %v2635_v47 = vld [vmem:[#allocation7 + $0x300] sm:$0xff] }
 0x5b8   :  { %v2225_v21 = vpop.permute.xlu1 %2224  ;;  %9788 = vmatpush3.msra.mxu1 %v2624_v3  ;;  %v2619_v3 = vld [vmem:[#allocation7 + $0x280] sm:$0xff] }
 0x5b9   :  { %v2260_v52 = vmul.f32 %v2225_v21, %v12852_v10  ;;  %9789 = vmatprep.subr.mxu1 %v2639_v41  ;;  %v2620_v21 = vld [vmem:[#allocation7 + $0x288] sm:$0xff] }
 0x5ba   :  { %9790 = vmatpush3.msra.mxu1 %v2623_v5 }
 0x5bb   :  { %v12993_v62 = vmul.f32 %v2260_v52, %v11979_v44  ;;  %9791 = vmatprep.subr.mxu1 %v2638_v7 }
 0x5bc   :  { %9792 = vmatpush3.msra.mxu1 %v2622_v50  ;;  %v2325_v50 = vrot.slane %v12934_v17, 7 }
 0x5bd   :  { %2428 = vst.msk [vmem:[#allocation2 + $0x98] sm:$0xff] %vm563_vm1, %v12993_v62  ;;  %9793 = vmatprep.subr.mxu1 %v2637_v11 }
 0x5bf   :  { %v2229_v28 = vpop.permute.xlu1 %2228 }
 0x5c0   :  { %v2262_v33 = vmul.f32 %v2229_v28, %v12862_v27  ;;  %v2621_v27 = vld [vmem:[#allocation7 + $0x290] sm:$0xff] }
 0x5c1   :  { %9794 = vmatpush3.msra.mxu1 %v2621_v27 }
 0x5c2   :  { %v12999_v10 = vmul.f32 %v2262_v33, %v12056_v25  ;;  %v2324_v33 = vrot.slane %v12928_v24, 7 }
 0x5c4   :  { %2430 = vst.msk [vmem:[#allocation2 + $0xc8] sm:$0xff] %vm563_vm1, %v12999_v10 }
 0x5c7   :  { %v2233_v61 = vpop.permute.xlu1 %2232 }
 0x5c8   :  { %v2264_v15 = vmul.f32 %v2233_v61, %v12872_v48  ;;  %v2636_v48 = vld [vmem:[#allocation7 + $0x308] sm:$0xff] }
 0x5c9   :  { %9795 = vmatprep.subr.mxu1 %v2636_v48  ;;  %v2326_v48 = vrot.slane %v12950_v20, 7  ;;  %v2288_v20 = vrot.slane %v12993_v62, 6 }
 0x5ca   :  { %v13005_v8 = vmul.f32 %v2264_v15, %v12129_v36  ;;  %9796 = vmatpush3.msra.mxu1 %v2620_v21  ;;  %v2538_v21 = vrot.slane %v12985_v63, 2 }
 0x5cb   :  { %9797 = vmatprep.subr.mxu1 %v2635_v47 }
 0x5cc   :  { %2432 = vst.msk [vmem:[#allocation2 + $0xf8] sm:$0xff] %vm563_vm1, %v13005_v8  ;;  %9798 = vmatpush3.msra.mxu1 %v2619_v3 }
 0x5d0   :  { %v2237_v26 = vpop.permute.xlu1 %2236 }
 0x5d1   :  { %v2266_v49 = vmul.f32 %v2237_v26, %v12883_v37 }
 0x5d3   :  { %v13011_v4 = vmul.f32 %v2266_v49, %v12202_v39  ;;  %v2239_v52 = vpop.permute.xlu0 %2238 }
 0x5d4   :  { %v2267_v41 = vmul.f32 %v2239_v52, %v12894_v23 }
 0x5d5   :  { %2434 = vst.msk [vmem:[#allocation2 + $0x128] sm:$0xff] %vm563_vm1, %v13011_v4  ;;  %v2546_v5 = vrot.slane %v13011_v4, 2  ;;  %v2294_v17 = vrot.slane %v13011_v4, 6 }
 0x5d6   :  { %v13017_v37 = vmul.f32 %v2267_v41, %v11884_v14 }
 0x5d7   :  { %v2219_v28 = vpop.permute.xlu0 %2218 }
 0x5d8   :  { %v2295_v61 = vrot.slane %v13017_v37, 6  ;;  %v2547_v15 = vrot.slane %v13017_v37, 2  ;;  %2435 = vst.msk [vmem:[#allocation2 + $0x140] sm:$0xff] %vm563_vm1, %v13017_v37  ;;  %v2257_v23 = vmul.f32 %v2219_v28, %v12881_v19  ;;  %v2337_v7 = vrot.slane %v13017_v37, 7 }
 0x5d9   :  { %v2350_v28 = vsel %vm592_vm5, %v2324_v33, %v2325_v50 }
 0x5da   :  { %v2548_v11 = vsel %vm805_vm2, %v2546_v5, %v2547_v15  ;;  %v2561_v26 = vsel %vm805_vm2, %v2547_v15, %v2534_v35  ;;  %v13037_v27 = vmul.f32 %v2257_v23, %v11932_v1  ;;  %v2351_v19 = vsel %vm592_vm5, %v2337_v7, %v2324_v33 }
 0x5db   :  { %2574 = vst.msk [vmem:[#allocation2 + $0x130] sm:$0xff] %vm563_vm1, %v2548_v11  ;;  %2575 = vst.msk [vmem:[#allocation2 + $0x148] sm:$0xff] %vm563_vm1, %v2561_v26  ;;  %2366 = vrot.lane.b32.xlu1 %v2351_v19, %s11659_s0  ;;  %v2223_v49 = vpop.permute.xlu0 %2222  ;;  %v2309_v35 = vsel %vm548_vm4, %v2295_v61, %v2282_v60  ;;  %v2296_v60 = vsel %vm548_vm4, %v2294_v17, %v2295_v61  ;;  %v2286_v61 = vrot.slane %v12985_v63, 6  ;;  %v2540_v26 = vrot.slane %v12993_v62, 2 }
 0x5dc   :  { %v2537_v47 = vrot.slane %v13037_v27, 2  ;;  %2425 = vst.msk [vmem:[#allocation2 + $0x50] sm:$0xff] %vm563_vm1, %v13037_v27  ;;  %v2259_v52 = vmul.f32 %v2223_v49, %v12897_v46  ;;  %v2439_v3 = vrot.slane %v13037_v27, 1  ;;  %2310 = vst.msk [vmem:[#allocation2] sm:$0xff] %vm563_vm1, %v2309_v35  ;;  %v2285_v41 = vrot.slane %v13037_v27, 6 }
 0x5dd   :  { %2323 = vst.msk [vmem:[#allocation2 + $0x138] sm:$0xff] %vm563_vm1, %v2296_v60  ;;  %v2349_v11 = vsel %vm592_vm5, %v2325_v50, %v2326_v48  ;;  %v2440_v49 = vrot.slane %v12985_v63, 1 }
 0x5de   :  { %v2557_v15 = vsel %vm805_vm2, %v2537_v47, %v2538_v21  ;;  %v2558_v46 = vsel %vm805_vm2, %v2536_v56, %v2537_v47  ;;  %v13073_v23 = vmul.f32 %v2259_v52, %v11941_v22  ;;  %v2460_v33 = vsel %vm706_vm3, %v2438_v54, %v2439_v3 }
 0x5df   :  { %2564 = vst.msk [vmem:[#allocation2 + $0x40] sm:$0xff] %vm563_vm1, %v2558_v46  ;;  %2565 = vst.msk [vmem:[#allocation2 + $0x58] sm:$0xff] %vm563_vm1, %v2557_v15  ;;  %2368 = vrot.lane.b32.xlu1 %v2350_v28, %s11659_s0  ;;  %2482 = vrot.lane.b32.xlu0 %v2460_v33, %s11659_s0  ;;  %v2227_v56 = vpop.permute.xlu0 %2226  ;;  %v2327_v47 = vrot.slane %v13037_v27, 7  ;;  %v2306_v50 = vsel %vm548_vm4, %v2284_v43, %v2285_v41  ;;  %v2305_v52 = vsel %vm548_vm4, %v2285_v41, %v2286_v61 }
 0x5e0   :  { %v2539_v54 = vrot.slane %v13073_v23, 2  ;;  %2427 = vst.msk [vmem:[#allocation2 + $0x80] sm:$0xff] %vm563_vm1, %v13073_v23  ;;  %v2261_v19 = vmul.f32 %v2227_v56, %v12904_v51  ;;  %v2287_v35 = vrot.slane %v13073_v23, 6  ;;  %v2459_v27 = vsel %vm706_vm3, %v2439_v3, %v2440_v49  ;;  %2313 = vst.msk [vmem:[#allocation2 + $0x48] sm:$0xff] %vm563_vm1, %v2306_v50 }
 0x5e1   :  { %2314 = vst.msk [vmem:[#allocation2 + $0x60] sm:$0xff] %vm563_vm1, %v2305_v52  ;;  %v2542_v41 = vrot.slane %v12999_v10, 2 }
 0x5e2   :  { %v2555_v28 = vsel %vm805_vm2, %v2539_v54, %v2540_v26  ;;  %v2556_v51 = vsel %vm805_vm2, %v2538_v21, %v2539_v54  ;;  %v13106_v60 = vmul.f32 %v2261_v19, %v12021_v2  ;;  %v2441_v21 = vrot.slane %v13073_v23, 1 }
 0x5e3   :  { %2566 = vst.msk [vmem:[#allocation2 + $0x70] sm:$0xff] %vm563_vm1, %v2556_v51  ;;  %2567 = vst.msk [vmem:[#allocation2 + $0x88] sm:$0xff] %vm563_vm1, %v2555_v28  ;;  %2370 = vrot.lane.b32.xlu1 %v2349_v11, %s11659_s0  ;;  %2484 = vrot.lane.b32.xlu0 %v2459_v27, %s11659_s0  ;;  %v2231_v43 = vpop.permute.xlu0 %2230  ;;  %v2304_v33 = vsel %vm548_vm4, %v2286_v61, %v2287_v35  ;;  %v2303_v56 = vsel %vm548_vm4, %v2287_v35, %v2288_v20  ;;  %v2290_v61 = vrot.slane %v12999_v10, 6 }
 0x5e4   :  { %v2541_v3 = vrot.slane %v13106_v60, 2  ;;  %2429 = vst.msk [vmem:[#allocation2 + $0xb0] sm:$0xff] %vm563_vm1, %v13106_v60  ;;  %v2263_v15 = vmul.f32 %v2231_v43, %v12908_v29  ;;  %v2289_v46 = vrot.slane %v13106_v60, 6  ;;  %v2348_v29 = vsel %vm592_vm5, %v2326_v48, %v2327_v47  ;;  %2315 = vst.msk [vmem:[#allocation2 + $0x78] sm:$0xff] %vm563_vm1, %v2304_v33 }
 0x5e5   :  { %2316 = vst.msk [vmem:[#allocation2 + $0x90] sm:$0xff] %vm563_vm1, %v2303_v56  ;;  %v2328_v48 = vrot.slane %v12985_v63, 7  ;;  %v2544_v28 = vrot.slane %v13005_v8, 2  ;;  %v2442_v43 = vrot.slane %v12993_v62, 1 }
 0x5e6   :  { %v2553_v11 = vsel %vm805_vm2, %v2541_v3, %v2542_v41  ;;  %v2554_v54 = vsel %vm805_vm2, %v2540_v26, %v2541_v3  ;;  %v13133_v19 = vmul.f32 %v2263_v15, %v12092_v0  ;;  %v2584_v50 = vld [vmem:[#allocation2 + $0x40] sm:$0xff]  ;;  %v2587_v52 = vld [vmem:[#allocation2 + $0x58] sm:$0xff]  ;;  %v2458_v26 = vsel %vm706_vm3, %v2440_v49, %v2441_v21 }
 0x5e7   :  { %2568 = vst.msk [vmem:[#allocation2 + $0xa0] sm:$0xff] %vm563_vm1, %v2554_v54  ;;  %2569 = vst.msk [vmem:[#allocation2 + $0xb8] sm:$0xff] %vm563_vm1, %v2553_v11  ;;  %10659 = vmatprep.mubr.msk.f32.mxu0 %vm563_vm1, %v2584_v50  ;;  %2372 = vrot.lane.b32.xlu1 %v2348_v29, %s11659_s0  ;;  %v2235_v35 = vpop.permute.xlu0 %2234  ;;  %v2347_v63 = vsel %vm592_vm5, %v2327_v47, %v2328_v48  ;;  %v2302_v3 = vsel %vm548_vm4, %v2288_v20, %v2289_v46  ;;  %v2329_v50 = vrot.slane %v13073_v23, 7 }
 0x5e8   :  { %v2543_v51 = vrot.slane %v13133_v19, 2  ;;  %2431 = vst.msk [vmem:[#allocation2 + $0xe0] sm:$0xff] %vm563_vm1, %v13133_v19  ;;  %2486 = vrot.lane.b32.xlu0 %v2458_v26, %s11659_s0  ;;  %v2265_v27 = vmul.f32 %v2235_v35, %v12914_v55  ;;  %10660 = vmatmul.mubr.msk.f32.gmra.mxu0 %vm563_vm1, %v2587_v52  ;;  %v2291_v49 = vrot.slane %v13133_v19, 6  ;;  %v2301_v15 = vsel %vm548_vm4, %v2289_v46, %v2290_v61 }
 0x5e9   :  { %2317 = vst.msk [vmem:[#allocation2 + $0xa8] sm:$0xff] %vm563_vm1, %v2302_v3  ;;  %2318 = vst.msk [vmem:[#allocation2 + $0xc0] sm:$0xff] %vm563_vm1, %v2301_v15  ;;  %v2292_v47 = vrot.slane %v13005_v8, 6  ;;  %v2457_v20 = vsel %vm706_vm3, %v2441_v21, %v2442_v43  ;;  %v2346_v35 = vsel %vm592_vm5, %v2328_v48, %v2329_v50  ;;  %v2330_v48 = vrot.slane %v12993_v62, 7 }
 0x5ea   :  { %v2551_v33 = vsel %vm805_vm2, %v2543_v51, %v2544_v28  ;;  %v2552_v55 = vsel %vm805_vm2, %v2542_v41, %v2543_v51  ;;  %v13167_v56 = vmul.f32 %v2265_v27, %v16985_v6  ;;  %v2590_v11 = vld [vmem:[#allocation2 + $0x70] sm:$0xff]  ;;  %v2593_v54 = vld [vmem:[#allocation2 + $0x88] sm:$0xff]  ;;  %v2443_v41 = vrot.slane %v13106_v60, 1 }
 0x5eb   :  { %2570 = vst.msk [vmem:[#allocation2 + $0xd0] sm:$0xff] %vm563_vm1, %v2552_v55  ;;  %2571 = vst.msk [vmem:[#allocation2 + $0xe8] sm:$0xff] %vm563_vm1, %v2551_v33  ;;  %2374 = vrot.lane.b32.xlu1 %v2347_v63, %s11659_s0  ;;  %10662 = vmatprep.mubr.msk.f32.mxu0 %vm563_vm1, %v2590_v11  ;;  %v2300_v29 = vsel %vm548_vm4, %v2290_v61, %v2291_v49  ;;  %v2299_v52 = vsel %vm548_vm4, %v2291_v49, %v2292_v47  ;;  %v2444_v49 = vrot.slane %v12999_v10, 1 }
 0x5ec   :  { %v2293_v23 = vrot.slane %v13167_v56, 6  ;;  %v2545_v46 = vrot.slane %v13167_v56, 2  ;;  %2433 = vst.msk [vmem:[#allocation2 + $0x110] sm:$0xff] %vm563_vm1, %v13167_v56  ;;  %2488 = vrot.lane.b32.xlu0 %v2457_v20, %s11659_s0  ;;  %10663 = vmatmul.mubr.msk.f32.gmra.mxu0 %vm563_vm1, %v2593_v54  ;;  %2319 = vst.msk [vmem:[#allocation2 + $0xd8] sm:$0xff] %vm563_vm1, %v2300_v29  ;;  %v2331_v15 = vrot.slane %v13106_v60, 7  ;;  %v2614_v54 = vld [vmem:[#allocation2 + $0x130] sm:$0xff] }
 0x5ed   :  { %2320 = vst.msk [vmem:[#allocation2 + $0xf0] sm:$0xff] %vm563_vm1, %v2299_v52  ;;  %v2455_v62 = vsel %vm706_vm3, %v2443_v41, %v2444_v49  ;;  %v2447_v29 = vrot.slane %v13167_v56, 1  ;;  %v2334_v52 = vrot.slane %v13005_v8, 7 }
 0x5ee   :  { %v2549_v21 = vsel %vm805_vm2, %v2545_v46, %v2546_v5  ;;  %v2550_v26 = vsel %vm805_vm2, %v2544_v28, %v2545_v46  ;;  %v2596_v51 = vld [vmem:[#allocation2 + $0xa0] sm:$0xff]  ;;  %v2599_v27 = vld [vmem:[#allocation2 + $0xb8] sm:$0xff]  ;;  %v2456_v5 = vsel %vm706_vm3, %v2442_v43, %v2443_v41  ;;  %v2298_v61 = vsel %vm548_vm4, %v2292_v47, %v2293_v23  ;;  %v2617_v46 = vld [vmem:[#allocation2 + $0x148] sm:$0xff] }
 0x5ef   :  { %2572 = vst.msk [vmem:[#allocation2 + $0x100] sm:$0xff] %vm563_vm1, %v2550_v26  ;;  %2573 = vst.msk [vmem:[#allocation2 + $0x118] sm:$0xff] %vm563_vm1, %v2549_v21  ;;  %2376 = vrot.lane.b32.xlu1 %v2346_v35, %s11659_s0  ;;  %10665 = vmatprep.mubr.msk.f32.mxu0 %vm563_vm1, %v2596_v51  ;;  %v2297_v28 = vsel %vm548_vm4, %v2293_v23, %v2294_v17  ;;  %v2345_v43 = vsel %vm592_vm5, %v2329_v50, %v2330_v48  ;;  %v2445_v17 = vrot.slane %v13133_v19, 1 }
 0x5f0   :  { %2490 = vrot.lane.b32.xlu0 %v2456_v5, %s11659_s0  ;;  %10666 = vmatmul.mubr.msk.f32.gmra.mxu0 %vm563_vm1, %v2599_v27  ;;  %2321 = vst.msk [vmem:[#allocation2 + $0x108] sm:$0xff] %vm563_vm1, %v2298_v61  ;;  %2322 = vst.msk [vmem:[#allocation2 + $0x120] sm:$0xff] %vm563_vm1, %v2297_v28  ;;  %v2344_v33 = vsel %vm592_vm5, %v2330_v48, %v2331_v15  ;;  %v2332_v50 = vrot.slane %v12999_v10, 7  ;;  %v2446_v47 = vrot.slane %v13005_v8, 1  ;;  %v2333_v41 = vrot.slane %v13133_v19, 7 }
 0x5f1   :  { %v2454_v60 = vsel %vm706_vm3, %v2444_v49, %v2445_v17  ;;  %v2448_v21 = vrot.slane %v13011_v4, 1  ;;  %v2335_v35 = vrot.slane %v13167_v56, 7  ;;  %v2449_v27 = vrot.slane %v13017_v37, 1 }
 0x5f2   :  { %v2602_v63 = vld [vmem:[#allocation2 + $0xd0] sm:$0xff]  ;;  %v2605_v3 = vld [vmem:[#allocation2 + $0xe8] sm:$0xff]  ;;  %v2343_v20 = vsel %vm592_vm5, %v2331_v15, %v2332_v50  ;;  %v2453_v23 = vsel %vm706_vm3, %v2445_v17, %v2446_v47  ;;  %v2342_v10 = vsel %vm592_vm5, %v2332_v50, %v2333_v41  ;;  %v2452_v19 = vsel %vm706_vm3, %v2446_v47, %v2447_v29 }
 0x5f3   :  { %2378 = vrot.lane.b32.xlu1 %v2345_v43, %s11659_s0  ;;  %10668 = vmatprep.mubr.msk.f32.mxu0 %vm563_vm1, %v2602_v63  ;;  %v2341_v26 = vsel %vm592_vm5, %v2333_v41, %v2334_v52  ;;  %v2451_v51 = vsel %vm706_vm3, %v2447_v29, %v2448_v21  ;;  %v2340_v5 = vsel %vm592_vm5, %v2334_v52, %v2335_v35  ;;  %v2336_v56 = vrot.slane %v13011_v4, 7 }
 0x5f4   :  { %2492 = vrot.lane.b32.xlu0 %v2455_v62, %s11659_s0  ;;  %10669 = vmatmul.mubr.msk.f32.gmra.mxu0 %vm563_vm1, %v2605_v3  ;;  %v2450_v8 = vsel %vm706_vm3, %v2448_v21, %v2449_v27  ;;  %v2463_v48 = vsel %vm706_vm3, %v2449_v27, %v2436_v18 }
 0x5f5   :  { %v2339_v61 = vsel %vm592_vm5, %v2335_v35, %v2336_v56  ;;  %v2338_v28 = vsel %vm592_vm5, %v2336_v56, %v2337_v7 }
 0x5f6   :  { %v2608_v55 = vld [vmem:[#allocation2 + $0x100] sm:$0xff]  ;;  %v2611_v11 = vld [vmem:[#allocation2 + $0x118] sm:$0xff] }
 0x5f7   :  { %2380 = vrot.lane.b32.xlu1 %v2344_v33, %s11659_s0  ;;  %10671 = vmatprep.mubr.msk.f32.mxu0 %vm563_vm1, %v2608_v55 }
 0x5f8   :  { %2494 = vrot.lane.b32.xlu0 %v2454_v60, %s11659_s0  ;;  %10672 = vmatmul.mubr.msk.f32.gmra.mxu0 %vm563_vm1, %v2611_v11 }
 0x5f9   :  { %10674 = vmatprep.mubr.msk.f32.mxu0 %vm563_vm1, %v2614_v54 }
 0x5fb   :  { %2382 = vrot.lane.b32.xlu1 %v2343_v20, %s11659_s0 }
 0x5fc   :  { %2496 = vrot.lane.b32.xlu0 %v2453_v23, %s11659_s0  ;;  %10675 = vmatmul.mubr.msk.f32.gmra.mxu0 %vm563_vm1, %v2617_v46 }
 0x5ff   :  { %2384 = vrot.lane.b32.xlu1 %v2342_v10, %s11659_s0 }
 0x600   :  { %2498 = vrot.lane.b32.xlu0 %v2452_v19, %s11659_s0 }
 0x603   :  { %2386 = vrot.lane.b32.xlu1 %v2341_v26, %s11659_s0 }
 0x604   :  { %2500 = vrot.lane.b32.xlu0 %v2451_v51, %s11659_s0 }
 0x607   :  { %2388 = vrot.lane.b32.xlu1 %v2340_v5, %s11659_s0 }
 0x608   :  { %2502 = vrot.lane.b32.xlu0 %v2450_v8, %s11659_s0 }
 0x60b   :  { %2390 = vrot.lane.b32.xlu1 %v2339_v61, %s11659_s0 }
 0x60c   :  { %2504 = vrot.lane.b32.xlu0 %v2463_v48, %s11659_s0 }
 0x60f   :  { %2392 = vrot.lane.b32.xlu1 %v2338_v28, %s11659_s0 }
 0x61d   :  { %v2479_v4 = vpop.permute.xlu0 %2478 }
 0x61e   :  { %2520 = vst.msk [vmem:[#allocation2 + $0x8] sm:$0xff] %vm663_vm6, %v2479_v4 }
 0x621   :  { %v2481_v49 = vpop.permute.xlu0 %2480 }
 0x622   :  { %2521 = vst.msk [vmem:[#allocation2 + $0x20] sm:$0xff] %vm663_vm6, %v2481_v49 }
 0x625   :  { %v2577_v24 = vld [vmem:[#allocation2 + $0x8] sm:$0xff] }
 0x626   :  { %2773 = vmatprep.mubr.f32.mxu1 %v2577_v24 }
 0x629   :  { %v2580_v15 = vld [vmem:[#allocation2 + $0x20] sm:$0xff] }
 0x64d   :  { %v2367_v18 = vpop.permute.xlu1 %2366 }
 0x64e   :  { %2408 = vst.msk [vmem:[#allocation2] sm:$0xff] %vm663_vm6, %v2367_v18 }
 0x651   :  { %v2369_v43 = vpop.permute.xlu1 %2368  ;;  %v2483_v63 = vpop.permute.xlu0 %2482 }
 0x652   :  { %2409 = vst.msk [vmem:[#allocation2 + $0x18] sm:$0xff] %vm663_vm6, %v2369_v43  ;;  %2522 = vst.msk [vmem:[#allocation2 + $0x38] sm:$0xff] %vm663_vm6, %v2483_v63 }
 0x655   :  { %v2371_v37 = vpop.permute.xlu1 %2370  ;;  %v2485_v7 = vpop.permute.xlu0 %2484  ;;  %v2576_v3 = vld [vmem:[#allocation2] sm:$0xff] }
 0x656   :  { %2410 = vst.msk [vmem:[#allocation2 + $0x30] sm:$0xff] %vm663_vm6, %v2371_v37  ;;  %2523 = vst.msk [vmem:[#allocation2 + $0x50] sm:$0xff] %vm663_vm6, %v2485_v7  ;;  %2774 = vmatmul.mubr.f32.vlgmr.msra.gmra.mxu1 %v2576_v3 }
 0x657   :  { %2778 = vmatprep.mubr.f32.mxu1 %v2580_v15 }
 0x659   :  { %v2373_v62 = vpop.permute.xlu1 %2372  ;;  %v2579_v17 = vld [vmem:[#allocation2 + $0x18] sm:$0xff] }
 0x65a   :  { %v2583_v33 = vld [vmem:[#allocation2 + $0x38] sm:$0xff]  ;;  %2411 = vst.msk [vmem:[#allocation2 + $0x48] sm:$0xff] %vm663_vm6, %v2373_v62  ;;  %v2487_v55 = vpop.permute.xlu0 %2486  ;;  %2779 = vmatmul.mubr.f32.gmra.mxu1 %v2579_v17 }
 0x65b   :  { %2524 = vst.msk [vmem:[#allocation2 + $0x68] sm:$0xff] %vm663_vm6, %v2487_v55  ;;  %2783 = vmatprep.mubr.f32.mxu1 %v2583_v33 }
 0x65d   :  { %v2375_v11 = vpop.permute.xlu1 %2374  ;;  %v2582_v60 = vld [vmem:[#allocation2 + $0x30] sm:$0xff] }
 0x65e   :  { %v2586_v54 = vld [vmem:[#allocation2 + $0x50] sm:$0xff]  ;;  %2412 = vst.msk [vmem:[#allocation2 + $0x60] sm:$0xff] %vm663_vm6, %v2375_v11  ;;  %v2489_v50 = vpop.permute.xlu0 %2488  ;;  %2784 = vmatmul.mubr.f32.gmra.mxu1 %v2582_v60 }
 0x65f   :  { %2525 = vst.msk [vmem:[#allocation2 + $0x80] sm:$0xff] %vm663_vm6, %v2489_v50  ;;  %2788 = vmatprep.mubr.f32.mxu1 %v2586_v54 }
 0x661   :  { %v2377_v47 = vpop.permute.xlu1 %2376  ;;  %v2585_v20 = vld [vmem:[#allocation2 + $0x48] sm:$0xff] }
 0x662   :  { %2413 = vst.msk [vmem:[#allocation2 + $0x78] sm:$0xff] %vm663_vm6, %v2377_v47  ;;  %v2491_v41 = vpop.permute.xlu0 %2490  ;;  %2789 = vmatmul.mubr.f32.gmra.mxu1 %v2585_v20  ;;  %v2589_v23 = vld [vmem:[#allocation2 + $0x68] sm:$0xff] }
 0x663   :  { %2526 = vst.msk [vmem:[#allocation2 + $0x98] sm:$0xff] %vm663_vm6, %v2491_v41  ;;  %2793 = vmatprep.mubr.f32.mxu1 %v2589_v23  ;;  %v13312_v41 = vld [vmem:[#allocation8 + $0x2] ss:$0 sm:$0xff] }
 0x665   :  { %v2379_v46 = vpop.permute.xlu1 %2378  ;;  %v2588_v29 = vld [vmem:[#allocation2 + $0x60] sm:$0xff] }
 0x666   :  { %2414 = vst.msk [vmem:[#allocation2 + $0x90] sm:$0xff] %vm663_vm6, %v2379_v46  ;;  %v2493_v10 = vpop.permute.xlu0 %2492  ;;  %2794 = vmatmul.mubr.f32.gmra.mxu1 %v2588_v29  ;;  %v2592_v19 = vld [vmem:[#allocation2 + $0x80] sm:$0xff] }
 0x667   :  { %2527 = vst.msk [vmem:[#allocation2 + $0xb0] sm:$0xff] %vm663_vm6, %v2493_v10  ;;  %2798 = vmatprep.mubr.f32.mxu1 %v2592_v19 }
 0x669   :  { %v2381_v52 = vpop.permute.xlu1 %2380  ;;  %v2591_v21 = vld [vmem:[#allocation2 + $0x78] sm:$0xff] }
 0x66a   :  { %2415 = vst.msk [vmem:[#allocation2 + $0xa8] sm:$0xff] %vm663_vm6, %v2381_v52  ;;  %v2495_v26 = vpop.permute.xlu0 %2494  ;;  %2799 = vmatmul.mubr.f32.gmra.mxu1 %v2591_v21  ;;  %v2595_v35 = vld [vmem:[#allocation2 + $0x98] sm:$0xff] }
 0x66b   :  { %2528 = vst.msk [vmem:[#allocation2 + $0xc8] sm:$0xff] %vm663_vm6, %v2495_v26  ;;  %2803 = vmatprep.mubr.f32.mxu1 %v2595_v35 }
 0x66d   :  { %v2383_v51 = vpop.permute.xlu1 %2382  ;;  %v2594_v27 = vld [vmem:[#allocation2 + $0x90] sm:$0xff] }
 0x66e   :  { %2416 = vst.msk [vmem:[#allocation2 + $0xc0] sm:$0xff] %vm663_vm6, %v2383_v51  ;;  %v2497_v5 = vpop.permute.xlu0 %2496  ;;  %2804 = vmatmul.mubr.f32.gmra.mxu1 %v2594_v27  ;;  %v2598_v8 = vld [vmem:[#allocation2 + $0xb0] sm:$0xff] }
 0x66f   :  { %2529 = vst.msk [vmem:[#allocation2 + $0xe0] sm:$0xff] %vm663_vm6, %v2497_v5  ;;  %2808 = vmatprep.mubr.f32.mxu1 %v2598_v8 }
 0x671   :  { %v2385_v56 = vpop.permute.xlu1 %2384  ;;  %v2597_v61 = vld [vmem:[#allocation2 + $0xa8] sm:$0xff] }
 0x672   :  { %2417 = vst.msk [vmem:[#allocation2 + $0xd8] sm:$0xff] %vm663_vm6, %v2385_v56  ;;  %v2499_v48 = vpop.permute.xlu0 %2498  ;;  %2809 = vmatmul.mubr.f32.gmra.mxu1 %v2597_v61  ;;  %v2601_v28 = vld [vmem:[#allocation2 + $0xc8] sm:$0xff] }
 0x673   :  { %2530 = vst.msk [vmem:[#allocation2 + $0xf8] sm:$0xff] %vm663_vm6, %v2499_v48  ;;  %2813 = vmatprep.mubr.f32.mxu1 %v2601_v28 }
 0x675   :  { %v2387_v4 = vpop.permute.xlu1 %2386  ;;  %v2600_v49 = vld [vmem:[#allocation2 + $0xc0] sm:$0xff] }
 0x676   :  { %2418 = vst.msk [vmem:[#allocation2 + $0xf0] sm:$0xff] %vm663_vm6, %v2387_v4  ;;  %v2501_v24 = vpop.permute.xlu0 %2500  ;;  %2814 = vmatmul.mubr.f32.gmra.mxu1 %v2600_v49  ;;  %v2604_v18 = vld [vmem:[#allocation2 + $0xe0] sm:$0xff] }
 0x677   :  { %2531 = vst.msk [vmem:[#allocation2 + $0x110] sm:$0xff] %vm663_vm6, %v2501_v24  ;;  %2818 = vmatprep.mubr.f32.mxu1 %v2604_v18  ;;  %v10658_v20 = vpop.f32.mrf.mxu0 }
 0x679   :  { %v2389_v43 = vpop.permute.xlu1 %2388  ;;  %v2603_v63 = vld [vmem:[#allocation2 + $0xd8] sm:$0xff]  ;;  %v2910_v19 = vpop.f32.mrf.mxu0 }
 0x67a   :  { %2419 = vst.msk [vmem:[#allocation2 + $0x108] sm:$0xff] %vm663_vm6, %v2389_v43  ;;  %v2503_v37 = vpop.permute.xlu0 %2502  ;;  %2819 = vmatmul.mubr.f32.gmra.mxu1 %v2603_v63  ;;  %v2607_v7 = vld [vmem:[#allocation2 + $0xf8] sm:$0xff] }
 0x67b   :  { %2532 = vst.msk [vmem:[#allocation2 + $0x128] sm:$0xff] %vm663_vm6, %v2503_v37  ;;  %2823 = vmatprep.mubr.f32.mxu1 %v2607_v7 }
 0x67d   :  { %v2391_v3 = vpop.permute.xlu1 %2390  ;;  %v2606_v15 = vld [vmem:[#allocation2 + $0xf0] sm:$0xff] }
 0x67e   :  { %2420 = vst.msk [vmem:[#allocation2 + $0x120] sm:$0xff] %vm663_vm6, %v2391_v3  ;;  %v2505_v62 = vpop.permute.xlu0 %2504  ;;  %2824 = vmatmul.mubr.f32.gmra.mxu1 %v2606_v15  ;;  %v2610_v17 = vld [vmem:[#allocation2 + $0x110] sm:$0xff] }
 0x67f   :  { %2533 = vst.msk [vmem:[#allocation2 + $0x140] sm:$0xff] %vm663_vm6, %v2505_v62  ;;  %2828 = vmatprep.mubr.f32.mxu1 %v2610_v17 }
 0x681   :  { %v2393_v33 = vpop.permute.xlu1 %2392  ;;  %v2609_v55 = vld [vmem:[#allocation2 + $0x108] sm:$0xff] }
 0x682   :  { %2421 = vst.msk [vmem:[#allocation2 + $0x138] sm:$0xff] %vm663_vm6, %v2393_v33  ;;  %2829 = vmatmul.mubr.f32.gmra.mxu1 %v2609_v55  ;;  %v2613_v11 = vld [vmem:[#allocation2 + $0x128] sm:$0xff] }
 0x683   :  { %2833 = vmatprep.mubr.f32.mxu1 %v2613_v11 }
 0x685   :  { %v2612_v60 = vld [vmem:[#allocation2 + $0x120] sm:$0xff] }
 0x686   :  { %2834 = vmatmul.mubr.f32.gmra.mxu1 %v2612_v60  ;;  %v2616_v54 = vld [vmem:[#allocation2 + $0x140] sm:$0xff] }
 0x687   :  { %2838 = vmatprep.mubr.f32.mxu1 %v2616_v54 }
 0x689   :  { %v2615_v50 = vld [vmem:[#allocation2 + $0x138] sm:$0xff] }
 0x68a   :  { %2839 = vmatmul.mubr.f32.gmra.mxu1 %v2615_v50 }
 0x6a8   :  { %v13319_v5 = vpop.f32.mrf.mxu0 }
 0x6aa   :  { %v2920_v49 = vpop.f32.mrf.mxu0 }
 0x6ac   :  { %v13332_v37 = vpop.f32.mrf.mxu0 }
 0x6ae   :  { %v2930_v17 = vpop.f32.mrf.mxu0 }
 0x716   :  { %v9799_v47 = vpop.f32.mrf.mxu1 }
 0x718   :  { %v9800_v23 = vpop.f32.mrf.mxu1 }
 0x719   :  { %v9801_v46 = vadd.f32 %v9800_v23, %v9799_v47  ;;  %v13342_v47 = vpop.f32.mrf.mxu0 }
 0x71a   :  { %v9802_v29 = vpop.f32.mrf.mxu1 }
 0x71b   :  { %v2776_v10 = vadd.f32 %v9801_v46, %v13312_v41 }
 0x71c   :  { %v9803_v52 = vpop.f32.mrf.mxu1 }
 0x71d   :  { %v13315_v21 = vadd.f32 %v2910_v19, %v2776_v10  ;;  %v9804_v26 = vadd.f32 %v9803_v52, %v9802_v29  ;;  %v2940_v52 = vpop.f32.mrf.mxu0 }
 0x71e   :  { %v9805_v35 = vpop.f32.mrf.mxu1 }
 0x71f   :  { %v9339_v51 = vmul.f32 -1.442695, %v13315_v21  ;;  %v2781_v27 = vadd.f32 %v9804_v26, %v13312_v41 }
 0x720   :  { %v9806_v8 = vpop.f32.mrf.mxu1 }
 0x721   :  { %11116 = vpow2.f32 %v9339_v51  ;;  %v13321_v56 = vadd.f32 %v10658_v20, %v2781_v27  ;;  %v9807_v61 = vadd.f32 %v9806_v8, %v9805_v35 }
 0x722   :  { %v13323_v48 = vpop.f32.mrf.mxu1 }
 0x723   :  { %v9340_v28 = vmul.f32 -1.442695, %v13321_v56  ;;  %v2786_v4 = vadd.f32 %v9807_v61, %v13312_v41 }
 0x724   :  { %v13327_v24 = vpop.f32.mrf.mxu1 }
 0x725   :  { %11118 = vpow2.f32 %v9340_v28  ;;  %v13329_v18 = vadd.f32 %v2920_v49, %v2786_v4  ;;  %v13352_v28 = vpop.f32.mrf.mxu0 }
 0x726   :  { %v9811_v43 = vpop.f32.mrf.mxu1 }
 0x727   :  { %v9341_v63 = vmul.f32 -1.442695, %v13329_v18 }
 0x728   :  { %v9812_v7 = vpop.f32.mrf.mxu1 }
 0x729   :  { %11120 = vpow2.f32 %v9341_v63  ;;  %v9813_v3 = vadd.f32 %v9812_v7, %v9811_v43  ;;  %v3523_v7 = vld [vmem:[#allocation7 + $0x4f8] sm:$0xff] }
 0x72a   :  { %v13334_v15 = vpop.f32.mrf.mxu1  ;;  %10677 = vmatprep.subr.mxu1 %v3523_v7 }
 0x72b   :  { %v2796_v62 = vadd.f32 %v9813_v3, %v13312_v41  ;;  %v2950_v3 = vpop.f32.mrf.mxu0  ;;  %10678 = vmatpush3.msra.mxu1 %v3523_v7  ;;  %v9810_v7 = vadd.f32 %v13327_v24, %v13323_v48 }
 0x72c   :  { %v13337_v33 = vpop.f32.mrf.mxu1 }
 0x72d   :  { %v13339_v55 = vadd.f32 %v2930_v17, %v2796_v62  ;;  %v2791_v48 = vadd.f32 %v9810_v7, %v13312_v41 }
 0x72e   :  { %v11117_v11 = vpop.eup %11116  ;;  %v9817_v60 = vpop.f32.mrf.mxu1 }
 0x72f   :  { %v3021_v54 = vadd.f32 1.0, %v11117_v11  ;;  %v9343_v50 = vmul.f32 -1.442695, %v13339_v55  ;;  %v3522_v11 = vld [vmem:[#allocation7 + $0x4f0] sm:$0xff] }
 0x730   :  { %v9818_v20 = vpop.f32.mrf.mxu1  ;;  %10679 = vmatprep.subr.mxu1 %v3522_v11 }
 0x731   :  { %11122 = vrcp.f32 %v3021_v54  ;;  %v9819_v23 = vadd.f32 %v9818_v20, %v9817_v60  ;;  %10680 = vmatpush3.msra.mxu1 %v3522_v11  ;;  %v3518_v11 = vld [vmem:[#allocation7 + $0x4d0] sm:$0xff] }
 0x732   :  { %v11119_v46 = vpop.eup %11118  ;;  %11124 = vpow2.f32 %v9343_v50  ;;  %v13344_v29 = vpop.f32.mrf.mxu1 }
 0x733   :  { %v3022_v10 = vadd.f32 1.0, %v11119_v46  ;;  %v2806_v19 = vadd.f32 %v9819_v23, %v13312_v41  ;;  %v3521_v23 = vld [vmem:[#allocation7 + $0x4e8] sm:$0xff]  ;;  %v13363_v46 = vpop.f32.mrf.mxu0 }
 0x734   :  { %v13347_v26 = vpop.f32.mrf.mxu1  ;;  %10681 = vmatprep.subr.mxu1 %v3521_v23 }
 0x735   :  { %11126 = vrcp.f32 %v3022_v10  ;;  %v13349_v35 = vadd.f32 %v2940_v52, %v2806_v19  ;;  %10682 = vmatpush3.msra.mxu1 %v3521_v23  ;;  %v3517_v23 = vld [vmem:[#allocation7 + $0x4c8] sm:$0xff] }
 0x736   :  { %v11121_v51 = vpop.eup %11120  ;;  %v9823_v27 = vpop.f32.mrf.mxu1 }
 0x737   :  { %v3023_v8 = vadd.f32 1.0, %v11121_v51  ;;  %v9345_v61 = vmul.f32 -1.442695, %v13349_v35  ;;  %v3520_v51 = vld [vmem:[#allocation7 + $0x4e0] sm:$0xff] }
 0x738   :  { %v9824_v4 = vpop.f32.mrf.mxu1  ;;  %10683 = vmatprep.subr.mxu1 %v3520_v51 }
 0x739   :  { %11128 = vrcp.f32 %v3023_v8  ;;  %v9825_v49 = vadd.f32 %v9824_v4, %v9823_v27  ;;  %v3519_v27 = vld [vmem:[#allocation7 + $0x4d8] sm:$0xff]  ;;  %10684 = vmatpush3.msra.mxu1 %v3520_v51 }
 0x73a   :  { %11130 = vpow2.f32 %v9345_v61  ;;  %v13354_v43 = vpop.f32.mrf.mxu1  ;;  %10685 = vmatprep.subr.mxu1 %v3519_v27 }
 0x73b   :  { %v2816_v63 = vadd.f32 %v9825_v49, %v13312_v41  ;;  %v2960_v49 = vpop.f32.mrf.mxu0  ;;  %10686 = vmatpush3.msra.mxu1 %v3519_v27  ;;  %v9816_v27 = vadd.f32 %v13337_v33, %v13334_v15  ;;  %v9822_v15 = vadd.f32 %v13347_v26, %v13344_v29 }
 0x73c   :  { %v13357_v62 = vpop.f32.mrf.mxu1  ;;  %10687 = vmatprep.subr.mxu1 %v3518_v11 }
 0x73d   :  { %v13359_v17 = vadd.f32 %v2950_v3, %v2816_v63  ;;  %10688 = vmatpush3.msra.mxu1 %v3518_v11  ;;  %v2811_v29 = vadd.f32 %v9822_v15, %v13312_v41 }
 0x73e   :  { %v11123_v60 = vpop.eup %11122  ;;  %v9829_v54 = vpop.f32.mrf.mxu1  ;;  %10689 = vmatprep.subr.mxu1 %v3517_v23 }
 0x73f   :  { %v11125_v50 = vpop.eup %11124  ;;  %v9347_v20 = vmul.f32 -1.442695, %v13359_v17  ;;  %3077 = vrot.lane.b32.xlu0 %v11123_v60, %s11659_s0  ;;  %10690 = vmatpush3.msra.mxu1 %v3517_v23 }
 0x740   :  { %v3025_v10 = vadd.f32 1.0, %v11125_v50  ;;  %v9830_v19 = vpop.f32.mrf.mxu1 }
 0x741   :  { %11132 = vpow2.f32 %v9347_v20  ;;  %v9831_v52 = vadd.f32 %v9830_v19, %v9829_v54  ;;  %v10676_v19 = vpop.f32.mrf.mxu0 }
 0x742   :  { %v11127_v8 = vpop.eup %11126  ;;  %11134 = vrcp.f32 %v3025_v10  ;;  %v9832_v61 = vpop.f32.mrf.mxu1  ;;  %v3516_v10 = vld [vmem:[#allocation7 + $0x4c0] sm:$0xff] }
 0x743   :  { %v2826_v4 = vadd.f32 %v9831_v52, %v13312_v41  ;;  %3079 = vrot.lane.b32.xlu1 %v11127_v8, %s11659_s0  ;;  %10691 = vmatprep.subr.mxu1 %v3516_v10 }
 0x744   :  { %v9833_v63 = vpop.f32.mrf.mxu1  ;;  %10692 = vmatpush3.msra.mxu1 %v3516_v10 }
 0x745   :  { %v13369_v3 = vadd.f32 %v2960_v49, %v2826_v4  ;;  %v2970_v49 = vpop.f32.mrf.mxu0 }
 0x746   :  { %v11129_v60 = vpop.eup %11128  ;;  %v9835_v54 = vpop.f32.mrf.mxu1 }
 0x747   :  { %v11131_v50 = vpop.eup %11130  ;;  %v9349_v20 = vmul.f32 -1.442695, %v13369_v3  ;;  %3081 = vrot.lane.b32.xlu1 %v11129_v60, %s11659_s0  ;;  %v13378_v60 = vadd.f32 %v13319_v5, %v2791_v48 }
 0x748   :  { %v3027_v52 = vadd.f32 1.0, %v11131_v50  ;;  %v9836_v51 = vpop.f32.mrf.mxu1 }
 0x749   :  { %11136 = vpow2.f32 %v9349_v20  ;;  %v9837_v24 = vadd.f32 %v9836_v51, %v9835_v54  ;;  %v2801_v54 = vadd.f32 %v9816_v27, %v13312_v41  ;;  %v9342_v5 = vmul.f32 -1.442695, %v13378_v60 }
 0x74a   :  { %11138 = vrcp.f32 %v3027_v52  ;;  %v9838_v8 = vpop.f32.mrf.mxu1  ;;  %v9828_v51 = vadd.f32 %v13357_v62, %v13354_v43 }
 0x74b   :  { %v2836_v4 = vadd.f32 %v9837_v24, %v13312_v41  ;;  %v13394_v24 = vadd.f32 %v13332_v37, %v2801_v54 }
 0x74c   :  { %v9839_v11 = vpop.f32.mrf.mxu1  ;;  %v2821_v27 = vadd.f32 %v9828_v51, %v13312_v41 }
 0x74d   :  { %v13380_v50 = vadd.f32 %v2970_v49, %v2836_v4  ;;  %v9840_v7 = vadd.f32 %v9839_v11, %v9838_v8  ;;  %v9834_v8 = vadd.f32 %v9833_v63, %v9832_v61  ;;  %v9344_v49 = vmul.f32 -1.442695, %v13394_v24 }
 0x74e   :  { %v11133_v20 = vpop.eup %11132  ;;  %v13401_v11 = vadd.f32 %v13342_v47, %v2811_v29  ;;  %v13405_v37 = vadd.f32 %v13352_v28, %v2821_v27 }
 0x74f   :  { %v11135_v33 = vpop.eup %11134  ;;  %v3029_v23 = vadd.f32 1.0, %v11133_v20  ;;  %v9351_v52 = vmul.f32 -1.442695, %v13380_v50  ;;  %v2841_v10 = vadd.f32 %v9840_v7, %v13312_v41 }
 0x750   :  { %3085 = vrot.lane.b32.xlu1 %v11135_v33, %s11659_s0  ;;  %v9346_v61 = vmul.f32 -1.442695, %v13401_v11  ;;  %v9348_v63 = vmul.f32 -1.442695, %v13405_v37 }
 0x751   :  { %11140 = vrcp.f32 %v3029_v23  ;;  %v13391_v48 = vadd.f32 %v10676_v19, %v2841_v10  ;;  %v2831_v19 = vadd.f32 %v9834_v8, %v13312_v41 }
 0x752   :  { %11142 = vpow2.f32 %v9351_v52 }
 0x753   :  { %v9352_v26 = vmul.f32 -1.442695, %v13391_v48  ;;  %11144 = vpow2.f32 %v9342_v5  ;;  %v13411_v7 = vadd.f32 %v13363_v46, %v2831_v19 }
 0x755   :  { %11146 = vpow2.f32 %v9352_v26  ;;  %v9350_v28 = vmul.f32 -1.442695, %v13411_v7 }
 0x756   :  { %v11137_v4 = vpop.eup %11136 }
 0x757   :  { %v11139_v43 = vpop.eup %11138  ;;  %v3031_v62 = vadd.f32 1.0, %v11137_v4 }
 0x758   :  { %3089 = vrot.lane.b32.xlu1 %v11139_v43, %s11659_s0 }
 0x759   :  { %11148 = vrcp.f32 %v3031_v62 }
 0x75a   :  { %11150 = vpow2.f32 %v9344_v49 }
 0x75b   :  { %11152 = vpow2.f32 %v9346_v61 }
 0x75c   :  { %11154 = vpow2.f32 %v9348_v63 }
 0x75e   :  { %v11141_v47 = vpop.eup %11140 }
 0x75f   :  { %v11143_v20 = vpop.eup %11142  ;;  %3093 = vrot.lane.b32.xlu1 %v11141_v47, %s11659_s0 }
 0x760   :  { %v3033_v54 = vadd.f32 1.0, %v11143_v20  ;;  %v11145_v15 = vpop.eup %11144 }
 0x761   :  { %v3024_v52 = vadd.f32 1.0, %v11145_v15 }
 0x762   :  { %11156 = vrcp.f32 %v3033_v54  ;;  %v11147_v41 = vpop.eup %11146 }
 0x763   :  { %v3034_v33 = vadd.f32 1.0, %v11147_v41  ;;  %11158 = vpow2.f32 %v9350_v28 }
 0x765   :  { %11160 = vrcp.f32 %v3034_v33  ;;  %v3515_v33 = vld [vmem:[#allocation7 + $0x4b8] sm:$0xff] }
 0x766   :  { %v11149_v23 = vpop.eup %11148  ;;  %11162 = vrcp.f32 %v3024_v52  ;;  %v3514_v52 = vld [vmem:[#allocation7 + $0x4b0] sm:$0xff]  ;;  %9863 = vmatprep.subr.mxu0 %v3515_v33 }
 0x767   :  { %v11151_v10 = vpop.eup %11150  ;;  %3097 = vrot.lane.b32.xlu1 %v11149_v23, %s11659_s0  ;;  %v3499_v23 = vld [vmem:[#allocation7 + $0x438] sm:$0xff] }
 0x768   :  { %v3026_v46 = vadd.f32 1.0, %v11151_v10  ;;  %v11153_v5 = vpop.eup %11152  ;;  %9864 = vmatpush3.msra.mxu0 %v3499_v23 }
 0x769   :  { %v11155_v51 = vpop.eup %11154  ;;  %v3028_v29 = vadd.f32 1.0, %v11153_v5  ;;  %9865 = vmatprep.subr.mxu0 %v3514_v52  ;;  %v3510_v52 = vld [vmem:[#allocation7 + $0x490] sm:$0xff] }
 0x76a   :  { %11164 = vrcp.f32 %v3026_v46  ;;  %v3030_v8 = vadd.f32 1.0, %v11155_v51  ;;  %v3498_v51 = vld [vmem:[#allocation7 + $0x430] sm:$0xff] }
 0x76b   :  { %11166 = vrcp.f32 %v3028_v29  ;;  %9866 = vmatpush3.msra.mxu0 %v3498_v51  ;;  %v3494_v51 = vld [vmem:[#allocation7 + $0x410] sm:$0xff] }
 0x76c   :  { %11168 = vrcp.f32 %v3030_v8  ;;  %v3513_v8 = vld [vmem:[#allocation7 + $0x4a8] sm:$0xff] }
 0x76d   :  { %9867 = vmatprep.subr.mxu0 %v3513_v8  ;;  %v3493_v8 = vld [vmem:[#allocation7 + $0x408] sm:$0xff] }
 0x76f   :  { %v11157_v26 = vpop.eup %11156 }
 0x770   :  { %3101 = vrot.lane.b32.xlu1 %v11157_v26, %s11659_s0  ;;  %v11159_v27 = vpop.eup %11158 }
 0x771   :  { %v3032_v49 = vadd.f32 1.0, %v11159_v27 }
 0x772   :  { %v11161_v4 = vpop.eup %11160 }
 0x773   :  { %3103 = vrot.lane.b32.xlu0 %v11161_v4, %s11659_s0  ;;  %v11163_v43 = vpop.eup %11162  ;;  %11170 = vrcp.f32 %v3032_v49  ;;  %v3497_v4 = vld [vmem:[#allocation7 + $0x428] sm:$0xff] }
 0x774   :  { %9868 = vmatpush3.msra.mxu0 %v3497_v4 }
 0x777   :  { %3083 = vrot.lane.b32.xlu0 %v11163_v43, %s11659_s0  ;;  %v11165_v62 = vpop.eup %11164 }
 0x778   :  { %v11167_v19 = vpop.eup %11166 }
 0x779   :  { %v11169_v61 = vpop.eup %11168 }
 0x77b   :  { %3087 = vrot.lane.b32.xlu0 %v11165_v62, %s11659_s0 }
 0x77f   :  { %3091 = vrot.lane.b32.xlu0 %v11167_v19, %s11659_s0 }
 0x780   :  { %v11171_v63 = vpop.eup %11170 }
 0x783   :  { %3095 = vrot.lane.b32.xlu0 %v11169_v61, %s11659_s0  ;;  %v3496_v61 = vld [vmem:[#allocation7 + $0x420] sm:$0xff] }
 0x787   :  { %3099 = vrot.lane.b32.xlu0 %v11171_v63, %s11659_s0 }
 0x7b1   :  { %v3078_v47 = vpop.permute.xlu0 %3077 }
 0x7b2   :  { %v3119_v20 = vmul.f32 %v3078_v47, %v13315_v21 }
 0x7b4   :  { %v13425_v54 = vmul.f32 %v3119_v20, %v11880_v12 }
 0x7b5   :  { %v3080_v28 = vpop.permute.xlu1 %3079 }
 0x7b6   :  { %3287 = vst.msk [vmem:[#allocation2 + $0x8] sm:$0xff] %vm563_vm1, %v13425_v54  ;;  %v3120_v15 = vmul.f32 %v3080_v28, %v13321_v56  ;;  %v3147_v10 = vrot.slane %v13425_v54, 6  ;;  %v3399_v46 = vrot.slane %v13425_v54, 2  ;;  %v3301_v5 = vrot.slane %v13425_v54, 1  ;;  %v3511_v28 = vld [vmem:[#allocation7 + $0x498] sm:$0xff] }
 0x7b8   :  { %v13431_v41 = vmul.f32 %v3120_v15, %v11882_v13  ;;  %v3495_v15 = vld [vmem:[#allocation7 + $0x418] sm:$0xff] }
 0x7b9   :  { %v3082_v21 = vpop.permute.xlu1 %3081 }
 0x7ba   :  { %v3148_v29 = vrot.slane %v13431_v41, 6  ;;  %v3400_v26 = vrot.slane %v13431_v41, 2  ;;  %3288 = vst.msk [vmem:[#allocation2 + $0x20] sm:$0xff] %vm563_vm1, %v13431_v41  ;;  %v3121_v56 = vmul.f32 %v3082_v21, %v13329_v18  ;;  %v3302_v27 = vrot.slane %v13431_v41, 1  ;;  %v3512_v18 = vld [vmem:[#allocation7 + $0x4a0] sm:$0xff] }
 0x7bb   :  { %9869 = vmatprep.subr.mxu0 %v3512_v18  ;;  %v3507_v18 = vld [vmem:[#allocation7 + $0x478] sm:$0xff] }
 0x7bc   :  { %v3425_v49 = vsel %vm805_vm2, %v3399_v46, %v3400_v26  ;;  %v13447_v43 = vmul.f32 %v3121_v56, %v11930_v59  ;;  %v3327_v62 = vsel %vm706_vm3, %v3301_v5, %v3302_v27  ;;  %v3173_v19 = vsel %vm548_vm4, %v3147_v10, %v3148_v29  ;;  %9870 = vmatpush3.msra.mxu0 %v3496_v61  ;;  %v3509_v56 = vld [vmem:[#allocation7 + $0x488] sm:$0xff]  ;;  %v3506_v61 = vld [vmem:[#allocation7 + $0x470] sm:$0xff] }
 0x7bd   :  { %3427 = vst.msk [vmem:[#allocation2 + $0x10] sm:$0xff] %vm563_vm1, %v3425_v49  ;;  %3343 = vrot.lane.b32.xlu0 %v3327_v62, %s11659_s0  ;;  %3176 = vst.msk [vmem:[#allocation2 + $0x18] sm:$0xff] %vm563_vm1, %v3173_v19  ;;  %9871 = vmatprep.subr.mxu0 %v3511_v28  ;;  %v3508_v49 = vld [vmem:[#allocation7 + $0x480] sm:$0xff]  ;;  %v3491_v19 = vld [vmem:[#allocation7 + $0x3f8] sm:$0xff] }
 0x7be   :  { %v3149_v63 = vrot.slane %v13447_v43, 6  ;;  %v3401_v47 = vrot.slane %v13447_v43, 2  ;;  %3289 = vst.msk [vmem:[#allocation2 + $0x38] sm:$0xff] %vm563_vm1, %v13447_v43  ;;  %v3303_v20 = vrot.slane %v13447_v43, 1  ;;  %9872 = vmatpush3.msra.mxu0 %v3495_v15  ;;  %v3492_v62 = vld [vmem:[#allocation7 + $0x400] sm:$0xff]  ;;  %v3490_v28 = vld [vmem:[#allocation7 + $0x3f0] sm:$0xff] }
 0x7bf   :  { %9873 = vmatprep.subr.mxu0 %v3510_v52  ;;  %v3489_v52 = vld [vmem:[#allocation7 + $0x3e8] sm:$0xff] }
 0x7c0   :  { %v3424_v33 = vsel %vm805_vm2, %v3400_v26, %v3401_v47  ;;  %v3326_v23 = vsel %vm706_vm3, %v3302_v27, %v3303_v20  ;;  %v3172_v21 = vsel %vm548_vm4, %v3148_v29, %v3149_v63  ;;  %9874 = vmatpush3.msra.mxu0 %v3494_v51 }
 0x7c1   :  { %3428 = vst.msk [vmem:[#allocation2 + $0x28] sm:$0xff] %vm563_vm1, %v3424_v33  ;;  %3345 = vrot.lane.b32.xlu0 %v3326_v23, %s11659_s0  ;;  %3177 = vst.msk [vmem:[#allocation2 + $0x30] sm:$0xff] %vm563_vm1, %v3172_v21  ;;  %9875 = vmatprep.subr.mxu0 %v3509_v56  ;;  %v3505_v33 = vld [vmem:[#allocation7 + $0x468] sm:$0xff]  ;;  %v3504_v21 = vld [vmem:[#allocation7 + $0x460] sm:$0xff] }
 0x7c2   :  { %v3086_v26 = vpop.permute.xlu1 %3085  ;;  %9876 = vmatpush3.msra.mxu0 %v3493_v8 }
 0x7c3   :  { %v3123_v27 = vmul.f32 %v3086_v26, %v13339_v55  ;;  %9877 = vmatprep.subr.mxu0 %v3508_v49  ;;  %v3488_v26 = vld [vmem:[#allocation7 + $0x3e0] sm:$0xff] }
 0x7c4   :  { %v3443_v4 = vld [vmem:[#allocation2 + $0x10] sm:$0xff]  ;;  %9878 = vmatpush3.msra.mxu0 %v3492_v62 }
 0x7c5   :  { %v13482_v29 = vmul.f32 %v3123_v27, %v11935_v9  ;;  %10693 = vmatprep.mubr.msk.f32.mxu1 %vm563_vm1, %v3443_v4  ;;  %9879 = vmatprep.subr.mxu0 %v3507_v18  ;;  %v3503_v62 = vld [vmem:[#allocation7 + $0x458] sm:$0xff] }
 0x7c6   :  { %9880 = vmatpush3.msra.mxu0 %v3491_v19  ;;  %v3487_v18 = vld [vmem:[#allocation7 + $0x3d8] sm:$0xff]  ;;  %v3502_v19 = vld [vmem:[#allocation7 + $0x450] sm:$0xff] }
 0x7c7   :  { %3291 = vst.msk [vmem:[#allocation2 + $0x68] sm:$0xff] %vm563_vm1, %v13482_v29  ;;  %9881 = vmatprep.subr.mxu0 %v3506_v61 }
 0x7c8   :  { %v3446_v55 = vld [vmem:[#allocation2 + $0x28] sm:$0xff]  ;;  %9882 = vmatpush3.msra.mxu0 %v3490_v28 }
 0x7c9   :  { %10694 = vmatmul.mubr.msk.f32.vlgmr.msra.gmra.mxu1 %vm563_vm1, %v3446_v55  ;;  %9883 = vmatprep.subr.mxu0 %v3505_v33  ;;  %v3500_v33 = vld [vmem:[#allocation7 + $0x440] sm:$0xff] }
 0x7ca   :  { %v3090_v15 = vpop.permute.xlu1 %3089  ;;  %9884 = vmatpush3.msra.mxu0 %v3489_v52  ;;  %v3484_v52 = vld [vmem:[#allocation7 + $0x3c0] sm:$0xff] }
 0x7cb   :  { %v3125_v23 = vmul.f32 %v3090_v15, %v13349_v35  ;;  %9885 = vmatprep.subr.mxu0 %v3504_v21  ;;  %v3485_v15 = vld [vmem:[#allocation7 + $0x3c8] sm:$0xff] }
 0x7cc   :  { %9886 = vmatpush3.msra.mxu0 %v3488_v26 }
 0x7cd   :  { %v13490_v51 = vmul.f32 %v3125_v23, %v11979_v44  ;;  %9887 = vmatprep.subr.mxu0 %v3503_v62 }
 0x7ce   :  { %9888 = vmatpush3.msra.mxu0 %v3487_v18  ;;  %v3190_v18 = vrot.slane %v13431_v41, 7 }
 0x7cf   :  { %3293 = vst.msk [vmem:[#allocation2 + $0x98] sm:$0xff] %vm563_vm1, %v13490_v51  ;;  %9889 = vmatprep.subr.mxu0 %v3502_v19 }
 0x7d1   :  { %v3094_v56 = vpop.permute.xlu1 %3093 }
 0x7d2   :  { %v3127_v27 = vmul.f32 %v3094_v56, %v13359_v17  ;;  %v3486_v17 = vld [vmem:[#allocation7 + $0x3d0] sm:$0xff] }
 0x7d3   :  { %9890 = vmatpush3.msra.mxu0 %v3486_v17 }
 0x7d4   :  { %v13496_v35 = vmul.f32 %v3127_v27, %v12056_v25  ;;  %v3189_v27 = vrot.slane %v13425_v54, 7 }
 0x7d6   :  { %3295 = vst.msk [vmem:[#allocation2 + $0xc8] sm:$0xff] %vm563_vm1, %v13496_v35 }
 0x7d9   :  { %v3098_v8 = vpop.permute.xlu1 %3097 }
 0x7da   :  { %v3129_v4 = vmul.f32 %v3098_v8, %v13369_v3  ;;  %v3501_v3 = vld [vmem:[#allocation7 + $0x448] sm:$0xff] }
 0x7db   :  { %9891 = vmatprep.subr.mxu0 %v3501_v3  ;;  %v3191_v3 = vrot.slane %v13447_v43, 7  ;;  %v3153_v43 = vrot.slane %v13490_v51, 6 }
 0x7dc   :  { %v13502_v49 = vmul.f32 %v3129_v4, %v12129_v36  ;;  %9892 = vmatpush3.msra.mxu0 %v3485_v15  ;;  %v3403_v15 = vrot.slane %v13482_v29, 2 }
 0x7dd   :  { %9893 = vmatprep.subr.mxu0 %v3500_v33 }
 0x7de   :  { %3297 = vst.msk [vmem:[#allocation2 + $0xf8] sm:$0xff] %vm563_vm1, %v13502_v49  ;;  %9894 = vmatpush3.msra.mxu0 %v3484_v52 }
 0x7e2   :  { %v3102_v55 = vpop.permute.xlu1 %3101 }
 0x7e3   :  { %v3131_v61 = vmul.f32 %v3102_v55, %v13380_v50 }
 0x7e5   :  { %v13508_v28 = vmul.f32 %v3131_v61, %v12202_v39  ;;  %v3104_v23 = vpop.permute.xlu0 %3103 }
 0x7e6   :  { %v3132_v21 = vmul.f32 %v3104_v23, %v13391_v48 }
 0x7e7   :  { %3299 = vst.msk [vmem:[#allocation2 + $0x128] sm:$0xff] %vm563_vm1, %v13508_v28  ;;  %v3411_v26 = vrot.slane %v13508_v28, 2  ;;  %v3159_v41 = vrot.slane %v13508_v28, 6 }
 0x7e8   :  { %v13514_v50 = vmul.f32 %v3132_v21, %v11884_v14 }
 0x7e9   :  { %v3084_v56 = vpop.permute.xlu0 %3083 }
 0x7ea   :  { %v3160_v8 = vrot.slane %v13514_v50, 6  ;;  %v3412_v4 = vrot.slane %v13514_v50, 2  ;;  %3300 = vst.msk [vmem:[#allocation2 + $0x140] sm:$0xff] %vm563_vm1, %v13514_v50  ;;  %v3122_v48 = vmul.f32 %v3084_v56, %v13378_v60  ;;  %v3202_v62 = vrot.slane %v13514_v50, 7 }
 0x7eb   :  { %v3215_v56 = vsel %vm592_vm5, %v3189_v27, %v3190_v18 }
 0x7ec   :  { %v3413_v19 = vsel %vm805_vm2, %v3411_v26, %v3412_v4  ;;  %v3426_v55 = vsel %vm805_vm2, %v3412_v4, %v3399_v46  ;;  %v13534_v17 = vmul.f32 %v3122_v48, %v11932_v1  ;;  %v3216_v60 = vsel %vm592_vm5, %v3202_v62, %v3189_v27 }
 0x7ed   :  { %3439 = vst.msk [vmem:[#allocation2 + $0x130] sm:$0xff] %vm563_vm1, %v3413_v19  ;;  %3440 = vst.msk [vmem:[#allocation2 + $0x148] sm:$0xff] %vm563_vm1, %v3426_v55  ;;  %3231 = vrot.lane.b32.xlu1 %v3216_v60, %s11659_s0  ;;  %v3088_v61 = vpop.permute.xlu0 %3087  ;;  %v3174_v46 = vsel %vm548_vm4, %v3160_v8, %v3147_v10  ;;  %v3161_v10 = vsel %vm548_vm4, %v3159_v41, %v3160_v8  ;;  %v3151_v8 = vrot.slane %v13482_v29, 6  ;;  %v3405_v55 = vrot.slane %v13490_v51, 2 }
 0x7ee   :  { %v3402_v33 = vrot.slane %v13534_v17, 2  ;;  %3290 = vst.msk [vmem:[#allocation2 + $0x50] sm:$0xff] %vm563_vm1, %v13534_v17  ;;  %v3124_v23 = vmul.f32 %v3088_v61, %v13394_v24  ;;  %v3304_v52 = vrot.slane %v13534_v17, 1  ;;  %3175 = vst.msk [vmem:[#allocation2] sm:$0xff] %vm563_vm1, %v3174_v46  ;;  %v3150_v21 = vrot.slane %v13534_v17, 6 }
 0x7ef   :  { %3188 = vst.msk [vmem:[#allocation2 + $0x138] sm:$0xff] %vm563_vm1, %v3161_v10  ;;  %v3214_v19 = vsel %vm592_vm5, %v3190_v18, %v3191_v3  ;;  %v3305_v61 = vrot.slane %v13482_v29, 1 }
 0x7f0   :  { %v3422_v4 = vsel %vm805_vm2, %v3402_v33, %v3403_v15  ;;  %v3423_v24 = vsel %vm805_vm2, %v3401_v47, %v3402_v33  ;;  %v13570_v48 = vmul.f32 %v3124_v23, %v11941_v22  ;;  %v3325_v27 = vsel %vm706_vm3, %v3303_v20, %v3304_v52 }
 0x7f1   :  { %3429 = vst.msk [vmem:[#allocation2 + $0x40] sm:$0xff] %vm563_vm1, %v3423_v24  ;;  %3430 = vst.msk [vmem:[#allocation2 + $0x58] sm:$0xff] %vm563_vm1, %v3422_v4  ;;  %3233 = vrot.lane.b32.xlu1 %v3215_v56, %s11659_s0  ;;  %3347 = vrot.lane.b32.xlu0 %v3325_v27, %s11659_s0  ;;  %v3092_v47 = vpop.permute.xlu0 %3091  ;;  %v3192_v33 = vrot.slane %v13534_v17, 7  ;;  %v3171_v18 = vsel %vm548_vm4, %v3149_v63, %v3150_v21  ;;  %v3170_v23 = vsel %vm548_vm4, %v3150_v21, %v3151_v8 }
 0x7f2   :  { %v3404_v20 = vrot.slane %v13570_v48, 2  ;;  %3292 = vst.msk [vmem:[#allocation2 + $0x80] sm:$0xff] %vm563_vm1, %v13570_v48  ;;  %v3126_v60 = vmul.f32 %v3092_v47, %v13401_v11  ;;  %v3152_v46 = vrot.slane %v13570_v48, 6  ;;  %v3324_v17 = vsel %vm706_vm3, %v3304_v52, %v3305_v61  ;;  %3178 = vst.msk [vmem:[#allocation2 + $0x48] sm:$0xff] %vm563_vm1, %v3171_v18 }
 0x7f3   :  { %3179 = vst.msk [vmem:[#allocation2 + $0x60] sm:$0xff] %vm563_vm1, %v3170_v23  ;;  %v3407_v21 = vrot.slane %v13496_v35, 2 }
 0x7f4   :  { %v3420_v56 = vsel %vm805_vm2, %v3404_v20, %v3405_v55  ;;  %v3421_v11 = vsel %vm805_vm2, %v3403_v15, %v3404_v20  ;;  %v13603_v10 = vmul.f32 %v3126_v60, %v12021_v2  ;;  %v3306_v15 = vrot.slane %v13570_v48, 1 }
 0x7f5   :  { %3431 = vst.msk [vmem:[#allocation2 + $0x70] sm:$0xff] %vm563_vm1, %v3421_v11  ;;  %3432 = vst.msk [vmem:[#allocation2 + $0x88] sm:$0xff] %vm563_vm1, %v3420_v56  ;;  %3235 = vrot.lane.b32.xlu1 %v3214_v19, %s11659_s0  ;;  %3349 = vrot.lane.b32.xlu0 %v3324_v17, %s11659_s0  ;;  %v3096_v63 = vpop.permute.xlu0 %3095  ;;  %v3169_v27 = vsel %vm548_vm4, %v3151_v8, %v3152_v46  ;;  %v3168_v47 = vsel %vm548_vm4, %v3152_v46, %v3153_v43  ;;  %v3155_v8 = vrot.slane %v13496_v35, 6 }
 0x7f6   :  { %v3406_v52 = vrot.slane %v13603_v10, 2  ;;  %3294 = vst.msk [vmem:[#allocation2 + $0xb0] sm:$0xff] %vm563_vm1, %v13603_v10  ;;  %v3128_v4 = vmul.f32 %v3096_v63, %v13405_v37  ;;  %v3154_v24 = vrot.slane %v13603_v10, 6  ;;  %v3213_v37 = vsel %vm592_vm5, %v3191_v3, %v3192_v33  ;;  %3180 = vst.msk [vmem:[#allocation2 + $0x78] sm:$0xff] %vm563_vm1, %v3169_v27 }
 0x7f7   :  { %3181 = vst.msk [vmem:[#allocation2 + $0x90] sm:$0xff] %vm563_vm1, %v3168_v47  ;;  %v3193_v3 = vrot.slane %v13482_v29, 7  ;;  %v3409_v56 = vrot.slane %v13502_v49, 2  ;;  %v3307_v63 = vrot.slane %v13490_v51, 1 }
 0x7f8   :  { %v3418_v19 = vsel %vm805_vm2, %v3406_v52, %v3407_v21  ;;  %v3419_v20 = vsel %vm805_vm2, %v3405_v55, %v3406_v52  ;;  %v13630_v60 = vmul.f32 %v3128_v4, %v12092_v0  ;;  %v3449_v18 = vld [vmem:[#allocation2 + $0x40] sm:$0xff]  ;;  %v3452_v23 = vld [vmem:[#allocation2 + $0x58] sm:$0xff]  ;;  %v3323_v55 = vsel %vm706_vm3, %v3305_v61, %v3306_v15 }
 0x7f9   :  { %3433 = vst.msk [vmem:[#allocation2 + $0xa0] sm:$0xff] %vm563_vm1, %v3419_v20  ;;  %3434 = vst.msk [vmem:[#allocation2 + $0xb8] sm:$0xff] %vm563_vm1, %v3418_v19  ;;  %10696 = vmatprep.mubr.msk.f32.mxu1 %vm563_vm1, %v3449_v18  ;;  %3237 = vrot.lane.b32.xlu1 %v3213_v37, %s11659_s0  ;;  %v3100_v46 = vpop.permute.xlu0 %3099  ;;  %v3212_v29 = vsel %vm592_vm5, %v3192_v33, %v3193_v3  ;;  %v3167_v52 = vsel %vm548_vm4, %v3153_v43, %v3154_v24  ;;  %v3194_v18 = vrot.slane %v13570_v48, 7 }
 0x7fa   :  { %v3408_v11 = vrot.slane %v13630_v60, 2  ;;  %3296 = vst.msk [vmem:[#allocation2 + $0xe0] sm:$0xff] %vm563_vm1, %v13630_v60  ;;  %3351 = vrot.lane.b32.xlu0 %v3323_v55, %s11659_s0  ;;  %v3130_v17 = vmul.f32 %v3100_v46, %v13411_v7  ;;  %10697 = vmatmul.mubr.msk.f32.gmra.mxu1 %vm563_vm1, %v3452_v23  ;;  %v3156_v61 = vrot.slane %v13630_v60, 6  ;;  %v3166_v4 = vsel %vm548_vm4, %v3154_v24, %v3155_v8 }
 0x7fb   :  { %3182 = vst.msk [vmem:[#allocation2 + $0xa8] sm:$0xff] %vm563_vm1, %v3167_v52  ;;  %3183 = vst.msk [vmem:[#allocation2 + $0xc0] sm:$0xff] %vm563_vm1, %v3166_v4  ;;  %v3157_v33 = vrot.slane %v13502_v49, 6  ;;  %v3322_v43 = vsel %vm706_vm3, %v3306_v15, %v3307_v63  ;;  %v3211_v46 = vsel %vm592_vm5, %v3193_v3, %v3194_v18  ;;  %v3195_v3 = vrot.slane %v13490_v51, 7 }
 0x7fc   :  { %v3416_v27 = vsel %vm805_vm2, %v3408_v11, %v3409_v56  ;;  %v3417_v7 = vsel %vm805_vm2, %v3407_v21, %v3408_v11  ;;  %v13664_v47 = vmul.f32 %v3130_v17, %v16985_v6  ;;  %v3455_v19 = vld [vmem:[#allocation2 + $0x70] sm:$0xff]  ;;  %v3458_v20 = vld [vmem:[#allocation2 + $0x88] sm:$0xff]  ;;  %v3308_v21 = vrot.slane %v13603_v10, 1 }
 0x7fd   :  { %3435 = vst.msk [vmem:[#allocation2 + $0xd0] sm:$0xff] %vm563_vm1, %v3417_v7  ;;  %3436 = vst.msk [vmem:[#allocation2 + $0xe8] sm:$0xff] %vm563_vm1, %v3416_v27  ;;  %3239 = vrot.lane.b32.xlu1 %v3212_v29, %s11659_s0  ;;  %10699 = vmatprep.mubr.msk.f32.mxu1 %vm563_vm1, %v3455_v19  ;;  %v3165_v37 = vsel %vm548_vm4, %v3155_v8, %v3156_v61  ;;  %v3164_v23 = vsel %vm548_vm4, %v3156_v61, %v3157_v33  ;;  %v3309_v61 = vrot.slane %v13496_v35, 1 }
 0x7fe   :  { %v3158_v48 = vrot.slane %v13664_v47, 6  ;;  %v3410_v24 = vrot.slane %v13664_v47, 2  ;;  %3298 = vst.msk [vmem:[#allocation2 + $0x110] sm:$0xff] %vm563_vm1, %v13664_v47  ;;  %3353 = vrot.lane.b32.xlu0 %v3322_v43, %s11659_s0  ;;  %10700 = vmatmul.mubr.msk.f32.gmra.mxu1 %vm563_vm1, %v3458_v20  ;;  %3184 = vst.msk [vmem:[#allocation2 + $0xd8] sm:$0xff] %vm563_vm1, %v3165_v37  ;;  %v3196_v4 = vrot.slane %v13603_v10, 7  ;;  %v3479_v20 = vld [vmem:[#allocation2 + $0x130] sm:$0xff] }
 0x7ff   :  { %3185 = vst.msk [vmem:[#allocation2 + $0xf0] sm:$0xff] %vm563_vm1, %v3164_v23  ;;  %v3320_v51 = vsel %vm706_vm3, %v3308_v21, %v3309_v61  ;;  %v3312_v37 = vrot.slane %v13664_v47, 1  ;;  %v3199_v23 = vrot.slane %v13502_v49, 7 }
 0x800   :  { %v3414_v15 = vsel %vm805_vm2, %v3410_v24, %v3411_v26  ;;  %v3415_v55 = vsel %vm805_vm2, %v3409_v56, %v3410_v24  ;;  %v3461_v11 = vld [vmem:[#allocation2 + $0xa0] sm:$0xff]  ;;  %v3464_v17 = vld [vmem:[#allocation2 + $0xb8] sm:$0xff]  ;;  %v3321_v26 = vsel %vm706_vm3, %v3307_v63, %v3308_v21  ;;  %v3163_v8 = vsel %vm548_vm4, %v3157_v33, %v3158_v48  ;;  %v3482_v24 = vld [vmem:[#allocation2 + $0x148] sm:$0xff] }
 0x801   :  { %3437 = vst.msk [vmem:[#allocation2 + $0x100] sm:$0xff] %vm563_vm1, %v3415_v55  ;;  %3438 = vst.msk [vmem:[#allocation2 + $0x118] sm:$0xff] %vm563_vm1, %v3414_v15  ;;  %3241 = vrot.lane.b32.xlu1 %v3211_v46, %s11659_s0  ;;  %10702 = vmatprep.mubr.msk.f32.mxu1 %vm563_vm1, %v3461_v11  ;;  %v3162_v56 = vsel %vm548_vm4, %v3158_v48, %v3159_v41  ;;  %v3210_v63 = vsel %vm592_vm5, %v3194_v18, %v3195_v3  ;;  %v3310_v41 = vrot.slane %v13630_v60, 1 }
 0x802   :  { %3355 = vrot.lane.b32.xlu0 %v3321_v26, %s11659_s0  ;;  %10703 = vmatmul.mubr.msk.f32.gmra.mxu1 %vm563_vm1, %v3464_v17  ;;  %3186 = vst.msk [vmem:[#allocation2 + $0x108] sm:$0xff] %vm563_vm1, %v3163_v8  ;;  %3187 = vst.msk [vmem:[#allocation2 + $0x120] sm:$0xff] %vm563_vm1, %v3162_v56  ;;  %v3209_v27 = vsel %vm592_vm5, %v3195_v3, %v3196_v4  ;;  %v3197_v18 = vrot.slane %v13496_v35, 7  ;;  %v3311_v33 = vrot.slane %v13502_v49, 1  ;;  %v3198_v21 = vrot.slane %v13630_v60, 7 }
 0x803   :  { %v3319_v10 = vsel %vm706_vm3, %v3309_v61, %v3310_v41  ;;  %v3313_v15 = vrot.slane %v13508_v28, 1  ;;  %v3200_v46 = vrot.slane %v13664_v47, 7  ;;  %v3314_v17 = vrot.slane %v13514_v50, 1 }
 0x804   :  { %v3467_v29 = vld [vmem:[#allocation2 + $0xd0] sm:$0xff]  ;;  %v3470_v52 = vld [vmem:[#allocation2 + $0xe8] sm:$0xff]  ;;  %v3208_v43 = vsel %vm592_vm5, %v3196_v4, %v3197_v18  ;;  %v3318_v48 = vsel %vm706_vm3, %v3310_v41, %v3311_v33  ;;  %v3207_v35 = vsel %vm592_vm5, %v3197_v18, %v3198_v21  ;;  %v3317_v60 = vsel %vm706_vm3, %v3311_v33, %v3312_v37 }
 0x805   :  { %3243 = vrot.lane.b32.xlu1 %v3210_v63, %s11659_s0  ;;  %10705 = vmatprep.mubr.msk.f32.mxu1 %vm563_vm1, %v3467_v29  ;;  %v3206_v55 = vsel %vm592_vm5, %v3198_v21, %v3199_v23  ;;  %v3316_v11 = vsel %vm706_vm3, %v3312_v37, %v3313_v15  ;;  %v3205_v26 = vsel %vm592_vm5, %v3199_v23, %v3200_v46  ;;  %v3201_v47 = vrot.slane %v13508_v28, 7 }
 0x806   :  { %3357 = vrot.lane.b32.xlu0 %v3320_v51, %s11659_s0  ;;  %10706 = vmatmul.mubr.msk.f32.gmra.mxu1 %vm563_vm1, %v3470_v52  ;;  %v3315_v49 = vsel %vm706_vm3, %v3313_v15, %v3314_v17  ;;  %v3328_v3 = vsel %vm706_vm3, %v3314_v17, %v3301_v5 }
 0x807   :  { %v3204_v8 = vsel %vm592_vm5, %v3200_v46, %v3201_v47  ;;  %v3203_v56 = vsel %vm592_vm5, %v3201_v47, %v3202_v62 }
 0x808   :  { %v3473_v7 = vld [vmem:[#allocation2 + $0x100] sm:$0xff]  ;;  %v3476_v19 = vld [vmem:[#allocation2 + $0x118] sm:$0xff] }
 0x809   :  { %3245 = vrot.lane.b32.xlu1 %v3209_v27, %s11659_s0  ;;  %10708 = vmatprep.mubr.msk.f32.mxu1 %vm563_vm1, %v3473_v7 }
 0x80a   :  { %3359 = vrot.lane.b32.xlu0 %v3319_v10, %s11659_s0  ;;  %10709 = vmatmul.mubr.msk.f32.gmra.mxu1 %vm563_vm1, %v3476_v19 }
 0x80b   :  { %10711 = vmatprep.mubr.msk.f32.mxu1 %vm563_vm1, %v3479_v20 }
 0x80d   :  { %3247 = vrot.lane.b32.xlu1 %v3208_v43, %s11659_s0 }
 0x80e   :  { %3361 = vrot.lane.b32.xlu0 %v3318_v48, %s11659_s0  ;;  %10712 = vmatmul.mubr.msk.f32.gmra.mxu1 %vm563_vm1, %v3482_v24 }
 0x811   :  { %3249 = vrot.lane.b32.xlu1 %v3207_v35, %s11659_s0 }
 0x812   :  { %3363 = vrot.lane.b32.xlu0 %v3317_v60, %s11659_s0 }
 0x815   :  { %3251 = vrot.lane.b32.xlu1 %v3206_v55, %s11659_s0 }
 0x816   :  { %3365 = vrot.lane.b32.xlu0 %v3316_v11, %s11659_s0 }
 0x819   :  { %3253 = vrot.lane.b32.xlu1 %v3205_v26, %s11659_s0 }
 0x81a   :  { %3367 = vrot.lane.b32.xlu0 %v3315_v49, %s11659_s0 }
 0x81d   :  { %3255 = vrot.lane.b32.xlu1 %v3204_v8, %s11659_s0 }
 0x81e   :  { %3369 = vrot.lane.b32.xlu0 %v3328_v3, %s11659_s0 }
 0x821   :  { %3257 = vrot.lane.b32.xlu1 %v3203_v56, %s11659_s0 }
 0x82f   :  { %v3344_v28 = vpop.permute.xlu0 %3343 }
 0x830   :  { %3385 = vst.msk [vmem:[#allocation2 + $0x8] sm:$0xff] %vm663_vm6, %v3344_v28 }
 0x833   :  { %v3346_v61 = vpop.permute.xlu0 %3345 }
 0x834   :  { %3386 = vst.msk [vmem:[#allocation2 + $0x20] sm:$0xff] %vm663_vm6, %v3346_v61 }
 0x837   :  { %v3442_v54 = vld [vmem:[#allocation2 + $0x8] sm:$0xff] }
 0x838   :  { %3638 = vmatprep.mubr.f32.mxu0 %v3442_v54 }
 0x83b   :  { %v3445_v4 = vld [vmem:[#allocation2 + $0x20] sm:$0xff] }
 0x85f   :  { %v3232_v5 = vpop.permute.xlu1 %3231 }
 0x860   :  { %3273 = vst.msk [vmem:[#allocation2] sm:$0xff] %vm663_vm6, %v3232_v5 }
 0x863   :  { %v3234_v63 = vpop.permute.xlu1 %3233  ;;  %v3348_v29 = vpop.permute.xlu0 %3347 }
 0x864   :  { %3274 = vst.msk [vmem:[#allocation2 + $0x18] sm:$0xff] %vm663_vm6, %v3234_v63  ;;  %3387 = vst.msk [vmem:[#allocation2 + $0x38] sm:$0xff] %vm663_vm6, %v3348_v29 }
 0x867   :  { %v3236_v50 = vpop.permute.xlu1 %3235  ;;  %v3350_v62 = vpop.permute.xlu0 %3349  ;;  %v3441_v52 = vld [vmem:[#allocation2] sm:$0xff] }
 0x868   :  { %3275 = vst.msk [vmem:[#allocation2 + $0x30] sm:$0xff] %vm663_vm6, %v3236_v50  ;;  %3388 = vst.msk [vmem:[#allocation2 + $0x50] sm:$0xff] %vm663_vm6, %v3350_v62  ;;  %3639 = vmatmul.mubr.f32.vlgmr.msra.gmra.mxu0 %v3441_v52 }
 0x869   :  { %3643 = vmatprep.mubr.f32.mxu0 %v3445_v4 }
 0x86b   :  { %v3238_v51 = vpop.permute.xlu1 %3237  ;;  %v3444_v41 = vld [vmem:[#allocation2 + $0x18] sm:$0xff] }
 0x86c   :  { %v3448_v27 = vld [vmem:[#allocation2 + $0x38] sm:$0xff]  ;;  %3276 = vst.msk [vmem:[#allocation2 + $0x48] sm:$0xff] %vm663_vm6, %v3238_v51  ;;  %v3352_v7 = vpop.permute.xlu0 %3351  ;;  %3644 = vmatmul.mubr.f32.gmra.mxu0 %v3444_v41 }
 0x86d   :  { %3389 = vst.msk [vmem:[#allocation2 + $0x68] sm:$0xff] %vm663_vm6, %v3352_v7  ;;  %3648 = vmatprep.mubr.f32.mxu0 %v3448_v27 }
 0x86f   :  { %v3240_v19 = vpop.permute.xlu1 %3239  ;;  %v3447_v10 = vld [vmem:[#allocation2 + $0x30] sm:$0xff] }
 0x870   :  { %v3451_v20 = vld [vmem:[#allocation2 + $0x50] sm:$0xff]  ;;  %3277 = vst.msk [vmem:[#allocation2 + $0x60] sm:$0xff] %vm663_vm6, %v3240_v19  ;;  %v3354_v18 = vpop.permute.xlu0 %3353  ;;  %3649 = vmatmul.mubr.f32.gmra.mxu0 %v3447_v10 }
 0x871   :  { %3390 = vst.msk [vmem:[#allocation2 + $0x80] sm:$0xff] %vm663_vm6, %v3354_v18  ;;  %3653 = vmatprep.mubr.f32.mxu0 %v3451_v20 }
 0x873   :  { %v3242_v33 = vpop.permute.xlu1 %3241  ;;  %v3450_v43 = vld [vmem:[#allocation2 + $0x48] sm:$0xff] }
 0x874   :  { %3278 = vst.msk [vmem:[#allocation2 + $0x78] sm:$0xff] %vm663_vm6, %v3242_v33  ;;  %v3356_v21 = vpop.permute.xlu0 %3355  ;;  %3654 = vmatmul.mubr.f32.gmra.mxu0 %v3450_v43  ;;  %v3454_v48 = vld [vmem:[#allocation2 + $0x68] sm:$0xff] }
 0x875   :  { %3391 = vst.msk [vmem:[#allocation2 + $0x98] sm:$0xff] %vm663_vm6, %v3356_v21  ;;  %3658 = vmatprep.mubr.f32.mxu0 %v3454_v48  ;;  %v13809_v21 = vld [vmem:[#allocation8 + $0x3] ss:$0 sm:$0xff] }
 0x877   :  { %v3244_v24 = vpop.permute.xlu1 %3243  ;;  %v3453_v37 = vld [vmem:[#allocation2 + $0x60] sm:$0xff] }
 0x878   :  { %3279 = vst.msk [vmem:[#allocation2 + $0x90] sm:$0xff] %vm663_vm6, %v3244_v24  ;;  %v3358_v35 = vpop.permute.xlu0 %3357  ;;  %3659 = vmatmul.mubr.f32.gmra.mxu0 %v3453_v37  ;;  %v3457_v60 = vld [vmem:[#allocation2 + $0x80] sm:$0xff] }
 0x879   :  { %3392 = vst.msk [vmem:[#allocation2 + $0xb0] sm:$0xff] %vm663_vm6, %v3358_v35  ;;  %3663 = vmatprep.mubr.f32.mxu0 %v3457_v60 }
 0x87b   :  { %v3246_v23 = vpop.permute.xlu1 %3245  ;;  %v3456_v15 = vld [vmem:[#allocation2 + $0x78] sm:$0xff] }
 0x87c   :  { %3280 = vst.msk [vmem:[#allocation2 + $0xa8] sm:$0xff] %vm663_vm6, %v3246_v23  ;;  %v3360_v55 = vpop.permute.xlu0 %3359  ;;  %3664 = vmatmul.mubr.f32.gmra.mxu0 %v3456_v15  ;;  %v3460_v46 = vld [vmem:[#allocation2 + $0x98] sm:$0xff] }
 0x87d   :  { %3393 = vst.msk [vmem:[#allocation2 + $0xc8] sm:$0xff] %vm663_vm6, %v3360_v55  ;;  %3668 = vmatprep.mubr.f32.mxu0 %v3460_v46 }
 0x87f   :  { %v3248_v11 = vpop.permute.xlu1 %3247  ;;  %v3459_v17 = vld [vmem:[#allocation2 + $0x90] sm:$0xff] }
 0x880   :  { %3281 = vst.msk [vmem:[#allocation2 + $0xc0] sm:$0xff] %vm663_vm6, %v3248_v11  ;;  %v3362_v26 = vpop.permute.xlu0 %3361  ;;  %3669 = vmatmul.mubr.f32.gmra.mxu0 %v3459_v17  ;;  %v3463_v49 = vld [vmem:[#allocation2 + $0xb0] sm:$0xff] }
 0x881   :  { %3394 = vst.msk [vmem:[#allocation2 + $0xe0] sm:$0xff] %vm663_vm6, %v3362_v26  ;;  %3673 = vmatprep.mubr.f32.mxu0 %v3463_v49 }
 0x883   :  { %v3250_v47 = vpop.permute.xlu1 %3249  ;;  %v3462_v8 = vld [vmem:[#allocation2 + $0xa8] sm:$0xff] }
 0x884   :  { %3282 = vst.msk [vmem:[#allocation2 + $0xd8] sm:$0xff] %vm663_vm6, %v3250_v47  ;;  %v3364_v3 = vpop.permute.xlu0 %3363  ;;  %3674 = vmatmul.mubr.f32.gmra.mxu0 %v3462_v8  ;;  %v3466_v56 = vld [vmem:[#allocation2 + $0xc8] sm:$0xff] }
 0x885   :  { %3395 = vst.msk [vmem:[#allocation2 + $0xf8] sm:$0xff] %vm663_vm6, %v3364_v3  ;;  %3678 = vmatprep.mubr.f32.mxu0 %v3466_v56 }
 0x887   :  { %v3252_v28 = vpop.permute.xlu1 %3251  ;;  %v3465_v61 = vld [vmem:[#allocation2 + $0xc0] sm:$0xff] }
 0x888   :  { %3283 = vst.msk [vmem:[#allocation2 + $0xf0] sm:$0xff] %vm663_vm6, %v3252_v28  ;;  %v3366_v54 = vpop.permute.xlu0 %3365  ;;  %3679 = vmatmul.mubr.f32.gmra.mxu0 %v3465_v61  ;;  %v3469_v5 = vld [vmem:[#allocation2 + $0xe0] sm:$0xff] }
 0x889   :  { %3396 = vst.msk [vmem:[#allocation2 + $0x110] sm:$0xff] %vm663_vm6, %v3366_v54  ;;  %3683 = vmatprep.mubr.f32.mxu0 %v3469_v5  ;;  %v10695_v43 = vpop.f32.mrf.mxu1 }
 0x88b   :  { %v3254_v63 = vpop.permute.xlu1 %3253  ;;  %v3468_v29 = vld [vmem:[#allocation2 + $0xd8] sm:$0xff]  ;;  %v3775_v60 = vpop.f32.mrf.mxu1 }
 0x88c   :  { %3284 = vst.msk [vmem:[#allocation2 + $0x108] sm:$0xff] %vm663_vm6, %v3254_v63  ;;  %v3368_v50 = vpop.permute.xlu0 %3367  ;;  %3684 = vmatmul.mubr.f32.gmra.mxu0 %v3468_v29  ;;  %v3472_v62 = vld [vmem:[#allocation2 + $0xf8] sm:$0xff] }
 0x88d   :  { %3397 = vst.msk [vmem:[#allocation2 + $0x128] sm:$0xff] %vm663_vm6, %v3368_v50  ;;  %3688 = vmatprep.mubr.f32.mxu0 %v3472_v62 }
 0x88f   :  { %v3256_v52 = vpop.permute.xlu1 %3255  ;;  %v3471_v4 = vld [vmem:[#allocation2 + $0xf0] sm:$0xff] }
 0x890   :  { %3285 = vst.msk [vmem:[#allocation2 + $0x120] sm:$0xff] %vm663_vm6, %v3256_v52  ;;  %v3370_v51 = vpop.permute.xlu0 %3369  ;;  %3689 = vmatmul.mubr.f32.gmra.mxu0 %v3471_v4  ;;  %v3475_v41 = vld [vmem:[#allocation2 + $0x110] sm:$0xff] }
 0x891   :  { %3398 = vst.msk [vmem:[#allocation2 + $0x140] sm:$0xff] %vm663_vm6, %v3370_v51  ;;  %3693 = vmatprep.mubr.f32.mxu0 %v3475_v41 }
 0x893   :  { %v3258_v27 = vpop.permute.xlu1 %3257  ;;  %v3474_v7 = vld [vmem:[#allocation2 + $0x108] sm:$0xff] }
 0x894   :  { %3286 = vst.msk [vmem:[#allocation2 + $0x138] sm:$0xff] %vm663_vm6, %v3258_v27  ;;  %3694 = vmatmul.mubr.f32.gmra.mxu0 %v3474_v7  ;;  %v3478_v19 = vld [vmem:[#allocation2 + $0x128] sm:$0xff] }
 0x895   :  { %3698 = vmatprep.mubr.f32.mxu0 %v3478_v19 }
 0x897   :  { %v3477_v10 = vld [vmem:[#allocation2 + $0x120] sm:$0xff] }
 0x898   :  { %3699 = vmatmul.mubr.f32.gmra.mxu0 %v3477_v10  ;;  %v3481_v20 = vld [vmem:[#allocation2 + $0x140] sm:$0xff] }
 0x899   :  { %3703 = vmatprep.mubr.f32.mxu0 %v3481_v20 }
 0x89b   :  { %v3480_v18 = vld [vmem:[#allocation2 + $0x138] sm:$0xff] }
 0x89c   :  { %3704 = vmatmul.mubr.f32.gmra.mxu0 %v3480_v18 }
 0x8ba   :  { %v13816_v26 = vpop.f32.mrf.mxu1 }
 0x8bc   :  { %v3785_v61 = vpop.f32.mrf.mxu1 }
 0x8be   :  { %v13829_v50 = vpop.f32.mrf.mxu1 }
 0x8c0   :  { %v3795_v41 = vpop.f32.mrf.mxu1 }
 0x928   :  { %v9895_v33 = vpop.f32.mrf.mxu0 }
 0x92a   :  { %v9896_v48 = vpop.f32.mrf.mxu0 }
 0x92b   :  { %v9897_v24 = vadd.f32 %v9896_v48, %v9895_v33  ;;  %v13839_v33 = vpop.f32.mrf.mxu1 }
 0x92c   :  { %v9898_v37 = vpop.f32.mrf.mxu0 }
 0x92d   :  { %v3641_v35 = vadd.f32 %v9897_v24, %v13809_v21 }
 0x92e   :  { %v9899_v23 = vpop.f32.mrf.mxu0 }
 0x92f   :  { %v13812_v15 = vadd.f32 %v3775_v60, %v3641_v35  ;;  %v9900_v55 = vadd.f32 %v9899_v23, %v9898_v37  ;;  %v3805_v23 = vpop.f32.mrf.mxu1 }
 0x930   :  { %v9901_v46 = vpop.f32.mrf.mxu0 }
 0x931   :  { %v9368_v11 = vmul.f32 -1.442695, %v13812_v15  ;;  %v3646_v17 = vadd.f32 %v9900_v55, %v13809_v21 }
 0x932   :  { %v9902_v49 = vpop.f32.mrf.mxu0 }
 0x933   :  { %11172 = vpow2.f32 %v9368_v11  ;;  %v13818_v47 = vadd.f32 %v10695_v43, %v3646_v17  ;;  %v9903_v8 = vadd.f32 %v9902_v49, %v9901_v46 }
 0x934   :  { %v13820_v3 = vpop.f32.mrf.mxu0 }
 0x935   :  { %v9369_v56 = vmul.f32 -1.442695, %v13818_v47  ;;  %v3651_v28 = vadd.f32 %v9903_v8, %v13809_v21 }
 0x936   :  { %v13824_v54 = vpop.f32.mrf.mxu0 }
 0x937   :  { %11174 = vpow2.f32 %v9369_v56  ;;  %v13826_v5 = vadd.f32 %v3785_v61, %v3651_v28  ;;  %v13849_v56 = vpop.f32.mrf.mxu1 }
 0x938   :  { %v9907_v63 = vpop.f32.mrf.mxu0 }
 0x939   :  { %v9370_v29 = vmul.f32 -1.442695, %v13826_v5 }
 0x93a   :  { %v9908_v62 = vpop.f32.mrf.mxu0 }
 0x93b   :  { %11176 = vpow2.f32 %v9370_v29  ;;  %v9909_v52 = vadd.f32 %v9908_v62, %v9907_v63  ;;  %v4388_v62 = vld [vmem:[#allocation7 + $0x638] sm:$0xff] }
 0x93c   :  { %v13831_v4 = vpop.f32.mrf.mxu0  ;;  %10714 = vmatprep.subr.mxu0 %v4388_v62 }
 0x93d   :  { %v3661_v51 = vadd.f32 %v9909_v52, %v13809_v21  ;;  %v3815_v52 = vpop.f32.mrf.mxu1  ;;  %10715 = vmatpush3.msra.mxu0 %v4388_v62  ;;  %v9906_v62 = vadd.f32 %v13824_v54, %v13820_v3 }
 0x93e   :  { %v13834_v27 = vpop.f32.mrf.mxu0 }
 0x93f   :  { %v13836_v7 = vadd.f32 %v3795_v41, %v3661_v51  ;;  %v3656_v3 = vadd.f32 %v9906_v62, %v13809_v21 }
 0x940   :  { %v11173_v19 = vpop.eup %11172  ;;  %v9913_v10 = vpop.f32.mrf.mxu0 }
 0x941   :  { %v3886_v20 = vadd.f32 1.0, %v11173_v19  ;;  %v9372_v18 = vmul.f32 -1.442695, %v13836_v7  ;;  %v4387_v19 = vld [vmem:[#allocation7 + $0x630] sm:$0xff] }
 0x942   :  { %v9914_v43 = vpop.f32.mrf.mxu0  ;;  %10716 = vmatprep.subr.mxu0 %v4387_v19 }
 0x943   :  { %11178 = vrcp.f32 %v3886_v20  ;;  %v9915_v48 = vadd.f32 %v9914_v43, %v9913_v10  ;;  %10717 = vmatpush3.msra.mxu0 %v4387_v19  ;;  %v4383_v19 = vld [vmem:[#allocation7 + $0x610] sm:$0xff] }
 0x944   :  { %v11175_v24 = vpop.eup %11174  ;;  %11180 = vpow2.f32 %v9372_v18  ;;  %v13841_v37 = vpop.f32.mrf.mxu0 }
 0x945   :  { %v3887_v35 = vadd.f32 1.0, %v11175_v24  ;;  %v3671_v60 = vadd.f32 %v9915_v48, %v13809_v21  ;;  %v4386_v48 = vld [vmem:[#allocation7 + $0x628] sm:$0xff]  ;;  %v13860_v24 = vpop.f32.mrf.mxu1 }
 0x946   :  { %v13844_v55 = vpop.f32.mrf.mxu0  ;;  %10718 = vmatprep.subr.mxu0 %v4386_v48 }
 0x947   :  { %11182 = vrcp.f32 %v3887_v35  ;;  %v13846_v46 = vadd.f32 %v3805_v23, %v3671_v60  ;;  %10719 = vmatpush3.msra.mxu0 %v4386_v48  ;;  %v4382_v48 = vld [vmem:[#allocation7 + $0x608] sm:$0xff] }
 0x948   :  { %v11177_v11 = vpop.eup %11176  ;;  %v9919_v17 = vpop.f32.mrf.mxu0 }
 0x949   :  { %v3888_v49 = vadd.f32 1.0, %v11177_v11  ;;  %v9374_v8 = vmul.f32 -1.442695, %v13846_v46  ;;  %v4385_v11 = vld [vmem:[#allocation7 + $0x620] sm:$0xff] }
 0x94a   :  { %v9920_v28 = vpop.f32.mrf.mxu0  ;;  %10720 = vmatprep.subr.mxu0 %v4385_v11 }
 0x94b   :  { %11184 = vrcp.f32 %v3888_v49  ;;  %v9921_v61 = vadd.f32 %v9920_v28, %v9919_v17  ;;  %v4384_v17 = vld [vmem:[#allocation7 + $0x618] sm:$0xff]  ;;  %10721 = vmatpush3.msra.mxu0 %v4385_v11 }
 0x94c   :  { %11186 = vpow2.f32 %v9374_v8  ;;  %v13851_v63 = vpop.f32.mrf.mxu0  ;;  %10722 = vmatprep.subr.mxu0 %v4384_v17 }
 0x94d   :  { %v3681_v29 = vadd.f32 %v9921_v61, %v13809_v21  ;;  %v3825_v61 = vpop.f32.mrf.mxu1  ;;  %10723 = vmatpush3.msra.mxu0 %v4384_v17  ;;  %v9912_v17 = vadd.f32 %v13834_v27, %v13831_v4  ;;  %v9918_v4 = vadd.f32 %v13844_v55, %v13841_v37 }
 0x94e   :  { %v13854_v51 = vpop.f32.mrf.mxu0  ;;  %10724 = vmatprep.subr.mxu0 %v4383_v19 }
 0x94f   :  { %v13856_v41 = vadd.f32 %v3815_v52, %v3681_v29  ;;  %10725 = vmatpush3.msra.mxu0 %v4383_v19  ;;  %v3676_v37 = vadd.f32 %v9918_v4, %v13809_v21 }
 0x950   :  { %v11179_v10 = vpop.eup %11178  ;;  %v9925_v20 = vpop.f32.mrf.mxu0  ;;  %10726 = vmatprep.subr.mxu0 %v4382_v48 }
 0x951   :  { %v11181_v18 = vpop.eup %11180  ;;  %v9376_v43 = vmul.f32 -1.442695, %v13856_v41  ;;  %3942 = vrot.lane.b32.xlu0 %v11179_v10, %s11659_s0  ;;  %10727 = vmatpush3.msra.mxu0 %v4382_v48 }
 0x952   :  { %v3890_v35 = vadd.f32 1.0, %v11181_v18  ;;  %v9926_v60 = vpop.f32.mrf.mxu0 }
 0x953   :  { %11188 = vpow2.f32 %v9376_v43  ;;  %v9927_v23 = vadd.f32 %v9926_v60, %v9925_v20  ;;  %v10713_v60 = vpop.f32.mrf.mxu1 }
 0x954   :  { %v11183_v49 = vpop.eup %11182  ;;  %11190 = vrcp.f32 %v3890_v35  ;;  %v9928_v8 = vpop.f32.mrf.mxu0  ;;  %v4381_v35 = vld [vmem:[#allocation7 + $0x600] sm:$0xff] }
 0x955   :  { %v3691_v28 = vadd.f32 %v9927_v23, %v13809_v21  ;;  %3944 = vrot.lane.b32.xlu1 %v11183_v49, %s11659_s0  ;;  %10728 = vmatprep.subr.mxu0 %v4381_v35 }
 0x956   :  { %v9929_v29 = vpop.f32.mrf.mxu0  ;;  %10729 = vmatpush3.msra.mxu0 %v4381_v35 }
 0x957   :  { %v13866_v52 = vadd.f32 %v3825_v61, %v3691_v28  ;;  %v3835_v61 = vpop.f32.mrf.mxu1 }
 0x958   :  { %v11185_v10 = vpop.eup %11184  ;;  %v9931_v20 = vpop.f32.mrf.mxu0 }
 0x959   :  { %v11187_v18 = vpop.eup %11186  ;;  %v9378_v43 = vmul.f32 -1.442695, %v13866_v52  ;;  %3946 = vrot.lane.b32.xlu1 %v11185_v10, %s11659_s0  ;;  %v13875_v10 = vadd.f32 %v13816_v26, %v3656_v3 }
 0x95a   :  { %v3892_v23 = vadd.f32 1.0, %v11187_v18  ;;  %v9932_v11 = vpop.f32.mrf.mxu0 }
 0x95b   :  { %11192 = vpow2.f32 %v9378_v43  ;;  %v9933_v54 = vadd.f32 %v9932_v11, %v9931_v20  ;;  %v3666_v20 = vadd.f32 %v9912_v17, %v13809_v21  ;;  %v9371_v26 = vmul.f32 -1.442695, %v13875_v10 }
 0x95c   :  { %11194 = vrcp.f32 %v3892_v23  ;;  %v9934_v49 = vpop.f32.mrf.mxu0  ;;  %v9924_v11 = vadd.f32 %v13854_v51, %v13851_v63 }
 0x95d   :  { %v3701_v28 = vadd.f32 %v9933_v54, %v13809_v21  ;;  %v13891_v54 = vadd.f32 %v13829_v50, %v3666_v20 }
 0x95e   :  { %v9935_v19 = vpop.f32.mrf.mxu0  ;;  %v3686_v17 = vadd.f32 %v9924_v11, %v13809_v21 }
 0x95f   :  { %v13877_v18 = vadd.f32 %v3835_v61, %v3701_v28  ;;  %v9936_v62 = vadd.f32 %v9935_v19, %v9934_v49  ;;  %v9930_v49 = vadd.f32 %v9929_v29, %v9928_v8  ;;  %v9373_v61 = vmul.f32 -1.442695, %v13891_v54 }
 0x960   :  { %v11189_v43 = vpop.eup %11188  ;;  %v13898_v19 = vadd.f32 %v13839_v33, %v3676_v37  ;;  %v13902_v50 = vadd.f32 %v13849_v56, %v3686_v17 }
 0x961   :  { %v11191_v27 = vpop.eup %11190  ;;  %v3894_v48 = vadd.f32 1.0, %v11189_v43  ;;  %v9380_v23 = vmul.f32 -1.442695, %v13877_v18  ;;  %v3706_v35 = vadd.f32 %v9936_v62, %v13809_v21 }
 0x962   :  { %3950 = vrot.lane.b32.xlu1 %v11191_v27, %s11659_s0  ;;  %v9375_v8 = vmul.f32 -1.442695, %v13898_v19  ;;  %v9377_v29 = vmul.f32 -1.442695, %v13902_v50 }
 0x963   :  { %11196 = vrcp.f32 %v3894_v48  ;;  %v13888_v3 = vadd.f32 %v10713_v60, %v3706_v35  ;;  %v3696_v60 = vadd.f32 %v9930_v49, %v13809_v21 }
 0x964   :  { %11198 = vpow2.f32 %v9380_v23 }
 0x965   :  { %v9381_v55 = vmul.f32 -1.442695, %v13888_v3  ;;  %11200 = vpow2.f32 %v9371_v26  ;;  %v13908_v62 = vadd.f32 %v13860_v24, %v3696_v60 }
 0x967   :  { %11202 = vpow2.f32 %v9381_v55  ;;  %v9379_v56 = vmul.f32 -1.442695, %v13908_v62 }
 0x968   :  { %v11193_v28 = vpop.eup %11192 }
 0x969   :  { %v11195_v63 = vpop.eup %11194  ;;  %v3896_v51 = vadd.f32 1.0, %v11193_v28 }
 0x96a   :  { %3954 = vrot.lane.b32.xlu1 %v11195_v63, %s11659_s0 }
 0x96b   :  { %11204 = vrcp.f32 %v3896_v51 }
 0x96c   :  { %11206 = vpow2.f32 %v9373_v61 }
 0x96d   :  { %11208 = vpow2.f32 %v9375_v8 }
 0x96e   :  { %11210 = vpow2.f32 %v9377_v29 }
 0x970   :  { %v11197_v33 = vpop.eup %11196 }
 0x971   :  { %v11199_v43 = vpop.eup %11198  ;;  %3958 = vrot.lane.b32.xlu1 %v11197_v33, %s11659_s0 }
 0x972   :  { %v3898_v20 = vadd.f32 1.0, %v11199_v43  ;;  %v11201_v4 = vpop.eup %11200 }
 0x973   :  { %v3889_v23 = vadd.f32 1.0, %v11201_v4 }
 0x974   :  { %11212 = vrcp.f32 %v3898_v20  ;;  %v11203_v21 = vpop.eup %11202 }
 0x975   :  { %v3899_v27 = vadd.f32 1.0, %v11203_v21  ;;  %11214 = vpow2.f32 %v9379_v56 }
 0x977   :  { %11216 = vrcp.f32 %v3899_v27  ;;  %v4380_v27 = vld [vmem:[#allocation7 + $0x5f8] sm:$0xff] }
 0x978   :  { %v11205_v48 = vpop.eup %11204  ;;  %11218 = vrcp.f32 %v3889_v23  ;;  %v4379_v23 = vld [vmem:[#allocation7 + $0x5f0] sm:$0xff]  ;;  %9959 = vmatprep.subr.mxu1 %v4380_v27 }
 0x979   :  { %v11207_v35 = vpop.eup %11206  ;;  %3962 = vrot.lane.b32.xlu1 %v11205_v48, %s11659_s0  ;;  %v4364_v48 = vld [vmem:[#allocation7 + $0x578] sm:$0xff] }
 0x97a   :  { %v3891_v24 = vadd.f32 1.0, %v11207_v35  ;;  %v11209_v26 = vpop.eup %11208  ;;  %9960 = vmatpush3.msra.mxu1 %v4364_v48 }
 0x97b   :  { %v11211_v11 = vpop.eup %11210  ;;  %v3893_v37 = vadd.f32 1.0, %v11209_v26  ;;  %9961 = vmatprep.subr.mxu1 %v4379_v23  ;;  %v4375_v23 = vld [vmem:[#allocation7 + $0x5d0] sm:$0xff] }
 0x97c   :  { %11220 = vrcp.f32 %v3891_v24  ;;  %v3895_v49 = vadd.f32 1.0, %v11211_v11  ;;  %v4363_v11 = vld [vmem:[#allocation7 + $0x570] sm:$0xff] }
 0x97d   :  { %11222 = vrcp.f32 %v3893_v37  ;;  %9962 = vmatpush3.msra.mxu1 %v4363_v11  ;;  %v4359_v11 = vld [vmem:[#allocation7 + $0x550] sm:$0xff] }
 0x97e   :  { %11224 = vrcp.f32 %v3895_v49  ;;  %v4378_v49 = vld [vmem:[#allocation7 + $0x5e8] sm:$0xff] }
 0x97f   :  { %9963 = vmatprep.subr.mxu1 %v4378_v49  ;;  %v4358_v49 = vld [vmem:[#allocation7 + $0x548] sm:$0xff] }
 0x981   :  { %v11213_v55 = vpop.eup %11212 }
 0x982   :  { %3966 = vrot.lane.b32.xlu1 %v11213_v55, %s11659_s0  ;;  %v11215_v17 = vpop.eup %11214 }
 0x983   :  { %v3897_v61 = vadd.f32 1.0, %v11215_v17 }
 0x984   :  { %v11217_v28 = vpop.eup %11216 }
 0x985   :  { %3968 = vrot.lane.b32.xlu0 %v11217_v28, %s11659_s0  ;;  %v11219_v63 = vpop.eup %11218  ;;  %11226 = vrcp.f32 %v3897_v61  ;;  %v4362_v28 = vld [vmem:[#allocation7 + $0x568] sm:$0xff] }
 0x986   :  { %9964 = vmatpush3.msra.mxu1 %v4362_v28 }
 0x989   :  { %3948 = vrot.lane.b32.xlu0 %v11219_v63, %s11659_s0  ;;  %v11221_v51 = vpop.eup %11220 }
 0x98a   :  { %v11223_v60 = vpop.eup %11222 }
 0x98b   :  { %v11225_v8 = vpop.eup %11224 }
 0x98d   :  { %3952 = vrot.lane.b32.xlu0 %v11221_v51, %s11659_s0 }
 0x991   :  { %3956 = vrot.lane.b32.xlu0 %v11223_v60, %s11659_s0 }
 0x992   :  { %v11227_v29 = vpop.eup %11226 }
 0x995   :  { %3960 = vrot.lane.b32.xlu0 %v11225_v8, %s11659_s0  ;;  %v4361_v8 = vld [vmem:[#allocation7 + $0x560] sm:$0xff] }
 0x999   :  { %3964 = vrot.lane.b32.xlu0 %v11227_v29, %s11659_s0 }
 0x9c3   :  { %v3943_v33 = vpop.permute.xlu0 %3942 }
 0x9c4   :  { %v3984_v43 = vmul.f32 %v3943_v33, %v13812_v15 }
 0x9c6   :  { %v13922_v20 = vmul.f32 %v3984_v43, %v11880_v12 }
 0x9c7   :  { %v3945_v56 = vpop.permute.xlu1 %3944 }
 0x9c8   :  { %4152 = vst.msk [vmem:[#allocation2 + $0x8] sm:$0xff] %vm563_vm1, %v13922_v20  ;;  %v3985_v4 = vmul.f32 %v3945_v56, %v13818_v47  ;;  %v4012_v35 = vrot.slane %v13922_v20, 6  ;;  %v4264_v24 = vrot.slane %v13922_v20, 2  ;;  %v4166_v26 = vrot.slane %v13922_v20, 1  ;;  %v4376_v56 = vld [vmem:[#allocation7 + $0x5d8] sm:$0xff] }
 0x9ca   :  { %v13928_v21 = vmul.f32 %v3985_v4, %v11882_v13  ;;  %v4360_v4 = vld [vmem:[#allocation7 + $0x558] sm:$0xff] }
 0x9cb   :  { %v3947_v15 = vpop.permute.xlu1 %3946 }
 0x9cc   :  { %v4013_v37 = vrot.slane %v13928_v21, 6  ;;  %v4265_v55 = vrot.slane %v13928_v21, 2  ;;  %4153 = vst.msk [vmem:[#allocation2 + $0x20] sm:$0xff] %vm563_vm1, %v13928_v21  ;;  %v3986_v47 = vmul.f32 %v3947_v15, %v13826_v5  ;;  %v4167_v17 = vrot.slane %v13928_v21, 1  ;;  %v4377_v5 = vld [vmem:[#allocation7 + $0x5e0] sm:$0xff] }
 0x9cd   :  { %9965 = vmatprep.subr.mxu1 %v4377_v5  ;;  %v4372_v5 = vld [vmem:[#allocation7 + $0x5b8] sm:$0xff] }
 0x9ce   :  { %v4290_v61 = vsel %vm805_vm2, %v4264_v24, %v4265_v55  ;;  %v13944_v63 = vmul.f32 %v3986_v47, %v11930_v59  ;;  %v4192_v51 = vsel %vm706_vm3, %v4166_v26, %v4167_v17  ;;  %v4038_v60 = vsel %vm548_vm4, %v4012_v35, %v4013_v37  ;;  %9966 = vmatpush3.msra.mxu1 %v4361_v8  ;;  %v4374_v47 = vld [vmem:[#allocation7 + $0x5c8] sm:$0xff]  ;;  %v4371_v8 = vld [vmem:[#allocation7 + $0x5b0] sm:$0xff] }
 0x9cf   :  { %4292 = vst.msk [vmem:[#allocation2 + $0x10] sm:$0xff] %vm563_vm1, %v4290_v61  ;;  %4208 = vrot.lane.b32.xlu0 %v4192_v51, %s11659_s0  ;;  %4041 = vst.msk [vmem:[#allocation2 + $0x18] sm:$0xff] %vm563_vm1, %v4038_v60  ;;  %9967 = vmatprep.subr.mxu1 %v4376_v56  ;;  %v4373_v61 = vld [vmem:[#allocation7 + $0x5c0] sm:$0xff]  ;;  %v4356_v60 = vld [vmem:[#allocation7 + $0x538] sm:$0xff] }
 0x9d0   :  { %v4014_v29 = vrot.slane %v13944_v63, 6  ;;  %v4266_v33 = vrot.slane %v13944_v63, 2  ;;  %4154 = vst.msk [vmem:[#allocation2 + $0x38] sm:$0xff] %vm563_vm1, %v13944_v63  ;;  %v4168_v43 = vrot.slane %v13944_v63, 1  ;;  %9968 = vmatpush3.msra.mxu1 %v4360_v4  ;;  %v4357_v51 = vld [vmem:[#allocation7 + $0x540] sm:$0xff]  ;;  %v4355_v56 = vld [vmem:[#allocation7 + $0x530] sm:$0xff] }
 0x9d1   :  { %9969 = vmatprep.subr.mxu1 %v4375_v23  ;;  %v4354_v23 = vld [vmem:[#allocation7 + $0x528] sm:$0xff] }
 0x9d2   :  { %v4289_v27 = vsel %vm805_vm2, %v4265_v55, %v4266_v33  ;;  %v4191_v48 = vsel %vm706_vm3, %v4167_v17, %v4168_v43  ;;  %v4037_v15 = vsel %vm548_vm4, %v4013_v37, %v4014_v29  ;;  %9970 = vmatpush3.msra.mxu1 %v4359_v11 }
 0x9d3   :  { %4293 = vst.msk [vmem:[#allocation2 + $0x28] sm:$0xff] %vm563_vm1, %v4289_v27  ;;  %4210 = vrot.lane.b32.xlu0 %v4191_v48, %s11659_s0  ;;  %4042 = vst.msk [vmem:[#allocation2 + $0x30] sm:$0xff] %vm563_vm1, %v4037_v15  ;;  %9971 = vmatprep.subr.mxu1 %v4374_v47  ;;  %v4370_v27 = vld [vmem:[#allocation7 + $0x5a8] sm:$0xff]  ;;  %v4369_v15 = vld [vmem:[#allocation7 + $0x5a0] sm:$0xff] }
 0x9d4   :  { %v3951_v55 = vpop.permute.xlu1 %3950  ;;  %9972 = vmatpush3.msra.mxu1 %v4358_v49 }
 0x9d5   :  { %v3988_v17 = vmul.f32 %v3951_v55, %v13836_v7  ;;  %9973 = vmatprep.subr.mxu1 %v4373_v61  ;;  %v4353_v55 = vld [vmem:[#allocation7 + $0x520] sm:$0xff] }
 0x9d6   :  { %v4308_v28 = vld [vmem:[#allocation2 + $0x10] sm:$0xff]  ;;  %9974 = vmatpush3.msra.mxu1 %v4357_v51 }
 0x9d7   :  { %v13979_v37 = vmul.f32 %v3988_v17, %v11935_v9  ;;  %10730 = vmatprep.mubr.msk.f32.mxu0 %vm563_vm1, %v4308_v28  ;;  %9975 = vmatprep.subr.mxu1 %v4372_v5  ;;  %v4368_v51 = vld [vmem:[#allocation7 + $0x598] sm:$0xff] }
 0x9d8   :  { %9976 = vmatpush3.msra.mxu1 %v4356_v60  ;;  %v4352_v5 = vld [vmem:[#allocation7 + $0x518] sm:$0xff]  ;;  %v4367_v60 = vld [vmem:[#allocation7 + $0x590] sm:$0xff] }
 0x9d9   :  { %4156 = vst.msk [vmem:[#allocation2 + $0x68] sm:$0xff] %vm563_vm1, %v13979_v37  ;;  %9977 = vmatprep.subr.mxu1 %v4371_v8 }
 0x9da   :  { %v4311_v7 = vld [vmem:[#allocation2 + $0x28] sm:$0xff]  ;;  %9978 = vmatpush3.msra.mxu1 %v4355_v56 }
 0x9db   :  { %10731 = vmatmul.mubr.msk.f32.vlgmr.msra.gmra.mxu0 %vm563_vm1, %v4311_v7  ;;  %9979 = vmatprep.subr.mxu1 %v4370_v27  ;;  %v4365_v27 = vld [vmem:[#allocation7 + $0x580] sm:$0xff] }
 0x9dc   :  { %v3955_v4 = vpop.permute.xlu1 %3954  ;;  %9980 = vmatpush3.msra.mxu1 %v4354_v23  ;;  %v4349_v23 = vld [vmem:[#allocation7 + $0x500] sm:$0xff] }
 0x9dd   :  { %v3990_v48 = vmul.f32 %v3955_v4, %v13846_v46  ;;  %9981 = vmatprep.subr.mxu1 %v4369_v15  ;;  %v4350_v4 = vld [vmem:[#allocation7 + $0x508] sm:$0xff] }
 0x9de   :  { %9982 = vmatpush3.msra.mxu1 %v4353_v55 }
 0x9df   :  { %v13987_v11 = vmul.f32 %v3990_v48, %v11979_v44  ;;  %9983 = vmatprep.subr.mxu1 %v4368_v51 }
 0x9e0   :  { %9984 = vmatpush3.msra.mxu1 %v4352_v5  ;;  %v4055_v5 = vrot.slane %v13928_v21, 7 }
 0x9e1   :  { %4158 = vst.msk [vmem:[#allocation2 + $0x98] sm:$0xff] %vm563_vm1, %v13987_v11  ;;  %9985 = vmatprep.subr.mxu1 %v4367_v60 }
 0x9e3   :  { %v3959_v47 = vpop.permute.xlu1 %3958 }
 0x9e4   :  { %v3992_v17 = vmul.f32 %v3959_v47, %v13856_v41  ;;  %v4351_v41 = vld [vmem:[#allocation7 + $0x510] sm:$0xff] }
 0x9e5   :  { %9986 = vmatpush3.msra.mxu1 %v4351_v41 }
 0x9e6   :  { %v13993_v46 = vmul.f32 %v3992_v17, %v12056_v25  ;;  %v4054_v17 = vrot.slane %v13922_v20, 7 }
 0x9e8   :  { %4160 = vst.msk [vmem:[#allocation2 + $0xc8] sm:$0xff] %vm563_vm1, %v13993_v46 }
 0x9eb   :  { %v3963_v49 = vpop.permute.xlu1 %3962 }
 0x9ec   :  { %v3994_v28 = vmul.f32 %v3963_v49, %v13866_v52  ;;  %v4366_v52 = vld [vmem:[#allocation7 + $0x588] sm:$0xff] }
 0x9ed   :  { %9987 = vmatprep.subr.mxu1 %v4366_v52  ;;  %v4056_v52 = vrot.slane %v13944_v63, 7  ;;  %v4018_v63 = vrot.slane %v13987_v11, 6 }
 0x9ee   :  { %v13999_v61 = vmul.f32 %v3994_v28, %v12129_v36  ;;  %9988 = vmatpush3.msra.mxu1 %v4350_v4  ;;  %v4268_v4 = vrot.slane %v13979_v37, 2 }
 0x9ef   :  { %9989 = vmatprep.subr.mxu1 %v4365_v27 }
 0x9f0   :  { %4162 = vst.msk [vmem:[#allocation2 + $0xf8] sm:$0xff] %vm563_vm1, %v13999_v61  ;;  %9990 = vmatpush3.msra.mxu1 %v4349_v23 }
 0x9f4   :  { %v3967_v7 = vpop.permute.xlu1 %3966 }
 0x9f5   :  { %v3996_v8 = vmul.f32 %v3967_v7, %v13877_v18 }
 0x9f7   :  { %v14005_v56 = vmul.f32 %v3996_v8, %v12202_v39  ;;  %v3969_v48 = vpop.permute.xlu0 %3968 }
 0x9f8   :  { %v3997_v15 = vmul.f32 %v3969_v48, %v13888_v3 }
 0x9f9   :  { %4164 = vst.msk [vmem:[#allocation2 + $0x128] sm:$0xff] %vm563_vm1, %v14005_v56  ;;  %v4276_v55 = vrot.slane %v14005_v56, 2  ;;  %v4024_v21 = vrot.slane %v14005_v56, 6 }
 0x9fa   :  { %v14011_v18 = vmul.f32 %v3997_v15, %v11884_v14 }
 0x9fb   :  { %v3949_v47 = vpop.permute.xlu0 %3948 }
 0x9fc   :  { %v4025_v49 = vrot.slane %v14011_v18, 6  ;;  %v4277_v28 = vrot.slane %v14011_v18, 2  ;;  %4165 = vst.msk [vmem:[#allocation2 + $0x140] sm:$0xff] %vm563_vm1, %v14011_v18  ;;  %v3987_v3 = vmul.f32 %v3949_v47, %v13875_v10  ;;  %v4067_v51 = vrot.slane %v14011_v18, 7 }
 0x9fd   :  { %v4080_v47 = vsel %vm592_vm5, %v4054_v17, %v4055_v5 }
 0x9fe   :  { %v4278_v60 = vsel %vm805_vm2, %v4276_v55, %v4277_v28  ;;  %v4291_v7 = vsel %vm805_vm2, %v4277_v28, %v4264_v24  ;;  %v14031_v41 = vmul.f32 %v3987_v3, %v11932_v1  ;;  %v4081_v10 = vsel %vm592_vm5, %v4067_v51, %v4054_v17 }
 0x9ff   :  { %4304 = vst.msk [vmem:[#allocation2 + $0x130] sm:$0xff] %vm563_vm1, %v4278_v60  ;;  %4305 = vst.msk [vmem:[#allocation2 + $0x148] sm:$0xff] %vm563_vm1, %v4291_v7  ;;  %4096 = vrot.lane.b32.xlu1 %v4081_v10, %s11659_s0  ;;  %v3953_v8 = vpop.permute.xlu0 %3952  ;;  %v4039_v24 = vsel %vm548_vm4, %v4025_v49, %v4012_v35  ;;  %v4026_v35 = vsel %vm548_vm4, %v4024_v21, %v4025_v49  ;;  %v4016_v49 = vrot.slane %v13979_v37, 6  ;;  %v4270_v7 = vrot.slane %v13987_v11, 2 }
 0xa00   :  { %v4267_v27 = vrot.slane %v14031_v41, 2  ;;  %4155 = vst.msk [vmem:[#allocation2 + $0x50] sm:$0xff] %vm563_vm1, %v14031_v41  ;;  %v3989_v48 = vmul.f32 %v3953_v8, %v13891_v54  ;;  %v4169_v23 = vrot.slane %v14031_v41, 1  ;;  %4040 = vst.msk [vmem:[#allocation2] sm:$0xff] %vm563_vm1, %v4039_v24  ;;  %v4015_v15 = vrot.slane %v14031_v41, 6 }
 0xa01   :  { %4053 = vst.msk [vmem:[#allocation2 + $0x138] sm:$0xff] %vm563_vm1, %v4026_v35  ;;  %v4079_v60 = vsel %vm592_vm5, %v4055_v5, %v4056_v52  ;;  %v4170_v8 = vrot.slane %v13979_v37, 1 }
 0xa02   :  { %v4287_v28 = vsel %vm805_vm2, %v4267_v27, %v4268_v4  ;;  %v4288_v54 = vsel %vm805_vm2, %v4266_v33, %v4267_v27  ;;  %v14067_v3 = vmul.f32 %v3989_v48, %v11941_v22  ;;  %v4190_v17 = vsel %vm706_vm3, %v4168_v43, %v4169_v23 }
 0xa03   :  { %4294 = vst.msk [vmem:[#allocation2 + $0x40] sm:$0xff] %vm563_vm1, %v4288_v54  ;;  %4295 = vst.msk [vmem:[#allocation2 + $0x58] sm:$0xff] %vm563_vm1, %v4287_v28  ;;  %4098 = vrot.lane.b32.xlu1 %v4080_v47, %s11659_s0  ;;  %4212 = vrot.lane.b32.xlu0 %v4190_v17, %s11659_s0  ;;  %v3957_v33 = vpop.permute.xlu0 %3956  ;;  %v4057_v27 = vrot.slane %v14031_v41, 7  ;;  %v4036_v5 = vsel %vm548_vm4, %v4014_v29, %v4015_v15  ;;  %v4035_v48 = vsel %vm548_vm4, %v4015_v15, %v4016_v49 }
 0xa04   :  { %v4269_v43 = vrot.slane %v14067_v3, 2  ;;  %4157 = vst.msk [vmem:[#allocation2 + $0x80] sm:$0xff] %vm563_vm1, %v14067_v3  ;;  %v3991_v10 = vmul.f32 %v3957_v33, %v13898_v19  ;;  %v4017_v24 = vrot.slane %v14067_v3, 6  ;;  %v4189_v41 = vsel %vm706_vm3, %v4169_v23, %v4170_v8  ;;  %4043 = vst.msk [vmem:[#allocation2 + $0x48] sm:$0xff] %vm563_vm1, %v4036_v5 }
 0xa05   :  { %4044 = vst.msk [vmem:[#allocation2 + $0x60] sm:$0xff] %vm563_vm1, %v4035_v48  ;;  %v4272_v15 = vrot.slane %v13993_v46, 2 }
 0xa06   :  { %v4285_v47 = vsel %vm805_vm2, %v4269_v43, %v4270_v7  ;;  %v4286_v19 = vsel %vm805_vm2, %v4268_v4, %v4269_v43  ;;  %v14100_v35 = vmul.f32 %v3991_v10, %v12021_v2  ;;  %v4171_v4 = vrot.slane %v14067_v3, 1 }
 0xa07   :  { %4296 = vst.msk [vmem:[#allocation2 + $0x70] sm:$0xff] %vm563_vm1, %v4286_v19  ;;  %4297 = vst.msk [vmem:[#allocation2 + $0x88] sm:$0xff] %vm563_vm1, %v4285_v47  ;;  %4100 = vrot.lane.b32.xlu1 %v4079_v60, %s11659_s0  ;;  %4214 = vrot.lane.b32.xlu0 %v4189_v41, %s11659_s0  ;;  %v3961_v29 = vpop.permute.xlu0 %3960  ;;  %v4034_v17 = vsel %vm548_vm4, %v4016_v49, %v4017_v24  ;;  %v4033_v33 = vsel %vm548_vm4, %v4017_v24, %v4018_v63  ;;  %v4020_v49 = vrot.slane %v13993_v46, 6 }
 0xa08   :  { %v4271_v23 = vrot.slane %v14100_v35, 2  ;;  %4159 = vst.msk [vmem:[#allocation2 + $0xb0] sm:$0xff] %vm563_vm1, %v14100_v35  ;;  %v3993_v28 = vmul.f32 %v3961_v29, %v13902_v50  ;;  %v4019_v54 = vrot.slane %v14100_v35, 6  ;;  %v4078_v50 = vsel %vm592_vm5, %v4056_v52, %v4057_v27  ;;  %4045 = vst.msk [vmem:[#allocation2 + $0x78] sm:$0xff] %vm563_vm1, %v4034_v17 }
 0xa09   :  { %4046 = vst.msk [vmem:[#allocation2 + $0x90] sm:$0xff] %vm563_vm1, %v4033_v33  ;;  %v4058_v52 = vrot.slane %v13979_v37, 7  ;;  %v4274_v47 = vrot.slane %v13999_v61, 2  ;;  %v4172_v29 = vrot.slane %v13987_v11, 1 }
 0xa0a   :  { %v4283_v60 = vsel %vm805_vm2, %v4271_v23, %v4272_v15  ;;  %v4284_v43 = vsel %vm805_vm2, %v4270_v7, %v4271_v23  ;;  %v14127_v10 = vmul.f32 %v3993_v28, %v12092_v0  ;;  %v4314_v5 = vld [vmem:[#allocation2 + $0x40] sm:$0xff]  ;;  %v4317_v48 = vld [vmem:[#allocation2 + $0x58] sm:$0xff]  ;;  %v4188_v7 = vsel %vm706_vm3, %v4170_v8, %v4171_v4 }
 0xa0b   :  { %4298 = vst.msk [vmem:[#allocation2 + $0xa0] sm:$0xff] %vm563_vm1, %v4284_v43  ;;  %4299 = vst.msk [vmem:[#allocation2 + $0xb8] sm:$0xff] %vm563_vm1, %v4283_v60  ;;  %10733 = vmatprep.mubr.msk.f32.mxu0 %vm563_vm1, %v4314_v5  ;;  %4102 = vrot.lane.b32.xlu1 %v4078_v50, %s11659_s0  ;;  %v3965_v24 = vpop.permute.xlu0 %3964  ;;  %v4077_v37 = vsel %vm592_vm5, %v4057_v27, %v4058_v52  ;;  %v4032_v23 = vsel %vm548_vm4, %v4018_v63, %v4019_v54  ;;  %v4059_v5 = vrot.slane %v14067_v3, 7 }
 0xa0c   :  { %v4273_v19 = vrot.slane %v14127_v10, 2  ;;  %4161 = vst.msk [vmem:[#allocation2 + $0xe0] sm:$0xff] %vm563_vm1, %v14127_v10  ;;  %4216 = vrot.lane.b32.xlu0 %v4188_v7, %s11659_s0  ;;  %v3995_v41 = vmul.f32 %v3965_v24, %v13908_v62  ;;  %10734 = vmatmul.mubr.msk.f32.gmra.mxu0 %vm563_vm1, %v4317_v48  ;;  %v4021_v8 = vrot.slane %v14127_v10, 6  ;;  %v4031_v28 = vsel %vm548_vm4, %v4019_v54, %v4020_v49 }
 0xa0d   :  { %4047 = vst.msk [vmem:[#allocation2 + $0xa8] sm:$0xff] %vm563_vm1, %v4032_v23  ;;  %4048 = vst.msk [vmem:[#allocation2 + $0xc0] sm:$0xff] %vm563_vm1, %v4031_v28  ;;  %v4022_v27 = vrot.slane %v13999_v61, 6  ;;  %v4187_v63 = vsel %vm706_vm3, %v4171_v4, %v4172_v29  ;;  %v4076_v24 = vsel %vm592_vm5, %v4058_v52, %v4059_v5  ;;  %v4060_v52 = vrot.slane %v13987_v11, 7 }
 0xa0e   :  { %v4281_v17 = vsel %vm805_vm2, %v4273_v19, %v4274_v47  ;;  %v4282_v62 = vsel %vm805_vm2, %v4272_v15, %v4273_v19  ;;  %v14161_v33 = vmul.f32 %v3995_v41, %v16985_v6  ;;  %v4320_v60 = vld [vmem:[#allocation2 + $0x70] sm:$0xff]  ;;  %v4323_v43 = vld [vmem:[#allocation2 + $0x88] sm:$0xff]  ;;  %v4173_v15 = vrot.slane %v14100_v35, 1 }
 0xa0f   :  { %4300 = vst.msk [vmem:[#allocation2 + $0xd0] sm:$0xff] %vm563_vm1, %v4282_v62  ;;  %4301 = vst.msk [vmem:[#allocation2 + $0xe8] sm:$0xff] %vm563_vm1, %v4281_v17  ;;  %4104 = vrot.lane.b32.xlu1 %v4077_v37, %s11659_s0  ;;  %10736 = vmatprep.mubr.msk.f32.mxu0 %vm563_vm1, %v4320_v60  ;;  %v4030_v50 = vsel %vm548_vm4, %v4020_v49, %v4021_v8  ;;  %v4029_v48 = vsel %vm548_vm4, %v4021_v8, %v4022_v27  ;;  %v4174_v8 = vrot.slane %v13993_v46, 1 }
 0xa10   :  { %v4023_v3 = vrot.slane %v14161_v33, 6  ;;  %v4275_v54 = vrot.slane %v14161_v33, 2  ;;  %4163 = vst.msk [vmem:[#allocation2 + $0x110] sm:$0xff] %vm563_vm1, %v14161_v33  ;;  %4218 = vrot.lane.b32.xlu0 %v4187_v63, %s11659_s0  ;;  %10737 = vmatmul.mubr.msk.f32.gmra.mxu0 %vm563_vm1, %v4323_v43  ;;  %4049 = vst.msk [vmem:[#allocation2 + $0xd8] sm:$0xff] %vm563_vm1, %v4030_v50  ;;  %v4061_v28 = vrot.slane %v14100_v35, 7  ;;  %v4344_v43 = vld [vmem:[#allocation2 + $0x130] sm:$0xff] }
 0xa11   :  { %4050 = vst.msk [vmem:[#allocation2 + $0xf0] sm:$0xff] %vm563_vm1, %v4029_v48  ;;  %v4185_v11 = vsel %vm706_vm3, %v4173_v15, %v4174_v8  ;;  %v4177_v50 = vrot.slane %v14161_v33, 1  ;;  %v4064_v48 = vrot.slane %v13999_v61, 7 }
 0xa12   :  { %v4279_v4 = vsel %vm805_vm2, %v4275_v54, %v4276_v55  ;;  %v4280_v7 = vsel %vm805_vm2, %v4274_v47, %v4275_v54  ;;  %v4326_v19 = vld [vmem:[#allocation2 + $0xa0] sm:$0xff]  ;;  %v4329_v41 = vld [vmem:[#allocation2 + $0xb8] sm:$0xff]  ;;  %v4186_v55 = vsel %vm706_vm3, %v4172_v29, %v4173_v15  ;;  %v4028_v49 = vsel %vm548_vm4, %v4022_v27, %v4023_v3  ;;  %v4347_v54 = vld [vmem:[#allocation2 + $0x148] sm:$0xff] }
 0xa13   :  { %4302 = vst.msk [vmem:[#allocation2 + $0x100] sm:$0xff] %vm563_vm1, %v4280_v7  ;;  %4303 = vst.msk [vmem:[#allocation2 + $0x118] sm:$0xff] %vm563_vm1, %v4279_v4  ;;  %4106 = vrot.lane.b32.xlu1 %v4076_v24, %s11659_s0  ;;  %10739 = vmatprep.mubr.msk.f32.mxu0 %vm563_vm1, %v4326_v19  ;;  %v4027_v47 = vsel %vm548_vm4, %v4023_v3, %v4024_v21  ;;  %v4075_v29 = vsel %vm592_vm5, %v4059_v5, %v4060_v52  ;;  %v4175_v21 = vrot.slane %v14127_v10, 1 }
 0xa14   :  { %4220 = vrot.lane.b32.xlu0 %v4186_v55, %s11659_s0  ;;  %10740 = vmatmul.mubr.msk.f32.gmra.mxu0 %vm563_vm1, %v4329_v41  ;;  %4051 = vst.msk [vmem:[#allocation2 + $0x108] sm:$0xff] %vm563_vm1, %v4028_v49  ;;  %4052 = vst.msk [vmem:[#allocation2 + $0x120] sm:$0xff] %vm563_vm1, %v4027_v47  ;;  %v4074_v17 = vsel %vm592_vm5, %v4060_v52, %v4061_v28  ;;  %v4062_v5 = vrot.slane %v13993_v46, 7  ;;  %v4176_v27 = vrot.slane %v13999_v61, 1  ;;  %v4063_v15 = vrot.slane %v14127_v10, 7 }
 0xa15   :  { %v4184_v35 = vsel %vm706_vm3, %v4174_v8, %v4175_v21  ;;  %v4178_v4 = vrot.slane %v14005_v56, 1  ;;  %v4065_v24 = vrot.slane %v14161_v33, 7  ;;  %v4179_v41 = vrot.slane %v14011_v18, 1 }
 0xa16   :  { %v4332_v37 = vld [vmem:[#allocation2 + $0xd0] sm:$0xff]  ;;  %v4335_v23 = vld [vmem:[#allocation2 + $0xe8] sm:$0xff]  ;;  %v4073_v63 = vsel %vm592_vm5, %v4061_v28, %v4062_v5  ;;  %v4183_v3 = vsel %vm706_vm3, %v4175_v21, %v4176_v27  ;;  %v4072_v46 = vsel %vm592_vm5, %v4062_v5, %v4063_v15  ;;  %v4182_v10 = vsel %vm706_vm3, %v4176_v27, %v4177_v50 }
 0xa17   :  { %4108 = vrot.lane.b32.xlu1 %v4075_v29, %s11659_s0  ;;  %10742 = vmatprep.mubr.msk.f32.mxu0 %vm563_vm1, %v4332_v37  ;;  %v4071_v7 = vsel %vm592_vm5, %v4063_v15, %v4064_v48  ;;  %v4181_v19 = vsel %vm706_vm3, %v4177_v50, %v4178_v4  ;;  %v4070_v55 = vsel %vm592_vm5, %v4064_v48, %v4065_v24  ;;  %v4066_v33 = vrot.slane %v14005_v56, 7 }
 0xa18   :  { %4222 = vrot.lane.b32.xlu0 %v4185_v11, %s11659_s0  ;;  %10743 = vmatmul.mubr.msk.f32.gmra.mxu0 %vm563_vm1, %v4335_v23  ;;  %v4180_v61 = vsel %vm706_vm3, %v4178_v4, %v4179_v41  ;;  %v4193_v52 = vsel %vm706_vm3, %v4179_v41, %v4166_v26 }
 0xa19   :  { %v4069_v49 = vsel %vm592_vm5, %v4065_v24, %v4066_v33  ;;  %v4068_v47 = vsel %vm592_vm5, %v4066_v33, %v4067_v51 }
 0xa1a   :  { %v4338_v62 = vld [vmem:[#allocation2 + $0x100] sm:$0xff]  ;;  %v4341_v60 = vld [vmem:[#allocation2 + $0x118] sm:$0xff] }
 0xa1b   :  { %4110 = vrot.lane.b32.xlu1 %v4074_v17, %s11659_s0  ;;  %10745 = vmatprep.mubr.msk.f32.mxu0 %vm563_vm1, %v4338_v62 }
 0xa1c   :  { %4224 = vrot.lane.b32.xlu0 %v4184_v35, %s11659_s0  ;;  %10746 = vmatmul.mubr.msk.f32.gmra.mxu0 %vm563_vm1, %v4341_v60 }
 0xa1d   :  { %10748 = vmatprep.mubr.msk.f32.mxu0 %vm563_vm1, %v4344_v43 }
 0xa1f   :  { %4112 = vrot.lane.b32.xlu1 %v4073_v63, %s11659_s0 }
 0xa20   :  { %4226 = vrot.lane.b32.xlu0 %v4183_v3, %s11659_s0  ;;  %10749 = vmatmul.mubr.msk.f32.gmra.mxu0 %vm563_vm1, %v4347_v54 }
 0xa23   :  { %4114 = vrot.lane.b32.xlu1 %v4072_v46, %s11659_s0 }
 0xa24   :  { %4228 = vrot.lane.b32.xlu0 %v4182_v10, %s11659_s0 }
 0xa27   :  { %4116 = vrot.lane.b32.xlu1 %v4071_v7, %s11659_s0 }
 0xa28   :  { %4230 = vrot.lane.b32.xlu0 %v4181_v19, %s11659_s0 }
 0xa2b   :  { %4118 = vrot.lane.b32.xlu1 %v4070_v55, %s11659_s0 }
 0xa2c   :  { %4232 = vrot.lane.b32.xlu0 %v4180_v61, %s11659_s0 }
 0xa2f   :  { %4120 = vrot.lane.b32.xlu1 %v4069_v49, %s11659_s0 }
 0xa30   :  { %4234 = vrot.lane.b32.xlu0 %v4193_v52, %s11659_s0 }
 0xa33   :  { %4122 = vrot.lane.b32.xlu1 %v4068_v47, %s11659_s0 }
 0xa41   :  { %v4209_v56 = vpop.permute.xlu0 %4208 }
 0xa42   :  { %4250 = vst.msk [vmem:[#allocation2 + $0x8] sm:$0xff] %vm663_vm6, %v4209_v56 }
 0xa45   :  { %v4211_v8 = vpop.permute.xlu0 %4210 }
 0xa46   :  { %4251 = vst.msk [vmem:[#allocation2 + $0x20] sm:$0xff] %vm663_vm6, %v4211_v8 }
 0xa49   :  { %v4307_v20 = vld [vmem:[#allocation2 + $0x8] sm:$0xff] }
 0xa4a   :  { %4503 = vmatprep.mubr.f32.mxu1 %v4307_v20 }
 0xa4d   :  { %v4310_v28 = vld [vmem:[#allocation2 + $0x20] sm:$0xff] }
 0xa71   :  { %v4097_v26 = vpop.permute.xlu1 %4096 }
 0xa72   :  { %4138 = vst.msk [vmem:[#allocation2] sm:$0xff] %vm663_vm6, %v4097_v26 }
 0xa75   :  { %v4099_v29 = vpop.permute.xlu1 %4098  ;;  %v4213_v37 = vpop.permute.xlu0 %4212 }
 0xa76   :  { %4139 = vst.msk [vmem:[#allocation2 + $0x18] sm:$0xff] %vm663_vm6, %v4099_v29  ;;  %4252 = vst.msk [vmem:[#allocation2 + $0x38] sm:$0xff] %vm663_vm6, %v4213_v37 }
 0xa79   :  { %v4101_v18 = vpop.permute.xlu1 %4100  ;;  %v4215_v51 = vpop.permute.xlu0 %4214  ;;  %v4306_v23 = vld [vmem:[#allocation2] sm:$0xff] }
 0xa7a   :  { %4140 = vst.msk [vmem:[#allocation2 + $0x30] sm:$0xff] %vm663_vm6, %v4101_v18  ;;  %4253 = vst.msk [vmem:[#allocation2 + $0x50] sm:$0xff] %vm663_vm6, %v4215_v51  ;;  %4504 = vmatmul.mubr.f32.vlgmr.msra.gmra.mxu1 %v4306_v23 }
 0xa7b   :  { %4508 = vmatprep.mubr.f32.mxu1 %v4310_v28 }
 0xa7d   :  { %v4103_v11 = vpop.permute.xlu1 %4102  ;;  %v4309_v21 = vld [vmem:[#allocation2 + $0x18] sm:$0xff] }
 0xa7e   :  { %v4313_v17 = vld [vmem:[#allocation2 + $0x38] sm:$0xff]  ;;  %4141 = vst.msk [vmem:[#allocation2 + $0x48] sm:$0xff] %vm663_vm6, %v4103_v11  ;;  %v4217_v62 = vpop.permute.xlu0 %4216  ;;  %4509 = vmatmul.mubr.f32.gmra.mxu1 %v4309_v21 }
 0xa7f   :  { %4254 = vst.msk [vmem:[#allocation2 + $0x68] sm:$0xff] %vm663_vm6, %v4217_v62  ;;  %4513 = vmatprep.mubr.f32.mxu1 %v4313_v17 }
 0xa81   :  { %v4105_v60 = vpop.permute.xlu1 %4104  ;;  %v4312_v35 = vld [vmem:[#allocation2 + $0x30] sm:$0xff] }
 0xa82   :  { %v4316_v43 = vld [vmem:[#allocation2 + $0x50] sm:$0xff]  ;;  %4142 = vst.msk [vmem:[#allocation2 + $0x60] sm:$0xff] %vm663_vm6, %v4105_v60  ;;  %v4219_v5 = vpop.permute.xlu0 %4218  ;;  %4514 = vmatmul.mubr.f32.gmra.mxu1 %v4312_v35 }
 0xa83   :  { %4255 = vst.msk [vmem:[#allocation2 + $0x80] sm:$0xff] %vm663_vm6, %v4219_v5  ;;  %4518 = vmatprep.mubr.f32.mxu1 %v4316_v43 }
 0xa85   :  { %v4107_v27 = vpop.permute.xlu1 %4106  ;;  %v4315_v63 = vld [vmem:[#allocation2 + $0x48] sm:$0xff] }
 0xa86   :  { %4143 = vst.msk [vmem:[#allocation2 + $0x78] sm:$0xff] %vm663_vm6, %v4107_v27  ;;  %v4221_v15 = vpop.permute.xlu0 %4220  ;;  %4519 = vmatmul.mubr.f32.gmra.mxu1 %v4315_v63  ;;  %v4319_v3 = vld [vmem:[#allocation2 + $0x68] sm:$0xff] }
 0xa87   :  { %4256 = vst.msk [vmem:[#allocation2 + $0x98] sm:$0xff] %vm663_vm6, %v4221_v15  ;;  %4523 = vmatprep.mubr.f32.mxu1 %v4319_v3  ;;  %v14306_v15 = vld [vmem:[#allocation8 + $0x4] ss:$0 sm:$0xff] }
 0xa89   :  { %v4109_v54 = vpop.permute.xlu1 %4108  ;;  %v4318_v50 = vld [vmem:[#allocation2 + $0x60] sm:$0xff] }
 0xa8a   :  { %4144 = vst.msk [vmem:[#allocation2 + $0x90] sm:$0xff] %vm663_vm6, %v4109_v54  ;;  %v4223_v46 = vpop.permute.xlu0 %4222  ;;  %4524 = vmatmul.mubr.f32.gmra.mxu1 %v4318_v50  ;;  %v4322_v10 = vld [vmem:[#allocation2 + $0x80] sm:$0xff] }
 0xa8b   :  { %4257 = vst.msk [vmem:[#allocation2 + $0xb0] sm:$0xff] %vm663_vm6, %v4223_v46  ;;  %4528 = vmatprep.mubr.f32.mxu1 %v4322_v10 }
 0xa8d   :  { %v4111_v48 = vpop.permute.xlu1 %4110  ;;  %v4321_v4 = vld [vmem:[#allocation2 + $0x78] sm:$0xff] }
 0xa8e   :  { %4145 = vst.msk [vmem:[#allocation2 + $0xa8] sm:$0xff] %vm663_vm6, %v4111_v48  ;;  %v4225_v7 = vpop.permute.xlu0 %4224  ;;  %4529 = vmatmul.mubr.f32.gmra.mxu1 %v4321_v4  ;;  %v4325_v24 = vld [vmem:[#allocation2 + $0x98] sm:$0xff] }
 0xa8f   :  { %4258 = vst.msk [vmem:[#allocation2 + $0xc8] sm:$0xff] %vm663_vm6, %v4225_v7  ;;  %4533 = vmatprep.mubr.f32.mxu1 %v4325_v24 }
 0xa91   :  { %v4113_v19 = vpop.permute.xlu1 %4112  ;;  %v4324_v41 = vld [vmem:[#allocation2 + $0x90] sm:$0xff] }
 0xa92   :  { %4146 = vst.msk [vmem:[#allocation2 + $0xc0] sm:$0xff] %vm663_vm6, %v4113_v19  ;;  %v4227_v55 = vpop.permute.xlu0 %4226  ;;  %4534 = vmatmul.mubr.f32.gmra.mxu1 %v4324_v41  ;;  %v4328_v61 = vld [vmem:[#allocation2 + $0xb0] sm:$0xff] }
 0xa93   :  { %4259 = vst.msk [vmem:[#allocation2 + $0xe0] sm:$0xff] %vm663_vm6, %v4227_v55  ;;  %4538 = vmatprep.mubr.f32.mxu1 %v4328_v61 }
 0xa95   :  { %v4115_v33 = vpop.permute.xlu1 %4114  ;;  %v4327_v49 = vld [vmem:[#allocation2 + $0xa8] sm:$0xff] }
 0xa96   :  { %4147 = vst.msk [vmem:[#allocation2 + $0xd8] sm:$0xff] %vm663_vm6, %v4115_v33  ;;  %v4229_v52 = vpop.permute.xlu0 %4228  ;;  %4539 = vmatmul.mubr.f32.gmra.mxu1 %v4327_v49  ;;  %v4331_v47 = vld [vmem:[#allocation2 + $0xc8] sm:$0xff] }
 0xa97   :  { %4260 = vst.msk [vmem:[#allocation2 + $0xf8] sm:$0xff] %vm663_vm6, %v4229_v52  ;;  %4543 = vmatprep.mubr.f32.mxu1 %v4331_v47 }
 0xa99   :  { %v4117_v56 = vpop.permute.xlu1 %4116  ;;  %v4330_v8 = vld [vmem:[#allocation2 + $0xc0] sm:$0xff] }
 0xa9a   :  { %4148 = vst.msk [vmem:[#allocation2 + $0xf0] sm:$0xff] %vm663_vm6, %v4117_v56  ;;  %v4231_v20 = vpop.permute.xlu0 %4230  ;;  %4544 = vmatmul.mubr.f32.gmra.mxu1 %v4330_v8  ;;  %v4334_v26 = vld [vmem:[#allocation2 + $0xe0] sm:$0xff] }
 0xa9b   :  { %4261 = vst.msk [vmem:[#allocation2 + $0x110] sm:$0xff] %vm663_vm6, %v4231_v20  ;;  %4548 = vmatprep.mubr.f32.mxu1 %v4334_v26  ;;  %v10732_v63 = vpop.f32.mrf.mxu0 }
 0xa9d   :  { %v4119_v29 = vpop.permute.xlu1 %4118  ;;  %v4333_v37 = vld [vmem:[#allocation2 + $0xd8] sm:$0xff]  ;;  %v4640_v10 = vpop.f32.mrf.mxu0 }
 0xa9e   :  { %4149 = vst.msk [vmem:[#allocation2 + $0x108] sm:$0xff] %vm663_vm6, %v4119_v29  ;;  %v4233_v18 = vpop.permute.xlu0 %4232  ;;  %4549 = vmatmul.mubr.f32.gmra.mxu1 %v4333_v37  ;;  %v4337_v51 = vld [vmem:[#allocation2 + $0xf8] sm:$0xff] }
 0xa9f   :  { %4262 = vst.msk [vmem:[#allocation2 + $0x128] sm:$0xff] %vm663_vm6, %v4233_v18  ;;  %4553 = vmatprep.mubr.f32.mxu1 %v4337_v51 }
 0xaa1   :  { %v4121_v23 = vpop.permute.xlu1 %4120  ;;  %v4336_v28 = vld [vmem:[#allocation2 + $0xf0] sm:$0xff] }
 0xaa2   :  { %4150 = vst.msk [vmem:[#allocation2 + $0x120] sm:$0xff] %vm663_vm6, %v4121_v23  ;;  %v4235_v11 = vpop.permute.xlu0 %4234  ;;  %4554 = vmatmul.mubr.f32.gmra.mxu1 %v4336_v28  ;;  %v4340_v21 = vld [vmem:[#allocation2 + $0x110] sm:$0xff] }
 0xaa3   :  { %4263 = vst.msk [vmem:[#allocation2 + $0x140] sm:$0xff] %vm663_vm6, %v4235_v11  ;;  %4558 = vmatprep.mubr.f32.mxu1 %v4340_v21 }
 0xaa5   :  { %v4123_v17 = vpop.permute.xlu1 %4122  ;;  %v4339_v62 = vld [vmem:[#allocation2 + $0x108] sm:$0xff] }
 0xaa6   :  { %4151 = vst.msk [vmem:[#allocation2 + $0x138] sm:$0xff] %vm663_vm6, %v4123_v17  ;;  %4559 = vmatmul.mubr.f32.gmra.mxu1 %v4339_v62  ;;  %v4343_v60 = vld [vmem:[#allocation2 + $0x128] sm:$0xff] }
 0xaa7   :  { %4563 = vmatprep.mubr.f32.mxu1 %v4343_v60 }
 0xaa9   :  { %v4342_v35 = vld [vmem:[#allocation2 + $0x120] sm:$0xff] }
 0xaaa   :  { %4564 = vmatmul.mubr.f32.gmra.mxu1 %v4342_v35  ;;  %v4346_v43 = vld [vmem:[#allocation2 + $0x140] sm:$0xff] }
 0xaab   :  { %4568 = vmatprep.mubr.f32.mxu1 %v4346_v43 }
 0xaad   :  { %v4345_v5 = vld [vmem:[#allocation2 + $0x138] sm:$0xff] }
 0xaae   :  { %4569 = vmatmul.mubr.f32.gmra.mxu1 %v4345_v5 }
 0xacc   :  { %v14313_v55 = vpop.f32.mrf.mxu0 }
 0xace   :  { %v4650_v8 = vpop.f32.mrf.mxu0 }
 0xad0   :  { %v14326_v18 = vpop.f32.mrf.mxu0 }
 0xad2   :  { %v4660_v21 = vpop.f32.mrf.mxu0 }
 0xb3a   :  { %v9991_v27 = vpop.f32.mrf.mxu1 }
 0xb3c   :  { %v9992_v3 = vpop.f32.mrf.mxu1 }
 0xb3d   :  { %v9993_v54 = vadd.f32 %v9992_v3, %v9991_v27  ;;  %v14336_v27 = vpop.f32.mrf.mxu0 }
 0xb3e   :  { %v9994_v50 = vpop.f32.mrf.mxu1 }
 0xb3f   :  { %v4506_v46 = vadd.f32 %v9993_v54, %v14306_v15 }
 0xb40   :  { %v9995_v48 = vpop.f32.mrf.mxu1 }
 0xb41   :  { %v14309_v4 = vadd.f32 %v4640_v10, %v4506_v46  ;;  %v9996_v7 = vadd.f32 %v9995_v48, %v9994_v50  ;;  %v4670_v48 = vpop.f32.mrf.mxu0 }
 0xb42   :  { %v9997_v24 = vpop.f32.mrf.mxu1 }
 0xb43   :  { %v9397_v19 = vmul.f32 -1.442695, %v14309_v4  ;;  %v4511_v41 = vadd.f32 %v9996_v7, %v14306_v15 }
 0xb44   :  { %v9998_v61 = vpop.f32.mrf.mxu1 }
 0xb45   :  { %11228 = vpow2.f32 %v9397_v19  ;;  %v14315_v33 = vadd.f32 %v10732_v63, %v4511_v41  ;;  %v9999_v49 = vadd.f32 %v9998_v61, %v9997_v24 }
 0xb46   :  { %v14317_v52 = vpop.f32.mrf.mxu1 }
 0xb47   :  { %v9398_v47 = vmul.f32 -1.442695, %v14315_v33  ;;  %v4516_v56 = vadd.f32 %v9999_v49, %v14306_v15 }
 0xb48   :  { %v14321_v20 = vpop.f32.mrf.mxu1 }
 0xb49   :  { %11230 = vpow2.f32 %v9398_v47  ;;  %v14323_v26 = vadd.f32 %v4650_v8, %v4516_v56  ;;  %v14346_v47 = vpop.f32.mrf.mxu0 }
 0xb4a   :  { %v10003_v29 = vpop.f32.mrf.mxu1 }
 0xb4b   :  { %v9399_v37 = vmul.f32 -1.442695, %v14323_v26 }
 0xb4c   :  { %v10004_v51 = vpop.f32.mrf.mxu1 }
 0xb4d   :  { %11232 = vpow2.f32 %v9399_v37  ;;  %v10005_v23 = vadd.f32 %v10004_v51, %v10003_v29  ;;  %v5253_v51 = vld [vmem:[#allocation7 + $0x778] sm:$0xff] }
 0xb4e   :  { %v14328_v28 = vpop.f32.mrf.mxu1  ;;  %10751 = vmatprep.subr.mxu1 %v5253_v51 }
 0xb4f   :  { %v4526_v11 = vadd.f32 %v10005_v23, %v14306_v15  ;;  %v4680_v23 = vpop.f32.mrf.mxu0  ;;  %10752 = vmatpush3.msra.mxu1 %v5253_v51  ;;  %v10002_v51 = vadd.f32 %v14321_v20, %v14317_v52 }
 0xb50   :  { %v14331_v17 = vpop.f32.mrf.mxu1 }
 0xb51   :  { %v14333_v62 = vadd.f32 %v4660_v21, %v4526_v11  ;;  %v4521_v52 = vadd.f32 %v10002_v51, %v14306_v15 }
 0xb52   :  { %v11229_v60 = vpop.eup %11228  ;;  %v10009_v35 = vpop.f32.mrf.mxu1 }
 0xb53   :  { %v4751_v43 = vadd.f32 1.0, %v11229_v60  ;;  %v9401_v5 = vmul.f32 -1.442695, %v14333_v62  ;;  %v5252_v60 = vld [vmem:[#allocation7 + $0x770] sm:$0xff] }
 0xb54   :  { %v10010_v63 = vpop.f32.mrf.mxu1  ;;  %10753 = vmatprep.subr.mxu1 %v5252_v60 }
 0xb55   :  { %11234 = vrcp.f32 %v4751_v43  ;;  %v10011_v3 = vadd.f32 %v10010_v63, %v10009_v35  ;;  %10754 = vmatpush3.msra.mxu1 %v5252_v60  ;;  %v5248_v60 = vld [vmem:[#allocation7 + $0x750] sm:$0xff] }
 0xb56   :  { %v11231_v54 = vpop.eup %11230  ;;  %11236 = vpow2.f32 %v9401_v5  ;;  %v14338_v50 = vpop.f32.mrf.mxu1 }
 0xb57   :  { %v4752_v46 = vadd.f32 1.0, %v11231_v54  ;;  %v4536_v10 = vadd.f32 %v10011_v3, %v14306_v15  ;;  %v5251_v3 = vld [vmem:[#allocation7 + $0x768] sm:$0xff]  ;;  %v14357_v54 = vpop.f32.mrf.mxu0 }
 0xb58   :  { %v14341_v7 = vpop.f32.mrf.mxu1  ;;  %10755 = vmatprep.subr.mxu1 %v5251_v3 }
 0xb59   :  { %11238 = vrcp.f32 %v4752_v46  ;;  %v14343_v24 = vadd.f32 %v4670_v48, %v4536_v10  ;;  %10756 = vmatpush3.msra.mxu1 %v5251_v3  ;;  %v5247_v3 = vld [vmem:[#allocation7 + $0x748] sm:$0xff] }
 0xb5a   :  { %v11233_v19 = vpop.eup %11232  ;;  %v10015_v41 = vpop.f32.mrf.mxu1 }
 0xb5b   :  { %v4753_v61 = vadd.f32 1.0, %v11233_v19  ;;  %v9403_v49 = vmul.f32 -1.442695, %v14343_v24  ;;  %v5250_v19 = vld [vmem:[#allocation7 + $0x760] sm:$0xff] }
 0xb5c   :  { %v10016_v56 = vpop.f32.mrf.mxu1  ;;  %10757 = vmatprep.subr.mxu1 %v5250_v19 }
 0xb5d   :  { %11240 = vrcp.f32 %v4753_v61  ;;  %v10017_v8 = vadd.f32 %v10016_v56, %v10015_v41  ;;  %v5249_v41 = vld [vmem:[#allocation7 + $0x758] sm:$0xff]  ;;  %10758 = vmatpush3.msra.mxu1 %v5250_v19 }
 0xb5e   :  { %11242 = vpow2.f32 %v9403_v49  ;;  %v14348_v29 = vpop.f32.mrf.mxu1  ;;  %10759 = vmatprep.subr.mxu1 %v5249_v41 }
 0xb5f   :  { %v4546_v37 = vadd.f32 %v10017_v8, %v14306_v15  ;;  %v4690_v8 = vpop.f32.mrf.mxu0  ;;  %10760 = vmatpush3.msra.mxu1 %v5249_v41  ;;  %v10008_v41 = vadd.f32 %v14331_v17, %v14328_v28  ;;  %v10014_v28 = vadd.f32 %v14341_v7, %v14338_v50 }
 0xb60   :  { %v14351_v11 = vpop.f32.mrf.mxu1  ;;  %10761 = vmatprep.subr.mxu1 %v5248_v60 }
 0xb61   :  { %v14353_v21 = vadd.f32 %v4680_v23, %v4546_v37  ;;  %10762 = vmatpush3.msra.mxu1 %v5248_v60  ;;  %v4541_v50 = vadd.f32 %v10014_v28, %v14306_v15 }
 0xb62   :  { %v11235_v35 = vpop.eup %11234  ;;  %v10021_v43 = vpop.f32.mrf.mxu1  ;;  %10763 = vmatprep.subr.mxu1 %v5247_v3 }
 0xb63   :  { %v11237_v5 = vpop.eup %11236  ;;  %v9405_v63 = vmul.f32 -1.442695, %v14353_v21  ;;  %4807 = vrot.lane.b32.xlu0 %v11235_v35, %s11659_s0  ;;  %10764 = vmatpush3.msra.mxu1 %v5247_v3 }
 0xb64   :  { %v4755_v46 = vadd.f32 1.0, %v11237_v5  ;;  %v10022_v10 = vpop.f32.mrf.mxu1 }
 0xb65   :  { %11244 = vpow2.f32 %v9405_v63  ;;  %v10023_v48 = vadd.f32 %v10022_v10, %v10021_v43  ;;  %v10750_v10 = vpop.f32.mrf.mxu0 }
 0xb66   :  { %v11239_v61 = vpop.eup %11238  ;;  %11246 = vrcp.f32 %v4755_v46  ;;  %v10024_v49 = vpop.f32.mrf.mxu1  ;;  %v5246_v46 = vld [vmem:[#allocation7 + $0x740] sm:$0xff] }
 0xb67   :  { %v4556_v56 = vadd.f32 %v10023_v48, %v14306_v15  ;;  %4809 = vrot.lane.b32.xlu1 %v11239_v61, %s11659_s0  ;;  %10765 = vmatprep.subr.mxu1 %v5246_v46 }
 0xb68   :  { %v10025_v37 = vpop.f32.mrf.mxu1  ;;  %10766 = vmatpush3.msra.mxu1 %v5246_v46 }
 0xb69   :  { %v14363_v23 = vadd.f32 %v4690_v8, %v4556_v56  ;;  %v4700_v8 = vpop.f32.mrf.mxu0 }
 0xb6a   :  { %v11241_v35 = vpop.eup %11240  ;;  %v10027_v43 = vpop.f32.mrf.mxu1 }
 0xb6b   :  { %v11243_v5 = vpop.eup %11242  ;;  %v9407_v63 = vmul.f32 -1.442695, %v14363_v23  ;;  %4811 = vrot.lane.b32.xlu1 %v11241_v35, %s11659_s0  ;;  %v14372_v35 = vadd.f32 %v14313_v55, %v4521_v52 }
 0xb6c   :  { %v4757_v48 = vadd.f32 1.0, %v11243_v5  ;;  %v10028_v19 = vpop.f32.mrf.mxu1 }
 0xb6d   :  { %11248 = vpow2.f32 %v9407_v63  ;;  %v10029_v20 = vadd.f32 %v10028_v19, %v10027_v43  ;;  %v4531_v43 = vadd.f32 %v10008_v41, %v14306_v15  ;;  %v9400_v55 = vmul.f32 -1.442695, %v14372_v35 }
 0xb6e   :  { %11250 = vrcp.f32 %v4757_v48  ;;  %v10030_v61 = vpop.f32.mrf.mxu1  ;;  %v10020_v19 = vadd.f32 %v14351_v11, %v14348_v29 }
 0xb6f   :  { %v4566_v56 = vadd.f32 %v10029_v20, %v14306_v15  ;;  %v14388_v20 = vadd.f32 %v14326_v18, %v4531_v43 }
 0xb70   :  { %v10031_v60 = vpop.f32.mrf.mxu1  ;;  %v4551_v41 = vadd.f32 %v10020_v19, %v14306_v15 }
 0xb71   :  { %v14374_v5 = vadd.f32 %v4700_v8, %v4566_v56  ;;  %v10032_v51 = vadd.f32 %v10031_v60, %v10030_v61  ;;  %v10026_v61 = vadd.f32 %v10025_v37, %v10024_v49  ;;  %v9402_v8 = vmul.f32 -1.442695, %v14388_v20 }
 0xb72   :  { %v11245_v63 = vpop.eup %11244  ;;  %v14395_v60 = vadd.f32 %v14336_v27, %v4541_v50  ;;  %v14399_v18 = vadd.f32 %v14346_v47, %v4551_v41 }
 0xb73   :  { %v11247_v17 = vpop.eup %11246  ;;  %v4759_v3 = vadd.f32 1.0, %v11245_v63  ;;  %v9409_v48 = vmul.f32 -1.442695, %v14374_v5  ;;  %v4571_v46 = vadd.f32 %v10032_v51, %v14306_v15 }
 0xb74   :  { %4815 = vrot.lane.b32.xlu1 %v11247_v17, %s11659_s0  ;;  %v9404_v49 = vmul.f32 -1.442695, %v14395_v60  ;;  %v9406_v37 = vmul.f32 -1.442695, %v14399_v18 }
 0xb75   :  { %11252 = vrcp.f32 %v4759_v3  ;;  %v14385_v52 = vadd.f32 %v10750_v10, %v4571_v46  ;;  %v4561_v10 = vadd.f32 %v10026_v61, %v14306_v15 }
 0xb76   :  { %11254 = vpow2.f32 %v9409_v48 }
 0xb77   :  { %v9410_v7 = vmul.f32 -1.442695, %v14385_v52  ;;  %11256 = vpow2.f32 %v9400_v55  ;;  %v14405_v51 = vadd.f32 %v14357_v54, %v4561_v10 }
 0xb79   :  { %11258 = vpow2.f32 %v9410_v7  ;;  %v9408_v47 = vmul.f32 -1.442695, %v14405_v51 }
 0xb7a   :  { %v11249_v56 = vpop.eup %11248 }
 0xb7b   :  { %v11251_v29 = vpop.eup %11250  ;;  %v4761_v11 = vadd.f32 1.0, %v11249_v56 }
 0xb7c   :  { %4819 = vrot.lane.b32.xlu1 %v11251_v29, %s11659_s0 }
 0xb7d   :  { %11260 = vrcp.f32 %v4761_v11 }
 0xb7e   :  { %11262 = vpow2.f32 %v9402_v8 }
 0xb7f   :  { %11264 = vpow2.f32 %v9404_v49 }
 0xb80   :  { %11266 = vpow2.f32 %v9406_v37 }
 0xb82   :  { %v11253_v27 = vpop.eup %11252 }
 0xb83   :  { %v11255_v63 = vpop.eup %11254  ;;  %4823 = vrot.lane.b32.xlu1 %v11253_v27, %s11659_s0 }
 0xb84   :  { %v4763_v43 = vadd.f32 1.0, %v11255_v63  ;;  %v11257_v28 = vpop.eup %11256 }
 0xb85   :  { %v4754_v48 = vadd.f32 1.0, %v11257_v28 }
 0xb86   :  { %11268 = vrcp.f32 %v4763_v43  ;;  %v11259_v15 = vpop.eup %11258 }
 0xb87   :  { %v4764_v17 = vadd.f32 1.0, %v11259_v15  ;;  %11270 = vpow2.f32 %v9408_v47 }
 0xb89   :  { %11272 = vrcp.f32 %v4764_v17  ;;  %v5245_v17 = vld [vmem:[#allocation7 + $0x738] sm:$0xff] }
 0xb8a   :  { %v11261_v3 = vpop.eup %11260  ;;  %11274 = vrcp.f32 %v4754_v48  ;;  %v5244_v48 = vld [vmem:[#allocation7 + $0x730] sm:$0xff]  ;;  %10055 = vmatprep.subr.mxu0 %v5245_v17 }
 0xb8b   :  { %v11263_v46 = vpop.eup %11262  ;;  %4827 = vrot.lane.b32.xlu1 %v11261_v3, %s11659_s0  ;;  %v5229_v3 = vld [vmem:[#allocation7 + $0x6b8] sm:$0xff] }
 0xb8c   :  { %v4756_v54 = vadd.f32 1.0, %v11263_v46  ;;  %v11265_v55 = vpop.eup %11264  ;;  %10056 = vmatpush3.msra.mxu0 %v5229_v3 }
 0xb8d   :  { %v11267_v19 = vpop.eup %11266  ;;  %v4758_v50 = vadd.f32 1.0, %v11265_v55  ;;  %10057 = vmatprep.subr.mxu0 %v5244_v48  ;;  %v5240_v48 = vld [vmem:[#allocation7 + $0x710] sm:$0xff] }
 0xb8e   :  { %11276 = vrcp.f32 %v4756_v54  ;;  %v4760_v61 = vadd.f32 1.0, %v11267_v19  ;;  %v5228_v19 = vld [vmem:[#allocation7 + $0x6b0] sm:$0xff] }
 0xb8f   :  { %11278 = vrcp.f32 %v4758_v50  ;;  %10058 = vmatpush3.msra.mxu0 %v5228_v19  ;;  %v5224_v19 = vld [vmem:[#allocation7 + $0x690] sm:$0xff] }
 0xb90   :  { %11280 = vrcp.f32 %v4760_v61  ;;  %v5243_v61 = vld [vmem:[#allocation7 + $0x728] sm:$0xff] }
 0xb91   :  { %10059 = vmatprep.subr.mxu0 %v5243_v61  ;;  %v5223_v61 = vld [vmem:[#allocation7 + $0x688] sm:$0xff] }
 0xb93   :  { %v11269_v7 = vpop.eup %11268 }
 0xb94   :  { %4831 = vrot.lane.b32.xlu1 %v11269_v7, %s11659_s0  ;;  %v11271_v41 = vpop.eup %11270 }
 0xb95   :  { %v4762_v8 = vadd.f32 1.0, %v11271_v41 }
 0xb96   :  { %v11273_v56 = vpop.eup %11272 }
 0xb97   :  { %4833 = vrot.lane.b32.xlu0 %v11273_v56, %s11659_s0  ;;  %v11275_v29 = vpop.eup %11274  ;;  %11282 = vrcp.f32 %v4762_v8  ;;  %v5227_v56 = vld [vmem:[#allocation7 + $0x6a8] sm:$0xff] }
 0xb98   :  { %10060 = vmatpush3.msra.mxu0 %v5227_v56 }
 0xb9b   :  { %4813 = vrot.lane.b32.xlu0 %v11275_v29, %s11659_s0  ;;  %v11277_v11 = vpop.eup %11276 }
 0xb9c   :  { %v11279_v10 = vpop.eup %11278 }
 0xb9d   :  { %v11281_v49 = vpop.eup %11280 }
 0xb9f   :  { %4817 = vrot.lane.b32.xlu0 %v11277_v11, %s11659_s0 }
 0xba3   :  { %4821 = vrot.lane.b32.xlu0 %v11279_v10, %s11659_s0 }
 0xba4   :  { %v11283_v37 = vpop.eup %11282 }
 0xba7   :  { %4825 = vrot.lane.b32.xlu0 %v11281_v49, %s11659_s0  ;;  %v5226_v49 = vld [vmem:[#allocation7 + $0x6a0] sm:$0xff] }
 0xbab   :  { %4829 = vrot.lane.b32.xlu0 %v11283_v37, %s11659_s0 }
 0xbd5   :  { %v4808_v27 = vpop.permute.xlu0 %4807 }
 0xbd6   :  { %v4849_v63 = vmul.f32 %v4808_v27, %v14309_v4 }
 0xbd8   :  { %v14419_v43 = vmul.f32 %v4849_v63, %v11880_v12 }
 0xbd9   :  { %v4810_v47 = vpop.permute.xlu1 %4809 }
 0xbda   :  { %5017 = vst.msk [vmem:[#allocation2 + $0x8] sm:$0xff] %vm563_vm1, %v14419_v43  ;;  %v4850_v28 = vmul.f32 %v4810_v47, %v14315_v33  ;;  %v4877_v46 = vrot.slane %v14419_v43, 6  ;;  %v5129_v54 = vrot.slane %v14419_v43, 2  ;;  %v5031_v55 = vrot.slane %v14419_v43, 1  ;;  %v5241_v47 = vld [vmem:[#allocation7 + $0x718] sm:$0xff] }
 0xbdc   :  { %v14425_v15 = vmul.f32 %v4850_v28, %v11882_v13  ;;  %v5225_v28 = vld [vmem:[#allocation7 + $0x698] sm:$0xff] }
 0xbdd   :  { %v4812_v4 = vpop.permute.xlu1 %4811 }
 0xbde   :  { %v4878_v50 = vrot.slane %v14425_v15, 6  ;;  %v5130_v7 = vrot.slane %v14425_v15, 2  ;;  %5018 = vst.msk [vmem:[#allocation2 + $0x20] sm:$0xff] %vm563_vm1, %v14425_v15  ;;  %v4851_v33 = vmul.f32 %v4812_v4, %v14323_v26  ;;  %v5032_v41 = vrot.slane %v14425_v15, 1  ;;  %v5242_v26 = vld [vmem:[#allocation7 + $0x720] sm:$0xff] }
 0xbdf   :  { %10061 = vmatprep.subr.mxu0 %v5242_v26  ;;  %v5237_v26 = vld [vmem:[#allocation7 + $0x6f8] sm:$0xff] }
 0xbe0   :  { %v5155_v8 = vsel %vm805_vm2, %v5129_v54, %v5130_v7  ;;  %v14441_v29 = vmul.f32 %v4851_v33, %v11930_v59  ;;  %v5057_v11 = vsel %vm706_vm3, %v5031_v55, %v5032_v41  ;;  %v4903_v10 = vsel %vm548_vm4, %v4877_v46, %v4878_v50  ;;  %10062 = vmatpush3.msra.mxu0 %v5226_v49  ;;  %v5239_v33 = vld [vmem:[#allocation7 + $0x708] sm:$0xff]  ;;  %v5236_v49 = vld [vmem:[#allocation7 + $0x6f0] sm:$0xff] }
 0xbe1   :  { %5157 = vst.msk [vmem:[#allocation2 + $0x10] sm:$0xff] %vm563_vm1, %v5155_v8  ;;  %5073 = vrot.lane.b32.xlu0 %v5057_v11, %s11659_s0  ;;  %4906 = vst.msk [vmem:[#allocation2 + $0x18] sm:$0xff] %vm563_vm1, %v4903_v10  ;;  %10063 = vmatprep.subr.mxu0 %v5241_v47  ;;  %v5238_v8 = vld [vmem:[#allocation7 + $0x700] sm:$0xff]  ;;  %v5221_v10 = vld [vmem:[#allocation7 + $0x678] sm:$0xff] }
 0xbe2   :  { %v4879_v37 = vrot.slane %v14441_v29, 6  ;;  %v5131_v27 = vrot.slane %v14441_v29, 2  ;;  %5019 = vst.msk [vmem:[#allocation2 + $0x38] sm:$0xff] %vm563_vm1, %v14441_v29  ;;  %v5033_v63 = vrot.slane %v14441_v29, 1  ;;  %10064 = vmatpush3.msra.mxu0 %v5225_v28  ;;  %v5222_v11 = vld [vmem:[#allocation7 + $0x680] sm:$0xff]  ;;  %v5220_v47 = vld [vmem:[#allocation7 + $0x670] sm:$0xff] }
 0xbe3   :  { %10065 = vmatprep.subr.mxu0 %v5240_v48  ;;  %v5219_v48 = vld [vmem:[#allocation7 + $0x668] sm:$0xff] }
 0xbe4   :  { %v5154_v17 = vsel %vm805_vm2, %v5130_v7, %v5131_v27  ;;  %v5056_v3 = vsel %vm706_vm3, %v5032_v41, %v5033_v63  ;;  %v4902_v4 = vsel %vm548_vm4, %v4878_v50, %v4879_v37  ;;  %10066 = vmatpush3.msra.mxu0 %v5224_v19 }
 0xbe5   :  { %5158 = vst.msk [vmem:[#allocation2 + $0x28] sm:$0xff] %vm563_vm1, %v5154_v17  ;;  %5075 = vrot.lane.b32.xlu0 %v5056_v3, %s11659_s0  ;;  %4907 = vst.msk [vmem:[#allocation2 + $0x30] sm:$0xff] %vm563_vm1, %v4902_v4  ;;  %10067 = vmatprep.subr.mxu0 %v5239_v33  ;;  %v5235_v17 = vld [vmem:[#allocation7 + $0x6e8] sm:$0xff]  ;;  %v5234_v4 = vld [vmem:[#allocation7 + $0x6e0] sm:$0xff] }
 0xbe6   :  { %v4816_v7 = vpop.permute.xlu1 %4815  ;;  %10068 = vmatpush3.msra.mxu0 %v5223_v61 }
 0xbe7   :  { %v4853_v41 = vmul.f32 %v4816_v7, %v14333_v62  ;;  %10069 = vmatprep.subr.mxu0 %v5238_v8  ;;  %v5218_v7 = vld [vmem:[#allocation7 + $0x660] sm:$0xff] }
 0xbe8   :  { %v5173_v56 = vld [vmem:[#allocation2 + $0x10] sm:$0xff]  ;;  %10070 = vmatpush3.msra.mxu0 %v5222_v11 }
 0xbe9   :  { %v14476_v50 = vmul.f32 %v4853_v41, %v11935_v9  ;;  %10767 = vmatprep.mubr.msk.f32.mxu1 %vm563_vm1, %v5173_v56  ;;  %10071 = vmatprep.subr.mxu0 %v5237_v26  ;;  %v5233_v11 = vld [vmem:[#allocation7 + $0x6d8] sm:$0xff] }
 0xbea   :  { %10072 = vmatpush3.msra.mxu0 %v5221_v10  ;;  %v5217_v26 = vld [vmem:[#allocation7 + $0x658] sm:$0xff]  ;;  %v5232_v10 = vld [vmem:[#allocation7 + $0x6d0] sm:$0xff] }
 0xbeb   :  { %5021 = vst.msk [vmem:[#allocation2 + $0x68] sm:$0xff] %vm563_vm1, %v14476_v50  ;;  %10073 = vmatprep.subr.mxu0 %v5236_v49 }
 0xbec   :  { %v5176_v62 = vld [vmem:[#allocation2 + $0x28] sm:$0xff]  ;;  %10074 = vmatpush3.msra.mxu0 %v5220_v47 }
 0xbed   :  { %10768 = vmatmul.mubr.msk.f32.vlgmr.msra.gmra.mxu1 %vm563_vm1, %v5176_v62  ;;  %10075 = vmatprep.subr.mxu0 %v5235_v17  ;;  %v5230_v17 = vld [vmem:[#allocation7 + $0x6c0] sm:$0xff] }
 0xbee   :  { %v4820_v28 = vpop.permute.xlu1 %4819  ;;  %10076 = vmatpush3.msra.mxu0 %v5219_v48  ;;  %v5214_v48 = vld [vmem:[#allocation7 + $0x640] sm:$0xff] }
 0xbef   :  { %v4855_v3 = vmul.f32 %v4820_v28, %v14343_v24  ;;  %10077 = vmatprep.subr.mxu0 %v5234_v4  ;;  %v5215_v28 = vld [vmem:[#allocation7 + $0x648] sm:$0xff] }
 0xbf0   :  { %10078 = vmatpush3.msra.mxu0 %v5218_v7 }
 0xbf1   :  { %v14484_v19 = vmul.f32 %v4855_v3, %v11979_v44  ;;  %10079 = vmatprep.subr.mxu0 %v5233_v11 }
 0xbf2   :  { %10080 = vmatpush3.msra.mxu0 %v5217_v26  ;;  %v4920_v26 = vrot.slane %v14425_v15, 7 }
 0xbf3   :  { %5023 = vst.msk [vmem:[#allocation2 + $0x98] sm:$0xff] %vm563_vm1, %v14484_v19  ;;  %10081 = vmatprep.subr.mxu0 %v5232_v10 }
 0xbf5   :  { %v4824_v33 = vpop.permute.xlu1 %4823 }
 0xbf6   :  { %v4857_v41 = vmul.f32 %v4824_v33, %v14353_v21  ;;  %v5216_v21 = vld [vmem:[#allocation7 + $0x650] sm:$0xff] }
 0xbf7   :  { %10082 = vmatpush3.msra.mxu0 %v5216_v21 }
 0xbf8   :  { %v14490_v24 = vmul.f32 %v4857_v41, %v12056_v25  ;;  %v4919_v41 = vrot.slane %v14419_v43, 7 }
 0xbfa   :  { %5025 = vst.msk [vmem:[#allocation2 + $0xc8] sm:$0xff] %vm563_vm1, %v14490_v24 }
 0xbfd   :  { %v4828_v61 = vpop.permute.xlu1 %4827 }
 0xbfe   :  { %v4859_v56 = vmul.f32 %v4828_v61, %v14363_v23  ;;  %v5231_v23 = vld [vmem:[#allocation7 + $0x6c8] sm:$0xff] }
 0xbff   :  { %10083 = vmatprep.subr.mxu0 %v5231_v23  ;;  %v4921_v23 = vrot.slane %v14441_v29, 7  ;;  %v4883_v29 = vrot.slane %v14484_v19, 6 }
 0xc00   :  { %v14496_v8 = vmul.f32 %v4859_v56, %v12129_v36  ;;  %10084 = vmatpush3.msra.mxu0 %v5215_v28  ;;  %v5133_v28 = vrot.slane %v14476_v50, 2 }
 0xc01   :  { %10085 = vmatprep.subr.mxu0 %v5230_v17 }
 0xc02   :  { %5027 = vst.msk [vmem:[#allocation2 + $0xf8] sm:$0xff] %vm563_vm1, %v14496_v8  ;;  %10086 = vmatpush3.msra.mxu0 %v5214_v48 }
 0xc06   :  { %v4832_v62 = vpop.permute.xlu1 %4831 }
 0xc07   :  { %v4861_v49 = vmul.f32 %v4832_v62, %v14374_v5 }
 0xc09   :  { %v14502_v47 = vmul.f32 %v4861_v49, %v12202_v39  ;;  %v4834_v3 = vpop.permute.xlu0 %4833 }
 0xc0a   :  { %v4862_v4 = vmul.f32 %v4834_v3, %v14385_v52 }
 0xc0b   :  { %5029 = vst.msk [vmem:[#allocation2 + $0x128] sm:$0xff] %vm563_vm1, %v14502_v47  ;;  %v5141_v7 = vrot.slane %v14502_v47, 2  ;;  %v4889_v15 = vrot.slane %v14502_v47, 6 }
 0xc0c   :  { %v14508_v5 = vmul.f32 %v4862_v4, %v11884_v14 }
 0xc0d   :  { %v4814_v33 = vpop.permute.xlu0 %4813 }
 0xc0e   :  { %v4890_v61 = vrot.slane %v14508_v5, 6  ;;  %v5142_v56 = vrot.slane %v14508_v5, 2  ;;  %5030 = vst.msk [vmem:[#allocation2 + $0x140] sm:$0xff] %vm563_vm1, %v14508_v5  ;;  %v4852_v52 = vmul.f32 %v4814_v33, %v14372_v35  ;;  %v4932_v11 = vrot.slane %v14508_v5, 7 }
 0xc0f   :  { %v4945_v33 = vsel %vm592_vm5, %v4919_v41, %v4920_v26 }
 0xc10   :  { %v5143_v10 = vsel %vm805_vm2, %v5141_v7, %v5142_v56  ;;  %v5156_v62 = vsel %vm805_vm2, %v5142_v56, %v5129_v54  ;;  %v14528_v21 = vmul.f32 %v4852_v52, %v11932_v1  ;;  %v4946_v35 = vsel %vm592_vm5, %v4932_v11, %v4919_v41 }
 0xc11   :  { %5169 = vst.msk [vmem:[#allocation2 + $0x130] sm:$0xff] %vm563_vm1, %v5143_v10  ;;  %5170 = vst.msk [vmem:[#allocation2 + $0x148] sm:$0xff] %vm563_vm1, %v5156_v62  ;;  %4961 = vrot.lane.b32.xlu1 %v4946_v35, %s11659_s0  ;;  %v4818_v49 = vpop.permute.xlu0 %4817  ;;  %v4904_v54 = vsel %vm548_vm4, %v4890_v61, %v4877_v46  ;;  %v4891_v46 = vsel %vm548_vm4, %v4889_v15, %v4890_v61  ;;  %v4881_v61 = vrot.slane %v14476_v50, 6  ;;  %v5135_v62 = vrot.slane %v14484_v19, 2 }
 0xc12   :  { %v5132_v17 = vrot.slane %v14528_v21, 2  ;;  %5020 = vst.msk [vmem:[#allocation2 + $0x50] sm:$0xff] %vm563_vm1, %v14528_v21  ;;  %v4854_v3 = vmul.f32 %v4818_v49, %v14388_v20  ;;  %v5034_v48 = vrot.slane %v14528_v21, 1  ;;  %4905 = vst.msk [vmem:[#allocation2] sm:$0xff] %vm563_vm1, %v4904_v54  ;;  %v4880_v4 = vrot.slane %v14528_v21, 6 }
 0xc13   :  { %4918 = vst.msk [vmem:[#allocation2 + $0x138] sm:$0xff] %vm563_vm1, %v4891_v46  ;;  %v4944_v10 = vsel %vm592_vm5, %v4920_v26, %v4921_v23  ;;  %v5035_v49 = vrot.slane %v14476_v50, 1 }
 0xc14   :  { %v5152_v56 = vsel %vm805_vm2, %v5132_v17, %v5133_v28  ;;  %v5153_v20 = vsel %vm805_vm2, %v5131_v27, %v5132_v17  ;;  %v14564_v52 = vmul.f32 %v4854_v3, %v11941_v22  ;;  %v5055_v41 = vsel %vm706_vm3, %v5033_v63, %v5034_v48 }
 0xc15   :  { %5159 = vst.msk [vmem:[#allocation2 + $0x40] sm:$0xff] %vm563_vm1, %v5153_v20  ;;  %5160 = vst.msk [vmem:[#allocation2 + $0x58] sm:$0xff] %vm563_vm1, %v5152_v56  ;;  %4963 = vrot.lane.b32.xlu1 %v4945_v33, %s11659_s0  ;;  %5077 = vrot.lane.b32.xlu0 %v5055_v41, %s11659_s0  ;;  %v4822_v27 = vpop.permute.xlu0 %4821  ;;  %v4922_v17 = vrot.slane %v14528_v21, 7  ;;  %v4901_v26 = vsel %vm548_vm4, %v4879_v37, %v4880_v4  ;;  %v4900_v3 = vsel %vm548_vm4, %v4880_v4, %v4881_v61 }
 0xc16   :  { %v5134_v63 = vrot.slane %v14564_v52, 2  ;;  %5022 = vst.msk [vmem:[#allocation2 + $0x80] sm:$0xff] %vm563_vm1, %v14564_v52  ;;  %v4856_v35 = vmul.f32 %v4822_v27, %v14395_v60  ;;  %v4882_v54 = vrot.slane %v14564_v52, 6  ;;  %v5054_v21 = vsel %vm706_vm3, %v5034_v48, %v5035_v49  ;;  %4908 = vst.msk [vmem:[#allocation2 + $0x48] sm:$0xff] %vm563_vm1, %v4901_v26 }
 0xc17   :  { %4909 = vst.msk [vmem:[#allocation2 + $0x60] sm:$0xff] %vm563_vm1, %v4900_v3  ;;  %v5137_v4 = vrot.slane %v14490_v24, 2 }
 0xc18   :  { %v5150_v33 = vsel %vm805_vm2, %v5134_v63, %v5135_v62  ;;  %v5151_v60 = vsel %vm805_vm2, %v5133_v28, %v5134_v63  ;;  %v14597_v46 = vmul.f32 %v4856_v35, %v12021_v2  ;;  %v5036_v28 = vrot.slane %v14564_v52, 1 }
 0xc19   :  { %5161 = vst.msk [vmem:[#allocation2 + $0x70] sm:$0xff] %vm563_vm1, %v5151_v60  ;;  %5162 = vst.msk [vmem:[#allocation2 + $0x88] sm:$0xff] %vm563_vm1, %v5150_v33  ;;  %4965 = vrot.lane.b32.xlu1 %v4944_v10, %s11659_s0  ;;  %5079 = vrot.lane.b32.xlu0 %v5054_v21, %s11659_s0  ;;  %v4826_v37 = vpop.permute.xlu0 %4825  ;;  %v4899_v41 = vsel %vm548_vm4, %v4881_v61, %v4882_v54  ;;  %v4898_v27 = vsel %vm548_vm4, %v4882_v54, %v4883_v29  ;;  %v4885_v61 = vrot.slane %v14490_v24, 6 }
 0xc1a   :  { %v5136_v48 = vrot.slane %v14597_v46, 2  ;;  %5024 = vst.msk [vmem:[#allocation2 + $0xb0] sm:$0xff] %vm563_vm1, %v14597_v46  ;;  %v4858_v56 = vmul.f32 %v4826_v37, %v14399_v18  ;;  %v4884_v20 = vrot.slane %v14597_v46, 6  ;;  %v4943_v18 = vsel %vm592_vm5, %v4921_v23, %v4922_v17  ;;  %4910 = vst.msk [vmem:[#allocation2 + $0x78] sm:$0xff] %vm563_vm1, %v4899_v41 }
 0xc1b   :  { %4911 = vst.msk [vmem:[#allocation2 + $0x90] sm:$0xff] %vm563_vm1, %v4898_v27  ;;  %v4923_v23 = vrot.slane %v14476_v50, 7  ;;  %v5139_v33 = vrot.slane %v14496_v8, 2  ;;  %v5037_v37 = vrot.slane %v14484_v19, 1 }
 0xc1c   :  { %v5148_v10 = vsel %vm805_vm2, %v5136_v48, %v5137_v4  ;;  %v5149_v63 = vsel %vm805_vm2, %v5135_v62, %v5136_v48  ;;  %v14624_v35 = vmul.f32 %v4858_v56, %v12092_v0  ;;  %v5179_v26 = vld [vmem:[#allocation2 + $0x40] sm:$0xff]  ;;  %v5182_v3 = vld [vmem:[#allocation2 + $0x58] sm:$0xff]  ;;  %v5053_v62 = vsel %vm706_vm3, %v5035_v49, %v5036_v28 }
 0xc1d   :  { %5163 = vst.msk [vmem:[#allocation2 + $0xa0] sm:$0xff] %vm563_vm1, %v5149_v63  ;;  %5164 = vst.msk [vmem:[#allocation2 + $0xb8] sm:$0xff] %vm563_vm1, %v5148_v10  ;;  %10770 = vmatprep.mubr.msk.f32.mxu1 %vm563_vm1, %v5179_v26  ;;  %4967 = vrot.lane.b32.xlu1 %v4943_v18, %s11659_s0  ;;  %v4830_v54 = vpop.permute.xlu0 %4829  ;;  %v4942_v50 = vsel %vm592_vm5, %v4922_v17, %v4923_v23  ;;  %v4897_v48 = vsel %vm548_vm4, %v4883_v29, %v4884_v20  ;;  %v4924_v26 = vrot.slane %v14564_v52, 7 }
 0xc1e   :  { %v5138_v60 = vrot.slane %v14624_v35, 2  ;;  %5026 = vst.msk [vmem:[#allocation2 + $0xe0] sm:$0xff] %vm563_vm1, %v14624_v35  ;;  %5081 = vrot.lane.b32.xlu0 %v5053_v62, %s11659_s0  ;;  %v4860_v21 = vmul.f32 %v4830_v54, %v14405_v51  ;;  %10771 = vmatmul.mubr.msk.f32.gmra.mxu1 %vm563_vm1, %v5182_v3  ;;  %v4886_v49 = vrot.slane %v14624_v35, 6  ;;  %v4896_v56 = vsel %vm548_vm4, %v4884_v20, %v4885_v61 }
 0xc1f   :  { %4912 = vst.msk [vmem:[#allocation2 + $0xa8] sm:$0xff] %vm563_vm1, %v4897_v48  ;;  %4913 = vst.msk [vmem:[#allocation2 + $0xc0] sm:$0xff] %vm563_vm1, %v4896_v56  ;;  %v4887_v17 = vrot.slane %v14496_v8, 6  ;;  %v5052_v29 = vsel %vm706_vm3, %v5036_v28, %v5037_v37  ;;  %v4941_v54 = vsel %vm592_vm5, %v4923_v23, %v4924_v26  ;;  %v4925_v23 = vrot.slane %v14484_v19, 7 }
 0xc20   :  { %v5146_v41 = vsel %vm805_vm2, %v5138_v60, %v5139_v33  ;;  %v5147_v51 = vsel %vm805_vm2, %v5137_v4, %v5138_v60  ;;  %v14658_v27 = vmul.f32 %v4860_v21, %v16985_v6  ;;  %v5185_v10 = vld [vmem:[#allocation2 + $0x70] sm:$0xff]  ;;  %v5188_v63 = vld [vmem:[#allocation2 + $0x88] sm:$0xff]  ;;  %v5038_v4 = vrot.slane %v14597_v46, 1 }
 0xc21   :  { %5165 = vst.msk [vmem:[#allocation2 + $0xd0] sm:$0xff] %vm563_vm1, %v5147_v51  ;;  %5166 = vst.msk [vmem:[#allocation2 + $0xe8] sm:$0xff] %vm563_vm1, %v5146_v41  ;;  %4969 = vrot.lane.b32.xlu1 %v4942_v50, %s11659_s0  ;;  %10773 = vmatprep.mubr.msk.f32.mxu1 %vm563_vm1, %v5185_v10  ;;  %v4895_v18 = vsel %vm548_vm4, %v4885_v61, %v4886_v49  ;;  %v4894_v3 = vsel %vm548_vm4, %v4886_v49, %v4887_v17  ;;  %v5039_v49 = vrot.slane %v14490_v24, 1 }
 0xc22   :  { %v4888_v52 = vrot.slane %v14658_v27, 6  ;;  %v5140_v20 = vrot.slane %v14658_v27, 2  ;;  %5028 = vst.msk [vmem:[#allocation2 + $0x110] sm:$0xff] %vm563_vm1, %v14658_v27  ;;  %5083 = vrot.lane.b32.xlu0 %v5052_v29, %s11659_s0  ;;  %10774 = vmatmul.mubr.msk.f32.gmra.mxu1 %vm563_vm1, %v5188_v63  ;;  %4914 = vst.msk [vmem:[#allocation2 + $0xd8] sm:$0xff] %vm563_vm1, %v4895_v18  ;;  %v4926_v56 = vrot.slane %v14597_v46, 7  ;;  %v5209_v63 = vld [vmem:[#allocation2 + $0x130] sm:$0xff] }
 0xc23   :  { %4915 = vst.msk [vmem:[#allocation2 + $0xf0] sm:$0xff] %vm563_vm1, %v4894_v3  ;;  %v5050_v19 = vsel %vm706_vm3, %v5038_v4, %v5039_v49  ;;  %v5042_v18 = vrot.slane %v14658_v27, 1  ;;  %v4929_v3 = vrot.slane %v14496_v8, 7 }
 0xc24   :  { %v5144_v28 = vsel %vm805_vm2, %v5140_v20, %v5141_v7  ;;  %v5145_v62 = vsel %vm805_vm2, %v5139_v33, %v5140_v20  ;;  %v5191_v60 = vld [vmem:[#allocation2 + $0xa0] sm:$0xff]  ;;  %v5194_v21 = vld [vmem:[#allocation2 + $0xb8] sm:$0xff]  ;;  %v5051_v7 = vsel %vm706_vm3, %v5037_v37, %v5038_v4  ;;  %v4893_v61 = vsel %vm548_vm4, %v4887_v17, %v4888_v52  ;;  %v5212_v20 = vld [vmem:[#allocation2 + $0x148] sm:$0xff] }
 0xc25   :  { %5167 = vst.msk [vmem:[#allocation2 + $0x100] sm:$0xff] %vm563_vm1, %v5145_v62  ;;  %5168 = vst.msk [vmem:[#allocation2 + $0x118] sm:$0xff] %vm563_vm1, %v5144_v28  ;;  %4971 = vrot.lane.b32.xlu1 %v4941_v54, %s11659_s0  ;;  %10776 = vmatprep.mubr.msk.f32.mxu1 %vm563_vm1, %v5191_v60  ;;  %v4892_v33 = vsel %vm548_vm4, %v4888_v52, %v4889_v15  ;;  %v4940_v37 = vsel %vm592_vm5, %v4924_v26, %v4925_v23  ;;  %v5040_v15 = vrot.slane %v14624_v35, 1 }
 0xc26   :  { %5085 = vrot.lane.b32.xlu0 %v5051_v7, %s11659_s0  ;;  %10777 = vmatmul.mubr.msk.f32.gmra.mxu1 %vm563_vm1, %v5194_v21  ;;  %4916 = vst.msk [vmem:[#allocation2 + $0x108] sm:$0xff] %vm563_vm1, %v4893_v61  ;;  %4917 = vst.msk [vmem:[#allocation2 + $0x120] sm:$0xff] %vm563_vm1, %v4892_v33  ;;  %v4939_v41 = vsel %vm592_vm5, %v4925_v23, %v4926_v56  ;;  %v4927_v26 = vrot.slane %v14490_v24, 7  ;;  %v5041_v17 = vrot.slane %v14496_v8, 1  ;;  %v4928_v4 = vrot.slane %v14624_v35, 7 }
 0xc27   :  { %v5049_v46 = vsel %vm706_vm3, %v5039_v49, %v5040_v15  ;;  %v5043_v28 = vrot.slane %v14502_v47, 1  ;;  %v4930_v54 = vrot.slane %v14658_v27, 7  ;;  %v5044_v21 = vrot.slane %v14508_v5, 1 }
 0xc28   :  { %v5197_v50 = vld [vmem:[#allocation2 + $0xd0] sm:$0xff]  ;;  %v5200_v48 = vld [vmem:[#allocation2 + $0xe8] sm:$0xff]  ;;  %v4938_v29 = vsel %vm592_vm5, %v4926_v56, %v4927_v26  ;;  %v5048_v52 = vsel %vm706_vm3, %v5040_v15, %v5041_v17  ;;  %v4937_v24 = vsel %vm592_vm5, %v4927_v26, %v4928_v4  ;;  %v5047_v35 = vsel %vm706_vm3, %v5041_v17, %v5042_v18 }
 0xc29   :  { %4973 = vrot.lane.b32.xlu1 %v4940_v37, %s11659_s0  ;;  %10779 = vmatprep.mubr.msk.f32.mxu1 %vm563_vm1, %v5197_v50  ;;  %v4936_v62 = vsel %vm592_vm5, %v4928_v4, %v4929_v3  ;;  %v5046_v60 = vsel %vm706_vm3, %v5042_v18, %v5043_v28  ;;  %v4935_v7 = vsel %vm592_vm5, %v4929_v3, %v4930_v54  ;;  %v4931_v27 = vrot.slane %v14502_v47, 7 }
 0xc2a   :  { %5087 = vrot.lane.b32.xlu0 %v5050_v19, %s11659_s0  ;;  %10780 = vmatmul.mubr.msk.f32.gmra.mxu1 %vm563_vm1, %v5200_v48  ;;  %v5045_v8 = vsel %vm706_vm3, %v5043_v28, %v5044_v21  ;;  %v5058_v23 = vsel %vm706_vm3, %v5044_v21, %v5031_v55 }
 0xc2b   :  { %v4934_v61 = vsel %vm592_vm5, %v4930_v54, %v4931_v27  ;;  %v4933_v33 = vsel %vm592_vm5, %v4931_v27, %v4932_v11 }
 0xc2c   :  { %v5203_v51 = vld [vmem:[#allocation2 + $0x100] sm:$0xff]  ;;  %v5206_v10 = vld [vmem:[#allocation2 + $0x118] sm:$0xff] }
 0xc2d   :  { %4975 = vrot.lane.b32.xlu1 %v4939_v41, %s11659_s0  ;;  %10782 = vmatprep.mubr.msk.f32.mxu1 %vm563_vm1, %v5203_v51 }
 0xc2e   :  { %5089 = vrot.lane.b32.xlu0 %v5049_v46, %s11659_s0  ;;  %10783 = vmatmul.mubr.msk.f32.gmra.mxu1 %vm563_vm1, %v5206_v10 }
 0xc2f   :  { %10785 = vmatprep.mubr.msk.f32.mxu1 %vm563_vm1, %v5209_v63 }
 0xc31   :  { %4977 = vrot.lane.b32.xlu1 %v4938_v29, %s11659_s0 }
 0xc32   :  { %5091 = vrot.lane.b32.xlu0 %v5048_v52, %s11659_s0  ;;  %10786 = vmatmul.mubr.msk.f32.gmra.mxu1 %vm563_vm1, %v5212_v20 }
 0xc35   :  { %4979 = vrot.lane.b32.xlu1 %v4937_v24, %s11659_s0 }
 0xc36   :  { %5093 = vrot.lane.b32.xlu0 %v5047_v35, %s11659_s0 }
 0xc39   :  { %4981 = vrot.lane.b32.xlu1 %v4936_v62, %s11659_s0 }
 0xc3a   :  { %5095 = vrot.lane.b32.xlu0 %v5046_v60, %s11659_s0 }
 0xc3d   :  { %4983 = vrot.lane.b32.xlu1 %v4935_v7, %s11659_s0 }
 0xc3e   :  { %5097 = vrot.lane.b32.xlu0 %v5045_v8, %s11659_s0 }
 0xc41   :  { %4985 = vrot.lane.b32.xlu1 %v4934_v61, %s11659_s0 }
 0xc42   :  { %5099 = vrot.lane.b32.xlu0 %v5058_v23, %s11659_s0 }
 0xc45   :  { %4987 = vrot.lane.b32.xlu1 %v4933_v33, %s11659_s0 }
 0xc53   :  { %v5074_v47 = vpop.permute.xlu0 %5073 }
 0xc54   :  { %5115 = vst.msk [vmem:[#allocation2 + $0x8] sm:$0xff] %vm663_vm6, %v5074_v47 }
 0xc57   :  { %v5076_v49 = vpop.permute.xlu0 %5075 }
 0xc58   :  { %5116 = vst.msk [vmem:[#allocation2 + $0x20] sm:$0xff] %vm663_vm6, %v5076_v49 }
 0xc5b   :  { %v5172_v43 = vld [vmem:[#allocation2 + $0x8] sm:$0xff] }
 0xc5c   :  { %5368 = vmatprep.mubr.f32.mxu0 %v5172_v43 }
 0xc5f   :  { %v5175_v56 = vld [vmem:[#allocation2 + $0x20] sm:$0xff] }
 0xc83   :  { %v4962_v55 = vpop.permute.xlu1 %4961 }
 0xc84   :  { %5003 = vst.msk [vmem:[#allocation2] sm:$0xff] %vm663_vm6, %v4962_v55 }
 0xc87   :  { %v4964_v37 = vpop.permute.xlu1 %4963  ;;  %v5078_v50 = vpop.permute.xlu0 %5077 }
 0xc88   :  { %5004 = vst.msk [vmem:[#allocation2 + $0x18] sm:$0xff] %vm663_vm6, %v4964_v37  ;;  %5117 = vst.msk [vmem:[#allocation2 + $0x38] sm:$0xff] %vm663_vm6, %v5078_v50 }
 0xc8b   :  { %v4966_v5 = vpop.permute.xlu1 %4965  ;;  %v5080_v11 = vpop.permute.xlu0 %5079  ;;  %v5171_v48 = vld [vmem:[#allocation2] sm:$0xff] }
 0xc8c   :  { %5005 = vst.msk [vmem:[#allocation2 + $0x30] sm:$0xff] %vm663_vm6, %v4966_v5  ;;  %5118 = vst.msk [vmem:[#allocation2 + $0x50] sm:$0xff] %vm663_vm6, %v5080_v11  ;;  %5369 = vmatmul.mubr.f32.vlgmr.msra.gmra.mxu0 %v5171_v48 }
 0xc8d   :  { %5373 = vmatprep.mubr.f32.mxu0 %v5175_v56 }
 0xc8f   :  { %v4968_v19 = vpop.permute.xlu1 %4967  ;;  %v5174_v15 = vld [vmem:[#allocation2 + $0x18] sm:$0xff] }
 0xc90   :  { %v5178_v41 = vld [vmem:[#allocation2 + $0x38] sm:$0xff]  ;;  %5006 = vst.msk [vmem:[#allocation2 + $0x48] sm:$0xff] %vm663_vm6, %v4968_v19  ;;  %v5082_v51 = vpop.permute.xlu0 %5081  ;;  %5374 = vmatmul.mubr.f32.gmra.mxu0 %v5174_v15 }
 0xc91   :  { %5119 = vst.msk [vmem:[#allocation2 + $0x68] sm:$0xff] %vm663_vm6, %v5082_v51  ;;  %5378 = vmatprep.mubr.f32.mxu0 %v5178_v41 }
 0xc93   :  { %v4970_v10 = vpop.permute.xlu1 %4969  ;;  %v5177_v46 = vld [vmem:[#allocation2 + $0x30] sm:$0xff] }
 0xc94   :  { %v5181_v63 = vld [vmem:[#allocation2 + $0x50] sm:$0xff]  ;;  %5007 = vst.msk [vmem:[#allocation2 + $0x60] sm:$0xff] %vm663_vm6, %v4970_v10  ;;  %v5084_v26 = vpop.permute.xlu0 %5083  ;;  %5379 = vmatmul.mubr.f32.gmra.mxu0 %v5177_v46 }
 0xc95   :  { %5120 = vst.msk [vmem:[#allocation2 + $0x80] sm:$0xff] %vm663_vm6, %v5084_v26  ;;  %5383 = vmatprep.mubr.f32.mxu0 %v5181_v63 }
 0xc97   :  { %v4972_v17 = vpop.permute.xlu1 %4971  ;;  %v5180_v29 = vld [vmem:[#allocation2 + $0x48] sm:$0xff] }
 0xc98   :  { %5008 = vst.msk [vmem:[#allocation2 + $0x78] sm:$0xff] %vm663_vm6, %v4972_v17  ;;  %v5086_v4 = vpop.permute.xlu0 %5085  ;;  %5384 = vmatmul.mubr.f32.gmra.mxu0 %v5180_v29  ;;  %v5184_v52 = vld [vmem:[#allocation2 + $0x68] sm:$0xff] }
 0xc99   :  { %5121 = vst.msk [vmem:[#allocation2 + $0x98] sm:$0xff] %vm663_vm6, %v5086_v4  ;;  %5388 = vmatprep.mubr.f32.mxu0 %v5184_v52  ;;  %v14803_v4 = vld [vmem:[#allocation8 + $0x5] ss:$0 sm:$0xff] }
 0xc9b   :  { %v4974_v20 = vpop.permute.xlu1 %4973  ;;  %v5183_v18 = vld [vmem:[#allocation2 + $0x60] sm:$0xff] }
 0xc9c   :  { %5009 = vst.msk [vmem:[#allocation2 + $0x90] sm:$0xff] %vm663_vm6, %v4974_v20  ;;  %v5088_v24 = vpop.permute.xlu0 %5087  ;;  %5389 = vmatmul.mubr.f32.gmra.mxu0 %v5183_v18  ;;  %v5187_v35 = vld [vmem:[#allocation2 + $0x80] sm:$0xff] }
 0xc9d   :  { %5122 = vst.msk [vmem:[#allocation2 + $0xb0] sm:$0xff] %vm663_vm6, %v5088_v24  ;;  %5393 = vmatprep.mubr.f32.mxu0 %v5187_v35 }
 0xc9f   :  { %v4976_v3 = vpop.permute.xlu1 %4975  ;;  %v5186_v28 = vld [vmem:[#allocation2 + $0x78] sm:$0xff] }
 0xca0   :  { %5010 = vst.msk [vmem:[#allocation2 + $0xa8] sm:$0xff] %vm663_vm6, %v4976_v3  ;;  %v5090_v62 = vpop.permute.xlu0 %5089  ;;  %5394 = vmatmul.mubr.f32.gmra.mxu0 %v5186_v28  ;;  %v5190_v54 = vld [vmem:[#allocation2 + $0x98] sm:$0xff] }
 0xca1   :  { %5123 = vst.msk [vmem:[#allocation2 + $0xc8] sm:$0xff] %vm663_vm6, %v5090_v62  ;;  %5398 = vmatprep.mubr.f32.mxu0 %v5190_v54 }
 0xca3   :  { %v4978_v60 = vpop.permute.xlu1 %4977  ;;  %v5189_v21 = vld [vmem:[#allocation2 + $0x90] sm:$0xff] }
 0xca4   :  { %5011 = vst.msk [vmem:[#allocation2 + $0xc0] sm:$0xff] %vm663_vm6, %v4978_v60  ;;  %v5092_v7 = vpop.permute.xlu0 %5091  ;;  %5399 = vmatmul.mubr.f32.gmra.mxu0 %v5189_v21  ;;  %v5193_v8 = vld [vmem:[#allocation2 + $0xb0] sm:$0xff] }
 0xca5   :  { %5124 = vst.msk [vmem:[#allocation2 + $0xe0] sm:$0xff] %vm663_vm6, %v5092_v7  ;;  %5403 = vmatprep.mubr.f32.mxu0 %v5193_v8 }
 0xca7   :  { %v4980_v27 = vpop.permute.xlu1 %4979  ;;  %v5192_v61 = vld [vmem:[#allocation2 + $0xa8] sm:$0xff] }
 0xca8   :  { %5012 = vst.msk [vmem:[#allocation2 + $0xd8] sm:$0xff] %vm663_vm6, %v4980_v27  ;;  %v5094_v23 = vpop.permute.xlu0 %5093  ;;  %5404 = vmatmul.mubr.f32.gmra.mxu0 %v5192_v61  ;;  %v5196_v33 = vld [vmem:[#allocation2 + $0xc8] sm:$0xff] }
 0xca9   :  { %5125 = vst.msk [vmem:[#allocation2 + $0xf8] sm:$0xff] %vm663_vm6, %v5094_v23  ;;  %5408 = vmatprep.mubr.f32.mxu0 %v5196_v33 }
 0xcab   :  { %v4982_v47 = vpop.permute.xlu1 %4981  ;;  %v5195_v49 = vld [vmem:[#allocation2 + $0xc0] sm:$0xff] }
 0xcac   :  { %5013 = vst.msk [vmem:[#allocation2 + $0xf0] sm:$0xff] %vm663_vm6, %v4982_v47  ;;  %v5096_v43 = vpop.permute.xlu0 %5095  ;;  %5409 = vmatmul.mubr.f32.gmra.mxu0 %v5195_v49  ;;  %v5199_v55 = vld [vmem:[#allocation2 + $0xe0] sm:$0xff] }
 0xcad   :  { %5126 = vst.msk [vmem:[#allocation2 + $0x110] sm:$0xff] %vm663_vm6, %v5096_v43  ;;  %5413 = vmatprep.mubr.f32.mxu0 %v5199_v55  ;;  %v10769_v29 = vpop.f32.mrf.mxu1 }
 0xcaf   :  { %v4984_v37 = vpop.permute.xlu1 %4983  ;;  %v5198_v50 = vld [vmem:[#allocation2 + $0xd8] sm:$0xff]  ;;  %v5505_v35 = vpop.f32.mrf.mxu1 }
 0xcb0   :  { %5014 = vst.msk [vmem:[#allocation2 + $0x108] sm:$0xff] %vm663_vm6, %v4984_v37  ;;  %v5098_v5 = vpop.permute.xlu0 %5097  ;;  %5414 = vmatmul.mubr.f32.gmra.mxu0 %v5198_v50  ;;  %v5202_v11 = vld [vmem:[#allocation2 + $0xf8] sm:$0xff] }
 0xcb1   :  { %5127 = vst.msk [vmem:[#allocation2 + $0x128] sm:$0xff] %vm663_vm6, %v5098_v5  ;;  %5418 = vmatprep.mubr.f32.mxu0 %v5202_v11 }
 0xcb3   :  { %v4986_v48 = vpop.permute.xlu1 %4985  ;;  %v5201_v56 = vld [vmem:[#allocation2 + $0xf0] sm:$0xff] }
 0xcb4   :  { %5015 = vst.msk [vmem:[#allocation2 + $0x120] sm:$0xff] %vm663_vm6, %v4986_v48  ;;  %v5100_v19 = vpop.permute.xlu0 %5099  ;;  %5419 = vmatmul.mubr.f32.gmra.mxu0 %v5201_v56  ;;  %v5205_v15 = vld [vmem:[#allocation2 + $0x110] sm:$0xff] }
 0xcb5   :  { %5128 = vst.msk [vmem:[#allocation2 + $0x140] sm:$0xff] %vm663_vm6, %v5100_v19  ;;  %5423 = vmatprep.mubr.f32.mxu0 %v5205_v15 }
 0xcb7   :  { %v4988_v41 = vpop.permute.xlu1 %4987  ;;  %v5204_v51 = vld [vmem:[#allocation2 + $0x108] sm:$0xff] }
 0xcb8   :  { %5016 = vst.msk [vmem:[#allocation2 + $0x138] sm:$0xff] %vm663_vm6, %v4988_v41  ;;  %5424 = vmatmul.mubr.f32.gmra.mxu0 %v5204_v51  ;;  %v5208_v10 = vld [vmem:[#allocation2 + $0x128] sm:$0xff] }
 0xcb9   :  { %5428 = vmatprep.mubr.f32.mxu0 %v5208_v10 }
 0xcbb   :  { %v5207_v46 = vld [vmem:[#allocation2 + $0x120] sm:$0xff] }
 0xcbc   :  { %5429 = vmatmul.mubr.f32.gmra.mxu0 %v5207_v46  ;;  %v5211_v63 = vld [vmem:[#allocation2 + $0x140] sm:$0xff] }
 0xcbd   :  { %5433 = vmatprep.mubr.f32.mxu0 %v5211_v63 }
 0xcbf   :  { %v5210_v26 = vld [vmem:[#allocation2 + $0x138] sm:$0xff] }
 0xcc0   :  { %5434 = vmatmul.mubr.f32.gmra.mxu0 %v5210_v26 }
 0xcde   :  { %v14810_v7 = vpop.f32.mrf.mxu1 }
 0xce0   :  { %v5515_v49 = vpop.f32.mrf.mxu1 }
 0xce2   :  { %v14823_v5 = vpop.f32.mrf.mxu1 }
 0xce4   :  { %v5525_v15 = vpop.f32.mrf.mxu1 }
 0xd4c   :  { %v10087_v17 = vpop.f32.mrf.mxu0 }
 0xd4e   :  { %v10088_v52 = vpop.f32.mrf.mxu0 }
 0xd4f   :  { %v10089_v20 = vadd.f32 %v10088_v52, %v10087_v17  ;;  %v14833_v17 = vpop.f32.mrf.mxu1 }
 0xd50   :  { %v10090_v18 = vpop.f32.mrf.mxu0 }
 0xd51   :  { %v5371_v24 = vadd.f32 %v10089_v20, %v14803_v4 }
 0xd52   :  { %v10091_v3 = vpop.f32.mrf.mxu0 }
 0xd53   :  { %v14806_v28 = vadd.f32 %v5505_v35, %v5371_v24  ;;  %v10092_v62 = vadd.f32 %v10091_v3, %v10090_v18  ;;  %v5535_v3 = vpop.f32.mrf.mxu1 }
 0xd54   :  { %v10093_v54 = vpop.f32.mrf.mxu0 }
 0xd55   :  { %v9426_v60 = vmul.f32 -1.442695, %v14806_v28  ;;  %v5376_v21 = vadd.f32 %v10092_v62, %v14803_v4 }
 0xd56   :  { %v10094_v8 = vpop.f32.mrf.mxu0 }
 0xd57   :  { %11284 = vpow2.f32 %v9426_v60  ;;  %v14812_v27 = vadd.f32 %v10769_v29, %v5376_v21  ;;  %v10095_v61 = vadd.f32 %v10094_v8, %v10093_v54 }
 0xd58   :  { %v14814_v23 = vpop.f32.mrf.mxu0 }
 0xd59   :  { %v9427_v33 = vmul.f32 -1.442695, %v14812_v27  ;;  %v5381_v47 = vadd.f32 %v10095_v61, %v14803_v4 }
 0xd5a   :  { %v14818_v43 = vpop.f32.mrf.mxu0 }
 0xd5b   :  { %11286 = vpow2.f32 %v9427_v33  ;;  %v14820_v55 = vadd.f32 %v5515_v49, %v5381_v47  ;;  %v14843_v33 = vpop.f32.mrf.mxu1 }
 0xd5c   :  { %v10099_v37 = vpop.f32.mrf.mxu0 }
 0xd5d   :  { %v9428_v50 = vmul.f32 -1.442695, %v14820_v55 }
 0xd5e   :  { %v10100_v11 = vpop.f32.mrf.mxu0 }
 0xd5f   :  { %11288 = vpow2.f32 %v9428_v50  ;;  %v10101_v48 = vadd.f32 %v10100_v11, %v10099_v37  ;;  %v5545_v11 = vpop.f32.mrf.mxu1 }
 0xd60   :  { %v14825_v56 = vpop.f32.mrf.mxu0 }
 0xd61   :  { %v5391_v19 = vadd.f32 %v10101_v48, %v14803_v4 }
 0xd62   :  { %v14828_v41 = vpop.f32.mrf.mxu0 }
 0xd63   :  { %v14830_v51 = vadd.f32 %v5525_v15, %v5391_v19  ;;  %v6132_v15 = vld [vmem:[#allocation7 + $0x8b8] sm:$0xff] }
 0xd64   :  { %v11285_v10 = vpop.eup %11284  ;;  %v10105_v46 = vpop.f32.mrf.mxu0  ;;  %10788 = vmatprep.subr.mxu0 %v6132_v15 }
 0xd65   :  { %v5616_v63 = vadd.f32 1.0, %v11285_v10  ;;  %v9430_v26 = vmul.f32 -1.442695, %v14830_v51  ;;  %10789 = vmatpush3.msra.mxu0 %v6132_v15  ;;  %v6128_v15 = vld [vmem:[#allocation7 + $0x898] sm:$0xff] }
 0xd66   :  { %v10106_v29 = vpop.f32.mrf.mxu0 }
 0xd67   :  { %11290 = vrcp.f32 %v5616_v63  ;;  %v10107_v52 = vadd.f32 %v10106_v29, %v10105_v46  ;;  %v6131_v29 = vld [vmem:[#allocation7 + $0x8b0] sm:$0xff] }
 0xd68   :  { %v11287_v20 = vpop.eup %11286  ;;  %11292 = vpow2.f32 %v9430_v26  ;;  %v14835_v18 = vpop.f32.mrf.mxu0  ;;  %10790 = vmatprep.subr.mxu0 %v6131_v29 }
 0xd69   :  { %v5617_v24 = vadd.f32 1.0, %v11287_v20  ;;  %v5401_v35 = vadd.f32 %v10107_v52, %v14803_v4  ;;  %v14854_v52 = vpop.f32.mrf.mxu1  ;;  %10791 = vmatpush3.msra.mxu0 %v6131_v29  ;;  %v6127_v29 = vld [vmem:[#allocation7 + $0x890] sm:$0xff] }
 0xd6a   :  { %v14838_v62 = vpop.f32.mrf.mxu0 }
 0xd6b   :  { %11294 = vrcp.f32 %v5617_v24  ;;  %v14840_v54 = vadd.f32 %v5535_v3, %v5401_v35  ;;  %v6130_v3 = vld [vmem:[#allocation7 + $0x8a8] sm:$0xff] }
 0xd6c   :  { %v11289_v60 = vpop.eup %11288  ;;  %v10111_v21 = vpop.f32.mrf.mxu0  ;;  %10792 = vmatprep.subr.mxu0 %v6130_v3 }
 0xd6d   :  { %v5618_v8 = vadd.f32 1.0, %v11289_v60  ;;  %v9432_v61 = vmul.f32 -1.442695, %v14840_v54  ;;  %10793 = vmatpush3.msra.mxu0 %v6130_v3  ;;  %v6126_v3 = vld [vmem:[#allocation7 + $0x888] sm:$0xff] }
 0xd6e   :  { %v10112_v47 = vpop.f32.mrf.mxu0 }
 0xd6f   :  { %11296 = vrcp.f32 %v5618_v8  ;;  %v10113_v49 = vadd.f32 %v10112_v47, %v10111_v21  ;;  %v5555_v47 = vpop.f32.mrf.mxu1 }
 0xd70   :  { %11298 = vpow2.f32 %v9432_v61  ;;  %v14845_v37 = vpop.f32.mrf.mxu0  ;;  %v6129_v61 = vld [vmem:[#allocation7 + $0x8a0] sm:$0xff] }
 0xd71   :  { %v5411_v50 = vadd.f32 %v10113_v49, %v14803_v4  ;;  %10794 = vmatprep.subr.mxu0 %v6129_v61 }
 0xd72   :  { %v14848_v48 = vpop.f32.mrf.mxu0  ;;  %10795 = vmatpush3.msra.mxu0 %v6129_v61 }
 0xd73   :  { %v14850_v19 = vadd.f32 %v5545_v11, %v5411_v50  ;;  %v10098_v50 = vadd.f32 %v14818_v43, %v14814_v23  ;;  %10796 = vmatprep.subr.mxu0 %v6128_v15 }
 0xd74   :  { %v11291_v10 = vpop.eup %11290  ;;  %v10117_v46 = vpop.f32.mrf.mxu0  ;;  %10797 = vmatpush3.msra.mxu0 %v6128_v15 }
 0xd75   :  { %v11293_v63 = vpop.eup %11292  ;;  %v9434_v26 = vmul.f32 -1.442695, %v14850_v19  ;;  %5672 = vrot.lane.b32.xlu0 %v11291_v10, %s11659_s0  ;;  %10798 = vmatprep.subr.mxu0 %v6127_v29  ;;  %v5386_v23 = vadd.f32 %v10098_v50, %v14803_v4 }
 0xd76   :  { %v5620_v20 = vadd.f32 1.0, %v11293_v63  ;;  %v10118_v24 = vpop.f32.mrf.mxu0  ;;  %10799 = vmatpush3.msra.mxu0 %v6127_v29 }
 0xd77   :  { %11300 = vpow2.f32 %v9434_v26  ;;  %v10119_v35 = vadd.f32 %v10118_v24, %v10117_v46  ;;  %10800 = vmatprep.subr.mxu0 %v6126_v3 }
 0xd78   :  { %v11295_v60 = vpop.eup %11294  ;;  %11302 = vrcp.f32 %v5620_v20  ;;  %v10120_v21 = vpop.f32.mrf.mxu0  ;;  %10801 = vmatpush3.msra.mxu0 %v6126_v3 }
 0xd79   :  { %v5421_v8 = vadd.f32 %v10119_v35, %v14803_v4  ;;  %5674 = vrot.lane.b32.xlu1 %v11295_v60, %s11659_s0  ;;  %v10787_v20 = vpop.f32.mrf.mxu1  ;;  %v6125_v60 = vld [vmem:[#allocation7 + $0x880] sm:$0xff] }
 0xd7a   :  { %v10121_v49 = vpop.f32.mrf.mxu0  ;;  %10802 = vmatprep.subr.mxu0 %v6125_v60 }
 0xd7b   :  { %v14860_v11 = vadd.f32 %v5555_v47, %v5421_v8  ;;  %v10104_v8 = vadd.f32 %v14828_v41, %v14825_v56  ;;  %v5565_v15 = vpop.f32.mrf.mxu1  ;;  %10803 = vmatpush3.msra.mxu0 %v6125_v60  ;;  %v10110_v56 = vadd.f32 %v14838_v62, %v14835_v18 }
 0xd7c   :  { %v11297_v10 = vpop.eup %11296  ;;  %v10123_v46 = vpop.f32.mrf.mxu0 }
 0xd7d   :  { %v11299_v63 = vpop.eup %11298  ;;  %v9436_v26 = vmul.f32 -1.442695, %v14860_v11  ;;  %5676 = vrot.lane.b32.xlu1 %v11297_v10, %s11659_s0  ;;  %v5396_v29 = vadd.f32 %v10104_v8, %v14803_v4  ;;  %v5406_v18 = vadd.f32 %v10110_v56, %v14803_v4 }
 0xd7e   :  { %v5622_v24 = vadd.f32 1.0, %v11299_v63  ;;  %v10124_v35 = vpop.f32.mrf.mxu0  ;;  %v14869_v63 = vadd.f32 %v14810_v7, %v5386_v23  ;;  %v10116_v23 = vadd.f32 %v14848_v48, %v14845_v37 }
 0xd7f   :  { %11304 = vpow2.f32 %v9436_v26  ;;  %v10125_v43 = vadd.f32 %v10124_v35, %v10123_v46  ;;  %v14885_v60 = vadd.f32 %v14823_v5, %v5396_v29 }
 0xd80   :  { %11306 = vrcp.f32 %v5622_v24  ;;  %v10126_v61 = vpop.f32.mrf.mxu0  ;;  %v9429_v7 = vmul.f32 -1.442695, %v14869_v63  ;;  %v5416_v8 = vadd.f32 %v10116_v23, %v14803_v4 }
 0xd81   :  { %v5431_v47 = vadd.f32 %v10125_v43, %v14803_v4 }
 0xd82   :  { %v10127_v10 = vpop.f32.mrf.mxu0  ;;  %v14896_v5 = vadd.f32 %v14843_v33, %v5416_v8 }
 0xd83   :  { %v14871_v50 = vadd.f32 %v5565_v15, %v5431_v47  ;;  %v10128_v46 = vadd.f32 %v10127_v10, %v10126_v61  ;;  %v10122_v61 = vadd.f32 %v10121_v49, %v10120_v21  ;;  %v9431_v15 = vmul.f32 -1.442695, %v14885_v60 }
 0xd84   :  { %v11301_v26 = vpop.eup %11300  ;;  %v14892_v10 = vadd.f32 %v14833_v17, %v5406_v18  ;;  %v9435_v49 = vmul.f32 -1.442695, %v14896_v5 }
 0xd85   :  { %v11303_v41 = vpop.eup %11302  ;;  %v5624_v24 = vadd.f32 1.0, %v11301_v26  ;;  %v9438_v35 = vmul.f32 -1.442695, %v14871_v50  ;;  %v5436_v43 = vadd.f32 %v10128_v46, %v14803_v4 }
 0xd86   :  { %5680 = vrot.lane.b32.xlu1 %v11303_v41, %s11659_s0  ;;  %v9433_v21 = vmul.f32 -1.442695, %v14892_v10 }
 0xd87   :  { %11308 = vrcp.f32 %v5624_v24  ;;  %v14882_v3 = vadd.f32 %v10787_v20, %v5436_v43  ;;  %v5426_v20 = vadd.f32 %v10122_v61, %v14803_v4 }
 0xd88   :  { %11310 = vpow2.f32 %v9438_v35 }
 0xd89   :  { %v9439_v62 = vmul.f32 -1.442695, %v14882_v3  ;;  %11312 = vpow2.f32 %v9429_v7  ;;  %v14902_v46 = vadd.f32 %v14854_v52, %v5426_v20 }
 0xd8b   :  { %11314 = vpow2.f32 %v9439_v62  ;;  %v9437_v33 = vmul.f32 -1.442695, %v14902_v46 }
 0xd8c   :  { %v11305_v47 = vpop.eup %11304 }
 0xd8d   :  { %v11307_v37 = vpop.eup %11306  ;;  %v5626_v48 = vadd.f32 1.0, %v11305_v47 }
 0xd8e   :  { %5684 = vrot.lane.b32.xlu1 %v11307_v37, %s11659_s0 }
 0xd8f   :  { %11316 = vrcp.f32 %v5626_v48 }
 0xd90   :  { %11318 = vpow2.f32 %v9431_v15 }
 0xd91   :  { %11320 = vpow2.f32 %v9433_v21 }
 0xd92   :  { %11322 = vpow2.f32 %v9435_v49 }
 0xd94   :  { %v11309_v17 = vpop.eup %11308 }
 0xd95   :  { %v11311_v26 = vpop.eup %11310  ;;  %5688 = vrot.lane.b32.xlu1 %v11309_v17, %s11659_s0 }
 0xd96   :  { %v5628_v29 = vadd.f32 1.0, %v11311_v26  ;;  %v11313_v56 = vpop.eup %11312 }
 0xd97   :  { %v5619_v35 = vadd.f32 1.0, %v11313_v56 }
 0xd98   :  { %11324 = vrcp.f32 %v5628_v29  ;;  %v11315_v4 = vpop.eup %11314 }
 0xd99   :  { %v5629_v41 = vadd.f32 1.0, %v11315_v4  ;;  %11326 = vpow2.f32 %v9437_v33 }
 0xd9b   :  { %11328 = vrcp.f32 %v5629_v41 }
 0xd9c   :  { %v11317_v24 = vpop.eup %11316  ;;  %11330 = vrcp.f32 %v5619_v35 }
 0xd9d   :  { %v11319_v43 = vpop.eup %11318  ;;  %5692 = vrot.lane.b32.xlu1 %v11317_v24, %s11659_s0 }
 0xd9e   :  { %v5621_v52 = vadd.f32 1.0, %v11319_v43  ;;  %v11321_v7 = vpop.eup %11320 }
 0xd9f   :  { %v11323_v23 = vpop.eup %11322  ;;  %v5623_v18 = vadd.f32 1.0, %v11321_v7  ;;  %v6123_v7 = vld [vmem:[#allocation7 + $0x870] sm:$0xff] }
 0xda0   :  { %11332 = vrcp.f32 %v5621_v52  ;;  %v5625_v61 = vadd.f32 1.0, %v11323_v23  ;;  %v6108_v52 = vld [vmem:[#allocation7 + $0x7f8] sm:$0xff] }
 0xda1   :  { %11334 = vrcp.f32 %v5623_v18 }
 0xda2   :  { %11336 = vrcp.f32 %v5625_v61 }
 0xda5   :  { %v11325_v62 = vpop.eup %11324 }
 0xda6   :  { %5696 = vrot.lane.b32.xlu1 %v11325_v62, %s11659_s0  ;;  %v11327_v8 = vpop.eup %11326 }
 0xda7   :  { %v5627_v15 = vadd.f32 1.0, %v11327_v8  ;;  %v6106_v8 = vld [vmem:[#allocation7 + $0x7e8] sm:$0xff] }
 0xda8   :  { %v11329_v47 = vpop.eup %11328 }
 0xda9   :  { %5698 = vrot.lane.b32.xlu0 %v11329_v47, %s11659_s0  ;;  %v11331_v37 = vpop.eup %11330  ;;  %11338 = vrcp.f32 %v5627_v15 }
 0xdad   :  { %5678 = vrot.lane.b32.xlu0 %v11331_v37, %s11659_s0  ;;  %v11333_v48 = vpop.eup %11332 }
 0xdae   :  { %v11335_v20 = vpop.eup %11334 }
 0xdaf   :  { %v11337_v21 = vpop.eup %11336 }
 0xdb1   :  { %5682 = vrot.lane.b32.xlu0 %v11333_v48, %s11659_s0 }
 0xdb5   :  { %5686 = vrot.lane.b32.xlu0 %v11335_v20, %s11659_s0  ;;  %v6121_v20 = vld [vmem:[#allocation7 + $0x860] sm:$0xff] }
 0xdb6   :  { %v11339_v49 = vpop.eup %11338 }
 0xdb9   :  { %5690 = vrot.lane.b32.xlu0 %v11337_v21, %s11659_s0  ;;  %v6105_v21 = vld [vmem:[#allocation7 + $0x7e0] sm:$0xff] }
 0xdbd   :  { %5694 = vrot.lane.b32.xlu0 %v11339_v49, %s11659_s0 }
 0xde7   :  { %v5673_v17 = vpop.permute.xlu0 %5672 }
 0xde8   :  { %v5714_v26 = vmul.f32 %v5673_v17, %v14806_v28  ;;  %v6124_v28 = vld [vmem:[#allocation7 + $0x878] sm:$0xff] }
 0xde9   :  { %10151 = vmatprep.subr.mxu1 %v6124_v28 }
 0xdea   :  { %v5728_v29 = vmul.f32 %v5714_v26, %v11880_v12  ;;  %10152 = vmatpush3.msra.mxu1 %v6108_v52  ;;  %v6120_v26 = vld [vmem:[#allocation7 + $0x858] sm:$0xff]  ;;  %v6103_v52 = vld [vmem:[#allocation7 + $0x7d0] sm:$0xff] }
 0xdeb   :  { %v5675_v33 = vpop.permute.xlu1 %5674  ;;  %10153 = vmatprep.subr.mxu1 %v6123_v7 }
 0xdec   :  { %v14917_v56 = vadd.f32 %v5728_v29, %v12414_v57  ;;  %v5715_v4 = vmul.f32 %v5675_v33, %v14812_v27  ;;  %v6107_v57 = vld [vmem:[#allocation7 + $0x7f0] sm:$0xff]  ;;  %v6104_v29 = vld [vmem:[#allocation7 + $0x7d8] sm:$0xff] }
 0xded   :  { %10154 = vmatpush3.msra.mxu1 %v6107_v57  ;;  %v6118_v57 = vld [vmem:[#allocation7 + $0x848] sm:$0xff] }
 0xdee   :  { %5896 = vst.msk [vmem:[#allocation2 + $0x8] sm:$0xff] %vm563_vm1, %v14917_v56  ;;  %v5729_v41 = vmul.f32 %v5715_v4, %v11882_v13  ;;  %v6008_v23 = vrot.slane %v14917_v56, 2  ;;  %v5910_v62 = vrot.slane %v14917_v56, 1  ;;  %v5756_v61 = vrot.slane %v14917_v56, 6 }
 0xdef   :  { %v5677_v24 = vpop.permute.xlu1 %5676 }
 0xdf0   :  { %v14924_v35 = vadd.f32 %v5729_v41, %v12421_v38  ;;  %v5716_v43 = vmul.f32 %v5677_v24, %v14820_v55  ;;  %v6122_v55 = vld [vmem:[#allocation7 + $0x868] sm:$0xff] }
 0xdf1   :  { %10155 = vmatprep.subr.mxu1 %v6122_v55 }
 0xdf2   :  { %v6009_v27 = vrot.slane %v14924_v35, 2  ;;  %5897 = vst.msk [vmem:[#allocation2 + $0x20] sm:$0xff] %vm563_vm1, %v14924_v35  ;;  %v5730_v18 = vmul.f32 %v5716_v43, %v11930_v59  ;;  %v5911_v38 = vrot.slane %v14924_v35, 1  ;;  %v5757_v47 = vrot.slane %v14924_v35, 6  ;;  %10156 = vmatpush3.msra.mxu1 %v6106_v8  ;;  %v6119_v43 = vld [vmem:[#allocation7 + $0x850] sm:$0xff]  ;;  %v6101_v8 = vld [vmem:[#allocation7 + $0x7c0] sm:$0xff] }
 0xdf3   :  { %10157 = vmatprep.subr.mxu1 %v6121_v20 }
 0xdf4   :  { %v6034_v15 = vsel %vm805_vm2, %v6008_v23, %v6009_v27  ;;  %v14941_v37 = vadd.f32 %v5730_v18, %v12438_v34  ;;  %v5936_v48 = vsel %vm706_vm3, %v5910_v62, %v5911_v38  ;;  %v5782_v49 = vsel %vm548_vm4, %v5756_v61, %v5757_v47  ;;  %10158 = vmatpush3.msra.mxu1 %v6105_v21  ;;  %v6102_v18 = vld [vmem:[#allocation7 + $0x7c8] sm:$0xff]  ;;  %v6115_v21 = vld [vmem:[#allocation7 + $0x830] sm:$0xff] }
 0xdf5   :  { %6036 = vst.msk [vmem:[#allocation2 + $0x10] sm:$0xff] %vm563_vm1, %v6034_v15  ;;  %5952 = vrot.lane.b32.xlu0 %v5936_v48, %s11659_s0  ;;  %5785 = vst.msk [vmem:[#allocation2 + $0x18] sm:$0xff] %vm563_vm1, %v5782_v49  ;;  %10159 = vmatprep.subr.mxu1 %v6120_v26  ;;  %v6100_v15 = vld [vmem:[#allocation7 + $0x7b8] sm:$0xff]  ;;  %v6114_v26 = vld [vmem:[#allocation7 + $0x828] sm:$0xff] }
 0xdf6   :  { %v6010_v34 = vrot.slane %v14941_v37, 2  ;;  %5898 = vst.msk [vmem:[#allocation2 + $0x38] sm:$0xff] %vm563_vm1, %v14941_v37  ;;  %v5912_v17 = vrot.slane %v14941_v37, 1  ;;  %v5758_v33 = vrot.slane %v14941_v37, 6  ;;  %10160 = vmatpush3.msra.mxu1 %v6104_v29 }
 0xdf7   :  { %10161 = vmatprep.subr.mxu1 %v6119_v43  ;;  %v6097_v43 = vld [vmem:[#allocation7 + $0x7a0] sm:$0xff] }
 0xdf8   :  { %v6033_v4 = vsel %vm805_vm2, %v6009_v27, %v6010_v34  ;;  %v5681_v41 = vpop.permute.xlu1 %5680  ;;  %v5935_v24 = vsel %vm706_vm3, %v5911_v38, %v5912_v17  ;;  %v5781_v7 = vsel %vm548_vm4, %v5757_v47, %v5758_v33  ;;  %10162 = vmatpush3.msra.mxu1 %v6103_v52  ;;  %v6116_v47 = vld [vmem:[#allocation7 + $0x838] sm:$0xff] }
 0xdf9   :  { %6037 = vst.msk [vmem:[#allocation2 + $0x28] sm:$0xff] %vm563_vm1, %v6033_v4  ;;  %v5718_v28 = vmul.f32 %v5681_v41, %v14830_v51  ;;  %5954 = vrot.lane.b32.xlu0 %v5935_v24, %s11659_s0  ;;  %5786 = vst.msk [vmem:[#allocation2 + $0x30] sm:$0xff] %vm563_vm1, %v5781_v7  ;;  %v6117_v51 = vld [vmem:[#allocation7 + $0x840] sm:$0xff]  ;;  %10163 = vmatprep.subr.mxu1 %v6118_v57  ;;  %v6098_v4 = vld [vmem:[#allocation7 + $0x7a8] sm:$0xff] }
 0xdfa   :  { %10164 = vmatpush3.msra.mxu1 %v6102_v18  ;;  %v6113_v41 = vld [vmem:[#allocation7 + $0x820] sm:$0xff] }
 0xdfb   :  { %v5732_v27 = vmul.f32 %v5718_v28, %v11935_v9  ;;  %10165 = vmatprep.subr.mxu1 %v6117_v51  ;;  %v6112_v51 = vld [vmem:[#allocation7 + $0x818] sm:$0xff] }
 0xdfc   :  { %v6052_v38 = vld [vmem:[#allocation2 + $0x10] sm:$0xff]  ;;  %10166 = vmatpush3.msra.mxu1 %v6101_v8 }
 0xdfd   :  { %v14977_v55 = vadd.f32 %v5732_v27, %v12474_v40  ;;  %10804 = vmatprep.mubr.msk.f32.mxu0 %vm563_vm1, %v6052_v38  ;;  %10167 = vmatprep.subr.mxu1 %v6116_v47  ;;  %v6099_v40 = vld [vmem:[#allocation7 + $0x7b0] sm:$0xff] }
 0xdfe   :  { %10168 = vmatpush3.msra.mxu1 %v6100_v15  ;;  %v6111_v8 = vld [vmem:[#allocation7 + $0x810] sm:$0xff] }
 0xdff   :  { %5900 = vst.msk [vmem:[#allocation2 + $0x68] sm:$0xff] %vm563_vm1, %v14977_v55  ;;  %10169 = vmatprep.subr.mxu1 %v6115_v21  ;;  %v6095_v15 = vld [vmem:[#allocation7 + $0x790] sm:$0xff]  ;;  %v6094_v21 = vld [vmem:[#allocation7 + $0x788] sm:$0xff] }
 0xe00   :  { %v5685_v48 = vpop.permute.xlu1 %5684  ;;  %v6055_v20 = vld [vmem:[#allocation2 + $0x28] sm:$0xff]  ;;  %10170 = vmatpush3.msra.mxu1 %v6099_v40  ;;  %v6093_v40 = vld [vmem:[#allocation7 + $0x780] sm:$0xff] }
 0xe01   :  { %v5720_v49 = vmul.f32 %v5685_v48, %v14840_v54  ;;  %10805 = vmatmul.mubr.msk.f32.vlgmr.msra.gmra.mxu0 %vm563_vm1, %v6055_v20  ;;  %10171 = vmatprep.subr.mxu1 %v6114_v26  ;;  %v6110_v20 = vld [vmem:[#allocation7 + $0x808] sm:$0xff] }
 0xe02   :  { %10172 = vmatpush3.msra.mxu1 %v6098_v4 }
 0xe03   :  { %v5734_v29 = vmul.f32 %v5720_v49, %v11979_v44  ;;  %10173 = vmatprep.subr.mxu1 %v6113_v41  ;;  %v6109_v49 = vld [vmem:[#allocation7 + $0x800] sm:$0xff] }
 0xe04   :  { %10174 = vmatpush3.msra.mxu1 %v6097_v43 }
 0xe05   :  { %v14986_v24 = vadd.f32 %v5734_v29, %v12483_v32  ;;  %10175 = vmatprep.subr.mxu1 %v6112_v51 }
 0xe07   :  { %5902 = vst.msk [vmem:[#allocation2 + $0x98] sm:$0xff] %vm563_vm1, %v14986_v24  ;;  %v5689_v54 = vpop.permute.xlu1 %5688 }
 0xe08   :  { %v5722_v28 = vmul.f32 %v5689_v54, %v14850_v19 }
 0xe0a   :  { %v5736_v52 = vmul.f32 %v5722_v28, %v12056_v25  ;;  %v5798_v28 = vrot.slane %v14917_v56, 7 }
 0xe0c   :  { %v14993_v7 = vadd.f32 %v5736_v52, %v12490_v53  ;;  %v6096_v53 = vld [vmem:[#allocation7 + $0x798] sm:$0xff] }
 0xe0d   :  { %10176 = vmatpush3.msra.mxu1 %v6096_v53 }
 0xe0e   :  { %5904 = vst.msk [vmem:[#allocation2 + $0xc8] sm:$0xff] %vm563_vm1, %v14993_v7  ;;  %10177 = vmatprep.subr.mxu1 %v6111_v8 }
 0xe0f   :  { %v5693_v32 = vpop.permute.xlu1 %5692  ;;  %10178 = vmatpush3.msra.mxu1 %v6095_v15 }
 0xe10   :  { %v5724_v57 = vmul.f32 %v5693_v32, %v14860_v11  ;;  %10179 = vmatprep.subr.mxu1 %v6110_v20 }
 0xe11   :  { %10180 = vmatpush3.msra.mxu1 %v6094_v21 }
 0xe12   :  { %v5738_v27 = vmul.f32 %v5724_v57, %v12129_v36  ;;  %10181 = vmatprep.subr.mxu1 %v6109_v49 }
 0xe13   :  { %10182 = vmatpush3.msra.mxu1 %v6093_v40 }
 0xe14   :  { %v15000_v18 = vadd.f32 %v5738_v27, %v12497_v31 }
 0xe16   :  { %5906 = vst.msk [vmem:[#allocation2 + $0xf8] sm:$0xff] %vm563_vm1, %v15000_v18 }
 0xe18   :  { %v5697_v19 = vpop.permute.xlu1 %5696 }
 0xe19   :  { %v5726_v38 = vmul.f32 %v5697_v19, %v14871_v50  ;;  %v5799_v19 = vrot.slane %v14924_v35, 7 }
 0xe1b   :  { %v5740_v47 = vmul.f32 %v5726_v38, %v12202_v39  ;;  %v5699_v48 = vpop.permute.xlu0 %5698  ;;  %v5800_v38 = vrot.slane %v14941_v37, 7  ;;  %v5824_v21 = vsel %vm592_vm5, %v5798_v28, %v5799_v19  ;;  %v5916_v37 = vrot.slane %v14986_v24, 1 }
 0xe1c   :  { %v5727_v31 = vmul.f32 %v5699_v48, %v14882_v3 }
 0xe1d   :  { %v15007_v11 = vadd.f32 %v5740_v47, %v12504_v16 }
 0xe1e   :  { %v5741_v50 = vmul.f32 %v5727_v31, %v11884_v14 }
 0xe1f   :  { %5908 = vst.msk [vmem:[#allocation2 + $0x128] sm:$0xff] %vm563_vm1, %v15007_v11  ;;  %v5679_v26 = vpop.permute.xlu0 %5678  ;;  %v6020_v3 = vrot.slane %v15007_v11, 2 }
 0xe20   :  { %v15014_v29 = vadd.f32 %v5741_v50, %v12511_v58  ;;  %v5717_v16 = vmul.f32 %v5679_v26, %v14869_v63  ;;  %v5914_v26 = vrot.slane %v14977_v55, 1 }
 0xe22   :  { %v6021_v4 = vrot.slane %v15014_v29, 2  ;;  %5909 = vst.msk [vmem:[#allocation2 + $0x140] sm:$0xff] %vm563_vm1, %v15014_v29  ;;  %v5731_v41 = vmul.f32 %v5717_v16, %v11932_v1  ;;  %v5811_v43 = vrot.slane %v15014_v29, 7  ;;  %v5769_v58 = vrot.slane %v15014_v29, 6 }
 0xe23   :  { %v5683_v54 = vpop.permute.xlu0 %5682 }
 0xe24   :  { %v6022_v63 = vsel %vm805_vm2, %v6020_v3, %v6021_v4  ;;  %v6035_v52 = vsel %vm805_vm2, %v6021_v4, %v6008_v23  ;;  %v15034_v32 = vadd.f32 %v5731_v41, %v12531_v42  ;;  %v5719_v57 = vmul.f32 %v5683_v54, %v14885_v60 }
 0xe25   :  { %6048 = vst.msk [vmem:[#allocation2 + $0x130] sm:$0xff] %vm563_vm1, %v6022_v63  ;;  %6049 = vst.msk [vmem:[#allocation2 + $0x148] sm:$0xff] %vm563_vm1, %v6035_v52  ;;  %v5825_v27 = vsel %vm592_vm5, %v5811_v43, %v5798_v28  ;;  %v5768_v23 = vrot.slane %v15007_v11, 6  ;;  %v6012_v42 = vrot.slane %v14977_v55, 2  ;;  %v5783_v35 = vsel %vm548_vm4, %v5769_v58, %v5756_v61 }
 0xe26   :  { %v6011_v51 = vrot.slane %v15034_v32, 2  ;;  %5899 = vst.msk [vmem:[#allocation2 + $0x50] sm:$0xff] %vm563_vm1, %v15034_v32  ;;  %v5733_v60 = vmul.f32 %v5719_v57, %v11941_v22  ;;  %5840 = vrot.lane.b32.xlu1 %v5825_v27, %s11659_s0  ;;  %v5913_v53 = vrot.slane %v15034_v32, 1  ;;  %v5759_v47 = vrot.slane %v15034_v32, 6  ;;  %5784 = vst.msk [vmem:[#allocation2] sm:$0xff] %vm563_vm1, %v5783_v35 }
 0xe27   :  { %v5687_v8 = vpop.permute.xlu0 %5686  ;;  %v5770_v15 = vsel %vm548_vm4, %v5768_v23, %v5769_v58  ;;  %v16988_v58 = vld [vmem:[#allocation16_spill] sm:$0xff]  ;;  %v5801_v57 = vrot.slane %v15034_v32, 7 }
 0xe28   :  { %v6031_v48 = vsel %vm805_vm2, %v6011_v51, %v6012_v42  ;;  %v6032_v31 = vsel %vm805_vm2, %v6010_v34, %v6011_v51  ;;  %v15069_v20 = vadd.f32 %v5733_v60, %v12566_v45  ;;  %v5721_v61 = vmul.f32 %v5687_v8, %v14892_v10  ;;  %5797 = vst.msk [vmem:[#allocation2 + $0x138] sm:$0xff] %vm563_vm1, %v5770_v15  ;;  %v16989_v15 = vld [vmem:[#allocation13_spill] sm:$0xff] }
 0xe29   :  { %6038 = vst.msk [vmem:[#allocation2 + $0x40] sm:$0xff] %vm563_vm1, %v6032_v31  ;;  %6039 = vst.msk [vmem:[#allocation2 + $0x58] sm:$0xff] %vm563_vm1, %v6031_v48  ;;  %v5934_v34 = vsel %vm706_vm3, %v5912_v17, %v5913_v53  ;;  %v5760_v45 = vrot.slane %v14977_v55, 6  ;;  %v6014_v10 = vrot.slane %v14986_v24, 2  ;;  %v5823_v17 = vsel %vm592_vm5, %v5799_v19, %v5800_v38 }
 0xe2a   :  { %v6013_v49 = vrot.slane %v15069_v20, 2  ;;  %5901 = vst.msk [vmem:[#allocation2 + $0x80] sm:$0xff] %vm563_vm1, %v15069_v20  ;;  %v5735_v50 = vmul.f32 %v5721_v61, %v12021_v2  ;;  %5842 = vrot.lane.b32.xlu1 %v5824_v21, %s11659_s0  ;;  %5956 = vrot.lane.b32.xlu0 %v5934_v34, %s11659_s0  ;;  %v5780_v16 = vsel %vm548_vm4, %v5758_v33, %v5759_v47  ;;  %v5761_v41 = vrot.slane %v15069_v20, 6 }
 0xe2b   :  { %v5691_v40 = vpop.permute.xlu0 %5690  ;;  %v5779_v4 = vsel %vm548_vm4, %v5759_v47, %v5760_v45  ;;  %5787 = vst.msk [vmem:[#allocation2 + $0x48] sm:$0xff] %vm563_vm1, %v5780_v16  ;;  %v5933_v33 = vsel %vm706_vm3, %v5913_v53, %v5914_v26  ;;  %v5915_v27 = vrot.slane %v15069_v20, 1  ;;  %v5762_v19 = vrot.slane %v14986_v24, 6 }
 0xe2c   :  { %v6029_v54 = vsel %vm805_vm2, %v6013_v49, %v6014_v10  ;;  %v6030_v28 = vsel %vm805_vm2, %v6012_v42, %v6013_v49  ;;  %v15107_v63 = vadd.f32 %v5735_v50, %v16988_v58  ;;  %v5723_v52 = vmul.f32 %v5691_v40, %v14896_v5  ;;  %5788 = vst.msk [vmem:[#allocation2 + $0x60] sm:$0xff] %vm563_vm1, %v5779_v4 }
 0xe2d   :  { %6040 = vst.msk [vmem:[#allocation2 + $0x70] sm:$0xff] %vm563_vm1, %v6030_v28  ;;  %6041 = vst.msk [vmem:[#allocation2 + $0x88] sm:$0xff] %vm563_vm1, %v6029_v54  ;;  %v6016_v42 = vrot.slane %v14993_v7, 2  ;;  %v5778_v32 = vsel %vm548_vm4, %v5760_v45, %v5761_v41  ;;  %v5777_v53 = vsel %vm548_vm4, %v5761_v41, %v5762_v19  ;;  %v5822_v34 = vsel %vm592_vm5, %v5800_v38, %v5801_v57  ;;  %v16990_v41 = vld [vmem:[#allocation14_spill] sm:$0xff] }
 0xe2e   :  { %v6015_v5 = vrot.slane %v15107_v63, 2  ;;  %5903 = vst.msk [vmem:[#allocation2 + $0xb0] sm:$0xff] %vm563_vm1, %v15107_v63  ;;  %v5737_v51 = vmul.f32 %v5723_v52, %v12092_v0  ;;  %5844 = vrot.lane.b32.xlu1 %v5823_v17, %s11659_s0  ;;  %5958 = vrot.lane.b32.xlu0 %v5933_v33, %s11659_s0  ;;  %v5763_v8 = vrot.slane %v15107_v63, 6  ;;  %5789 = vst.msk [vmem:[#allocation2 + $0x78] sm:$0xff] %vm563_vm1, %v5778_v32  ;;  %v5802_v45 = vrot.slane %v14977_v55, 7 }
 0xe2f   :  { %v5695_v60 = vpop.permute.xlu0 %5694  ;;  %5790 = vst.msk [vmem:[#allocation2 + $0x90] sm:$0xff] %vm563_vm1, %v5777_v53  ;;  %v6018_v49 = vrot.slane %v15000_v18, 2  ;;  %v5931_v33 = vsel %vm706_vm3, %v5915_v27, %v5916_v37 }
 0xe30   :  { %v6027_v35 = vsel %vm805_vm2, %v6015_v5, %v6016_v42  ;;  %v6028_v47 = vsel %vm805_vm2, %v6014_v10, %v6015_v5  ;;  %v15136_v48 = vadd.f32 %v5737_v51, %v16989_v15  ;;  %v5725_v31 = vmul.f32 %v5695_v60, %v14902_v46  ;;  %v6058_v61 = vld [vmem:[#allocation2 + $0x40] sm:$0xff]  ;;  %v6061_v21 = vld [vmem:[#allocation2 + $0x58] sm:$0xff] }
 0xe31   :  { %6042 = vst.msk [vmem:[#allocation2 + $0xa0] sm:$0xff] %vm563_vm1, %v6028_v47  ;;  %6043 = vst.msk [vmem:[#allocation2 + $0xb8] sm:$0xff] %vm563_vm1, %v6027_v35  ;;  %10807 = vmatprep.mubr.msk.f32.mxu0 %vm563_vm1, %v6058_v61  ;;  %v5932_v46 = vsel %vm706_vm3, %v5914_v26, %v5915_v27  ;;  %v5764_v10 = vrot.slane %v14993_v7, 6  ;;  %v5776_v55 = vsel %vm548_vm4, %v5762_v19, %v5763_v8  ;;  %v5766_v26 = vrot.slane %v15000_v18, 6 }
 0xe32   :  { %v6017_v50 = vrot.slane %v15136_v48, 2  ;;  %5905 = vst.msk [vmem:[#allocation2 + $0xe0] sm:$0xff] %vm563_vm1, %v15136_v48  ;;  %v5739_v17 = vmul.f32 %v5725_v31, %v16985_v6  ;;  %5846 = vrot.lane.b32.xlu1 %v5822_v34, %s11659_s0  ;;  %5960 = vrot.lane.b32.xlu0 %v5932_v46, %s11659_s0  ;;  %v5765_v40 = vrot.slane %v15136_v48, 6  ;;  %v5821_v28 = vsel %vm592_vm5, %v5801_v57, %v5802_v45 }
 0xe33   :  { %10808 = vmatmul.mubr.msk.f32.gmra.mxu0 %vm563_vm1, %v6061_v21  ;;  %v5775_v38 = vsel %vm548_vm4, %v5763_v8, %v5764_v10  ;;  %5791 = vst.msk [vmem:[#allocation2 + $0xa8] sm:$0xff] %vm563_vm1, %v5776_v55  ;;  %v5803_v19 = vrot.slane %v15069_v20, 7  ;;  %v5804_v15 = vrot.slane %v14986_v24, 7  ;;  %v5918_v31 = vrot.slane %v14993_v7, 1 }
 0xe34   :  { %v6025_v16 = vsel %vm805_vm2, %v6017_v50, %v6018_v49  ;;  %v6026_v4 = vsel %vm805_vm2, %v6016_v42, %v6017_v50  ;;  %v15172_v54 = vadd.f32 %v5739_v17, %v16990_v41  ;;  %v6064_v58 = vld [vmem:[#allocation2 + $0x70] sm:$0xff]  ;;  %v6067_v52 = vld [vmem:[#allocation2 + $0x88] sm:$0xff]  ;;  %5792 = vst.msk [vmem:[#allocation2 + $0xc0] sm:$0xff] %vm563_vm1, %v5775_v38  ;;  %v5917_v42 = vrot.slane %v15107_v63, 1 }
 0xe35   :  { %6044 = vst.msk [vmem:[#allocation2 + $0xd0] sm:$0xff] %vm563_vm1, %v6026_v4  ;;  %6045 = vst.msk [vmem:[#allocation2 + $0xe8] sm:$0xff] %vm563_vm1, %v6025_v16  ;;  %10810 = vmatprep.mubr.msk.f32.mxu0 %vm563_vm1, %v6064_v58  ;;  %v5774_v57 = vsel %vm548_vm4, %v5764_v10, %v5765_v40  ;;  %v5773_v27 = vsel %vm548_vm4, %v5765_v40, %v5766_v26  ;;  %v5820_v8 = vsel %vm592_vm5, %v5802_v45, %v5803_v19  ;;  %v6091_v16 = vld [vmem:[#allocation2 + $0x148] sm:$0xff] }
 0xe36   :  { %v6019_v5 = vrot.slane %v15172_v54, 2  ;;  %5907 = vst.msk [vmem:[#allocation2 + $0x110] sm:$0xff] %vm563_vm1, %v15172_v54  ;;  %5848 = vrot.lane.b32.xlu1 %v5821_v28, %s11659_s0  ;;  %5962 = vrot.lane.b32.xlu0 %v5931_v33, %s11659_s0  ;;  %5793 = vst.msk [vmem:[#allocation2 + $0xd8] sm:$0xff] %vm563_vm1, %v5774_v57  ;;  %v5767_v20 = vrot.slane %v15172_v54, 6  ;;  %v5930_v35 = vsel %vm706_vm3, %v5916_v37, %v5917_v42  ;;  %v5805_v46 = vrot.slane %v15107_v63, 7  ;;  %v6088_v63 = vld [vmem:[#allocation2 + $0x130] sm:$0xff] }
 0xe37   :  { %10811 = vmatmul.mubr.msk.f32.gmra.mxu0 %vm563_vm1, %v6067_v52  ;;  %5794 = vst.msk [vmem:[#allocation2 + $0xf0] sm:$0xff] %vm563_vm1, %v5773_v27  ;;  %v5819_v34 = vsel %vm592_vm5, %v5803_v19, %v5804_v15  ;;  %v5919_v45 = vrot.slane %v15136_v48, 1  ;;  %v5806_v17 = vrot.slane %v14993_v7, 7  ;;  %v5920_v37 = vrot.slane %v15000_v18, 1 }
 0xe38   :  { %v6023_v51 = vsel %vm805_vm2, %v6019_v5, %v6020_v3  ;;  %v6024_v60 = vsel %vm805_vm2, %v6018_v49, %v6019_v5  ;;  %v6070_v32 = vld [vmem:[#allocation2 + $0xa0] sm:$0xff]  ;;  %v6073_v53 = vld [vmem:[#allocation2 + $0xb8] sm:$0xff]  ;;  %v5772_v3 = vsel %vm548_vm4, %v5766_v26, %v5767_v20  ;;  %v5771_v47 = vsel %vm548_vm4, %v5767_v20, %v5768_v23 }
 0xe39   :  { %6046 = vst.msk [vmem:[#allocation2 + $0x100] sm:$0xff] %vm563_vm1, %v6024_v60  ;;  %6047 = vst.msk [vmem:[#allocation2 + $0x118] sm:$0xff] %vm563_vm1, %v6023_v51  ;;  %10813 = vmatprep.mubr.msk.f32.mxu0 %vm563_vm1, %v6070_v32  ;;  %v5929_v23 = vsel %vm706_vm3, %v5917_v42, %v5918_v31  ;;  %v5818_v49 = vsel %vm592_vm5, %v5804_v15, %v5805_v46  ;;  %v5928_v50 = vsel %vm706_vm3, %v5918_v31, %v5919_v45 }
 0xe3a   :  { %5850 = vrot.lane.b32.xlu1 %v5820_v8, %s11659_s0  ;;  %5964 = vrot.lane.b32.xlu0 %v5930_v35, %s11659_s0  ;;  %5795 = vst.msk [vmem:[#allocation2 + $0x108] sm:$0xff] %vm563_vm1, %v5772_v3  ;;  %5796 = vst.msk [vmem:[#allocation2 + $0x120] sm:$0xff] %vm563_vm1, %v5771_v47  ;;  %v5817_v55 = vsel %vm592_vm5, %v5805_v46, %v5806_v17  ;;  %v5927_v38 = vsel %vm706_vm3, %v5919_v45, %v5920_v37  ;;  %v5807_v40 = vrot.slane %v15136_v48, 7 }
 0xe3b   :  { %10814 = vmatmul.mubr.msk.f32.gmra.mxu0 %vm563_vm1, %v6073_v53  ;;  %v5921_v26 = vrot.slane %v15172_v54, 1  ;;  %v5808_v48 = vrot.slane %v15000_v18, 7  ;;  %v5922_v41 = vrot.slane %v15007_v11, 1  ;;  %v5923_v52 = vrot.slane %v15014_v29, 1 }
 0xe3c   :  { %v6076_v61 = vld [vmem:[#allocation2 + $0xd0] sm:$0xff]  ;;  %v6079_v21 = vld [vmem:[#allocation2 + $0xe8] sm:$0xff]  ;;  %v5816_v7 = vsel %vm592_vm5, %v5806_v17, %v5807_v40  ;;  %v5809_v33 = vrot.slane %v15172_v54, 7  ;;  %v5810_v42 = vrot.slane %v15007_v11, 7 }
 0xe3d   :  { %10816 = vmatprep.mubr.msk.f32.mxu0 %vm563_vm1, %v6076_v61  ;;  %v5926_v4 = vsel %vm706_vm3, %v5920_v37, %v5921_v26  ;;  %v5815_v28 = vsel %vm592_vm5, %v5807_v40, %v5808_v48  ;;  %v5925_v58 = vsel %vm706_vm3, %v5921_v26, %v5922_v41  ;;  %v5924_v19 = vsel %vm706_vm3, %v5922_v41, %v5923_v52 }
 0xe3e   :  { %5852 = vrot.lane.b32.xlu1 %v5819_v34, %s11659_s0  ;;  %5966 = vrot.lane.b32.xlu0 %v5929_v23, %s11659_s0  ;;  %v5814_v18 = vsel %vm592_vm5, %v5808_v48, %v5809_v33  ;;  %v5937_v54 = vsel %vm706_vm3, %v5923_v52, %v5910_v62  ;;  %v5813_v57 = vsel %vm592_vm5, %v5809_v33, %v5810_v42 }
 0xe3f   :  { %10817 = vmatmul.mubr.msk.f32.gmra.mxu0 %vm563_vm1, %v6079_v21  ;;  %v5812_v5 = vsel %vm592_vm5, %v5810_v42, %v5811_v43 }
 0xe40   :  { %v6082_v24 = vld [vmem:[#allocation2 + $0x100] sm:$0xff]  ;;  %v6085_v10 = vld [vmem:[#allocation2 + $0x118] sm:$0xff] }
 0xe41   :  { %10819 = vmatprep.mubr.msk.f32.mxu0 %vm563_vm1, %v6082_v24 }
 0xe42   :  { %5854 = vrot.lane.b32.xlu1 %v5818_v49, %s11659_s0  ;;  %5968 = vrot.lane.b32.xlu0 %v5928_v50, %s11659_s0 }
 0xe43   :  { %10820 = vmatmul.mubr.msk.f32.gmra.mxu0 %vm563_vm1, %v6085_v10 }
 0xe44   :  { %10822 = vmatprep.mubr.msk.f32.mxu0 %vm563_vm1, %v6088_v63 }
 0xe46   :  { %5856 = vrot.lane.b32.xlu1 %v5817_v55, %s11659_s0  ;;  %5970 = vrot.lane.b32.xlu0 %v5927_v38, %s11659_s0 }
 0xe47   :  { %10823 = vmatmul.mubr.msk.f32.gmra.mxu0 %vm563_vm1, %v6091_v16 }
 0xe4a   :  { %5858 = vrot.lane.b32.xlu1 %v5816_v7, %s11659_s0  ;;  %5972 = vrot.lane.b32.xlu0 %v5926_v4, %s11659_s0 }
 0xe4e   :  { %5860 = vrot.lane.b32.xlu1 %v5815_v28, %s11659_s0  ;;  %5974 = vrot.lane.b32.xlu0 %v5925_v58, %s11659_s0 }
 0xe52   :  { %5976 = vrot.lane.b32.xlu0 %v5924_v19, %s11659_s0  ;;  %5862 = vrot.lane.b32.xlu1 %v5814_v18, %s11659_s0 }
 0xe56   :  { %5978 = vrot.lane.b32.xlu0 %v5937_v54, %s11659_s0  ;;  %5864 = vrot.lane.b32.xlu1 %v5813_v57, %s11659_s0 }
 0xe5a   :  { %5866 = vrot.lane.b32.xlu1 %v5812_v5, %s11659_s0 }
 0xe67   :  { %v5953_v11 = vpop.permute.xlu0 %5952 }
 0xe68   :  { %5994 = vst.msk [vmem:[#allocation2 + $0x8] sm:$0xff] %vm663_vm6, %v5953_v11 }
 0xe6b   :  { %v5955_v56 = vpop.permute.xlu0 %5954 }
 0xe6c   :  { %5995 = vst.msk [vmem:[#allocation2 + $0x20] sm:$0xff] %vm663_vm6, %v5955_v56 }
 0xe6f   :  { %v6051_v62 = vld [vmem:[#allocation2 + $0x8] sm:$0xff] }
 0xe70   :  { %6247 = vmatprep.mubr.f32.mxu1 %v6051_v62 }
 0xe73   :  { %v6054_v32 = vld [vmem:[#allocation2 + $0x20] sm:$0xff] }
 0xe98   :  { %v5841_v27 = vpop.permute.xlu1 %5840 }
 0xe99   :  { %5882 = vst.msk [vmem:[#allocation2] sm:$0xff] %vm663_vm6, %v5841_v27 }
 0xe9c   :  { %v5843_v20 = vpop.permute.xlu1 %5842  ;;  %v5957_v51 = vpop.permute.xlu0 %5956 }
 0xe9d   :  { %5883 = vst.msk [vmem:[#allocation2 + $0x18] sm:$0xff] %vm663_vm6, %v5843_v20  ;;  %5996 = vst.msk [vmem:[#allocation2 + $0x38] sm:$0xff] %vm663_vm6, %v5957_v51 }
 0xea0   :  { %v5845_v29 = vpop.permute.xlu1 %5844  ;;  %v5959_v43 = vpop.permute.xlu0 %5958  ;;  %v6050_v60 = vld [vmem:[#allocation2] sm:$0xff] }
 0xea1   :  { %5884 = vst.msk [vmem:[#allocation2 + $0x30] sm:$0xff] %vm663_vm6, %v5845_v29  ;;  %5997 = vst.msk [vmem:[#allocation2 + $0x50] sm:$0xff] %vm663_vm6, %v5959_v43  ;;  %6248 = vmatmul.mubr.f32.vlgmr.msra.gmra.mxu1 %v6050_v60 }
 0xea2   :  { %6252 = vmatprep.mubr.f32.mxu1 %v6054_v32  ;;  %v15318_v32 = vld [vmem:[#allocation8 + $0x6] ss:$0 sm:$0xff] }
 0xea4   :  { %v5847_v53 = vpop.permute.xlu1 %5846  ;;  %v5961_v8 = vpop.permute.xlu0 %5960  ;;  %v6053_v35 = vld [vmem:[#allocation2 + $0x18] sm:$0xff] }
 0xea5   :  { %v6057_v3 = vld [vmem:[#allocation2 + $0x38] sm:$0xff]  ;;  %5885 = vst.msk [vmem:[#allocation2 + $0x48] sm:$0xff] %vm663_vm6, %v5847_v53  ;;  %5998 = vst.msk [vmem:[#allocation2 + $0x68] sm:$0xff] %vm663_vm6, %v5961_v8  ;;  %6253 = vmatmul.mubr.f32.gmra.mxu1 %v6053_v35 }
 0xea6   :  { %6257 = vmatprep.mubr.f32.mxu1 %v6057_v3 }
 0xea8   :  { %v5849_v47 = vpop.permute.xlu1 %5848  ;;  %v5963_v15 = vpop.permute.xlu0 %5962  ;;  %v6056_v31 = vld [vmem:[#allocation2 + $0x30] sm:$0xff] }
 0xea9   :  { %v6060_v61 = vld [vmem:[#allocation2 + $0x50] sm:$0xff]  ;;  %5886 = vst.msk [vmem:[#allocation2 + $0x60] sm:$0xff] %vm663_vm6, %v5849_v47  ;;  %5999 = vst.msk [vmem:[#allocation2 + $0x80] sm:$0xff] %vm663_vm6, %v5963_v15  ;;  %6258 = vmatmul.mubr.f32.gmra.mxu1 %v6056_v31 }
 0xeaa   :  { %6262 = vmatprep.mubr.f32.mxu1 %v6060_v61 }
 0xeac   :  { %v5851_v21 = vpop.permute.xlu1 %5850  ;;  %v5965_v34 = vpop.permute.xlu0 %5964  ;;  %v6059_v23 = vld [vmem:[#allocation2 + $0x48] sm:$0xff] }
 0xead   :  { %v6063_v46 = vld [vmem:[#allocation2 + $0x68] sm:$0xff]  ;;  %5887 = vst.msk [vmem:[#allocation2 + $0x78] sm:$0xff] %vm663_vm6, %v5851_v21  ;;  %6000 = vst.msk [vmem:[#allocation2 + $0x98] sm:$0xff] %vm663_vm6, %v5965_v34  ;;  %6263 = vmatmul.mubr.f32.gmra.mxu1 %v6059_v23 }
 0xeae   :  { %6267 = vmatprep.mubr.f32.mxu1 %v6063_v46 }
 0xeb0   :  { %v5853_v45 = vpop.permute.xlu1 %5852  ;;  %v5967_v24 = vpop.permute.xlu0 %5966  ;;  %v6062_v10 = vld [vmem:[#allocation2 + $0x60] sm:$0xff] }
 0xeb1   :  { %v6066_v49 = vld [vmem:[#allocation2 + $0x80] sm:$0xff]  ;;  %5888 = vst.msk [vmem:[#allocation2 + $0x90] sm:$0xff] %vm663_vm6, %v5853_v45  ;;  %6001 = vst.msk [vmem:[#allocation2 + $0xb0] sm:$0xff] %vm663_vm6, %v5967_v24  ;;  %6268 = vmatmul.mubr.f32.gmra.mxu1 %v6062_v10 }
 0xeb2   :  { %6272 = vmatprep.mubr.f32.mxu1 %v6066_v49 }
 0xeb4   :  { %v5855_v50 = vpop.permute.xlu1 %5854  ;;  %v5969_v63 = vpop.permute.xlu0 %5968  ;;  %v6065_v17 = vld [vmem:[#allocation2 + $0x78] sm:$0xff] }
 0xeb5   :  { %v6069_v37 = vld [vmem:[#allocation2 + $0x98] sm:$0xff]  ;;  %5889 = vst.msk [vmem:[#allocation2 + $0xa8] sm:$0xff] %vm663_vm6, %v5855_v50  ;;  %6002 = vst.msk [vmem:[#allocation2 + $0xc8] sm:$0xff] %vm663_vm6, %v5969_v63  ;;  %6273 = vmatmul.mubr.f32.gmra.mxu1 %v6065_v17 }
 0xeb6   :  { %6277 = vmatprep.mubr.f32.mxu1 %v6069_v37 }
 0xeb8   :  { %v5857_v55 = vpop.permute.xlu1 %5856  ;;  %v5971_v38 = vpop.permute.xlu0 %5970  ;;  %v6068_v40 = vld [vmem:[#allocation2 + $0x90] sm:$0xff] }
 0xeb9   :  { %v6072_v26 = vld [vmem:[#allocation2 + $0xb0] sm:$0xff]  ;;  %5890 = vst.msk [vmem:[#allocation2 + $0xc0] sm:$0xff] %vm663_vm6, %v5857_v55  ;;  %6003 = vst.msk [vmem:[#allocation2 + $0xe0] sm:$0xff] %vm663_vm6, %v5971_v38  ;;  %6278 = vmatmul.mubr.f32.gmra.mxu1 %v6068_v40 }
 0xeba   :  { %6282 = vmatprep.mubr.f32.mxu1 %v6072_v26 }
 0xebc   :  { %v5859_v16 = vpop.permute.xlu1 %5858  ;;  %v5973_v7 = vpop.permute.xlu0 %5972  ;;  %v6071_v4 = vld [vmem:[#allocation2 + $0xa8] sm:$0xff] }
 0xebd   :  { %v6075_v48 = vld [vmem:[#allocation2 + $0xc8] sm:$0xff]  ;;  %5891 = vst.msk [vmem:[#allocation2 + $0xd8] sm:$0xff] %vm663_vm6, %v5859_v16  ;;  %6004 = vst.msk [vmem:[#allocation2 + $0xf8] sm:$0xff] %vm663_vm6, %v5973_v7  ;;  %6283 = vmatmul.mubr.f32.gmra.mxu1 %v6071_v4 }
 0xebe   :  { %6287 = vmatprep.mubr.f32.mxu1 %v6075_v48 }
 0xec0   :  { %v5861_v41 = vpop.permute.xlu1 %5860  ;;  %v5975_v28 = vpop.permute.xlu0 %5974  ;;  %v6074_v58 = vld [vmem:[#allocation2 + $0xc0] sm:$0xff] }
 0xec1   :  { %v6078_v52 = vld [vmem:[#allocation2 + $0xe0] sm:$0xff]  ;;  %5892 = vst.msk [vmem:[#allocation2 + $0xf0] sm:$0xff] %vm663_vm6, %v5861_v41  ;;  %6005 = vst.msk [vmem:[#allocation2 + $0x110] sm:$0xff] %vm663_vm6, %v5975_v28  ;;  %6288 = vmatmul.mubr.f32.gmra.mxu1 %v6074_v58  ;;  %v10806_v60 = vpop.f32.mrf.mxu0 }
 0xec2   :  { %6292 = vmatprep.mubr.f32.mxu1 %v6078_v52 }
 0xec3   :  { %v6384_v47 = vpop.f32.mrf.mxu0 }
 0xec4   :  { %v5863_v33 = vpop.permute.xlu1 %5862  ;;  %v5977_v19 = vpop.permute.xlu0 %5976  ;;  %v6077_v18 = vld [vmem:[#allocation2 + $0xd8] sm:$0xff] }
 0xec5   :  { %v6081_v42 = vld [vmem:[#allocation2 + $0xf8] sm:$0xff]  ;;  %5893 = vst.msk [vmem:[#allocation2 + $0x108] sm:$0xff] %vm663_vm6, %v5863_v33  ;;  %6006 = vst.msk [vmem:[#allocation2 + $0x128] sm:$0xff] %vm663_vm6, %v5977_v19  ;;  %6293 = vmatmul.mubr.f32.gmra.mxu1 %v6077_v18 }
 0xec6   :  { %6297 = vmatprep.mubr.f32.mxu1 %v6081_v42 }
 0xec8   :  { %v5865_v54 = vpop.permute.xlu1 %5864  ;;  %v5979_v57 = vpop.permute.xlu0 %5978  ;;  %v6080_v5 = vld [vmem:[#allocation2 + $0xf0] sm:$0xff] }
 0xec9   :  { %v6084_v11 = vld [vmem:[#allocation2 + $0x110] sm:$0xff]  ;;  %5894 = vst.msk [vmem:[#allocation2 + $0x120] sm:$0xff] %vm663_vm6, %v5865_v54  ;;  %6007 = vst.msk [vmem:[#allocation2 + $0x140] sm:$0xff] %vm663_vm6, %v5979_v57  ;;  %6298 = vmatmul.mubr.f32.gmra.mxu1 %v6080_v5 }
 0xeca   :  { %6302 = vmatprep.mubr.f32.mxu1 %v6084_v11 }
 0xecc   :  { %v5867_v56 = vpop.permute.xlu1 %5866  ;;  %v6083_v62 = vld [vmem:[#allocation2 + $0x108] sm:$0xff] }
 0xecd   :  { %v6087_v27 = vld [vmem:[#allocation2 + $0x128] sm:$0xff]  ;;  %5895 = vst.msk [vmem:[#allocation2 + $0x138] sm:$0xff] %vm663_vm6, %v5867_v56  ;;  %6303 = vmatmul.mubr.f32.gmra.mxu1 %v6083_v62 }
 0xece   :  { %6307 = vmatprep.mubr.f32.mxu1 %v6087_v27 }
 0xed0   :  { %v6086_v20 = vld [vmem:[#allocation2 + $0x120] sm:$0xff] }
 0xed1   :  { %v6090_v51 = vld [vmem:[#allocation2 + $0x140] sm:$0xff]  ;;  %6308 = vmatmul.mubr.f32.gmra.mxu1 %v6086_v20 }
 0xed2   :  { %6312 = vmatprep.mubr.f32.mxu1 %v6090_v51 }
 0xed4   :  { %v6089_v29 = vld [vmem:[#allocation2 + $0x138] sm:$0xff] }
 0xed5   :  { %6313 = vmatmul.mubr.f32.gmra.mxu1 %v6089_v29 }
 0xef3   :  { %v15325_v46 = vpop.f32.mrf.mxu0 }
 0xef5   :  { %v6394_v17 = vpop.f32.mrf.mxu0 }
 0xef7   :  { %v15338_v26 = vpop.f32.mrf.mxu0 }
 0xef9   :  { %v6404_v41 = vpop.f32.mrf.mxu0 }
 0xefb   :  { %v15348_v42 = vpop.f32.mrf.mxu0 }
 0xefd   :  { %v6414_v27 = vpop.f32.mrf.mxu0 }
 0xf61   :  { %v10183_v43 = vpop.f32.mrf.mxu1 }
 0xf63   :  { %v10184_v53 = vpop.f32.mrf.mxu1 }
 0xf64   :  { %v10185_v8 = vadd.f32 %v10184_v53, %v10183_v43 }
 0xf65   :  { %v10186_v35 = vpop.f32.mrf.mxu1 }
 0xf66   :  { %v6250_v3 = vadd.f32 %v10185_v8, %v15318_v32  ;;  %v15358_v8 = vpop.f32.mrf.mxu0 }
 0xf67   :  { %v10187_v15 = vpop.f32.mrf.mxu1 }
 0xf68   :  { %v15321_v31 = vadd.f32 %v6384_v47, %v6250_v3  ;;  %v10188_v61 = vadd.f32 %v10187_v15, %v10186_v35  ;;  %v6997_v15 = vld [vmem:[#allocation7 + $0x9f8] sm:$0xff] }
 0xf69   :  { %v10189_v21 = vpop.f32.mrf.mxu1  ;;  %10825 = vmatprep.subr.mxu1 %v6997_v15 }
 0xf6a   :  { %v9455_v34 = vmul.f32 -1.442695, %v15321_v31  ;;  %v6255_v23 = vadd.f32 %v10188_v61, %v15318_v32  ;;  %10826 = vmatpush3.msra.mxu1 %v6997_v15 }
 0xf6b   :  { %v10190_v45 = vpop.f32.mrf.mxu1 }
 0xf6c   :  { %11340 = vpow2.f32 %v9455_v34  ;;  %v15327_v24 = vadd.f32 %v10806_v60, %v6255_v23  ;;  %v10191_v10 = vadd.f32 %v10190_v45, %v10189_v21  ;;  %v6424_v21 = vpop.f32.mrf.mxu0  ;;  %v6996_v23 = vld [vmem:[#allocation7 + $0x9f0] sm:$0xff] }
 0xf6d   :  { %v15329_v49 = vpop.f32.mrf.mxu1  ;;  %10827 = vmatprep.subr.mxu1 %v6996_v23 }
 0xf6e   :  { %v9456_v50 = vmul.f32 -1.442695, %v15327_v24  ;;  %v6260_v63 = vadd.f32 %v10191_v10, %v15318_v32  ;;  %10828 = vmatpush3.msra.mxu1 %v6996_v23 }
 0xf6f   :  { %v15333_v37 = vpop.f32.mrf.mxu1 }
 0xf70   :  { %11342 = vpow2.f32 %v9456_v50  ;;  %v15335_v55 = vadd.f32 %v6394_v17, %v6260_v63  ;;  %v6995_v63 = vld [vmem:[#allocation7 + $0x9e8] sm:$0xff] }
 0xf71   :  { %v10195_v38 = vpop.f32.mrf.mxu1  ;;  %10829 = vmatprep.subr.mxu1 %v6995_v63 }
 0xf72   :  { %v9457_v40 = vmul.f32 -1.442695, %v15335_v55  ;;  %10830 = vmatpush3.msra.mxu1 %v6995_v63 }
 0xf73   :  { %v10196_v16 = vpop.f32.mrf.mxu1 }
 0xf74   :  { %11344 = vpow2.f32 %v9457_v40  ;;  %v10197_v7 = vadd.f32 %v10196_v16, %v10195_v38  ;;  %v15369_v40 = vpop.f32.mrf.mxu0 }
 0xf75   :  { %v15340_v4 = vpop.f32.mrf.mxu1 }
 0xf76   :  { %v6270_v48 = vadd.f32 %v10197_v7, %v15318_v32 }
 0xf77   :  { %v15343_v28 = vpop.f32.mrf.mxu1 }
 0xf78   :  { %v15345_v58 = vadd.f32 %v6404_v41, %v6270_v48  ;;  %v6994_v48 = vld [vmem:[#allocation7 + $0x9e0] sm:$0xff] }
 0xf79   :  { %v11341_v52 = vpop.eup %11340  ;;  %v10201_v33 = vpop.f32.mrf.mxu1  ;;  %10831 = vmatprep.subr.mxu1 %v6994_v48 }
 0xf7a   :  { %v6495_v19 = vadd.f32 1.0, %v11341_v52  ;;  %v9459_v18 = vmul.f32 -1.442695, %v15345_v58  ;;  %v6993_v52 = vld [vmem:[#allocation7 + $0x9d8] sm:$0xff]  ;;  %10832 = vmatpush3.msra.mxu1 %v6994_v48 }
 0xf7b   :  { %v10202_v54 = vpop.f32.mrf.mxu1  ;;  %10833 = vmatprep.subr.mxu1 %v6993_v52 }
 0xf7c   :  { %11346 = vrcp.f32 %v6495_v19  ;;  %v10203_v57 = vadd.f32 %v10202_v54, %v10201_v33  ;;  %v6434_v54 = vpop.f32.mrf.mxu0  ;;  %10834 = vmatpush3.msra.mxu1 %v6993_v52 }
 0xf7d   :  { %v11343_v5 = vpop.eup %11342  ;;  %11348 = vpow2.f32 %v9459_v18  ;;  %v15350_v11 = vpop.f32.mrf.mxu1 }
 0xf7e   :  { %v6496_v56 = vadd.f32 1.0, %v11343_v5  ;;  %v6280_v62 = vadd.f32 %v10203_v57, %v15318_v32  ;;  %v6992_v5 = vld [vmem:[#allocation7 + $0x9d0] sm:$0xff] }
 0xf7f   :  { %v15353_v20 = vpop.f32.mrf.mxu1  ;;  %10835 = vmatprep.subr.mxu1 %v6992_v5 }
 0xf80   :  { %11350 = vrcp.f32 %v6496_v56  ;;  %v15355_v51 = vadd.f32 %v6414_v27, %v6280_v62  ;;  %v10194_v56 = vadd.f32 %v15333_v37, %v15329_v49  ;;  %10836 = vmatpush3.msra.mxu1 %v6992_v5 }
 0xf81   :  { %v11345_v29 = vpop.eup %11344  ;;  %v10207_v43 = vpop.f32.mrf.mxu1 }
 0xf82   :  { %v6497_v60 = vadd.f32 1.0, %v11345_v29  ;;  %v9461_v53 = vmul.f32 -1.442695, %v15355_v51  ;;  %v6265_v49 = vadd.f32 %v10194_v56, %v15318_v32 }
 0xf83   :  { %v10208_v35 = vpop.f32.mrf.mxu1 }
 0xf84   :  { %11352 = vrcp.f32 %v6497_v60  ;;  %v10209_v3 = vadd.f32 %v10208_v35, %v10207_v43  ;;  %v6991_v43 = vld [vmem:[#allocation7 + $0x9c8] sm:$0xff]  ;;  %v6990_v35 = vld [vmem:[#allocation7 + $0x9c0] sm:$0xff] }
 0xf85   :  { %11354 = vpow2.f32 %v9461_v53  ;;  %v15360_v47 = vpop.f32.mrf.mxu1  ;;  %10837 = vmatprep.subr.mxu1 %v6991_v43 }
 0xf86   :  { %v6290_v61 = vadd.f32 %v10209_v3, %v15318_v32  ;;  %v10824_v3 = vpop.f32.mrf.mxu0  ;;  %10838 = vmatpush3.msra.mxu1 %v6991_v43 }
 0xf87   :  { %v15363_v34 = vpop.f32.mrf.mxu1  ;;  %10839 = vmatprep.subr.mxu1 %v6990_v35 }
 0xf88   :  { %v15365_v45 = vadd.f32 %v6424_v21, %v6290_v61  ;;  %v10200_v21 = vadd.f32 %v15343_v28, %v15340_v4  ;;  %10840 = vmatpush3.msra.mxu1 %v6990_v35 }
 0xf89   :  { %v11347_v10 = vpop.eup %11346  ;;  %v10213_v50 = vpop.f32.mrf.mxu1 }
 0xf8a   :  { %v11349_v17 = vpop.eup %11348  ;;  %v9463_v38 = vmul.f32 -1.442695, %v15365_v45  ;;  %6551 = vrot.lane.b32.xlu0 %v11347_v10, %s11659_s0  ;;  %v6275_v48 = vadd.f32 %v10200_v21, %v15318_v32 }
 0xf8b   :  { %v6499_v16 = vadd.f32 1.0, %v11349_v17  ;;  %v10214_v7 = vpop.f32.mrf.mxu1  ;;  %v15384_v17 = vadd.f32 %v15325_v46, %v6265_v49 }
 0xf8c   :  { %11356 = vpow2.f32 %v9463_v38  ;;  %v10215_v41 = vadd.f32 %v10214_v7, %v10213_v50  ;;  %v6444_v50 = vpop.f32.mrf.mxu0  ;;  %v15400_v5 = vadd.f32 %v15338_v26, %v6275_v48 }
 0xf8d   :  { %v11351_v33 = vpop.eup %11350  ;;  %11358 = vrcp.f32 %v6499_v16  ;;  %v10216_v19 = vpop.f32.mrf.mxu1  ;;  %v9458_v46 = vmul.f32 -1.442695, %v15384_v17 }
 0xf8e   :  { %v6300_v18 = vadd.f32 %v10215_v41, %v15318_v32  ;;  %6553 = vrot.lane.b32.xlu1 %v11351_v33, %s11659_s0  ;;  %v10206_v41 = vadd.f32 %v15353_v20, %v15350_v11  ;;  %v9460_v43 = vmul.f32 -1.442695, %v15400_v5 }
 0xf8f   :  { %v10217_v57 = vpop.f32.mrf.mxu1 }
 0xf90   :  { %v15375_v62 = vadd.f32 %v6434_v54, %v6300_v18  ;;  %v10212_v18 = vadd.f32 %v15363_v34, %v15360_v47  ;;  %v6285_v11 = vadd.f32 %v10206_v41, %v15318_v32 }
 0xf91   :  { %v11353_v27 = vpop.eup %11352  ;;  %v10219_v29 = vpop.f32.mrf.mxu1 }
 0xf92   :  { %v11355_v60 = vpop.eup %11354  ;;  %v9465_v53 = vmul.f32 -1.442695, %v15375_v62  ;;  %6555 = vrot.lane.b32.xlu1 %v11353_v27, %s11659_s0  ;;  %v6295_v56 = vadd.f32 %v10212_v18, %v15318_v32  ;;  %v10218_v27 = vadd.f32 %v10217_v57, %v10216_v19 }
 0xf93   :  { %v6501_v15 = vadd.f32 1.0, %v11355_v60  ;;  %v10220_v61 = vpop.f32.mrf.mxu1  ;;  %v15407_v60 = vadd.f32 %v15348_v42, %v6285_v11 }
 0xf94   :  { %11360 = vpow2.f32 %v9465_v53  ;;  %v10221_v37 = vadd.f32 %v10220_v61, %v10219_v29  ;;  %v15411_v26 = vadd.f32 %v15358_v8, %v6295_v56  ;;  %v6305_v53 = vadd.f32 %v10218_v27, %v15318_v32 }
 0xf95   :  { %11362 = vrcp.f32 %v6501_v15  ;;  %v10222_v23 = vpop.f32.mrf.mxu1  ;;  %v9462_v19 = vmul.f32 -1.442695, %v15407_v60 }
 0xf96   :  { %v6310_v10 = vadd.f32 %v10221_v37, %v15318_v32  ;;  %v9464_v57 = vmul.f32 -1.442695, %v15411_v26  ;;  %v15417_v35 = vadd.f32 %v15369_v40, %v6305_v53  ;;  %v6988_v53 = vld [vmem:[#allocation7 + $0x9b0] sm:$0xff] }
 0xf97   :  { %v10223_v63 = vpop.f32.mrf.mxu1 }
 0xf98   :  { %v15386_v38 = vadd.f32 %v6444_v50, %v6310_v10  ;;  %v10224_v16 = vadd.f32 %v10223_v63, %v10222_v23  ;;  %v9466_v8 = vmul.f32 -1.442695, %v15417_v35 }
 0xf99   :  { %v11357_v7 = vpop.eup %11356 }
 0xf9a   :  { %v11359_v4 = vpop.eup %11358  ;;  %v6503_v28 = vadd.f32 1.0, %v11357_v7  ;;  %v9467_v52 = vmul.f32 -1.442695, %v15386_v38  ;;  %v6315_v33 = vadd.f32 %v10224_v16, %v15318_v32 }
 0xf9b   :  { %6559 = vrot.lane.b32.xlu1 %v11359_v4, %s11659_s0 }
 0xf9c   :  { %11364 = vrcp.f32 %v6503_v28  ;;  %v15397_v54 = vadd.f32 %v10824_v3, %v6315_v33 }
 0xf9d   :  { %11366 = vpow2.f32 %v9467_v52 }
 0xf9e   :  { %v9468_v20 = vmul.f32 -1.442695, %v15397_v54  ;;  %11368 = vpow2.f32 %v9458_v46 }
 0xfa0   :  { %11370 = vpow2.f32 %v9468_v20 }
 0xfa1   :  { %v11361_v29 = vpop.eup %11360 }
 0xfa2   :  { %v11363_v47 = vpop.eup %11362  ;;  %v6505_v34 = vadd.f32 1.0, %v11361_v29 }
 0xfa3   :  { %6563 = vrot.lane.b32.xlu1 %v11363_v47, %s11659_s0  ;;  %v6989_v47 = vld [vmem:[#allocation7 + $0x9b8] sm:$0xff] }
 0xfa4   :  { %11372 = vrcp.f32 %v6505_v34  ;;  %v6973_v34 = vld [vmem:[#allocation7 + $0x938] sm:$0xff]  ;;  %10247 = vmatprep.subr.mxu0 %v6989_v47 }
 0xfa5   :  { %11374 = vpow2.f32 %v9460_v43  ;;  %10248 = vmatpush3.msra.mxu0 %v6973_v34  ;;  %v6966_v34 = vld [vmem:[#allocation7 + $0x900] sm:$0xff] }
 0xfa6   :  { %11376 = vpow2.f32 %v9462_v19  ;;  %10249 = vmatprep.subr.mxu0 %v6988_v53  ;;  %v6981_v53 = vld [vmem:[#allocation7 + $0x978] sm:$0xff] }
 0xfa7   :  { %11378 = vpow2.f32 %v9464_v57 }
 0xfa9   :  { %v11365_v42 = vpop.eup %11364 }
 0xfaa   :  { %v11367_v3 = vpop.eup %11366  ;;  %6567 = vrot.lane.b32.xlu1 %v11365_v42, %s11659_s0 }
 0xfab   :  { %v6507_v15 = vadd.f32 1.0, %v11367_v3  ;;  %v11369_v61 = vpop.eup %11368  ;;  %v6972_v3 = vld [vmem:[#allocation7 + $0x930] sm:$0xff] }
 0xfac   :  { %v6498_v21 = vadd.f32 1.0, %v11369_v61  ;;  %10250 = vmatpush3.msra.mxu0 %v6972_v3  ;;  %v6980_v3 = vld [vmem:[#allocation7 + $0x970] sm:$0xff] }
 0xfad   :  { %11380 = vrcp.f32 %v6507_v15  ;;  %v11371_v32 = vpop.eup %11370 }
 0xfae   :  { %v6508_v49 = vadd.f32 1.0, %v11371_v32  ;;  %11382 = vpow2.f32 %v9466_v8  ;;  %v6987_v32 = vld [vmem:[#allocation7 + $0x9a8] sm:$0xff] }
 0xfaf   :  { %10251 = vmatprep.subr.mxu0 %v6987_v32  ;;  %v6963_v32 = vld [vmem:[#allocation7 + $0x8e8] sm:$0xff] }
 0xfb0   :  { %11384 = vrcp.f32 %v6508_v49  ;;  %v6971_v49 = vld [vmem:[#allocation7 + $0x928] sm:$0xff] }
 0xfb1   :  { %v11373_v37 = vpop.eup %11372  ;;  %11386 = vrcp.f32 %v6498_v21  ;;  %10252 = vmatpush3.msra.mxu0 %v6971_v49  ;;  %v6978_v49 = vld [vmem:[#allocation7 + $0x960] sm:$0xff] }
 0xfb2   :  { %v11375_v23 = vpop.eup %11374  ;;  %6571 = vrot.lane.b32.xlu1 %v11373_v37, %s11659_s0 }
 0xfb3   :  { %v6500_v40 = vadd.f32 1.0, %v11375_v23  ;;  %v11377_v10 = vpop.eup %11376 }
 0xfb4   :  { %v11379_v50 = vpop.eup %11378  ;;  %v6502_v63 = vadd.f32 1.0, %v11377_v10  ;;  %v6970_v10 = vld [vmem:[#allocation7 + $0x920] sm:$0xff] }
 0xfb5   :  { %11388 = vrcp.f32 %v6500_v40  ;;  %v6504_v48 = vadd.f32 1.0, %v11379_v50 }
 0xfb6   :  { %11390 = vrcp.f32 %v6502_v63 }
 0xfb7   :  { %11392 = vrcp.f32 %v6504_v48  ;;  %v6969_v48 = vld [vmem:[#allocation7 + $0x918] sm:$0xff] }
 0xfba   :  { %v11381_v16 = vpop.eup %11380 }
 0xfbb   :  { %6575 = vrot.lane.b32.xlu1 %v11381_v16, %s11659_s0  ;;  %v11383_v7 = vpop.eup %11382 }
 0xfbc   :  { %v6506_v4 = vadd.f32 1.0, %v11383_v7  ;;  %v6985_v7 = vld [vmem:[#allocation7 + $0x998] sm:$0xff] }
 0xfbd   :  { %v11385_v41 = vpop.eup %11384 }
 0xfbe   :  { %6577 = vrot.lane.b32.xlu0 %v11385_v41, %s11659_s0  ;;  %v11387_v28 = vpop.eup %11386  ;;  %11394 = vrcp.f32 %v6506_v4 }
 0xfc2   :  { %6557 = vrot.lane.b32.xlu0 %v11387_v28, %s11659_s0  ;;  %v11389_v52 = vpop.eup %11388  ;;  %v6984_v28 = vld [vmem:[#allocation7 + $0x990] sm:$0xff] }
 0xfc3   :  { %v11391_v33 = vpop.eup %11390 }
 0xfc4   :  { %v11393_v46 = vpop.eup %11392 }
 0xfc6   :  { %6561 = vrot.lane.b32.xlu0 %v11389_v52, %s11659_s0 }
 0xfca   :  { %6565 = vrot.lane.b32.xlu0 %v11391_v33, %s11659_s0  ;;  %v6968_v33 = vld [vmem:[#allocation7 + $0x910] sm:$0xff] }
 0xfcb   :  { %v11395_v18 = vpop.eup %11394 }
 0xfce   :  { %6569 = vrot.lane.b32.xlu0 %v11393_v46, %s11659_s0 }
 0xfd2   :  { %6573 = vrot.lane.b32.xlu0 %v11395_v18, %s11659_s0  ;;  %v6983_v18 = vld [vmem:[#allocation7 + $0x988] sm:$0xff] }
 0xffc   :  { %v6552_v11 = vpop.permute.xlu0 %6551 }
 0xffd   :  { %v6593_v20 = vmul.f32 %v6552_v11, %v15321_v31 }
 0xfff   :  { %v15431_v56 = vmul.f32 %v6593_v20, %v11880_v12  ;;  %v6967_v20 = vld [vmem:[#allocation7 + $0x908] sm:$0xff] }
0x1000   :  { %v6554_v27 = vpop.permute.xlu1 %6553 }
0x1001   :  { %6761 = vst.msk [vmem:[#allocation2 + $0x8] sm:$0xff] %vm563_vm1, %v15431_v56  ;;  %v6594_v29 = vmul.f32 %v6554_v27, %v15327_v24  ;;  %v6621_v19 = vrot.slane %v15431_v56, 6  ;;  %v6873_v57 = vrot.slane %v15431_v56, 2  ;;  %v6775_v42 = vrot.slane %v15431_v56, 1 }
0x1003   :  { %v15437_v43 = vmul.f32 %v6594_v29, %v11882_v13  ;;  %v6982_v29 = vld [vmem:[#allocation7 + $0x980] sm:$0xff] }
0x1004   :  { %v6556_v31 = vpop.permute.xlu1 %6555 }
0x1005   :  { %v6622_v15 = vrot.slane %v15437_v43, 6  ;;  %v6874_v8 = vrot.slane %v15437_v43, 2  ;;  %6762 = vst.msk [vmem:[#allocation2 + $0x20] sm:$0xff] %vm563_vm1, %v15437_v43  ;;  %v6595_v24 = vmul.f32 %v6556_v31, %v15335_v55  ;;  %v6776_v61 = vrot.slane %v15437_v43, 1  ;;  %v6986_v55 = vld [vmem:[#allocation7 + $0x9a0] sm:$0xff]  ;;  %v6965_v31 = vld [vmem:[#allocation7 + $0x8f8] sm:$0xff] }
0x1006   :  { %10253 = vmatprep.subr.mxu0 %v6986_v55 }
0x1007   :  { %v6899_v37 = vsel %vm805_vm2, %v6873_v57, %v6874_v8  ;;  %v15453_v21 = vmul.f32 %v6595_v24, %v11930_v59  ;;  %v6801_v23 = vsel %vm706_vm3, %v6775_v42, %v6776_v61  ;;  %v6647_v40 = vsel %vm548_vm4, %v6621_v19, %v6622_v15  ;;  %10254 = vmatpush3.msra.mxu0 %v6970_v10  ;;  %v6979_v24 = vld [vmem:[#allocation7 + $0x968] sm:$0xff] }
0x1008   :  { %6901 = vst.msk [vmem:[#allocation2 + $0x10] sm:$0xff] %vm563_vm1, %v6899_v37  ;;  %6817 = vrot.lane.b32.xlu0 %v6801_v23, %s11659_s0  ;;  %6650 = vst.msk [vmem:[#allocation2 + $0x18] sm:$0xff] %vm563_vm1, %v6647_v40  ;;  %10255 = vmatprep.subr.mxu0 %v6985_v7  ;;  %v6962_v23 = vld [vmem:[#allocation7 + $0x8e0] sm:$0xff] }
0x1009   :  { %v6623_v50 = vrot.slane %v15453_v21, 6  ;;  %v6875_v63 = vrot.slane %v15453_v21, 2  ;;  %6763 = vst.msk [vmem:[#allocation2 + $0x38] sm:$0xff] %vm563_vm1, %v15453_v21  ;;  %v6777_v16 = vrot.slane %v15453_v21, 1  ;;  %10256 = vmatpush3.msra.mxu0 %v6969_v48 }
0x100a   :  { %10257 = vmatprep.subr.mxu0 %v6984_v28  ;;  %v6976_v28 = vld [vmem:[#allocation7 + $0x950] sm:$0xff] }
0x100b   :  { %v6898_v41 = vsel %vm805_vm2, %v6874_v8, %v6875_v63  ;;  %v6800_v4 = vsel %vm706_vm3, %v6776_v61, %v6777_v16  ;;  %v6646_v52 = vsel %vm548_vm4, %v6622_v15, %v6623_v50  ;;  %10258 = vmatpush3.msra.mxu0 %v6968_v33  ;;  %v6964_v15 = vld [vmem:[#allocation7 + $0x8f0] sm:$0xff] }
0x100c   :  { %6902 = vst.msk [vmem:[#allocation2 + $0x28] sm:$0xff] %vm563_vm1, %v6898_v41  ;;  %6819 = vrot.lane.b32.xlu0 %v6800_v4, %s11659_s0  ;;  %6651 = vst.msk [vmem:[#allocation2 + $0x30] sm:$0xff] %vm563_vm1, %v6646_v52  ;;  %10259 = vmatprep.subr.mxu0 %v6983_v18  ;;  %v6977_v41 = vld [vmem:[#allocation7 + $0x958] sm:$0xff]  ;;  %v6959_v18 = vld [vmem:[#allocation7 + $0x8c8] sm:$0xff] }
0x100d   :  { %v6560_v46 = vpop.permute.xlu1 %6559  ;;  %10260 = vmatpush3.msra.mxu0 %v6967_v20  ;;  %v6961_v4 = vld [vmem:[#allocation7 + $0x8d8] sm:$0xff] }
0x100e   :  { %v6597_v11 = vmul.f32 %v6560_v46, %v15345_v58  ;;  %10261 = vmatprep.subr.mxu0 %v6982_v29 }
0x100f   :  { %v6917_v27 = vld [vmem:[#allocation2 + $0x10] sm:$0xff]  ;;  %10262 = vmatpush3.msra.mxu0 %v6966_v34 }
0x1010   :  { %v15488_v47 = vmul.f32 %v6597_v11, %v11935_v9  ;;  %10841 = vmatprep.mubr.msk.f32.mxu1 %vm563_vm1, %v6917_v27  ;;  %10263 = vmatprep.subr.mxu0 %v6981_v53  ;;  %v6974_v11 = vld [vmem:[#allocation7 + $0x940] sm:$0xff] }
0x1011   :  { %10264 = vmatpush3.msra.mxu0 %v6965_v31  ;;  %v6958_v27 = vld [vmem:[#allocation7 + $0x8c0] sm:$0xff]  ;;  %v6663_v31 = vrot.slane %v15431_v56, 7 }
0x1012   :  { %6765 = vst.msk [vmem:[#allocation2 + $0x68] sm:$0xff] %vm563_vm1, %v15488_v47  ;;  %10265 = vmatprep.subr.mxu0 %v6980_v3 }
0x1013   :  { %v6920_v58 = vld [vmem:[#allocation2 + $0x28] sm:$0xff]  ;;  %10266 = vmatpush3.msra.mxu0 %v6964_v15 }
0x1014   :  { %10842 = vmatmul.mubr.msk.f32.vlgmr.msra.gmra.mxu1 %vm563_vm1, %v6920_v58  ;;  %10267 = vmatprep.subr.mxu0 %v6979_v24 }
0x1015   :  { %v6564_v8 = vpop.permute.xlu1 %6563  ;;  %10268 = vmatpush3.msra.mxu0 %v6963_v32 }
0x1016   :  { %v6599_v61 = vmul.f32 %v6564_v8, %v15355_v51  ;;  %10269 = vmatprep.subr.mxu0 %v6978_v49  ;;  %v6664_v8 = vrot.slane %v15437_v43, 7 }
0x1017   :  { %10270 = vmatpush3.msra.mxu0 %v6962_v23  ;;  %v6665_v23 = vrot.slane %v15453_v21, 7 }
0x1018   :  { %v15496_v37 = vmul.f32 %v6599_v61, %v11979_v44  ;;  %10271 = vmatprep.subr.mxu0 %v6977_v41 }
0x1019   :  { %10272 = vmatpush3.msra.mxu0 %v6961_v4  ;;  %v6689_v4 = vsel %vm592_vm5, %v6663_v31, %v6664_v8 }
0x101a   :  { %6767 = vst.msk [vmem:[#allocation2 + $0x98] sm:$0xff] %vm563_vm1, %v15496_v37  ;;  %10273 = vmatprep.subr.mxu0 %v6976_v28  ;;  %v6627_v21 = vrot.slane %v15496_v37, 6 }
0x101c   :  { %v6568_v55 = vpop.permute.xlu1 %6567 }
0x101d   :  { %v6601_v40 = vmul.f32 %v6568_v55, %v15365_v45  ;;  %v6960_v45 = vld [vmem:[#allocation7 + $0x8d0] sm:$0xff]  ;;  %v6877_v55 = vrot.slane %v15488_v47, 2 }
0x101e   :  { %10274 = vmatpush3.msra.mxu0 %v6960_v45 }
0x101f   :  { %v15502_v51 = vmul.f32 %v6601_v40, %v12056_v25 }
0x1021   :  { %6769 = vst.msk [vmem:[#allocation2 + $0xc8] sm:$0xff] %vm563_vm1, %v15502_v51 }
0x1024   :  { %v6572_v10 = vpop.permute.xlu1 %6571 }
0x1025   :  { %v6603_v7 = vmul.f32 %v6572_v10, %v15375_v62  ;;  %v6975_v62 = vld [vmem:[#allocation7 + $0x948] sm:$0xff] }
0x1026   :  { %10275 = vmatprep.subr.mxu0 %v6975_v62  ;;  %v6688_v62 = vsel %vm592_vm5, %v6664_v8, %v6665_v23 }
0x1027   :  { %v15508_v48 = vmul.f32 %v6603_v7, %v12129_v36  ;;  %10276 = vmatpush3.msra.mxu0 %v6959_v18  ;;  %v6879_v18 = vrot.slane %v15496_v37, 2 }
0x1028   :  { %10277 = vmatprep.subr.mxu0 %v6974_v11 }
0x1029   :  { %6771 = vst.msk [vmem:[#allocation2 + $0xf8] sm:$0xff] %vm563_vm1, %v15508_v48  ;;  %10278 = vmatpush3.msra.mxu0 %v6958_v27 }
0x102d   :  { %v6576_v52 = vpop.permute.xlu1 %6575 }
0x102e   :  { %v6605_v33 = vmul.f32 %v6576_v52, %v15386_v38 }
0x1030   :  { %v15514_v46 = vmul.f32 %v6605_v33, %v12202_v39  ;;  %v6578_v20 = vpop.permute.xlu0 %6577  ;;  %v6625_v33 = vrot.slane %v15488_v47, 6 }
0x1031   :  { %v6606_v29 = vmul.f32 %v6578_v20, %v15397_v54  ;;  %v6779_v20 = vrot.slane %v15488_v47, 1 }
0x1032   :  { %6773 = vst.msk [vmem:[#allocation2 + $0x128] sm:$0xff] %vm563_vm1, %v15514_v46  ;;  %v6885_v34 = vrot.slane %v15514_v46, 2  ;;  %v6633_v43 = vrot.slane %v15514_v46, 6 }
0x1033   :  { %v15520_v38 = vmul.f32 %v6606_v29, %v11884_v14 }
0x1034   :  { %v6558_v53 = vpop.permute.xlu0 %6557 }
0x1035   :  { %v6634_v58 = vrot.slane %v15520_v38, 6  ;;  %v6886_v3 = vrot.slane %v15520_v38, 2  ;;  %6774 = vst.msk [vmem:[#allocation2 + $0x140] sm:$0xff] %vm563_vm1, %v15520_v38  ;;  %v6596_v54 = vmul.f32 %v6558_v53, %v15384_v17  ;;  %v6676_v15 = vrot.slane %v15520_v38, 7 }
0x1037   :  { %v6887_v24 = vsel %vm805_vm2, %v6885_v34, %v6886_v3  ;;  %v6900_v61 = vsel %vm805_vm2, %v6886_v3, %v6873_v57  ;;  %v15540_v32 = vmul.f32 %v6596_v54, %v11932_v1  ;;  %v6690_v17 = vsel %vm592_vm5, %v6676_v15, %v6663_v31 }
0x1038   :  { %6913 = vst.msk [vmem:[#allocation2 + $0x130] sm:$0xff] %vm563_vm1, %v6887_v24  ;;  %6914 = vst.msk [vmem:[#allocation2 + $0x148] sm:$0xff] %vm563_vm1, %v6900_v61  ;;  %6705 = vrot.lane.b32.xlu1 %v6690_v17, %s11659_s0  ;;  %v6562_v49 = vpop.permute.xlu0 %6561  ;;  %v6648_v57 = vsel %vm548_vm4, %v6634_v58, %v6621_v19  ;;  %v6635_v19 = vsel %vm548_vm4, %v6633_v43, %v6634_v58  ;;  %v6881_v24 = vrot.slane %v15502_v51, 2 }
0x1039   :  { %v6876_v40 = vrot.slane %v15540_v32, 2  ;;  %6764 = vst.msk [vmem:[#allocation2 + $0x50] sm:$0xff] %vm563_vm1, %v15540_v32  ;;  %v6598_v10 = vmul.f32 %v6562_v49, %v15400_v5  ;;  %v6778_v7 = vrot.slane %v15540_v32, 1  ;;  %6649 = vst.msk [vmem:[#allocation2] sm:$0xff] %vm563_vm1, %v6648_v57  ;;  %v6624_v41 = vrot.slane %v15540_v32, 6 }
0x103a   :  { %6662 = vst.msk [vmem:[#allocation2 + $0x138] sm:$0xff] %vm563_vm1, %v6635_v19  ;;  %v6666_v29 = vrot.slane %v15540_v32, 7 }
0x103b   :  { %v6896_v28 = vsel %vm805_vm2, %v6876_v40, %v6877_v55  ;;  %v6897_v5 = vsel %vm805_vm2, %v6875_v63, %v6876_v40  ;;  %v15576_v52 = vmul.f32 %v6598_v10, %v11941_v22  ;;  %v6799_v45 = vsel %vm706_vm3, %v6777_v16, %v6778_v7 }
0x103c   :  { %6903 = vst.msk [vmem:[#allocation2 + $0x40] sm:$0xff] %vm563_vm1, %v6897_v5  ;;  %6904 = vst.msk [vmem:[#allocation2 + $0x58] sm:$0xff] %vm563_vm1, %v6896_v28  ;;  %6707 = vrot.lane.b32.xlu1 %v6689_v4, %s11659_s0  ;;  %6821 = vrot.lane.b32.xlu0 %v6799_v45, %s11659_s0  ;;  %v6566_v63 = vpop.permute.xlu0 %6565  ;;  %v6645_v53 = vsel %vm548_vm4, %v6623_v50, %v6624_v41  ;;  %v6644_v31 = vsel %vm548_vm4, %v6624_v41, %v6625_v33  ;;  %v6629_v4 = vrot.slane %v15502_v51, 6 }
0x103d   :  { %v6878_v16 = vrot.slane %v15576_v52, 2  ;;  %6766 = vst.msk [vmem:[#allocation2 + $0x80] sm:$0xff] %vm563_vm1, %v15576_v52  ;;  %v6600_v11 = vmul.f32 %v6566_v63, %v15407_v60  ;;  %v6626_v27 = vrot.slane %v15576_v52, 6  ;;  %v6798_v54 = vsel %vm706_vm3, %v6778_v7, %v6779_v20  ;;  %6652 = vst.msk [vmem:[#allocation2 + $0x48] sm:$0xff] %vm563_vm1, %v6645_v53 }
0x103e   :  { %6653 = vst.msk [vmem:[#allocation2 + $0x60] sm:$0xff] %vm563_vm1, %v6644_v31  ;;  %v6780_v8 = vrot.slane %v15576_v52, 1  ;;  %v6883_v5 = vrot.slane %v15508_v48, 2  ;;  %v6781_v63 = vrot.slane %v15496_v37, 1  ;;  %v6668_v31 = vrot.slane %v15576_v52, 7 }
0x103f   :  { %v6894_v58 = vsel %vm805_vm2, %v6878_v16, %v6879_v18  ;;  %v6895_v60 = vsel %vm805_vm2, %v6877_v55, %v6878_v16  ;;  %v15609_v3 = vmul.f32 %v6600_v11, %v12021_v2  ;;  %v6643_v49 = vsel %vm548_vm4, %v6625_v33, %v6626_v27 }
0x1040   :  { %6905 = vst.msk [vmem:[#allocation2 + $0x70] sm:$0xff] %vm563_vm1, %v6895_v60  ;;  %6906 = vst.msk [vmem:[#allocation2 + $0x88] sm:$0xff] %vm563_vm1, %v6894_v58  ;;  %6709 = vrot.lane.b32.xlu1 %v6688_v62, %s11659_s0  ;;  %6823 = vrot.lane.b32.xlu0 %v6798_v54, %s11659_s0  ;;  %v6570_v50 = vpop.permute.xlu0 %6569  ;;  %v6642_v57 = vsel %vm548_vm4, %v6626_v27, %v6627_v21  ;;  %v6797_v19 = vsel %vm706_vm3, %v6779_v20, %v6780_v8 }
0x1041   :  { %v6880_v61 = vrot.slane %v15609_v3, 2  ;;  %6768 = vst.msk [vmem:[#allocation2 + $0xb0] sm:$0xff] %vm563_vm1, %v15609_v3  ;;  %v6602_v32 = vmul.f32 %v6570_v50, %v15411_v26  ;;  %v6628_v17 = vrot.slane %v15609_v3, 6  ;;  %v6687_v26 = vsel %vm592_vm5, %v6665_v23, %v6666_v29  ;;  %6654 = vst.msk [vmem:[#allocation2 + $0x78] sm:$0xff] %vm563_vm1, %v6643_v49 }
0x1042   :  { %6655 = vst.msk [vmem:[#allocation2 + $0x90] sm:$0xff] %vm563_vm1, %v6642_v57  ;;  %v6667_v23 = vrot.slane %v15488_v47, 7  ;;  %v6796_v58 = vsel %vm706_vm3, %v6780_v8, %v6781_v63  ;;  %v6782_v60 = vrot.slane %v15609_v3, 1  ;;  %v6669_v57 = vrot.slane %v15496_v37, 7 }
0x1043   :  { %v6892_v55 = vsel %vm805_vm2, %v6880_v61, %v6881_v24  ;;  %v6893_v40 = vsel %vm805_vm2, %v6879_v18, %v6880_v61  ;;  %v15636_v10 = vmul.f32 %v6602_v32, %v12092_v0  ;;  %v6923_v7 = vld [vmem:[#allocation2 + $0x40] sm:$0xff]  ;;  %v6926_v41 = vld [vmem:[#allocation2 + $0x58] sm:$0xff]  ;;  %v6641_v18 = vsel %vm548_vm4, %v6627_v21, %v6628_v17 }
0x1044   :  { %6907 = vst.msk [vmem:[#allocation2 + $0xa0] sm:$0xff] %vm563_vm1, %v6893_v40  ;;  %6908 = vst.msk [vmem:[#allocation2 + $0xb8] sm:$0xff] %vm563_vm1, %v6892_v55  ;;  %10844 = vmatprep.mubr.msk.f32.mxu1 %vm563_vm1, %v6923_v7  ;;  %6711 = vrot.lane.b32.xlu1 %v6687_v26, %s11659_s0  ;;  %v6574_v28 = vpop.permute.xlu0 %6573  ;;  %v6686_v47 = vsel %vm592_vm5, %v6666_v29, %v6667_v23  ;;  %v6640_v16 = vsel %vm548_vm4, %v6628_v17, %v6629_v4  ;;  %v6631_v29 = vrot.slane %v15508_v48, 6 }
0x1045   :  { %v6882_v45 = vrot.slane %v15636_v10, 2  ;;  %6770 = vst.msk [vmem:[#allocation2 + $0xe0] sm:$0xff] %vm563_vm1, %v15636_v10  ;;  %6825 = vrot.lane.b32.xlu0 %v6797_v19, %s11659_s0  ;;  %v6604_v33 = vmul.f32 %v6574_v28, %v15417_v35  ;;  %10845 = vmatmul.mubr.msk.f32.gmra.mxu1 %vm563_vm1, %v6926_v41  ;;  %v6630_v62 = vrot.slane %v15636_v10, 6  ;;  %6656 = vst.msk [vmem:[#allocation2 + $0xa8] sm:$0xff] %vm563_vm1, %v6641_v18  ;;  %v6783_v40 = vrot.slane %v15502_v51, 1  ;;  %v6956_v18 = vld [vmem:[#allocation2 + $0x148] sm:$0xff] }
0x1046   :  { %6657 = vst.msk [vmem:[#allocation2 + $0xc0] sm:$0xff] %vm563_vm1, %v6640_v16  ;;  %v6685_v61 = vsel %vm592_vm5, %v6667_v23, %v6668_v31  ;;  %v6684_v7 = vsel %vm592_vm5, %v6668_v31, %v6669_v57 }
0x1047   :  { %v6890_v11 = vsel %vm805_vm2, %v6882_v45, %v6883_v5  ;;  %v6891_v35 = vsel %vm805_vm2, %v6881_v24, %v6882_v45  ;;  %v15670_v20 = vmul.f32 %v6604_v33, %v16985_v6  ;;  %v6929_v27 = vld [vmem:[#allocation2 + $0x70] sm:$0xff]  ;;  %v6932_v53 = vld [vmem:[#allocation2 + $0x88] sm:$0xff]  ;;  %v6639_v21 = vsel %vm548_vm4, %v6629_v4, %v6630_v62 }
0x1048   :  { %6909 = vst.msk [vmem:[#allocation2 + $0xd0] sm:$0xff] %vm563_vm1, %v6891_v35  ;;  %6910 = vst.msk [vmem:[#allocation2 + $0xe8] sm:$0xff] %vm563_vm1, %v6890_v11  ;;  %6713 = vrot.lane.b32.xlu1 %v6686_v47, %s11659_s0  ;;  %10847 = vmatprep.mubr.msk.f32.mxu1 %vm563_vm1, %v6929_v27  ;;  %v6638_v50 = vsel %vm548_vm4, %v6630_v62, %v6631_v29  ;;  %v6670_v4 = vrot.slane %v15609_v3, 7  ;;  %v6794_v37 = vsel %vm706_vm3, %v6782_v60, %v6783_v40 }
0x1049   :  { %v6632_v52 = vrot.slane %v15670_v20, 6  ;;  %v6884_v54 = vrot.slane %v15670_v20, 2  ;;  %6772 = vst.msk [vmem:[#allocation2 + $0x110] sm:$0xff] %vm563_vm1, %v15670_v20  ;;  %6827 = vrot.lane.b32.xlu0 %v6796_v58, %s11659_s0  ;;  %10848 = vmatmul.mubr.msk.f32.gmra.mxu1 %vm563_vm1, %v6932_v53  ;;  %6658 = vst.msk [vmem:[#allocation2 + $0xd8] sm:$0xff] %vm563_vm1, %v6639_v21  ;;  %v6671_v45 = vrot.slane %v15502_v51, 7  ;;  %v6785_v33 = vrot.slane %v15508_v48, 1 }
0x104a   :  { %6659 = vst.msk [vmem:[#allocation2 + $0xf0] sm:$0xff] %vm563_vm1, %v6638_v50  ;;  %v6683_v19 = vsel %vm592_vm5, %v6669_v57, %v6670_v4  ;;  %v6672_v62 = vrot.slane %v15636_v10, 7  ;;  %v6786_v16 = vrot.slane %v15670_v20, 1  ;;  %v6673_v11 = vrot.slane %v15508_v48, 7 }
0x104b   :  { %v6888_v8 = vsel %vm805_vm2, %v6884_v54, %v6885_v34  ;;  %v6889_v24 = vsel %vm805_vm2, %v6883_v5, %v6884_v54  ;;  %v6935_v32 = vld [vmem:[#allocation2 + $0xa0] sm:$0xff]  ;;  %v6938_v17 = vld [vmem:[#allocation2 + $0xb8] sm:$0xff]  ;;  %v6795_v34 = vsel %vm706_vm3, %v6781_v63, %v6782_v60  ;;  %v6637_v49 = vsel %vm548_vm4, %v6631_v29, %v6632_v52  ;;  %v6953_v5 = vld [vmem:[#allocation2 + $0x130] sm:$0xff] }
0x104c   :  { %6911 = vst.msk [vmem:[#allocation2 + $0x100] sm:$0xff] %vm563_vm1, %v6889_v24  ;;  %6912 = vst.msk [vmem:[#allocation2 + $0x118] sm:$0xff] %vm563_vm1, %v6888_v8  ;;  %6715 = vrot.lane.b32.xlu1 %v6685_v61, %s11659_s0  ;;  %10850 = vmatprep.mubr.msk.f32.mxu1 %vm563_vm1, %v6935_v32  ;;  %v6636_v55 = vsel %vm548_vm4, %v6632_v52, %v6633_v43  ;;  %v6784_v43 = vrot.slane %v15636_v10, 1  ;;  %v6682_v63 = vsel %vm592_vm5, %v6670_v4, %v6671_v45 }
0x104d   :  { %6829 = vrot.lane.b32.xlu0 %v6795_v34, %s11659_s0  ;;  %10851 = vmatmul.mubr.msk.f32.gmra.mxu1 %vm563_vm1, %v6938_v17  ;;  %6660 = vst.msk [vmem:[#allocation2 + $0x108] sm:$0xff] %vm563_vm1, %v6637_v49  ;;  %6661 = vst.msk [vmem:[#allocation2 + $0x120] sm:$0xff] %vm563_vm1, %v6636_v55  ;;  %v6681_v51 = vsel %vm592_vm5, %v6671_v45, %v6672_v62  ;;  %v6791_v10 = vsel %vm706_vm3, %v6785_v33, %v6786_v16  ;;  %v6787_v35 = vrot.slane %v15514_v46, 1 }
0x104e   :  { %v6793_v3 = vsel %vm706_vm3, %v6783_v40, %v6784_v43  ;;  %v6792_v47 = vsel %vm706_vm3, %v6784_v43, %v6785_v33  ;;  %v6680_v27 = vsel %vm592_vm5, %v6672_v62, %v6673_v11  ;;  %v6674_v53 = vrot.slane %v15670_v20, 7 }
0x104f   :  { %v6941_v26 = vld [vmem:[#allocation2 + $0xd0] sm:$0xff]  ;;  %v6944_v41 = vld [vmem:[#allocation2 + $0xe8] sm:$0xff]  ;;  %v6790_v31 = vsel %vm706_vm3, %v6786_v16, %v6787_v35  ;;  %v6788_v29 = vrot.slane %v15520_v38, 1  ;;  %v6675_v20 = vrot.slane %v15514_v46, 7 }
0x1050   :  { %6717 = vrot.lane.b32.xlu1 %v6684_v7, %s11659_s0  ;;  %10853 = vmatprep.mubr.msk.f32.mxu1 %vm563_vm1, %v6941_v26  ;;  %v6679_v58 = vsel %vm592_vm5, %v6673_v11, %v6674_v53 }
0x1051   :  { %6831 = vrot.lane.b32.xlu0 %v6794_v37, %s11659_s0  ;;  %10854 = vmatmul.mubr.msk.f32.gmra.mxu1 %vm563_vm1, %v6944_v41  ;;  %v6789_v48 = vsel %vm706_vm3, %v6787_v35, %v6788_v29  ;;  %v6678_v60 = vsel %vm592_vm5, %v6674_v53, %v6675_v20  ;;  %v6802_v52 = vsel %vm706_vm3, %v6788_v29, %v6775_v42 }
0x1052   :  { %v6677_v54 = vsel %vm592_vm5, %v6675_v20, %v6676_v15 }
0x1053   :  { %v6947_v28 = vld [vmem:[#allocation2 + $0x100] sm:$0xff]  ;;  %v6950_v23 = vld [vmem:[#allocation2 + $0x118] sm:$0xff] }
0x1054   :  { %6719 = vrot.lane.b32.xlu1 %v6683_v19, %s11659_s0  ;;  %10856 = vmatprep.mubr.msk.f32.mxu1 %vm563_vm1, %v6947_v28 }
0x1055   :  { %6833 = vrot.lane.b32.xlu0 %v6793_v3, %s11659_s0  ;;  %10857 = vmatmul.mubr.msk.f32.gmra.mxu1 %vm563_vm1, %v6950_v23 }
0x1056   :  { %10859 = vmatprep.mubr.msk.f32.mxu1 %vm563_vm1, %v6953_v5 }
0x1058   :  { %6721 = vrot.lane.b32.xlu1 %v6682_v63, %s11659_s0 }
0x1059   :  { %6835 = vrot.lane.b32.xlu0 %v6792_v47, %s11659_s0  ;;  %10860 = vmatmul.mubr.msk.f32.gmra.mxu1 %vm563_vm1, %v6956_v18 }
0x105c   :  { %6723 = vrot.lane.b32.xlu1 %v6681_v51, %s11659_s0 }
0x105d   :  { %6837 = vrot.lane.b32.xlu0 %v6791_v10, %s11659_s0 }
0x1060   :  { %6725 = vrot.lane.b32.xlu1 %v6680_v27, %s11659_s0 }
0x1061   :  { %6839 = vrot.lane.b32.xlu0 %v6790_v31, %s11659_s0 }
0x1064   :  { %6727 = vrot.lane.b32.xlu1 %v6679_v58, %s11659_s0 }
0x1065   :  { %6841 = vrot.lane.b32.xlu0 %v6789_v48, %s11659_s0 }
0x1068   :  { %6729 = vrot.lane.b32.xlu1 %v6678_v60, %s11659_s0 }
0x1069   :  { %6843 = vrot.lane.b32.xlu0 %v6802_v52, %s11659_s0 }
0x106c   :  { %6731 = vrot.lane.b32.xlu1 %v6677_v54, %s11659_s0 }
0x107a   :  { %v6818_v46 = vpop.permute.xlu0 %6817 }
0x107b   :  { %6859 = vst.msk [vmem:[#allocation2 + $0x8] sm:$0xff] %vm663_vm6, %v6818_v46 }
0x107e   :  { %v6820_v21 = vpop.permute.xlu0 %6819 }
0x107f   :  { %6860 = vst.msk [vmem:[#allocation2 + $0x20] sm:$0xff] %vm663_vm6, %v6820_v21 }
0x1082   :  { %v6916_v56 = vld [vmem:[#allocation2 + $0x8] sm:$0xff] }
0x1083   :  { %7112 = vmatprep.mubr.f32.mxu0 %v6916_v56 }
0x1086   :  { %v6919_v61 = vld [vmem:[#allocation2 + $0x20] sm:$0xff] }
0x10aa   :  { %v6706_v42 = vpop.permute.xlu1 %6705 }
0x10ab   :  { %6747 = vst.msk [vmem:[#allocation2] sm:$0xff] %vm663_vm6, %v6706_v42 }
0x10ae   :  { %v6708_v50 = vpop.permute.xlu1 %6707  ;;  %v6822_v8 = vpop.permute.xlu0 %6821 }
0x10af   :  { %6748 = vst.msk [vmem:[#allocation2 + $0x18] sm:$0xff] %vm663_vm6, %v6708_v50  ;;  %6861 = vst.msk [vmem:[#allocation2 + $0x38] sm:$0xff] %vm663_vm6, %v6822_v8 }
0x10b2   :  { %v6710_v38 = vpop.permute.xlu1 %6709  ;;  %v6824_v15 = vpop.permute.xlu0 %6823  ;;  %v6915_v24 = vld [vmem:[#allocation2] sm:$0xff] }
0x10b3   :  { %6749 = vst.msk [vmem:[#allocation2 + $0x30] sm:$0xff] %vm663_vm6, %v6710_v38  ;;  %6862 = vst.msk [vmem:[#allocation2 + $0x50] sm:$0xff] %vm663_vm6, %v6824_v15  ;;  %7113 = vmatmul.mubr.f32.vlgmr.msra.gmra.mxu0 %v6915_v24 }
0x10b4   :  { %7117 = vmatprep.mubr.f32.mxu0 %v6919_v61  ;;  %v15815_v61 = vld [vmem:[#allocation8 + $0x7] ss:$0 sm:$0xff] }
0x10b6   :  { %v6712_v32 = vpop.permute.xlu1 %6711  ;;  %v6918_v17 = vld [vmem:[#allocation2 + $0x18] sm:$0xff] }
0x10b7   :  { %v6922_v34 = vld [vmem:[#allocation2 + $0x38] sm:$0xff]  ;;  %6750 = vst.msk [vmem:[#allocation2 + $0x48] sm:$0xff] %vm663_vm6, %v6712_v32  ;;  %v6826_v49 = vpop.permute.xlu0 %6825  ;;  %7118 = vmatmul.mubr.f32.gmra.mxu0 %v6918_v17 }
0x10b8   :  { %6863 = vst.msk [vmem:[#allocation2 + $0x68] sm:$0xff] %vm663_vm6, %v6826_v49  ;;  %7122 = vmatprep.mubr.f32.mxu0 %v6922_v34 }
0x10ba   :  { %v6714_v57 = vpop.permute.xlu1 %6713  ;;  %v6921_v55 = vld [vmem:[#allocation2 + $0x30] sm:$0xff] }
0x10bb   :  { %v6925_v40 = vld [vmem:[#allocation2 + $0x50] sm:$0xff]  ;;  %6751 = vst.msk [vmem:[#allocation2 + $0x60] sm:$0xff] %vm663_vm6, %v6714_v57  ;;  %v6828_v7 = vpop.permute.xlu0 %6827  ;;  %7123 = vmatmul.mubr.f32.gmra.mxu0 %v6921_v55 }
0x10bc   :  { %6864 = vst.msk [vmem:[#allocation2 + $0x80] sm:$0xff] %vm663_vm6, %v6828_v7  ;;  %7127 = vmatprep.mubr.f32.mxu0 %v6925_v40 }
0x10be   :  { %v6716_v26 = vpop.permute.xlu1 %6715  ;;  %v6924_v41 = vld [vmem:[#allocation2 + $0x48] sm:$0xff] }
0x10bf   :  { %6752 = vst.msk [vmem:[#allocation2 + $0x78] sm:$0xff] %vm663_vm6, %v6716_v26  ;;  %v6830_v4 = vpop.permute.xlu0 %6829  ;;  %7128 = vmatmul.mubr.f32.gmra.mxu0 %v6924_v41  ;;  %v6928_v37 = vld [vmem:[#allocation2 + $0x68] sm:$0xff] }
0x10c0   :  { %6865 = vst.msk [vmem:[#allocation2 + $0x98] sm:$0xff] %vm663_vm6, %v6830_v4  ;;  %7132 = vmatprep.mubr.f32.mxu0 %v6928_v37 }
0x10c2   :  { %v6718_v43 = vpop.permute.xlu1 %6717  ;;  %v6927_v19 = vld [vmem:[#allocation2 + $0x60] sm:$0xff] }
0x10c3   :  { %6753 = vst.msk [vmem:[#allocation2 + $0x90] sm:$0xff] %vm663_vm6, %v6718_v43  ;;  %v6832_v28 = vpop.permute.xlu0 %6831  ;;  %7133 = vmatmul.mubr.f32.gmra.mxu0 %v6927_v19  ;;  %v6931_v23 = vld [vmem:[#allocation2 + $0x80] sm:$0xff] }
0x10c4   :  { %6866 = vst.msk [vmem:[#allocation2 + $0xb0] sm:$0xff] %vm663_vm6, %v6832_v28  ;;  %7137 = vmatprep.mubr.f32.mxu0 %v6931_v23 }
0x10c6   :  { %v6720_v3 = vpop.permute.xlu1 %6719  ;;  %v6930_v5 = vld [vmem:[#allocation2 + $0x78] sm:$0xff] }
0x10c7   :  { %6754 = vst.msk [vmem:[#allocation2 + $0xa8] sm:$0xff] %vm663_vm6, %v6720_v3  ;;  %v6834_v45 = vpop.permute.xlu0 %6833  ;;  %7138 = vmatmul.mubr.f32.gmra.mxu0 %v6930_v5  ;;  %v6934_v33 = vld [vmem:[#allocation2 + $0x98] sm:$0xff] }
0x10c8   :  { %6867 = vst.msk [vmem:[#allocation2 + $0xc8] sm:$0xff] %vm663_vm6, %v6834_v45  ;;  %7142 = vmatprep.mubr.f32.mxu0 %v6934_v33 }
0x10ca   :  { %v6722_v63 = vpop.permute.xlu1 %6721  ;;  %v6933_v62 = vld [vmem:[#allocation2 + $0x90] sm:$0xff] }
0x10cb   :  { %6755 = vst.msk [vmem:[#allocation2 + $0xc0] sm:$0xff] %vm663_vm6, %v6722_v63  ;;  %v6836_v47 = vpop.permute.xlu0 %6835  ;;  %7143 = vmatmul.mubr.f32.gmra.mxu0 %v6933_v62  ;;  %v6937_v18 = vld [vmem:[#allocation2 + $0xb0] sm:$0xff] }
0x10cc   :  { %6868 = vst.msk [vmem:[#allocation2 + $0xe0] sm:$0xff] %vm663_vm6, %v6836_v47  ;;  %7147 = vmatprep.mubr.f32.mxu0 %v6937_v18 }
0x10ce   :  { %v6724_v16 = vpop.permute.xlu1 %6723  ;;  %v6936_v51 = vld [vmem:[#allocation2 + $0xa8] sm:$0xff] }
0x10cf   :  { %6756 = vst.msk [vmem:[#allocation2 + $0xd8] sm:$0xff] %vm663_vm6, %v6724_v16  ;;  %v6838_v10 = vpop.permute.xlu0 %6837  ;;  %7148 = vmatmul.mubr.f32.gmra.mxu0 %v6936_v51  ;;  %v6940_v11 = vld [vmem:[#allocation2 + $0xc8] sm:$0xff] }
0x10d0   :  { %6869 = vst.msk [vmem:[#allocation2 + $0xf8] sm:$0xff] %vm663_vm6, %v6838_v10  ;;  %7152 = vmatprep.mubr.f32.mxu0 %v6940_v11 }
0x10d2   :  { %v6726_v35 = vpop.permute.xlu1 %6725  ;;  %v6939_v27 = vld [vmem:[#allocation2 + $0xc0] sm:$0xff] }
0x10d3   :  { %6757 = vst.msk [vmem:[#allocation2 + $0xf0] sm:$0xff] %vm663_vm6, %v6726_v35  ;;  %v6840_v53 = vpop.permute.xlu0 %6839  ;;  %7153 = vmatmul.mubr.f32.gmra.mxu0 %v6939_v27  ;;  %v6943_v31 = vld [vmem:[#allocation2 + $0xe0] sm:$0xff] }
0x10d4   :  { %6870 = vst.msk [vmem:[#allocation2 + $0x110] sm:$0xff] %vm663_vm6, %v6840_v53  ;;  %7157 = vmatprep.mubr.f32.mxu0 %v6943_v31  ;;  %v10843_v24 = vpop.f32.mrf.mxu1 }
0x10d6   :  { %v6728_v29 = vpop.permute.xlu1 %6727  ;;  %v6942_v58 = vld [vmem:[#allocation2 + $0xd8] sm:$0xff]  ;;  %v7249_v57 = vpop.f32.mrf.mxu1 }
0x10d7   :  { %6758 = vst.msk [vmem:[#allocation2 + $0x108] sm:$0xff] %vm663_vm6, %v6728_v29  ;;  %v6842_v48 = vpop.permute.xlu0 %6841  ;;  %7158 = vmatmul.mubr.f32.gmra.mxu0 %v6942_v58  ;;  %v6946_v20 = vld [vmem:[#allocation2 + $0xf8] sm:$0xff] }
0x10d8   :  { %6871 = vst.msk [vmem:[#allocation2 + $0x128] sm:$0xff] %vm663_vm6, %v6842_v48  ;;  %7162 = vmatprep.mubr.f32.mxu0 %v6946_v20 }
0x10da   :  { %v6730_v60 = vpop.permute.xlu1 %6729  ;;  %v6945_v52 = vld [vmem:[#allocation2 + $0xf0] sm:$0xff] }
0x10db   :  { %6759 = vst.msk [vmem:[#allocation2 + $0x120] sm:$0xff] %vm663_vm6, %v6730_v60  ;;  %v6844_v54 = vpop.permute.xlu0 %6843  ;;  %7163 = vmatmul.mubr.f32.gmra.mxu0 %v6945_v52  ;;  %v6949_v46 = vld [vmem:[#allocation2 + $0x110] sm:$0xff] }
0x10dc   :  { %6872 = vst.msk [vmem:[#allocation2 + $0x140] sm:$0xff] %vm663_vm6, %v6844_v54  ;;  %7167 = vmatprep.mubr.f32.mxu0 %v6949_v46 }
0x10de   :  { %v6732_v21 = vpop.permute.xlu1 %6731  ;;  %v6948_v56 = vld [vmem:[#allocation2 + $0x108] sm:$0xff] }
0x10df   :  { %6760 = vst.msk [vmem:[#allocation2 + $0x138] sm:$0xff] %vm663_vm6, %v6732_v21  ;;  %7168 = vmatmul.mubr.f32.gmra.mxu0 %v6948_v56  ;;  %v6952_v42 = vld [vmem:[#allocation2 + $0x128] sm:$0xff] }
0x10e0   :  { %7172 = vmatprep.mubr.f32.mxu0 %v6952_v42 }
0x10e2   :  { %v6951_v50 = vld [vmem:[#allocation2 + $0x120] sm:$0xff] }
0x10e3   :  { %7173 = vmatmul.mubr.f32.gmra.mxu0 %v6951_v50  ;;  %v6955_v8 = vld [vmem:[#allocation2 + $0x140] sm:$0xff] }
0x10e4   :  { %7177 = vmatprep.mubr.f32.mxu0 %v6955_v8 }
0x10e6   :  { %v6954_v38 = vld [vmem:[#allocation2 + $0x138] sm:$0xff] }
0x10e7   :  { %7178 = vmatmul.mubr.f32.gmra.mxu0 %v6954_v38 }
0x1105   :  { %v15822_v37 = vpop.f32.mrf.mxu1 }
0x1107   :  { %v7259_v45 = vpop.f32.mrf.mxu1 }
0x1109   :  { %v15835_v18 = vpop.f32.mrf.mxu1 }
0x110b   :  { %v7269_v35 = vpop.f32.mrf.mxu1 }
0x110d   :  { %v15845_v20 = vpop.f32.mrf.mxu1 }
0x110f   :  { %v7279_v42 = vpop.f32.mrf.mxu1 }
0x1173   :  { %v10279_v15 = vpop.f32.mrf.mxu0 }
0x1175   :  { %v10280_v32 = vpop.f32.mrf.mxu0 }
0x1176   :  { %v10281_v17 = vadd.f32 %v10280_v32, %v10279_v15 }
0x1177   :  { %v10282_v34 = vpop.f32.mrf.mxu0 }
0x1178   :  { %v7115_v49 = vadd.f32 %v10281_v17, %v15815_v61  ;;  %v15855_v17 = vpop.f32.mrf.mxu1 }
0x1179   :  { %v10283_v55 = vpop.f32.mrf.mxu0 }
0x117a   :  { %v15818_v40 = vadd.f32 %v7249_v57, %v7115_v49  ;;  %v10284_v7 = vadd.f32 %v10283_v55, %v10282_v34 }
0x117b   :  { %v10285_v26 = vpop.f32.mrf.mxu0 }
0x117c   :  { %v9484_v41 = vmul.f32 -1.442695, %v15818_v40  ;;  %v7120_v4 = vadd.f32 %v10284_v7, %v15815_v61  ;;  %v7862_v7 = vld [vmem:[#allocation7 + $0xb38] sm:$0xff] }
0x117d   :  { %v10286_v43 = vpop.f32.mrf.mxu0  ;;  %10862 = vmatprep.subr.mxu0 %v7862_v7 }
0x117e   :  { %11396 = vpow2.f32 %v9484_v41  ;;  %v15824_v19 = vadd.f32 %v10843_v24, %v7120_v4  ;;  %v10287_v28 = vadd.f32 %v10286_v43, %v10285_v26  ;;  %v7289_v26 = vpop.f32.mrf.mxu1  ;;  %10863 = vmatpush3.msra.mxu0 %v7862_v7  ;;  %v7861_v43 = vld [vmem:[#allocation7 + $0xb30] sm:$0xff] }
0x117f   :  { %v15826_v23 = vpop.f32.mrf.mxu0  ;;  %10864 = vmatprep.subr.mxu0 %v7861_v43 }
0x1180   :  { %v9485_v3 = vmul.f32 -1.442695, %v15824_v19  ;;  %v7125_v5 = vadd.f32 %v10287_v28, %v15815_v61  ;;  %10865 = vmatpush3.msra.mxu0 %v7861_v43 }
0x1181   :  { %v15830_v33 = vpop.f32.mrf.mxu0 }
0x1182   :  { %11398 = vpow2.f32 %v9485_v3  ;;  %v15832_v63 = vadd.f32 %v7259_v45, %v7125_v5 }
0x1183   :  { %v10291_v62 = vpop.f32.mrf.mxu0 }
0x1184   :  { %v9486_v47 = vmul.f32 -1.442695, %v15832_v63 }
0x1185   :  { %v10292_v16 = vpop.f32.mrf.mxu0 }
0x1186   :  { %11400 = vpow2.f32 %v9486_v47  ;;  %v10293_v51 = vadd.f32 %v10292_v16, %v10291_v62  ;;  %v7860_v62 = vld [vmem:[#allocation7 + $0xb28] sm:$0xff]  ;;  %v15866_v47 = vpop.f32.mrf.mxu1 }
0x1187   :  { %v15837_v10 = vpop.f32.mrf.mxu0  ;;  %10866 = vmatprep.subr.mxu0 %v7860_v62 }
0x1188   :  { %v7135_v11 = vadd.f32 %v10293_v51, %v15815_v61  ;;  %10867 = vmatpush3.msra.mxu0 %v7860_v62 }
0x1189   :  { %v15840_v27 = vpop.f32.mrf.mxu0 }
0x118a   :  { %v15842_v53 = vadd.f32 %v7269_v35, %v7135_v11  ;;  %v7859_v35 = vld [vmem:[#allocation7 + $0xb20] sm:$0xff] }
0x118b   :  { %v11397_v31 = vpop.eup %11396  ;;  %v10297_v29 = vpop.f32.mrf.mxu0  ;;  %10868 = vmatprep.subr.mxu0 %v7859_v35 }
0x118c   :  { %v7360_v58 = vadd.f32 1.0, %v11397_v31  ;;  %v9488_v48 = vmul.f32 -1.442695, %v15842_v53  ;;  %v7858_v31 = vld [vmem:[#allocation7 + $0xb18] sm:$0xff]  ;;  %10869 = vmatpush3.msra.mxu0 %v7859_v35 }
0x118d   :  { %v10298_v60 = vpop.f32.mrf.mxu0  ;;  %10870 = vmatprep.subr.mxu0 %v7858_v31 }
0x118e   :  { %11402 = vrcp.f32 %v7360_v58  ;;  %v10299_v52 = vadd.f32 %v10298_v60, %v10297_v29  ;;  %v7299_v60 = vpop.f32.mrf.mxu1  ;;  %10871 = vmatpush3.msra.mxu0 %v7858_v31 }
0x118f   :  { %v11399_v54 = vpop.eup %11398  ;;  %11404 = vpow2.f32 %v9488_v48  ;;  %v15847_v46 = vpop.f32.mrf.mxu0 }
0x1190   :  { %v7361_v21 = vadd.f32 1.0, %v11399_v54  ;;  %v7145_v56 = vadd.f32 %v10299_v52, %v15815_v61  ;;  %v10290_v54 = vadd.f32 %v15830_v33, %v15826_v23 }
0x1191   :  { %v15850_v50 = vpop.f32.mrf.mxu0 }
0x1192   :  { %11406 = vrcp.f32 %v7361_v21  ;;  %v15852_v8 = vadd.f32 %v7279_v42, %v7145_v56  ;;  %v7857_v56 = vld [vmem:[#allocation7 + $0xb10] sm:$0xff]  ;;  %v7130_v23 = vadd.f32 %v10290_v54, %v15815_v61 }
0x1193   :  { %v11401_v38 = vpop.eup %11400  ;;  %v10303_v15 = vpop.f32.mrf.mxu0  ;;  %10872 = vmatprep.subr.mxu0 %v7857_v56 }
0x1194   :  { %v7362_v24 = vadd.f32 1.0, %v11401_v38  ;;  %v9490_v32 = vmul.f32 -1.442695, %v15852_v8  ;;  %10873 = vmatpush3.msra.mxu0 %v7857_v56 }
0x1195   :  { %v10304_v34 = vpop.f32.mrf.mxu0 }
0x1196   :  { %11408 = vrcp.f32 %v7362_v24  ;;  %v10305_v49 = vadd.f32 %v10304_v34, %v10303_v15  ;;  %v7855_v34 = vld [vmem:[#allocation7 + $0xb00] sm:$0xff] }
0x1197   :  { %11410 = vpow2.f32 %v9490_v32  ;;  %v15857_v57 = vpop.f32.mrf.mxu0  ;;  %v7856_v32 = vld [vmem:[#allocation7 + $0xb08] sm:$0xff] }
0x1198   :  { %v7155_v55 = vadd.f32 %v10305_v49, %v15815_v61  ;;  %v10861_v49 = vpop.f32.mrf.mxu1  ;;  %10874 = vmatprep.subr.mxu0 %v7856_v32 }
0x1199   :  { %v15860_v41 = vpop.f32.mrf.mxu0  ;;  %10875 = vmatpush3.msra.mxu0 %v7856_v32 }
0x119a   :  { %v15862_v4 = vadd.f32 %v7289_v26, %v7155_v55  ;;  %v10296_v26 = vadd.f32 %v15840_v27, %v15837_v10  ;;  %10876 = vmatprep.subr.mxu0 %v7855_v34  ;;  %v10302_v10 = vadd.f32 %v15850_v50, %v15847_v46 }
0x119b   :  { %v11403_v28 = vpop.eup %11402  ;;  %v10309_v3 = vpop.f32.mrf.mxu0  ;;  %10877 = vmatpush3.msra.mxu0 %v7855_v34 }
0x119c   :  { %v11405_v5 = vpop.eup %11404  ;;  %v9492_v45 = vmul.f32 -1.442695, %v15862_v4  ;;  %7416 = vrot.lane.b32.xlu0 %v11403_v28, %s11659_s0  ;;  %v7150_v46 = vadd.f32 %v10302_v10, %v15815_v61 }
0x119d   :  { %v7364_v16 = vadd.f32 1.0, %v11405_v5  ;;  %v10310_v51 = vpop.f32.mrf.mxu0 }
0x119e   :  { %11412 = vpow2.f32 %v9492_v45  ;;  %v10311_v11 = vadd.f32 %v10310_v51, %v10309_v3  ;;  %v7309_v3 = vpop.f32.mrf.mxu1  ;;  %v15881_v45 = vadd.f32 %v15822_v37, %v7130_v23 }
0x119f   :  { %v11407_v29 = vpop.eup %11406  ;;  %11414 = vrcp.f32 %v7364_v16  ;;  %v10312_v58 = vpop.f32.mrf.mxu0 }
0x11a0   :  { %v7165_v48 = vadd.f32 %v10311_v11, %v15815_v61  ;;  %7418 = vrot.lane.b32.xlu1 %v11407_v29, %s11659_s0  ;;  %v7140_v11 = vadd.f32 %v10296_v26, %v15815_v61  ;;  %v9487_v37 = vmul.f32 -1.442695, %v15881_v45 }
0x11a1   :  { %v10313_v52 = vpop.f32.mrf.mxu0 }
0x11a2   :  { %v15872_v21 = vadd.f32 %v7299_v60, %v7165_v48  ;;  %v10308_v48 = vadd.f32 %v15860_v41, %v15857_v57  ;;  %v15897_v54 = vadd.f32 %v15835_v18, %v7140_v11 }
0x11a3   :  { %v11409_v42 = vpop.eup %11408  ;;  %v10315_v38 = vpop.f32.mrf.mxu0 }
0x11a4   :  { %v11411_v15 = vpop.eup %11410  ;;  %v9494_v24 = vmul.f32 -1.442695, %v15872_v21  ;;  %7420 = vrot.lane.b32.xlu1 %v11409_v42, %s11659_s0  ;;  %v7160_v56 = vadd.f32 %v10308_v48, %v15815_v61  ;;  %v10314_v42 = vadd.f32 %v10313_v52, %v10312_v58 }
0x11a5   :  { %v7366_v55 = vadd.f32 1.0, %v11411_v15  ;;  %v10316_v7 = vpop.f32.mrf.mxu0  ;;  %v9489_v15 = vmul.f32 -1.442695, %v15897_v54 }
0x11a6   :  { %11416 = vpow2.f32 %v9494_v24  ;;  %v10317_v33 = vadd.f32 %v10316_v7, %v10315_v38  ;;  %v15904_v24 = vadd.f32 %v15845_v20, %v7150_v46  ;;  %v15908_v18 = vadd.f32 %v15855_v17, %v7160_v56 }
0x11a7   :  { %11418 = vrcp.f32 %v7366_v55  ;;  %v10318_v43 = vpop.f32.mrf.mxu0  ;;  %v7170_v32 = vadd.f32 %v10314_v42, %v15815_v61 }
0x11a8   :  { %v7175_v28 = vadd.f32 %v10317_v33, %v15815_v61  ;;  %v9491_v58 = vmul.f32 -1.442695, %v15904_v24  ;;  %v9493_v52 = vmul.f32 -1.442695, %v15908_v18 }
0x11a9   :  { %v10319_v5 = vpop.f32.mrf.mxu0  ;;  %v15914_v34 = vadd.f32 %v15866_v47, %v7170_v32  ;;  %v7853_v32 = vld [vmem:[#allocation7 + $0xaf0] sm:$0xff] }
0x11aa   :  { %v15883_v62 = vadd.f32 %v7309_v3, %v7175_v28  ;;  %v10320_v16 = vadd.f32 %v10319_v5, %v10318_v43 }
0x11ab   :  { %v11413_v51 = vpop.eup %11412  ;;  %v9495_v17 = vmul.f32 -1.442695, %v15914_v34 }
0x11ac   :  { %v11415_v27 = vpop.eup %11414  ;;  %v7368_v35 = vadd.f32 1.0, %v11413_v51  ;;  %v9496_v31 = vmul.f32 -1.442695, %v15883_v62  ;;  %v7180_v29 = vadd.f32 %v10320_v16, %v15815_v61 }
0x11ad   :  { %7424 = vrot.lane.b32.xlu1 %v11415_v27, %s11659_s0 }
0x11ae   :  { %11420 = vrcp.f32 %v7368_v35  ;;  %v15894_v60 = vadd.f32 %v10861_v49, %v7180_v29 }
0x11af   :  { %11422 = vpow2.f32 %v9496_v31 }
0x11b0   :  { %v9497_v50 = vmul.f32 -1.442695, %v15894_v60  ;;  %11424 = vpow2.f32 %v9487_v37 }
0x11b2   :  { %11426 = vpow2.f32 %v9497_v50 }
0x11b3   :  { %v11417_v38 = vpop.eup %11416 }
0x11b4   :  { %v11419_v57 = vpop.eup %11418  ;;  %v7370_v41 = vadd.f32 1.0, %v11417_v38 }
0x11b5   :  { %7428 = vrot.lane.b32.xlu1 %v11419_v57, %s11659_s0  ;;  %v7854_v57 = vld [vmem:[#allocation7 + $0xaf8] sm:$0xff] }
0x11b6   :  { %11428 = vrcp.f32 %v7370_v41  ;;  %v7838_v41 = vld [vmem:[#allocation7 + $0xa78] sm:$0xff]  ;;  %10343 = vmatprep.subr.mxu1 %v7854_v57 }
0x11b7   :  { %11430 = vpow2.f32 %v9489_v15  ;;  %10344 = vmatpush3.msra.mxu1 %v7838_v41  ;;  %v7831_v41 = vld [vmem:[#allocation7 + $0xa40] sm:$0xff] }
0x11b8   :  { %11432 = vpow2.f32 %v9491_v58  ;;  %10345 = vmatprep.subr.mxu1 %v7853_v32  ;;  %v7846_v32 = vld [vmem:[#allocation7 + $0xab8] sm:$0xff] }
0x11b9   :  { %11434 = vpow2.f32 %v9493_v52 }
0x11bb   :  { %v11421_v20 = vpop.eup %11420 }
0x11bc   :  { %v11423_v49 = vpop.eup %11422  ;;  %7432 = vrot.lane.b32.xlu1 %v11421_v20, %s11659_s0 }
0x11bd   :  { %v7372_v55 = vadd.f32 1.0, %v11423_v49  ;;  %v11425_v7 = vpop.eup %11424  ;;  %v7837_v49 = vld [vmem:[#allocation7 + $0xa70] sm:$0xff] }
0x11be   :  { %v7363_v26 = vadd.f32 1.0, %v11425_v7  ;;  %10346 = vmatpush3.msra.mxu1 %v7837_v49  ;;  %v7845_v49 = vld [vmem:[#allocation7 + $0xab0] sm:$0xff] }
0x11bf   :  { %11436 = vrcp.f32 %v7372_v55  ;;  %v11427_v61 = vpop.eup %11426 }
0x11c0   :  { %v7373_v23 = vadd.f32 1.0, %v11427_v61  ;;  %11438 = vpow2.f32 %v9495_v17  ;;  %v7852_v61 = vld [vmem:[#allocation7 + $0xae8] sm:$0xff] }
0x11c1   :  { %10347 = vmatprep.subr.mxu1 %v7852_v61  ;;  %v7828_v61 = vld [vmem:[#allocation7 + $0xa28] sm:$0xff] }
0x11c2   :  { %11440 = vrcp.f32 %v7373_v23  ;;  %v7836_v23 = vld [vmem:[#allocation7 + $0xa68] sm:$0xff] }
0x11c3   :  { %v11429_v33 = vpop.eup %11428  ;;  %11442 = vrcp.f32 %v7363_v26  ;;  %10348 = vmatpush3.msra.mxu1 %v7836_v23  ;;  %v7843_v23 = vld [vmem:[#allocation7 + $0xaa0] sm:$0xff] }
0x11c4   :  { %v11431_v43 = vpop.eup %11430  ;;  %7436 = vrot.lane.b32.xlu1 %v11429_v33, %s11659_s0 }
0x11c5   :  { %v7365_v47 = vadd.f32 1.0, %v11431_v43  ;;  %v11433_v28 = vpop.eup %11432 }
0x11c6   :  { %v11435_v3 = vpop.eup %11434  ;;  %v7367_v5 = vadd.f32 1.0, %v11433_v28  ;;  %v7835_v28 = vld [vmem:[#allocation7 + $0xa60] sm:$0xff] }
0x11c7   :  { %11444 = vrcp.f32 %v7365_v47  ;;  %v7369_v11 = vadd.f32 1.0, %v11435_v3 }
0x11c8   :  { %11446 = vrcp.f32 %v7367_v5 }
0x11c9   :  { %11448 = vrcp.f32 %v7369_v11  ;;  %v7834_v11 = vld [vmem:[#allocation7 + $0xa58] sm:$0xff] }
0x11cc   :  { %v11437_v16 = vpop.eup %11436 }
0x11cd   :  { %7440 = vrot.lane.b32.xlu1 %v11437_v16, %s11659_s0  ;;  %v11439_v51 = vpop.eup %11438 }
0x11ce   :  { %v7371_v27 = vadd.f32 1.0, %v11439_v51  ;;  %v7850_v51 = vld [vmem:[#allocation7 + $0xad8] sm:$0xff] }
0x11cf   :  { %v11441_v10 = vpop.eup %11440 }
0x11d0   :  { %7442 = vrot.lane.b32.xlu0 %v11441_v10, %s11659_s0  ;;  %v11443_v35 = vpop.eup %11442  ;;  %11450 = vrcp.f32 %v7371_v27 }
0x11d4   :  { %7422 = vrot.lane.b32.xlu0 %v11443_v35, %s11659_s0  ;;  %v11445_v31 = vpop.eup %11444  ;;  %v7849_v35 = vld [vmem:[#allocation7 + $0xad0] sm:$0xff] }
0x11d5   :  { %v11447_v29 = vpop.eup %11446 }
0x11d6   :  { %v11449_v37 = vpop.eup %11448 }
0x11d8   :  { %7426 = vrot.lane.b32.xlu0 %v11445_v31, %s11659_s0 }
0x11dc   :  { %7430 = vrot.lane.b32.xlu0 %v11447_v29, %s11659_s0  ;;  %v7833_v29 = vld [vmem:[#allocation7 + $0xa50] sm:$0xff] }
0x11dd   :  { %v11451_v48 = vpop.eup %11450 }
0x11e0   :  { %7434 = vrot.lane.b32.xlu0 %v11449_v37, %s11659_s0 }
0x11e4   :  { %7438 = vrot.lane.b32.xlu0 %v11451_v48, %s11659_s0  ;;  %v7848_v48 = vld [vmem:[#allocation7 + $0xac8] sm:$0xff] }
0x120e   :  { %v7417_v46 = vpop.permute.xlu0 %7416 }
0x120f   :  { %v7458_v50 = vmul.f32 %v7417_v46, %v15818_v40 }
0x1211   :  { %v15928_v56 = vmul.f32 %v7458_v50, %v11880_v12  ;;  %v7832_v50 = vld [vmem:[#allocation7 + $0xa48] sm:$0xff] }
0x1212   :  { %v7419_v42 = vpop.permute.xlu1 %7418 }
0x1213   :  { %7626 = vst.msk [vmem:[#allocation2 + $0x8] sm:$0xff] %vm563_vm1, %v15928_v56  ;;  %v7459_v38 = vmul.f32 %v7419_v42, %v15824_v19  ;;  %v7486_v58 = vrot.slane %v15928_v56, 6  ;;  %v7738_v52 = vrot.slane %v15928_v56, 2  ;;  %v7640_v20 = vrot.slane %v15928_v56, 1 }
0x1215   :  { %v15934_v15 = vmul.f32 %v7459_v38, %v11882_v13  ;;  %v7847_v38 = vld [vmem:[#allocation7 + $0xac0] sm:$0xff] }
0x1216   :  { %v7421_v40 = vpop.permute.xlu1 %7420 }
0x1217   :  { %v7487_v55 = vrot.slane %v15934_v15, 6  ;;  %v7739_v17 = vrot.slane %v15934_v15, 2  ;;  %7627 = vst.msk [vmem:[#allocation2 + $0x20] sm:$0xff] %vm563_vm1, %v15934_v15  ;;  %v7460_v19 = vmul.f32 %v7421_v40, %v15832_v63  ;;  %v7641_v7 = vrot.slane %v15934_v15, 1  ;;  %v7851_v63 = vld [vmem:[#allocation7 + $0xae0] sm:$0xff]  ;;  %v7830_v40 = vld [vmem:[#allocation7 + $0xa38] sm:$0xff] }
0x1218   :  { %10349 = vmatprep.subr.mxu1 %v7851_v63 }
0x1219   :  { %v7764_v33 = vsel %vm805_vm2, %v7738_v52, %v7739_v17  ;;  %v15950_v26 = vmul.f32 %v7460_v19, %v11930_v59  ;;  %v7666_v43 = vsel %vm706_vm3, %v7640_v20, %v7641_v7  ;;  %v7512_v47 = vsel %vm548_vm4, %v7486_v58, %v7487_v55  ;;  %10350 = vmatpush3.msra.mxu1 %v7835_v28  ;;  %v7844_v19 = vld [vmem:[#allocation7 + $0xaa8] sm:$0xff] }
0x121a   :  { %7766 = vst.msk [vmem:[#allocation2 + $0x10] sm:$0xff] %vm563_vm1, %v7764_v33  ;;  %7682 = vrot.lane.b32.xlu0 %v7666_v43, %s11659_s0  ;;  %7515 = vst.msk [vmem:[#allocation2 + $0x18] sm:$0xff] %vm563_vm1, %v7512_v47  ;;  %10351 = vmatprep.subr.mxu1 %v7850_v51  ;;  %v7827_v43 = vld [vmem:[#allocation7 + $0xa20] sm:$0xff] }
0x121b   :  { %v7488_v3 = vrot.slane %v15950_v26, 6  ;;  %v7740_v5 = vrot.slane %v15950_v26, 2  ;;  %7628 = vst.msk [vmem:[#allocation2 + $0x38] sm:$0xff] %vm563_vm1, %v15950_v26  ;;  %v7642_v16 = vrot.slane %v15950_v26, 1  ;;  %10352 = vmatpush3.msra.mxu1 %v7834_v11 }
0x121c   :  { %10353 = vmatprep.subr.mxu1 %v7849_v35  ;;  %v7841_v35 = vld [vmem:[#allocation7 + $0xa90] sm:$0xff] }
0x121d   :  { %v7763_v10 = vsel %vm805_vm2, %v7739_v17, %v7740_v5  ;;  %v7665_v27 = vsel %vm706_vm3, %v7641_v7, %v7642_v16  ;;  %v7511_v31 = vsel %vm548_vm4, %v7487_v55, %v7488_v3  ;;  %10354 = vmatpush3.msra.mxu1 %v7833_v29  ;;  %v7829_v55 = vld [vmem:[#allocation7 + $0xa30] sm:$0xff] }
0x121e   :  { %7767 = vst.msk [vmem:[#allocation2 + $0x28] sm:$0xff] %vm563_vm1, %v7763_v10  ;;  %7684 = vrot.lane.b32.xlu0 %v7665_v27, %s11659_s0  ;;  %7516 = vst.msk [vmem:[#allocation2 + $0x30] sm:$0xff] %vm563_vm1, %v7511_v31  ;;  %10355 = vmatprep.subr.mxu1 %v7848_v48  ;;  %v7842_v10 = vld [vmem:[#allocation7 + $0xa98] sm:$0xff]  ;;  %v7824_v48 = vld [vmem:[#allocation7 + $0xa08] sm:$0xff] }
0x121f   :  { %v7425_v37 = vpop.permute.xlu1 %7424  ;;  %10356 = vmatpush3.msra.mxu1 %v7832_v50  ;;  %v7826_v27 = vld [vmem:[#allocation7 + $0xa18] sm:$0xff] }
0x1220   :  { %v7462_v46 = vmul.f32 %v7425_v37, %v15842_v53  ;;  %10357 = vmatprep.subr.mxu1 %v7847_v38 }
0x1221   :  { %v7782_v42 = vld [vmem:[#allocation2 + $0x10] sm:$0xff]  ;;  %10358 = vmatpush3.msra.mxu1 %v7831_v41 }
0x1222   :  { %v15985_v57 = vmul.f32 %v7462_v46, %v11935_v9  ;;  %10878 = vmatprep.mubr.msk.f32.mxu0 %vm563_vm1, %v7782_v42  ;;  %10359 = vmatprep.subr.mxu1 %v7846_v32  ;;  %v7839_v46 = vld [vmem:[#allocation7 + $0xa80] sm:$0xff] }
0x1223   :  { %10360 = vmatpush3.msra.mxu1 %v7830_v40  ;;  %v7823_v42 = vld [vmem:[#allocation7 + $0xa00] sm:$0xff]  ;;  %v7528_v40 = vrot.slane %v15928_v56, 7 }
0x1224   :  { %7630 = vst.msk [vmem:[#allocation2 + $0x68] sm:$0xff] %vm563_vm1, %v15985_v57  ;;  %10361 = vmatprep.subr.mxu1 %v7845_v49 }
0x1225   :  { %v7785_v53 = vld [vmem:[#allocation2 + $0x28] sm:$0xff]  ;;  %10362 = vmatpush3.msra.mxu1 %v7829_v55 }
0x1226   :  { %10879 = vmatmul.mubr.msk.f32.vlgmr.msra.gmra.mxu0 %vm563_vm1, %v7785_v53  ;;  %10363 = vmatprep.subr.mxu1 %v7844_v19 }
0x1227   :  { %v7429_v17 = vpop.permute.xlu1 %7428  ;;  %10364 = vmatpush3.msra.mxu1 %v7828_v61 }
0x1228   :  { %v7464_v7 = vmul.f32 %v7429_v17, %v15852_v8  ;;  %10365 = vmatprep.subr.mxu1 %v7843_v23  ;;  %v7529_v17 = vrot.slane %v15934_v15, 7 }
0x1229   :  { %10366 = vmatpush3.msra.mxu1 %v7827_v43  ;;  %v7530_v43 = vrot.slane %v15950_v26, 7 }
0x122a   :  { %v15993_v33 = vmul.f32 %v7464_v7, %v11979_v44  ;;  %10367 = vmatprep.subr.mxu1 %v7842_v10 }
0x122b   :  { %10368 = vmatpush3.msra.mxu1 %v7826_v27  ;;  %v7554_v27 = vsel %vm592_vm5, %v7528_v40, %v7529_v17 }
0x122c   :  { %7632 = vst.msk [vmem:[#allocation2 + $0x98] sm:$0xff] %vm563_vm1, %v15993_v33  ;;  %10369 = vmatprep.subr.mxu1 %v7841_v35  ;;  %v7492_v26 = vrot.slane %v15993_v33, 6 }
0x122e   :  { %v7433_v63 = vpop.permute.xlu1 %7432 }
0x122f   :  { %v7466_v47 = vmul.f32 %v7433_v63, %v15862_v4  ;;  %v7825_v4 = vld [vmem:[#allocation7 + $0xa10] sm:$0xff]  ;;  %v7742_v63 = vrot.slane %v15985_v57, 2 }
0x1230   :  { %10370 = vmatpush3.msra.mxu1 %v7825_v4 }
0x1231   :  { %v15999_v8 = vmul.f32 %v7466_v47, %v12056_v25 }
0x1233   :  { %7634 = vst.msk [vmem:[#allocation2 + $0xc8] sm:$0xff] %vm563_vm1, %v15999_v8 }
0x1236   :  { %v7437_v28 = vpop.permute.xlu1 %7436 }
0x1237   :  { %v7468_v51 = vmul.f32 %v7437_v28, %v15872_v21  ;;  %v7840_v21 = vld [vmem:[#allocation7 + $0xa88] sm:$0xff] }
0x1238   :  { %10371 = vmatprep.subr.mxu1 %v7840_v21  ;;  %v7553_v21 = vsel %vm592_vm5, %v7529_v17, %v7530_v43 }
0x1239   :  { %v16005_v11 = vmul.f32 %v7468_v51, %v12129_v36  ;;  %10372 = vmatpush3.msra.mxu1 %v7824_v48  ;;  %v7744_v48 = vrot.slane %v15993_v33, 2 }
0x123a   :  { %10373 = vmatprep.subr.mxu1 %v7839_v46 }
0x123b   :  { %7636 = vst.msk [vmem:[#allocation2 + $0xf8] sm:$0xff] %vm563_vm1, %v16005_v11  ;;  %10374 = vmatpush3.msra.mxu1 %v7823_v42 }
0x123f   :  { %v7441_v31 = vpop.permute.xlu1 %7440 }
0x1240   :  { %v7470_v29 = vmul.f32 %v7441_v31, %v15883_v62 }
0x1242   :  { %v16011_v37 = vmul.f32 %v7470_v29, %v12202_v39  ;;  %v7443_v50 = vpop.permute.xlu0 %7442  ;;  %v7490_v29 = vrot.slane %v15985_v57, 6 }
0x1243   :  { %v7471_v38 = vmul.f32 %v7443_v50, %v15894_v60  ;;  %v7644_v50 = vrot.slane %v15985_v57, 1 }
0x1244   :  { %7638 = vst.msk [vmem:[#allocation2 + $0x128] sm:$0xff] %vm563_vm1, %v16011_v37  ;;  %v7750_v41 = vrot.slane %v16011_v37, 2  ;;  %v7498_v15 = vrot.slane %v16011_v37, 6 }
0x1245   :  { %v16017_v62 = vmul.f32 %v7471_v38, %v11884_v14 }
0x1246   :  { %v7423_v32 = vpop.permute.xlu0 %7422 }
0x1247   :  { %v7499_v53 = vrot.slane %v16017_v62, 6  ;;  %v7751_v49 = vrot.slane %v16017_v62, 2  ;;  %7639 = vst.msk [vmem:[#allocation2 + $0x140] sm:$0xff] %vm563_vm1, %v16017_v62  ;;  %v7461_v60 = vmul.f32 %v7423_v32, %v15881_v45  ;;  %v7541_v55 = vrot.slane %v16017_v62, 7 }
0x1249   :  { %v7752_v19 = vsel %vm805_vm2, %v7750_v41, %v7751_v49  ;;  %v7765_v7 = vsel %vm805_vm2, %v7751_v49, %v7738_v52  ;;  %v16037_v61 = vmul.f32 %v7461_v60, %v11932_v1  ;;  %v7555_v45 = vsel %vm592_vm5, %v7541_v55, %v7528_v40 }
0x124a   :  { %7778 = vst.msk [vmem:[#allocation2 + $0x130] sm:$0xff] %vm563_vm1, %v7752_v19  ;;  %7779 = vst.msk [vmem:[#allocation2 + $0x148] sm:$0xff] %vm563_vm1, %v7765_v7  ;;  %7570 = vrot.lane.b32.xlu1 %v7555_v45, %s11659_s0  ;;  %v7427_v23 = vpop.permute.xlu0 %7426  ;;  %v7513_v52 = vsel %vm548_vm4, %v7499_v53, %v7486_v58  ;;  %v7500_v58 = vsel %vm548_vm4, %v7498_v15, %v7499_v53  ;;  %v7746_v19 = vrot.slane %v15999_v8, 2 }
0x124b   :  { %v7741_v47 = vrot.slane %v16037_v61, 2  ;;  %7629 = vst.msk [vmem:[#allocation2 + $0x50] sm:$0xff] %vm563_vm1, %v16037_v61  ;;  %v7463_v28 = vmul.f32 %v7427_v23, %v15897_v54  ;;  %v7643_v51 = vrot.slane %v16037_v61, 1  ;;  %7514 = vst.msk [vmem:[#allocation2] sm:$0xff] %vm563_vm1, %v7513_v52  ;;  %v7489_v10 = vrot.slane %v16037_v61, 6 }
0x124c   :  { %7527 = vst.msk [vmem:[#allocation2 + $0x138] sm:$0xff] %vm563_vm1, %v7500_v58  ;;  %v7531_v38 = vrot.slane %v16037_v61, 7 }
0x124d   :  { %v7761_v35 = vsel %vm805_vm2, %v7741_v47, %v7742_v63  ;;  %v7762_v54 = vsel %vm805_vm2, %v7740_v5, %v7741_v47  ;;  %v16073_v31 = vmul.f32 %v7463_v28, %v11941_v22  ;;  %v7664_v4 = vsel %vm706_vm3, %v7642_v16, %v7643_v51 }
0x124e   :  { %7768 = vst.msk [vmem:[#allocation2 + $0x40] sm:$0xff] %vm563_vm1, %v7762_v54  ;;  %7769 = vst.msk [vmem:[#allocation2 + $0x58] sm:$0xff] %vm563_vm1, %v7761_v35  ;;  %7572 = vrot.lane.b32.xlu1 %v7554_v27, %s11659_s0  ;;  %7686 = vrot.lane.b32.xlu0 %v7664_v4, %s11659_s0  ;;  %v7431_v5 = vpop.permute.xlu0 %7430  ;;  %v7510_v32 = vsel %vm548_vm4, %v7488_v3, %v7489_v10  ;;  %v7509_v40 = vsel %vm548_vm4, %v7489_v10, %v7490_v29  ;;  %v7494_v27 = vrot.slane %v15999_v8, 6 }
0x124f   :  { %v7743_v16 = vrot.slane %v16073_v31, 2  ;;  %7631 = vst.msk [vmem:[#allocation2 + $0x80] sm:$0xff] %vm563_vm1, %v16073_v31  ;;  %v7465_v46 = vmul.f32 %v7431_v5, %v15904_v24  ;;  %v7491_v42 = vrot.slane %v16073_v31, 6  ;;  %v7663_v60 = vsel %vm706_vm3, %v7643_v51, %v7644_v50  ;;  %7517 = vst.msk [vmem:[#allocation2 + $0x48] sm:$0xff] %vm563_vm1, %v7510_v32 }
0x1250   :  { %7518 = vst.msk [vmem:[#allocation2 + $0x60] sm:$0xff] %vm563_vm1, %v7509_v40  ;;  %v7645_v17 = vrot.slane %v16073_v31, 1  ;;  %v7748_v54 = vrot.slane %v16005_v11, 2  ;;  %v7646_v5 = vrot.slane %v15993_v33, 1  ;;  %v7533_v40 = vrot.slane %v16073_v31, 7 }
0x1251   :  { %v7759_v53 = vsel %vm805_vm2, %v7743_v16, %v7744_v48  ;;  %v7760_v24 = vsel %vm805_vm2, %v7742_v63, %v7743_v16  ;;  %v16106_v49 = vmul.f32 %v7465_v46, %v12021_v2  ;;  %v7508_v23 = vsel %vm548_vm4, %v7490_v29, %v7491_v42 }
0x1252   :  { %7770 = vst.msk [vmem:[#allocation2 + $0x70] sm:$0xff] %vm563_vm1, %v7760_v24  ;;  %7771 = vst.msk [vmem:[#allocation2 + $0x88] sm:$0xff] %vm563_vm1, %v7759_v53  ;;  %7574 = vrot.lane.b32.xlu1 %v7553_v21, %s11659_s0  ;;  %7688 = vrot.lane.b32.xlu0 %v7663_v60, %s11659_s0  ;;  %v7435_v3 = vpop.permute.xlu0 %7434  ;;  %v7507_v52 = vsel %vm548_vm4, %v7491_v42, %v7492_v26  ;;  %v7662_v58 = vsel %vm706_vm3, %v7644_v50, %v7645_v17 }
0x1253   :  { %v7745_v7 = vrot.slane %v16106_v49, 2  ;;  %7633 = vst.msk [vmem:[#allocation2 + $0xb0] sm:$0xff] %vm563_vm1, %v16106_v49  ;;  %v7467_v61 = vmul.f32 %v7435_v3, %v15908_v18  ;;  %v7493_v45 = vrot.slane %v16106_v49, 6  ;;  %v7552_v18 = vsel %vm592_vm5, %v7530_v43, %v7531_v38  ;;  %7519 = vst.msk [vmem:[#allocation2 + $0x78] sm:$0xff] %vm563_vm1, %v7508_v23 }
0x1254   :  { %7520 = vst.msk [vmem:[#allocation2 + $0x90] sm:$0xff] %vm563_vm1, %v7507_v52  ;;  %v7532_v43 = vrot.slane %v15985_v57, 7  ;;  %v7661_v53 = vsel %vm706_vm3, %v7645_v17, %v7646_v5  ;;  %v7647_v24 = vrot.slane %v16106_v49, 1  ;;  %v7534_v52 = vrot.slane %v15993_v33, 7 }
0x1255   :  { %v7757_v63 = vsel %vm805_vm2, %v7745_v7, %v7746_v19  ;;  %v7758_v47 = vsel %vm805_vm2, %v7744_v48, %v7745_v7  ;;  %v16133_v28 = vmul.f32 %v7467_v61, %v12092_v0  ;;  %v7788_v51 = vld [vmem:[#allocation2 + $0x40] sm:$0xff]  ;;  %v7791_v10 = vld [vmem:[#allocation2 + $0x58] sm:$0xff]  ;;  %v7506_v48 = vsel %vm548_vm4, %v7492_v26, %v7493_v45 }
0x1256   :  { %7772 = vst.msk [vmem:[#allocation2 + $0xa0] sm:$0xff] %vm563_vm1, %v7758_v47  ;;  %7773 = vst.msk [vmem:[#allocation2 + $0xb8] sm:$0xff] %vm563_vm1, %v7757_v63  ;;  %10881 = vmatprep.mubr.msk.f32.mxu0 %vm563_vm1, %v7788_v51  ;;  %7576 = vrot.lane.b32.xlu1 %v7552_v18, %s11659_s0  ;;  %v7439_v35 = vpop.permute.xlu0 %7438  ;;  %v7551_v57 = vsel %vm592_vm5, %v7531_v38, %v7532_v43  ;;  %v7505_v16 = vsel %vm548_vm4, %v7493_v45, %v7494_v27  ;;  %v7496_v38 = vrot.slane %v16005_v11, 6 }
0x1257   :  { %v7747_v4 = vrot.slane %v16133_v28, 2  ;;  %7635 = vst.msk [vmem:[#allocation2 + $0xe0] sm:$0xff] %vm563_vm1, %v16133_v28  ;;  %7690 = vrot.lane.b32.xlu0 %v7662_v58, %s11659_s0  ;;  %v7469_v29 = vmul.f32 %v7439_v35, %v15914_v34  ;;  %10882 = vmatmul.mubr.msk.f32.gmra.mxu0 %vm563_vm1, %v7791_v10  ;;  %v7495_v21 = vrot.slane %v16133_v28, 6  ;;  %7521 = vst.msk [vmem:[#allocation2 + $0xa8] sm:$0xff] %vm563_vm1, %v7506_v48  ;;  %v7648_v47 = vrot.slane %v15999_v8, 1  ;;  %v7821_v48 = vld [vmem:[#allocation2 + $0x148] sm:$0xff] }
0x1258   :  { %7522 = vst.msk [vmem:[#allocation2 + $0xc0] sm:$0xff] %vm563_vm1, %v7505_v16  ;;  %v7550_v7 = vsel %vm592_vm5, %v7532_v43, %v7533_v40  ;;  %v7549_v51 = vsel %vm592_vm5, %v7533_v40, %v7534_v52 }
0x1259   :  { %v7755_v46 = vsel %vm805_vm2, %v7747_v4, %v7748_v54  ;;  %v7756_v34 = vsel %vm805_vm2, %v7746_v19, %v7747_v4  ;;  %v16167_v50 = vmul.f32 %v7469_v29, %v16985_v6  ;;  %v7794_v42 = vld [vmem:[#allocation2 + $0x70] sm:$0xff]  ;;  %v7797_v32 = vld [vmem:[#allocation2 + $0x88] sm:$0xff]  ;;  %v7504_v26 = vsel %vm548_vm4, %v7494_v27, %v7495_v21 }
0x125a   :  { %7774 = vst.msk [vmem:[#allocation2 + $0xd0] sm:$0xff] %vm563_vm1, %v7756_v34  ;;  %7775 = vst.msk [vmem:[#allocation2 + $0xe8] sm:$0xff] %vm563_vm1, %v7755_v46  ;;  %7578 = vrot.lane.b32.xlu1 %v7551_v57, %s11659_s0  ;;  %10884 = vmatprep.mubr.msk.f32.mxu0 %vm563_vm1, %v7794_v42  ;;  %v7503_v3 = vsel %vm548_vm4, %v7495_v21, %v7496_v38  ;;  %v7535_v27 = vrot.slane %v16106_v49, 7  ;;  %v7659_v33 = vsel %vm706_vm3, %v7647_v24, %v7648_v47 }
0x125b   :  { %v7497_v31 = vrot.slane %v16167_v50, 6  ;;  %v7749_v60 = vrot.slane %v16167_v50, 2  ;;  %7637 = vst.msk [vmem:[#allocation2 + $0x110] sm:$0xff] %vm563_vm1, %v16167_v50  ;;  %7692 = vrot.lane.b32.xlu0 %v7661_v53, %s11659_s0  ;;  %10885 = vmatmul.mubr.msk.f32.gmra.mxu0 %vm563_vm1, %v7797_v32  ;;  %7523 = vst.msk [vmem:[#allocation2 + $0xd8] sm:$0xff] %vm563_vm1, %v7504_v26  ;;  %v7536_v4 = vrot.slane %v15999_v8, 7  ;;  %v7650_v29 = vrot.slane %v16005_v11, 1 }
0x125c   :  { %7524 = vst.msk [vmem:[#allocation2 + $0xf0] sm:$0xff] %vm563_vm1, %v7503_v3  ;;  %v7548_v58 = vsel %vm592_vm5, %v7534_v52, %v7535_v27  ;;  %v7537_v21 = vrot.slane %v16133_v28, 7  ;;  %v7651_v16 = vrot.slane %v16167_v50, 1  ;;  %v7538_v46 = vrot.slane %v16005_v11, 7 }
0x125d   :  { %v7753_v17 = vsel %vm805_vm2, %v7749_v60, %v7750_v41  ;;  %v7754_v19 = vsel %vm805_vm2, %v7748_v54, %v7749_v60  ;;  %v7800_v61 = vld [vmem:[#allocation2 + $0xa0] sm:$0xff]  ;;  %v7803_v45 = vld [vmem:[#allocation2 + $0xb8] sm:$0xff]  ;;  %v7660_v41 = vsel %vm706_vm3, %v7646_v5, %v7647_v24  ;;  %v7502_v23 = vsel %vm548_vm4, %v7496_v38, %v7497_v31  ;;  %v7818_v54 = vld [vmem:[#allocation2 + $0x130] sm:$0xff] }
0x125e   :  { %7776 = vst.msk [vmem:[#allocation2 + $0x100] sm:$0xff] %vm563_vm1, %v7754_v19  ;;  %7777 = vst.msk [vmem:[#allocation2 + $0x118] sm:$0xff] %vm563_vm1, %v7753_v17  ;;  %7580 = vrot.lane.b32.xlu1 %v7550_v7, %s11659_s0  ;;  %10887 = vmatprep.mubr.msk.f32.mxu0 %vm563_vm1, %v7800_v61  ;;  %v7501_v63 = vsel %vm548_vm4, %v7497_v31, %v7498_v15  ;;  %v7649_v15 = vrot.slane %v16133_v28, 1  ;;  %v7547_v5 = vsel %vm592_vm5, %v7535_v27, %v7536_v4 }
0x125f   :  { %7694 = vrot.lane.b32.xlu0 %v7660_v41, %s11659_s0  ;;  %10888 = vmatmul.mubr.msk.f32.gmra.mxu0 %vm563_vm1, %v7803_v45  ;;  %7525 = vst.msk [vmem:[#allocation2 + $0x108] sm:$0xff] %vm563_vm1, %v7502_v23  ;;  %7526 = vst.msk [vmem:[#allocation2 + $0x120] sm:$0xff] %vm563_vm1, %v7501_v63  ;;  %v7546_v8 = vsel %vm592_vm5, %v7536_v4, %v7537_v21  ;;  %v7656_v28 = vsel %vm706_vm3, %v7650_v29, %v7651_v16  ;;  %v7652_v34 = vrot.slane %v16011_v37, 1 }
0x1260   :  { %v7658_v49 = vsel %vm706_vm3, %v7648_v47, %v7649_v15  ;;  %v7657_v57 = vsel %vm706_vm3, %v7649_v15, %v7650_v29  ;;  %v7545_v42 = vsel %vm592_vm5, %v7537_v21, %v7538_v46  ;;  %v7539_v32 = vrot.slane %v16167_v50, 7 }
0x1261   :  { %v7806_v18 = vld [vmem:[#allocation2 + $0xd0] sm:$0xff]  ;;  %v7809_v10 = vld [vmem:[#allocation2 + $0xe8] sm:$0xff]  ;;  %v7655_v40 = vsel %vm706_vm3, %v7651_v16, %v7652_v34  ;;  %v7653_v38 = vrot.slane %v16017_v62, 1  ;;  %v7540_v50 = vrot.slane %v16011_v37, 7 }
0x1262   :  { %7582 = vrot.lane.b32.xlu1 %v7549_v51, %s11659_s0  ;;  %10890 = vmatprep.mubr.msk.f32.mxu0 %vm563_vm1, %v7806_v18  ;;  %v7544_v53 = vsel %vm592_vm5, %v7538_v46, %v7539_v32 }
0x1263   :  { %7696 = vrot.lane.b32.xlu0 %v7659_v33, %s11659_s0  ;;  %10891 = vmatmul.mubr.msk.f32.gmra.mxu0 %vm563_vm1, %v7809_v10  ;;  %v7654_v11 = vsel %vm706_vm3, %v7652_v34, %v7653_v38  ;;  %v7543_v24 = vsel %vm592_vm5, %v7539_v32, %v7540_v50  ;;  %v7667_v31 = vsel %vm706_vm3, %v7653_v38, %v7640_v20 }
0x1264   :  { %v7542_v60 = vsel %vm592_vm5, %v7540_v50, %v7541_v55 }
0x1265   :  { %v7812_v35 = vld [vmem:[#allocation2 + $0x100] sm:$0xff]  ;;  %v7815_v43 = vld [vmem:[#allocation2 + $0x118] sm:$0xff] }
0x1266   :  { %7584 = vrot.lane.b32.xlu1 %v7548_v58, %s11659_s0  ;;  %10893 = vmatprep.mubr.msk.f32.mxu0 %vm563_vm1, %v7812_v35 }
0x1267   :  { %7698 = vrot.lane.b32.xlu0 %v7658_v49, %s11659_s0  ;;  %10894 = vmatmul.mubr.msk.f32.gmra.mxu0 %vm563_vm1, %v7815_v43 }
0x1268   :  { %10896 = vmatprep.mubr.msk.f32.mxu0 %vm563_vm1, %v7818_v54 }
0x126a   :  { %7586 = vrot.lane.b32.xlu1 %v7547_v5, %s11659_s0 }
0x126b   :  { %7700 = vrot.lane.b32.xlu0 %v7657_v57, %s11659_s0  ;;  %10897 = vmatmul.mubr.msk.f32.gmra.mxu0 %vm563_vm1, %v7821_v48 }
0x126e   :  { %7588 = vrot.lane.b32.xlu1 %v7546_v8, %s11659_s0 }
0x126f   :  { %7702 = vrot.lane.b32.xlu0 %v7656_v28, %s11659_s0 }
0x1272   :  { %7590 = vrot.lane.b32.xlu1 %v7545_v42, %s11659_s0 }
0x1273   :  { %7704 = vrot.lane.b32.xlu0 %v7655_v40, %s11659_s0 }
0x1276   :  { %7592 = vrot.lane.b32.xlu1 %v7544_v53, %s11659_s0 }
0x1277   :  { %7706 = vrot.lane.b32.xlu0 %v7654_v11, %s11659_s0 }
0x127a   :  { %7594 = vrot.lane.b32.xlu1 %v7543_v24, %s11659_s0 }
0x127b   :  { %7708 = vrot.lane.b32.xlu0 %v7667_v31, %s11659_s0 }
0x127e   :  { %7596 = vrot.lane.b32.xlu1 %v7542_v60, %s11659_s0 }
0x128c   :  { %v7683_v37 = vpop.permute.xlu0 %7682 }
0x128d   :  { %7724 = vst.msk [vmem:[#allocation2 + $0x8] sm:$0xff] %vm663_vm6, %v7683_v37 }
0x1290   :  { %v7685_v26 = vpop.permute.xlu0 %7684 }
0x1291   :  { %7725 = vst.msk [vmem:[#allocation2 + $0x20] sm:$0xff] %vm663_vm6, %v7685_v26 }
0x1294   :  { %v7781_v56 = vld [vmem:[#allocation2 + $0x8] sm:$0xff] }
0x1295   :  { %7977 = vmatprep.mubr.f32.mxu1 %v7781_v56 }
0x1298   :  { %v7784_v7 = vld [vmem:[#allocation2 + $0x20] sm:$0xff] }
0x12bc   :  { %v7571_v20 = vpop.permute.xlu1 %7570 }
0x12bd   :  { %7612 = vst.msk [vmem:[#allocation2] sm:$0xff] %vm663_vm6, %v7571_v20 }
0x12c0   :  { %v7573_v3 = vpop.permute.xlu1 %7572  ;;  %v7687_v17 = vpop.permute.xlu0 %7686 }
0x12c1   :  { %7613 = vst.msk [vmem:[#allocation2 + $0x18] sm:$0xff] %vm663_vm6, %v7573_v3  ;;  %7726 = vst.msk [vmem:[#allocation2 + $0x38] sm:$0xff] %vm663_vm6, %v7687_v17 }
0x12c4   :  { %v7575_v62 = vpop.permute.xlu1 %7574  ;;  %v7689_v55 = vpop.permute.xlu0 %7688  ;;  %v7780_v19 = vld [vmem:[#allocation2] sm:$0xff] }
0x12c5   :  { %7614 = vst.msk [vmem:[#allocation2 + $0x30] sm:$0xff] %vm663_vm6, %v7575_v62  ;;  %7727 = vst.msk [vmem:[#allocation2 + $0x50] sm:$0xff] %vm663_vm6, %v7689_v55  ;;  %7978 = vmatmul.mubr.f32.vlgmr.msra.gmra.mxu1 %v7780_v19 }
0x12c6   :  { %7982 = vmatprep.mubr.f32.mxu1 %v7784_v7  ;;  %v16312_v7 = vld [vmem:[#allocation8 + $0x8] ss:$0 sm:$0xff] }
0x12c8   :  { %v7577_v61 = vpop.permute.xlu1 %7576  ;;  %v7783_v45 = vld [vmem:[#allocation2 + $0x18] sm:$0xff] }
0x12c9   :  { %v7787_v41 = vld [vmem:[#allocation2 + $0x38] sm:$0xff]  ;;  %7615 = vst.msk [vmem:[#allocation2 + $0x48] sm:$0xff] %vm663_vm6, %v7577_v61  ;;  %v7691_v23 = vpop.permute.xlu0 %7690  ;;  %7983 = vmatmul.mubr.f32.gmra.mxu1 %v7783_v45 }
0x12ca   :  { %7728 = vst.msk [vmem:[#allocation2 + $0x68] sm:$0xff] %vm663_vm6, %v7691_v23  ;;  %7987 = vmatprep.mubr.f32.mxu1 %v7787_v41 }
0x12cc   :  { %v7579_v52 = vpop.permute.xlu1 %7578  ;;  %v7786_v63 = vld [vmem:[#allocation2 + $0x30] sm:$0xff] }
0x12cd   :  { %v7790_v47 = vld [vmem:[#allocation2 + $0x50] sm:$0xff]  ;;  %7616 = vst.msk [vmem:[#allocation2 + $0x60] sm:$0xff] %vm663_vm6, %v7579_v52  ;;  %v7693_v51 = vpop.permute.xlu0 %7692  ;;  %7988 = vmatmul.mubr.f32.gmra.mxu1 %v7786_v63 }
0x12ce   :  { %7729 = vst.msk [vmem:[#allocation2 + $0x80] sm:$0xff] %vm663_vm6, %v7693_v51  ;;  %7992 = vmatprep.mubr.f32.mxu1 %v7790_v47 }
0x12d0   :  { %v7581_v18 = vpop.permute.xlu1 %7580  ;;  %v7789_v10 = vld [vmem:[#allocation2 + $0x48] sm:$0xff] }
0x12d1   :  { %7617 = vst.msk [vmem:[#allocation2 + $0x78] sm:$0xff] %vm663_vm6, %v7581_v18  ;;  %v7695_v27 = vpop.permute.xlu0 %7694  ;;  %7993 = vmatmul.mubr.f32.gmra.mxu1 %v7789_v10  ;;  %v7793_v33 = vld [vmem:[#allocation2 + $0x68] sm:$0xff] }
0x12d2   :  { %7730 = vst.msk [vmem:[#allocation2 + $0x98] sm:$0xff] %vm663_vm6, %v7695_v27  ;;  %7997 = vmatprep.mubr.f32.mxu1 %v7793_v33 }
0x12d4   :  { %v7583_v15 = vpop.permute.xlu1 %7582  ;;  %v7792_v58 = vld [vmem:[#allocation2 + $0x60] sm:$0xff] }
0x12d5   :  { %7618 = vst.msk [vmem:[#allocation2 + $0x90] sm:$0xff] %vm663_vm6, %v7583_v15  ;;  %v7697_v35 = vpop.permute.xlu0 %7696  ;;  %7998 = vmatmul.mubr.f32.gmra.mxu1 %v7792_v58  ;;  %v7796_v43 = vld [vmem:[#allocation2 + $0x80] sm:$0xff] }
0x12d6   :  { %7731 = vst.msk [vmem:[#allocation2 + $0xb0] sm:$0xff] %vm663_vm6, %v7697_v35  ;;  %8002 = vmatprep.mubr.f32.mxu1 %v7796_v43 }
0x12d8   :  { %v7585_v49 = vpop.permute.xlu1 %7584  ;;  %v7795_v54 = vld [vmem:[#allocation2 + $0x78] sm:$0xff] }
0x12d9   :  { %7619 = vst.msk [vmem:[#allocation2 + $0xa8] sm:$0xff] %vm663_vm6, %v7585_v49  ;;  %v7699_v4 = vpop.permute.xlu0 %7698  ;;  %8003 = vmatmul.mubr.f32.gmra.mxu1 %v7795_v54  ;;  %v7799_v29 = vld [vmem:[#allocation2 + $0x98] sm:$0xff] }
0x12da   :  { %7732 = vst.msk [vmem:[#allocation2 + $0xc8] sm:$0xff] %vm663_vm6, %v7699_v4  ;;  %8007 = vmatprep.mubr.f32.mxu1 %v7799_v29 }
0x12dc   :  { %v7587_v5 = vpop.permute.xlu1 %7586  ;;  %v7798_v21 = vld [vmem:[#allocation2 + $0x90] sm:$0xff] }
0x12dd   :  { %7620 = vst.msk [vmem:[#allocation2 + $0xc0] sm:$0xff] %vm663_vm6, %v7587_v5  ;;  %v7701_v57 = vpop.permute.xlu0 %7700  ;;  %8008 = vmatmul.mubr.f32.gmra.mxu1 %v7798_v21  ;;  %v7802_v48 = vld [vmem:[#allocation2 + $0xb0] sm:$0xff] }
0x12de   :  { %7733 = vst.msk [vmem:[#allocation2 + $0xe0] sm:$0xff] %vm663_vm6, %v7701_v57  ;;  %8012 = vmatprep.mubr.f32.mxu1 %v7802_v48 }
0x12e0   :  { %v7589_v16 = vpop.permute.xlu1 %7588  ;;  %v7801_v8 = vld [vmem:[#allocation2 + $0xa8] sm:$0xff] }
0x12e1   :  { %7621 = vst.msk [vmem:[#allocation2 + $0xd8] sm:$0xff] %vm663_vm6, %v7589_v16  ;;  %v7703_v28 = vpop.permute.xlu0 %7702  ;;  %8013 = vmatmul.mubr.f32.gmra.mxu1 %v7801_v8  ;;  %v7805_v46 = vld [vmem:[#allocation2 + $0xc8] sm:$0xff] }
0x12e2   :  { %7734 = vst.msk [vmem:[#allocation2 + $0xf8] sm:$0xff] %vm663_vm6, %v7703_v28  ;;  %8017 = vmatprep.mubr.f32.mxu1 %v7805_v46 }
0x12e4   :  { %v7591_v34 = vpop.permute.xlu1 %7590  ;;  %v7804_v42 = vld [vmem:[#allocation2 + $0xc0] sm:$0xff] }
0x12e5   :  { %7622 = vst.msk [vmem:[#allocation2 + $0xf0] sm:$0xff] %vm663_vm6, %v7591_v34  ;;  %v7705_v32 = vpop.permute.xlu0 %7704  ;;  %8018 = vmatmul.mubr.f32.gmra.mxu1 %v7804_v42  ;;  %v7808_v40 = vld [vmem:[#allocation2 + $0xe0] sm:$0xff] }
0x12e6   :  { %7735 = vst.msk [vmem:[#allocation2 + $0x110] sm:$0xff] %vm663_vm6, %v7705_v32  ;;  %8022 = vmatprep.mubr.f32.mxu1 %v7808_v40  ;;  %v10880_v19 = vpop.f32.mrf.mxu0 }
0x12e8   :  { %v7593_v38 = vpop.permute.xlu1 %7592  ;;  %v7807_v53 = vld [vmem:[#allocation2 + $0xd8] sm:$0xff]  ;;  %v8114_v52 = vpop.f32.mrf.mxu0 }
0x12e9   :  { %7623 = vst.msk [vmem:[#allocation2 + $0x108] sm:$0xff] %vm663_vm6, %v7593_v38  ;;  %v7707_v11 = vpop.permute.xlu0 %7706  ;;  %8023 = vmatmul.mubr.f32.gmra.mxu1 %v7807_v53  ;;  %v7811_v50 = vld [vmem:[#allocation2 + $0xf8] sm:$0xff] }
0x12ea   :  { %7736 = vst.msk [vmem:[#allocation2 + $0x128] sm:$0xff] %vm663_vm6, %v7707_v11  ;;  %8027 = vmatprep.mubr.f32.mxu1 %v7811_v50 }
0x12ec   :  { %v7595_v24 = vpop.permute.xlu1 %7594  ;;  %v7810_v31 = vld [vmem:[#allocation2 + $0xf0] sm:$0xff] }
0x12ed   :  { %7624 = vst.msk [vmem:[#allocation2 + $0x120] sm:$0xff] %vm663_vm6, %v7595_v24  ;;  %v7709_v60 = vpop.permute.xlu0 %7708  ;;  %8028 = vmatmul.mubr.f32.gmra.mxu1 %v7810_v31  ;;  %v7814_v37 = vld [vmem:[#allocation2 + $0x110] sm:$0xff] }
0x12ee   :  { %7737 = vst.msk [vmem:[#allocation2 + $0x140] sm:$0xff] %vm663_vm6, %v7709_v60  ;;  %8032 = vmatprep.mubr.f32.mxu1 %v7814_v37 }
0x12f0   :  { %v7597_v26 = vpop.permute.xlu1 %7596  ;;  %v7813_v56 = vld [vmem:[#allocation2 + $0x108] sm:$0xff] }
0x12f1   :  { %7625 = vst.msk [vmem:[#allocation2 + $0x138] sm:$0xff] %vm663_vm6, %v7597_v26  ;;  %8033 = vmatmul.mubr.f32.gmra.mxu1 %v7813_v56  ;;  %v7817_v20 = vld [vmem:[#allocation2 + $0x128] sm:$0xff] }
0x12f2   :  { %8037 = vmatprep.mubr.f32.mxu1 %v7817_v20 }
0x12f4   :  { %v7816_v3 = vld [vmem:[#allocation2 + $0x120] sm:$0xff] }
0x12f5   :  { %8038 = vmatmul.mubr.f32.gmra.mxu1 %v7816_v3  ;;  %v7820_v17 = vld [vmem:[#allocation2 + $0x140] sm:$0xff] }
0x12f6   :  { %8042 = vmatprep.mubr.f32.mxu1 %v7820_v17 }
0x12f8   :  { %v7819_v62 = vld [vmem:[#allocation2 + $0x138] sm:$0xff] }
0x12f9   :  { %8043 = vmatmul.mubr.f32.gmra.mxu1 %v7819_v62 }
0x1317   :  { %v16319_v33 = vpop.f32.mrf.mxu0 }
0x1319   :  { %v8124_v4 = vpop.f32.mrf.mxu0 }
0x131b   :  { %v16332_v48 = vpop.f32.mrf.mxu0 }
0x131d   :  { %v8134_v34 = vpop.f32.mrf.mxu0 }
0x131f   :  { %v16342_v50 = vpop.f32.mrf.mxu0 }
0x1321   :  { %v8144_v20 = vpop.f32.mrf.mxu0 }
0x1385   :  { %v10375_v55 = vpop.f32.mrf.mxu1 }
0x1387   :  { %v10376_v61 = vpop.f32.mrf.mxu1 }
0x1388   :  { %v10377_v45 = vadd.f32 %v10376_v61, %v10375_v55 }
0x1389   :  { %v10378_v41 = vpop.f32.mrf.mxu1 }
0x138a   :  { %v7980_v23 = vadd.f32 %v10377_v45, %v16312_v7  ;;  %v16352_v45 = vpop.f32.mrf.mxu0 }
0x138b   :  { %v10379_v63 = vpop.f32.mrf.mxu1 }
0x138c   :  { %v16315_v47 = vadd.f32 %v8114_v52, %v7980_v23  ;;  %v10380_v51 = vadd.f32 %v10379_v63, %v10378_v41 }
0x138d   :  { %v10381_v18 = vpop.f32.mrf.mxu1 }
0x138e   :  { %v9513_v10 = vmul.f32 -1.442695, %v16315_v47  ;;  %v7985_v27 = vadd.f32 %v10380_v51, %v16312_v7  ;;  %v8727_v51 = vld [vmem:[#allocation7 + $0xc78] sm:$0xff] }
0x138f   :  { %v10382_v15 = vpop.f32.mrf.mxu1  ;;  %10899 = vmatprep.subr.mxu1 %v8727_v51 }
0x1390   :  { %11452 = vpow2.f32 %v9513_v10  ;;  %v16321_v58 = vadd.f32 %v10880_v19, %v7985_v27  ;;  %v10383_v35 = vadd.f32 %v10382_v15, %v10381_v18  ;;  %v8154_v18 = vpop.f32.mrf.mxu0  ;;  %10900 = vmatpush3.msra.mxu1 %v8727_v51  ;;  %v8726_v15 = vld [vmem:[#allocation7 + $0xc70] sm:$0xff] }
0x1391   :  { %v16323_v43 = vpop.f32.mrf.mxu1  ;;  %10901 = vmatprep.subr.mxu1 %v8726_v15 }
0x1392   :  { %v9514_v49 = vmul.f32 -1.442695, %v16321_v58  ;;  %v7990_v54 = vadd.f32 %v10383_v35, %v16312_v7  ;;  %10902 = vmatpush3.msra.mxu1 %v8726_v15 }
0x1393   :  { %v16327_v29 = vpop.f32.mrf.mxu1 }
0x1394   :  { %11454 = vpow2.f32 %v9514_v49  ;;  %v16329_v5 = vadd.f32 %v8124_v4, %v7990_v54 }
0x1395   :  { %v10387_v21 = vpop.f32.mrf.mxu1 }
0x1396   :  { %v9515_v57 = vmul.f32 -1.442695, %v16329_v5 }
0x1397   :  { %v10388_v16 = vpop.f32.mrf.mxu1 }
0x1398   :  { %11456 = vpow2.f32 %v9515_v57  ;;  %v10389_v8 = vadd.f32 %v10388_v16, %v10387_v21  ;;  %v8725_v21 = vld [vmem:[#allocation7 + $0xc68] sm:$0xff]  ;;  %v16363_v57 = vpop.f32.mrf.mxu0 }
0x1399   :  { %v16334_v28 = vpop.f32.mrf.mxu1  ;;  %10903 = vmatprep.subr.mxu1 %v8725_v21 }
0x139a   :  { %v8000_v46 = vadd.f32 %v10389_v8, %v16312_v7  ;;  %10904 = vmatpush3.msra.mxu1 %v8725_v21 }
0x139b   :  { %v16337_v42 = vpop.f32.mrf.mxu1 }
0x139c   :  { %v16339_v32 = vadd.f32 %v8134_v34, %v8000_v46  ;;  %v8724_v34 = vld [vmem:[#allocation7 + $0xc60] sm:$0xff] }
0x139d   :  { %v11453_v40 = vpop.eup %11452  ;;  %v10393_v38 = vpop.f32.mrf.mxu1  ;;  %10905 = vmatprep.subr.mxu1 %v8724_v34 }
0x139e   :  { %v8225_v53 = vadd.f32 1.0, %v11453_v40  ;;  %v9517_v11 = vmul.f32 -1.442695, %v16339_v32  ;;  %v8723_v40 = vld [vmem:[#allocation7 + $0xc58] sm:$0xff]  ;;  %10906 = vmatpush3.msra.mxu1 %v8724_v34 }
0x139f   :  { %v10394_v24 = vpop.f32.mrf.mxu1  ;;  %10907 = vmatprep.subr.mxu1 %v8723_v40 }
0x13a0   :  { %11458 = vrcp.f32 %v8225_v53  ;;  %v10395_v31 = vadd.f32 %v10394_v24, %v10393_v38  ;;  %v8164_v24 = vpop.f32.mrf.mxu0  ;;  %10908 = vmatpush3.msra.mxu1 %v8723_v40 }
0x13a1   :  { %v11455_v60 = vpop.eup %11454  ;;  %11460 = vpow2.f32 %v9517_v11  ;;  %v16344_v37 = vpop.f32.mrf.mxu1 }
0x13a2   :  { %v8226_v26 = vadd.f32 1.0, %v11455_v60  ;;  %v8010_v56 = vadd.f32 %v10395_v31, %v16312_v7  ;;  %v10386_v60 = vadd.f32 %v16327_v29, %v16323_v43 }
0x13a3   :  { %v16347_v3 = vpop.f32.mrf.mxu1 }
0x13a4   :  { %11462 = vrcp.f32 %v8226_v26  ;;  %v16349_v17 = vadd.f32 %v8144_v20, %v8010_v56  ;;  %v8722_v56 = vld [vmem:[#allocation7 + $0xc50] sm:$0xff]  ;;  %v7995_v43 = vadd.f32 %v10386_v60, %v16312_v7 }
0x13a5   :  { %v11457_v62 = vpop.eup %11456  ;;  %v10399_v55 = vpop.f32.mrf.mxu1  ;;  %10909 = vmatprep.subr.mxu1 %v8722_v56 }
0x13a6   :  { %v8227_v19 = vadd.f32 1.0, %v11457_v62  ;;  %v9519_v61 = vmul.f32 -1.442695, %v16349_v17  ;;  %10910 = vmatpush3.msra.mxu1 %v8722_v56 }
0x13a7   :  { %v10400_v41 = vpop.f32.mrf.mxu1 }
0x13a8   :  { %11464 = vrcp.f32 %v8227_v19  ;;  %v10401_v23 = vadd.f32 %v10400_v41, %v10399_v55  ;;  %v8720_v41 = vld [vmem:[#allocation7 + $0xc40] sm:$0xff] }
0x13a9   :  { %11466 = vpow2.f32 %v9519_v61  ;;  %v16354_v52 = vpop.f32.mrf.mxu1  ;;  %v8721_v61 = vld [vmem:[#allocation7 + $0xc48] sm:$0xff] }
0x13aa   :  { %v8020_v63 = vadd.f32 %v10401_v23, %v16312_v7  ;;  %v10898_v23 = vpop.f32.mrf.mxu0  ;;  %10911 = vmatprep.subr.mxu1 %v8721_v61 }
0x13ab   :  { %v16357_v10 = vpop.f32.mrf.mxu1  ;;  %10912 = vmatpush3.msra.mxu1 %v8721_v61 }
0x13ac   :  { %v16359_v27 = vadd.f32 %v8154_v18, %v8020_v63  ;;  %v10392_v18 = vadd.f32 %v16337_v42, %v16334_v28  ;;  %10913 = vmatprep.subr.mxu1 %v8720_v41  ;;  %v10398_v28 = vadd.f32 %v16347_v3, %v16344_v37 }
0x13ad   :  { %v11459_v35 = vpop.eup %11458  ;;  %v10405_v49 = vpop.f32.mrf.mxu1  ;;  %10914 = vmatpush3.msra.mxu1 %v8720_v41 }
0x13ae   :  { %v11461_v54 = vpop.eup %11460  ;;  %v9521_v4 = vmul.f32 -1.442695, %v16359_v27  ;;  %8281 = vrot.lane.b32.xlu0 %v11459_v35, %s11659_s0  ;;  %v8015_v37 = vadd.f32 %v10398_v28, %v16312_v7 }
0x13af   :  { %v8229_v16 = vadd.f32 1.0, %v11461_v54  ;;  %v10406_v8 = vpop.f32.mrf.mxu1 }
0x13b0   :  { %11468 = vpow2.f32 %v9521_v4  ;;  %v10407_v46 = vadd.f32 %v10406_v8, %v10405_v49  ;;  %v8174_v49 = vpop.f32.mrf.mxu0  ;;  %v16378_v4 = vadd.f32 %v16319_v33, %v7995_v43 }
0x13b1   :  { %v11463_v38 = vpop.eup %11462  ;;  %11470 = vrcp.f32 %v8229_v16  ;;  %v10408_v53 = vpop.f32.mrf.mxu1 }
0x13b2   :  { %v8030_v11 = vadd.f32 %v10407_v46, %v16312_v7  ;;  %8283 = vrot.lane.b32.xlu1 %v11463_v38, %s11659_s0  ;;  %v8005_v46 = vadd.f32 %v10392_v18, %v16312_v7  ;;  %v9516_v33 = vmul.f32 -1.442695, %v16378_v4 }
0x13b3   :  { %v10409_v31 = vpop.f32.mrf.mxu1 }
0x13b4   :  { %v16369_v26 = vadd.f32 %v8164_v24, %v8030_v11  ;;  %v10404_v11 = vadd.f32 %v16357_v10, %v16354_v52  ;;  %v16394_v60 = vadd.f32 %v16332_v48, %v8005_v46 }
0x13b5   :  { %v11465_v20 = vpop.eup %11464  ;;  %v10411_v62 = vpop.f32.mrf.mxu1 }
0x13b6   :  { %v11467_v55 = vpop.eup %11466  ;;  %v9523_v19 = vmul.f32 -1.442695, %v16369_v26  ;;  %8285 = vrot.lane.b32.xlu1 %v11465_v20, %s11659_s0  ;;  %v8025_v56 = vadd.f32 %v10404_v11, %v16312_v7  ;;  %v10410_v20 = vadd.f32 %v10409_v31, %v10408_v53 }
0x13b7   :  { %v8231_v63 = vadd.f32 1.0, %v11467_v55  ;;  %v10412_v51 = vpop.f32.mrf.mxu1  ;;  %v9518_v55 = vmul.f32 -1.442695, %v16394_v60 }
0x13b8   :  { %11472 = vpow2.f32 %v9523_v19  ;;  %v10413_v29 = vadd.f32 %v10412_v51, %v10411_v62  ;;  %v16401_v19 = vadd.f32 %v16342_v50, %v8015_v37  ;;  %v16405_v48 = vadd.f32 %v16352_v45, %v8025_v56 }
0x13b9   :  { %11474 = vrcp.f32 %v8231_v63  ;;  %v10414_v15 = vpop.f32.mrf.mxu1  ;;  %v8035_v61 = vadd.f32 %v10410_v20, %v16312_v7 }
0x13ba   :  { %v8040_v35 = vadd.f32 %v10413_v29, %v16312_v7  ;;  %v9520_v53 = vmul.f32 -1.442695, %v16401_v19  ;;  %v9522_v31 = vmul.f32 -1.442695, %v16405_v48 }
0x13bb   :  { %v10415_v54 = vpop.f32.mrf.mxu1  ;;  %v16411_v41 = vadd.f32 %v16363_v57, %v8035_v61  ;;  %v8718_v61 = vld [vmem:[#allocation7 + $0xc30] sm:$0xff] }
0x13bc   :  { %v16380_v21 = vadd.f32 %v8174_v49, %v8040_v35  ;;  %v10416_v16 = vadd.f32 %v10415_v54, %v10414_v15 }
0x13bd   :  { %v11469_v8 = vpop.eup %11468  ;;  %v9524_v45 = vmul.f32 -1.442695, %v16411_v41 }
0x13be   :  { %v11471_v42 = vpop.eup %11470  ;;  %v8233_v34 = vadd.f32 1.0, %v11469_v8  ;;  %v9525_v40 = vmul.f32 -1.442695, %v16380_v21  ;;  %v8045_v38 = vadd.f32 %v10416_v16, %v16312_v7 }
0x13bf   :  { %8289 = vrot.lane.b32.xlu1 %v11471_v42, %s11659_s0 }
0x13c0   :  { %11476 = vrcp.f32 %v8233_v34  ;;  %v16391_v24 = vadd.f32 %v10898_v23, %v8045_v38 }
0x13c1   :  { %11478 = vpow2.f32 %v9525_v40 }
0x13c2   :  { %v9526_v3 = vmul.f32 -1.442695, %v16391_v24  ;;  %11480 = vpow2.f32 %v9516_v33 }
0x13c4   :  { %11482 = vpow2.f32 %v9526_v3 }
0x13c5   :  { %v11473_v62 = vpop.eup %11472 }
0x13c6   :  { %v11475_v52 = vpop.eup %11474  ;;  %v8235_v10 = vadd.f32 1.0, %v11473_v62 }
0x13c7   :  { %8293 = vrot.lane.b32.xlu1 %v11475_v52, %s11659_s0  ;;  %v8719_v52 = vld [vmem:[#allocation7 + $0xc38] sm:$0xff] }
0x13c8   :  { %11484 = vrcp.f32 %v8235_v10  ;;  %v8703_v10 = vld [vmem:[#allocation7 + $0xbb8] sm:$0xff]  ;;  %10439 = vmatprep.subr.mxu0 %v8719_v52 }
0x13c9   :  { %11486 = vpow2.f32 %v9518_v55  ;;  %10440 = vmatpush3.msra.mxu0 %v8703_v10  ;;  %v8696_v10 = vld [vmem:[#allocation7 + $0xb80] sm:$0xff] }
0x13ca   :  { %11488 = vpow2.f32 %v9520_v53  ;;  %10441 = vmatprep.subr.mxu0 %v8718_v61  ;;  %v8711_v61 = vld [vmem:[#allocation7 + $0xbf8] sm:$0xff] }
0x13cb   :  { %11490 = vpow2.f32 %v9522_v31 }
0x13cd   :  { %v11477_v50 = vpop.eup %11476 }
0x13ce   :  { %v11479_v23 = vpop.eup %11478  ;;  %8297 = vrot.lane.b32.xlu1 %v11477_v50, %s11659_s0 }
0x13cf   :  { %v8237_v63 = vadd.f32 1.0, %v11479_v23  ;;  %v11481_v51 = vpop.eup %11480  ;;  %v8702_v23 = vld [vmem:[#allocation7 + $0xbb0] sm:$0xff] }
0x13d0   :  { %v8228_v18 = vadd.f32 1.0, %v11481_v51  ;;  %10442 = vmatpush3.msra.mxu0 %v8702_v23  ;;  %v8710_v23 = vld [vmem:[#allocation7 + $0xbf0] sm:$0xff] }
0x13d1   :  { %11492 = vrcp.f32 %v8237_v63  ;;  %v11483_v7 = vpop.eup %11482 }
0x13d2   :  { %v8238_v43 = vadd.f32 1.0, %v11483_v7  ;;  %11494 = vpow2.f32 %v9524_v45  ;;  %v8717_v7 = vld [vmem:[#allocation7 + $0xc28] sm:$0xff] }
0x13d3   :  { %10443 = vmatprep.subr.mxu0 %v8717_v7  ;;  %v8693_v7 = vld [vmem:[#allocation7 + $0xb68] sm:$0xff] }
0x13d4   :  { %11496 = vrcp.f32 %v8238_v43  ;;  %v8701_v43 = vld [vmem:[#allocation7 + $0xba8] sm:$0xff] }
0x13d5   :  { %v11485_v29 = vpop.eup %11484  ;;  %11498 = vrcp.f32 %v8228_v18  ;;  %10444 = vmatpush3.msra.mxu0 %v8701_v43  ;;  %v8708_v43 = vld [vmem:[#allocation7 + $0xbe0] sm:$0xff] }
0x13d6   :  { %v11487_v15 = vpop.eup %11486  ;;  %8301 = vrot.lane.b32.xlu1 %v11485_v29, %s11659_s0 }
0x13d7   :  { %v8230_v57 = vadd.f32 1.0, %v11487_v15  ;;  %v11489_v35 = vpop.eup %11488 }
0x13d8   :  { %v11491_v49 = vpop.eup %11490  ;;  %v8232_v54 = vadd.f32 1.0, %v11489_v35  ;;  %v8700_v35 = vld [vmem:[#allocation7 + $0xba0] sm:$0xff] }
0x13d9   :  { %11500 = vrcp.f32 %v8230_v57  ;;  %v8234_v46 = vadd.f32 1.0, %v11491_v49 }
0x13da   :  { %11502 = vrcp.f32 %v8232_v54 }
0x13db   :  { %11504 = vrcp.f32 %v8234_v46  ;;  %v8699_v46 = vld [vmem:[#allocation7 + $0xb98] sm:$0xff] }
0x13de   :  { %v11493_v16 = vpop.eup %11492 }
0x13df   :  { %8305 = vrot.lane.b32.xlu1 %v11493_v16, %s11659_s0  ;;  %v11495_v8 = vpop.eup %11494 }
0x13e0   :  { %v8236_v42 = vadd.f32 1.0, %v11495_v8  ;;  %v8715_v8 = vld [vmem:[#allocation7 + $0xc18] sm:$0xff] }
0x13e1   :  { %v11497_v28 = vpop.eup %11496 }
0x13e2   :  { %8307 = vrot.lane.b32.xlu0 %v11497_v28, %s11659_s0  ;;  %v11499_v34 = vpop.eup %11498  ;;  %11506 = vrcp.f32 %v8236_v42 }
0x13e6   :  { %8287 = vrot.lane.b32.xlu0 %v11499_v34, %s11659_s0  ;;  %v11501_v40 = vpop.eup %11500  ;;  %v8714_v34 = vld [vmem:[#allocation7 + $0xc10] sm:$0xff] }
0x13e7   :  { %v11503_v38 = vpop.eup %11502 }
0x13e8   :  { %v11505_v33 = vpop.eup %11504 }
0x13ea   :  { %8291 = vrot.lane.b32.xlu0 %v11501_v40, %s11659_s0 }
0x13ee   :  { %8295 = vrot.lane.b32.xlu0 %v11503_v38, %s11659_s0  ;;  %v8698_v38 = vld [vmem:[#allocation7 + $0xb90] sm:$0xff] }
0x13ef   :  { %v11507_v11 = vpop.eup %11506 }
0x13f2   :  { %8299 = vrot.lane.b32.xlu0 %v11505_v33, %s11659_s0 }
0x13f6   :  { %8303 = vrot.lane.b32.xlu0 %v11507_v11, %s11659_s0  ;;  %v8713_v11 = vld [vmem:[#allocation7 + $0xc08] sm:$0xff] }
0x1420   :  { %v8282_v37 = vpop.permute.xlu0 %8281 }
0x1421   :  { %v8323_v3 = vmul.f32 %v8282_v37, %v16315_v47 }
0x1423   :  { %v16425_v56 = vmul.f32 %v8323_v3, %v11880_v12  ;;  %v8697_v3 = vld [vmem:[#allocation7 + $0xb88] sm:$0xff] }
0x1424   :  { %v8284_v20 = vpop.permute.xlu1 %8283 }
0x1425   :  { %8491 = vst.msk [vmem:[#allocation2 + $0x8] sm:$0xff] %vm563_vm1, %v16425_v56  ;;  %v8324_v62 = vmul.f32 %v8284_v20, %v16321_v58  ;;  %v8351_v53 = vrot.slane %v16425_v56, 6  ;;  %v8603_v31 = vrot.slane %v16425_v56, 2  ;;  %v8505_v50 = vrot.slane %v16425_v56, 1 }
0x1427   :  { %v16431_v55 = vmul.f32 %v8324_v62, %v11882_v13  ;;  %v8712_v62 = vld [vmem:[#allocation7 + $0xc00] sm:$0xff] }
0x1428   :  { %v8286_v47 = vpop.permute.xlu1 %8285 }
0x1429   :  { %v8352_v63 = vrot.slane %v16431_v55, 6  ;;  %v8604_v45 = vrot.slane %v16431_v55, 2  ;;  %8492 = vst.msk [vmem:[#allocation2 + $0x20] sm:$0xff] %vm563_vm1, %v16431_v55  ;;  %v8325_v58 = vmul.f32 %v8286_v47, %v16329_v5  ;;  %v8506_v51 = vrot.slane %v16431_v55, 1  ;;  %v8716_v5 = vld [vmem:[#allocation7 + $0xc20] sm:$0xff]  ;;  %v8695_v47 = vld [vmem:[#allocation7 + $0xb78] sm:$0xff] }
0x142a   :  { %10445 = vmatprep.subr.mxu0 %v8716_v5 }
0x142b   :  { %v8629_v29 = vsel %vm805_vm2, %v8603_v31, %v8604_v45  ;;  %v16447_v18 = vmul.f32 %v8325_v58, %v11930_v59  ;;  %v8531_v15 = vsel %vm706_vm3, %v8505_v50, %v8506_v51  ;;  %v8377_v57 = vsel %vm548_vm4, %v8351_v53, %v8352_v63  ;;  %10446 = vmatpush3.msra.mxu0 %v8700_v35  ;;  %v8709_v58 = vld [vmem:[#allocation7 + $0xbe8] sm:$0xff] }
0x142c   :  { %8631 = vst.msk [vmem:[#allocation2 + $0x10] sm:$0xff] %vm563_vm1, %v8629_v29  ;;  %8547 = vrot.lane.b32.xlu0 %v8531_v15, %s11659_s0  ;;  %8380 = vst.msk [vmem:[#allocation2 + $0x18] sm:$0xff] %vm563_vm1, %v8377_v57  ;;  %10447 = vmatprep.subr.mxu0 %v8715_v8  ;;  %v8692_v15 = vld [vmem:[#allocation7 + $0xb60] sm:$0xff] }
0x142d   :  { %v8353_v49 = vrot.slane %v16447_v18, 6  ;;  %v8605_v54 = vrot.slane %v16447_v18, 2  ;;  %8493 = vst.msk [vmem:[#allocation2 + $0x38] sm:$0xff] %vm563_vm1, %v16447_v18  ;;  %v8507_v16 = vrot.slane %v16447_v18, 1  ;;  %10448 = vmatpush3.msra.mxu0 %v8699_v46 }
0x142e   :  { %10449 = vmatprep.subr.mxu0 %v8714_v34  ;;  %v8706_v34 = vld [vmem:[#allocation7 + $0xbd0] sm:$0xff] }
0x142f   :  { %v8628_v28 = vsel %vm805_vm2, %v8604_v45, %v8605_v54  ;;  %v8530_v42 = vsel %vm706_vm3, %v8506_v51, %v8507_v16  ;;  %v8376_v40 = vsel %vm548_vm4, %v8352_v63, %v8353_v49  ;;  %10450 = vmatpush3.msra.mxu0 %v8698_v38  ;;  %v8694_v63 = vld [vmem:[#allocation7 + $0xb70] sm:$0xff] }
0x1430   :  { %8632 = vst.msk [vmem:[#allocation2 + $0x28] sm:$0xff] %vm563_vm1, %v8628_v28  ;;  %8549 = vrot.lane.b32.xlu0 %v8530_v42, %s11659_s0  ;;  %8381 = vst.msk [vmem:[#allocation2 + $0x30] sm:$0xff] %vm563_vm1, %v8376_v40  ;;  %10451 = vmatprep.subr.mxu0 %v8713_v11  ;;  %v8707_v28 = vld [vmem:[#allocation7 + $0xbd8] sm:$0xff]  ;;  %v8689_v11 = vld [vmem:[#allocation7 + $0xb48] sm:$0xff] }
0x1431   :  { %v8290_v33 = vpop.permute.xlu1 %8289  ;;  %10452 = vmatpush3.msra.mxu0 %v8697_v3  ;;  %v8691_v42 = vld [vmem:[#allocation7 + $0xb58] sm:$0xff] }
0x1432   :  { %v8327_v37 = vmul.f32 %v8290_v33, %v16339_v32  ;;  %10453 = vmatprep.subr.mxu0 %v8712_v62 }
0x1433   :  { %v8647_v20 = vld [vmem:[#allocation2 + $0x10] sm:$0xff]  ;;  %10454 = vmatpush3.msra.mxu0 %v8696_v10 }
0x1434   :  { %v16482_v52 = vmul.f32 %v8327_v37, %v11935_v9  ;;  %10915 = vmatprep.mubr.msk.f32.mxu1 %vm563_vm1, %v8647_v20  ;;  %10455 = vmatprep.subr.mxu0 %v8711_v61  ;;  %v8704_v37 = vld [vmem:[#allocation7 + $0xbc0] sm:$0xff] }
0x1435   :  { %10456 = vmatpush3.msra.mxu0 %v8695_v47  ;;  %v8688_v20 = vld [vmem:[#allocation7 + $0xb40] sm:$0xff]  ;;  %v8393_v47 = vrot.slane %v16425_v56, 7 }
0x1436   :  { %8495 = vst.msk [vmem:[#allocation2 + $0x68] sm:$0xff] %vm563_vm1, %v16482_v52  ;;  %10457 = vmatprep.subr.mxu0 %v8710_v23 }
0x1437   :  { %v8650_v32 = vld [vmem:[#allocation2 + $0x28] sm:$0xff]  ;;  %10458 = vmatpush3.msra.mxu0 %v8694_v63 }
0x1438   :  { %10916 = vmatmul.mubr.msk.f32.vlgmr.msra.gmra.mxu1 %vm563_vm1, %v8650_v32  ;;  %10459 = vmatprep.subr.mxu0 %v8709_v58 }
0x1439   :  { %v8294_v45 = vpop.permute.xlu1 %8293  ;;  %10460 = vmatpush3.msra.mxu0 %v8693_v7 }
0x143a   :  { %v8329_v51 = vmul.f32 %v8294_v45, %v16349_v17  ;;  %10461 = vmatprep.subr.mxu0 %v8708_v43  ;;  %v8394_v45 = vrot.slane %v16431_v55, 7 }
0x143b   :  { %10462 = vmatpush3.msra.mxu0 %v8692_v15  ;;  %v8395_v15 = vrot.slane %v16447_v18, 7 }
0x143c   :  { %v16490_v29 = vmul.f32 %v8329_v51, %v11979_v44  ;;  %10463 = vmatprep.subr.mxu0 %v8707_v28 }
0x143d   :  { %10464 = vmatpush3.msra.mxu0 %v8691_v42  ;;  %v8419_v42 = vsel %vm592_vm5, %v8393_v47, %v8394_v45 }
0x143e   :  { %8497 = vst.msk [vmem:[#allocation2 + $0x98] sm:$0xff] %vm563_vm1, %v16490_v29  ;;  %10465 = vmatprep.subr.mxu0 %v8706_v34  ;;  %v8357_v18 = vrot.slane %v16490_v29, 6 }
0x1440   :  { %v8298_v5 = vpop.permute.xlu1 %8297 }
0x1441   :  { %v8331_v57 = vmul.f32 %v8298_v5, %v16359_v27  ;;  %v8690_v27 = vld [vmem:[#allocation7 + $0xb50] sm:$0xff]  ;;  %v8607_v5 = vrot.slane %v16482_v52, 2 }
0x1442   :  { %10466 = vmatpush3.msra.mxu0 %v8690_v27 }
0x1443   :  { %v16496_v17 = vmul.f32 %v8331_v57, %v12056_v25 }
0x1445   :  { %8499 = vst.msk [vmem:[#allocation2 + $0xc8] sm:$0xff] %vm563_vm1, %v16496_v17 }
0x1448   :  { %v8302_v35 = vpop.permute.xlu1 %8301 }
0x1449   :  { %v8333_v8 = vmul.f32 %v8302_v35, %v16369_v26  ;;  %v8705_v26 = vld [vmem:[#allocation7 + $0xbc8] sm:$0xff] }
0x144a   :  { %10467 = vmatprep.subr.mxu0 %v8705_v26  ;;  %v8418_v26 = vsel %vm592_vm5, %v8394_v45, %v8395_v15 }
0x144b   :  { %v16502_v46 = vmul.f32 %v8333_v8, %v12129_v36  ;;  %10468 = vmatpush3.msra.mxu0 %v8689_v11  ;;  %v8609_v11 = vrot.slane %v16490_v29, 2 }
0x144c   :  { %10469 = vmatprep.subr.mxu0 %v8704_v37 }
0x144d   :  { %8501 = vst.msk [vmem:[#allocation2 + $0xf8] sm:$0xff] %vm563_vm1, %v16502_v46  ;;  %10470 = vmatpush3.msra.mxu0 %v8688_v20 }
0x1451   :  { %v8306_v40 = vpop.permute.xlu1 %8305 }
0x1452   :  { %v8335_v38 = vmul.f32 %v8306_v40, %v16380_v21 }
0x1454   :  { %v16508_v33 = vmul.f32 %v8335_v38, %v12202_v39  ;;  %v8308_v3 = vpop.permute.xlu0 %8307  ;;  %v8355_v38 = vrot.slane %v16482_v52, 6 }
0x1455   :  { %v8336_v62 = vmul.f32 %v8308_v3, %v16391_v24  ;;  %v8509_v3 = vrot.slane %v16482_v52, 1 }
0x1456   :  { %8503 = vst.msk [vmem:[#allocation2 + $0x128] sm:$0xff] %vm563_vm1, %v16508_v33  ;;  %v8615_v10 = vrot.slane %v16508_v33, 2  ;;  %v8363_v55 = vrot.slane %v16508_v33, 6 }
0x1457   :  { %v16514_v21 = vmul.f32 %v8336_v62, %v11884_v14 }
0x1458   :  { %v8288_v61 = vpop.permute.xlu0 %8287 }
0x1459   :  { %v8364_v32 = vrot.slane %v16514_v21, 6  ;;  %v8616_v23 = vrot.slane %v16514_v21, 2  ;;  %8504 = vst.msk [vmem:[#allocation2 + $0x140] sm:$0xff] %vm563_vm1, %v16514_v21  ;;  %v8326_v24 = vmul.f32 %v8288_v61, %v16378_v4  ;;  %v8406_v63 = vrot.slane %v16514_v21, 7 }
0x145b   :  { %v8617_v58 = vsel %vm805_vm2, %v8615_v10, %v8616_v23  ;;  %v8630_v51 = vsel %vm805_vm2, %v8616_v23, %v8603_v31  ;;  %v16534_v7 = vmul.f32 %v8326_v24, %v11932_v1  ;;  %v8420_v4 = vsel %vm592_vm5, %v8406_v63, %v8393_v47 }
0x145c   :  { %8643 = vst.msk [vmem:[#allocation2 + $0x130] sm:$0xff] %vm563_vm1, %v8617_v58  ;;  %8644 = vst.msk [vmem:[#allocation2 + $0x148] sm:$0xff] %vm563_vm1, %v8630_v51  ;;  %8435 = vrot.lane.b32.xlu1 %v8420_v4, %s11659_s0  ;;  %v8292_v43 = vpop.permute.xlu0 %8291  ;;  %v8378_v31 = vsel %vm548_vm4, %v8364_v32, %v8351_v53  ;;  %v8365_v53 = vsel %vm548_vm4, %v8363_v55, %v8364_v32  ;;  %v8611_v58 = vrot.slane %v16496_v17, 2 }
0x145d   :  { %v8606_v57 = vrot.slane %v16534_v7, 2  ;;  %8494 = vst.msk [vmem:[#allocation2 + $0x50] sm:$0xff] %vm563_vm1, %v16534_v7  ;;  %v8328_v35 = vmul.f32 %v8292_v43, %v16394_v60  ;;  %v8508_v8 = vrot.slane %v16534_v7, 1  ;;  %8379 = vst.msk [vmem:[#allocation2] sm:$0xff] %vm563_vm1, %v8378_v31  ;;  %v8354_v28 = vrot.slane %v16534_v7, 6 }
0x145e   :  { %8392 = vst.msk [vmem:[#allocation2 + $0x138] sm:$0xff] %vm563_vm1, %v8365_v53  ;;  %v8396_v62 = vrot.slane %v16534_v7, 7 }
0x145f   :  { %v8626_v34 = vsel %vm805_vm2, %v8606_v57, %v8607_v5  ;;  %v8627_v60 = vsel %vm805_vm2, %v8605_v54, %v8606_v57  ;;  %v16570_v40 = vmul.f32 %v8328_v35, %v11941_v22  ;;  %v8529_v27 = vsel %vm706_vm3, %v8507_v16, %v8508_v8 }
0x1460   :  { %8633 = vst.msk [vmem:[#allocation2 + $0x40] sm:$0xff] %vm563_vm1, %v8627_v60  ;;  %8634 = vst.msk [vmem:[#allocation2 + $0x58] sm:$0xff] %vm563_vm1, %v8626_v34  ;;  %8437 = vrot.lane.b32.xlu1 %v8419_v42, %s11659_s0  ;;  %8551 = vrot.lane.b32.xlu0 %v8529_v27, %s11659_s0  ;;  %v8296_v54 = vpop.permute.xlu0 %8295  ;;  %v8375_v61 = vsel %vm548_vm4, %v8353_v49, %v8354_v28  ;;  %v8374_v47 = vsel %vm548_vm4, %v8354_v28, %v8355_v38  ;;  %v8359_v42 = vrot.slane %v16496_v17, 6 }
0x1461   :  { %v8608_v16 = vrot.slane %v16570_v40, 2  ;;  %8496 = vst.msk [vmem:[#allocation2 + $0x80] sm:$0xff] %vm563_vm1, %v16570_v40  ;;  %v8330_v37 = vmul.f32 %v8296_v54, %v16401_v19  ;;  %v8356_v20 = vrot.slane %v16570_v40, 6  ;;  %v8528_v24 = vsel %vm706_vm3, %v8508_v8, %v8509_v3  ;;  %8382 = vst.msk [vmem:[#allocation2 + $0x48] sm:$0xff] %vm563_vm1, %v8375_v61 }
0x1462   :  { %8383 = vst.msk [vmem:[#allocation2 + $0x60] sm:$0xff] %vm563_vm1, %v8374_v47  ;;  %v8510_v45 = vrot.slane %v16570_v40, 1  ;;  %v8613_v60 = vrot.slane %v16502_v46, 2  ;;  %v8511_v54 = vrot.slane %v16490_v29, 1  ;;  %v8398_v47 = vrot.slane %v16570_v40, 7 }
0x1463   :  { %v8624_v32 = vsel %vm805_vm2, %v8608_v16, %v8609_v11  ;;  %v8625_v19 = vsel %vm805_vm2, %v8607_v5, %v8608_v16  ;;  %v16603_v23 = vmul.f32 %v8330_v37, %v12021_v2  ;;  %v8373_v43 = vsel %vm548_vm4, %v8355_v38, %v8356_v20 }
0x1464   :  { %8635 = vst.msk [vmem:[#allocation2 + $0x70] sm:$0xff] %vm563_vm1, %v8625_v19  ;;  %8636 = vst.msk [vmem:[#allocation2 + $0x88] sm:$0xff] %vm563_vm1, %v8624_v32  ;;  %8439 = vrot.lane.b32.xlu1 %v8418_v26, %s11659_s0  ;;  %8553 = vrot.lane.b32.xlu0 %v8528_v24, %s11659_s0  ;;  %v8300_v49 = vpop.permute.xlu0 %8299  ;;  %v8372_v31 = vsel %vm548_vm4, %v8356_v20, %v8357_v18  ;;  %v8527_v53 = vsel %vm706_vm3, %v8509_v3, %v8510_v45 }
0x1465   :  { %v8610_v51 = vrot.slane %v16603_v23, 2  ;;  %8498 = vst.msk [vmem:[#allocation2 + $0xb0] sm:$0xff] %vm563_vm1, %v16603_v23  ;;  %v8332_v7 = vmul.f32 %v8300_v49, %v16405_v48  ;;  %v8358_v4 = vrot.slane %v16603_v23, 6  ;;  %v8417_v48 = vsel %vm592_vm5, %v8395_v15, %v8396_v62  ;;  %8384 = vst.msk [vmem:[#allocation2 + $0x78] sm:$0xff] %vm563_vm1, %v8373_v43 }
0x1466   :  { %8385 = vst.msk [vmem:[#allocation2 + $0x90] sm:$0xff] %vm563_vm1, %v8372_v31  ;;  %v8397_v15 = vrot.slane %v16482_v52, 7  ;;  %v8526_v32 = vsel %vm706_vm3, %v8510_v45, %v8511_v54  ;;  %v8512_v19 = vrot.slane %v16603_v23, 1  ;;  %v8399_v31 = vrot.slane %v16490_v29, 7 }
0x1467   :  { %v8622_v5 = vsel %vm805_vm2, %v8610_v51, %v8611_v58  ;;  %v8623_v57 = vsel %vm805_vm2, %v8609_v11, %v8610_v51  ;;  %v16630_v35 = vmul.f32 %v8332_v7, %v12092_v0  ;;  %v8653_v8 = vld [vmem:[#allocation2 + $0x40] sm:$0xff]  ;;  %v8656_v28 = vld [vmem:[#allocation2 + $0x58] sm:$0xff]  ;;  %v8371_v11 = vsel %vm548_vm4, %v8357_v18, %v8358_v4 }
0x1468   :  { %8637 = vst.msk [vmem:[#allocation2 + $0xa0] sm:$0xff] %vm563_vm1, %v8623_v57  ;;  %8638 = vst.msk [vmem:[#allocation2 + $0xb8] sm:$0xff] %vm563_vm1, %v8622_v5  ;;  %10918 = vmatprep.mubr.msk.f32.mxu1 %vm563_vm1, %v8653_v8  ;;  %8441 = vrot.lane.b32.xlu1 %v8417_v48, %s11659_s0  ;;  %v8304_v34 = vpop.permute.xlu0 %8303  ;;  %v8416_v52 = vsel %vm592_vm5, %v8396_v62, %v8397_v15  ;;  %v8370_v16 = vsel %vm548_vm4, %v8358_v4, %v8359_v42  ;;  %v8361_v62 = vrot.slane %v16502_v46, 6 }
0x1469   :  { %v8612_v27 = vrot.slane %v16630_v35, 2  ;;  %8500 = vst.msk [vmem:[#allocation2 + $0xe0] sm:$0xff] %vm563_vm1, %v16630_v35  ;;  %8555 = vrot.lane.b32.xlu0 %v8527_v53, %s11659_s0  ;;  %v8334_v38 = vmul.f32 %v8304_v34, %v16411_v41  ;;  %10919 = vmatmul.mubr.msk.f32.gmra.mxu1 %vm563_vm1, %v8656_v28  ;;  %v8360_v26 = vrot.slane %v16630_v35, 6  ;;  %8386 = vst.msk [vmem:[#allocation2 + $0xa8] sm:$0xff] %vm563_vm1, %v8371_v11  ;;  %v8513_v57 = vrot.slane %v16496_v17, 1  ;;  %v8686_v11 = vld [vmem:[#allocation2 + $0x148] sm:$0xff] }
0x146a   :  { %8387 = vst.msk [vmem:[#allocation2 + $0xc0] sm:$0xff] %vm563_vm1, %v8370_v16  ;;  %v8415_v51 = vsel %vm592_vm5, %v8397_v15, %v8398_v47  ;;  %v8414_v8 = vsel %vm592_vm5, %v8398_v47, %v8399_v31 }
0x146b   :  { %v8620_v37 = vsel %vm805_vm2, %v8612_v27, %v8613_v60  ;;  %v8621_v41 = vsel %vm805_vm2, %v8611_v58, %v8612_v27  ;;  %v16664_v3 = vmul.f32 %v8334_v38, %v16985_v6  ;;  %v8659_v20 = vld [vmem:[#allocation2 + $0x70] sm:$0xff]  ;;  %v8662_v61 = vld [vmem:[#allocation2 + $0x88] sm:$0xff]  ;;  %v8369_v18 = vsel %vm548_vm4, %v8359_v42, %v8360_v26 }
0x146c   :  { %8639 = vst.msk [vmem:[#allocation2 + $0xd0] sm:$0xff] %vm563_vm1, %v8621_v41  ;;  %8640 = vst.msk [vmem:[#allocation2 + $0xe8] sm:$0xff] %vm563_vm1, %v8620_v37  ;;  %8443 = vrot.lane.b32.xlu1 %v8416_v52, %s11659_s0  ;;  %10921 = vmatprep.mubr.msk.f32.mxu1 %vm563_vm1, %v8659_v20  ;;  %v8368_v49 = vsel %vm548_vm4, %v8360_v26, %v8361_v62  ;;  %v8400_v42 = vrot.slane %v16603_v23, 7  ;;  %v8524_v29 = vsel %vm706_vm3, %v8512_v19, %v8513_v57 }
0x146d   :  { %v8362_v40 = vrot.slane %v16664_v3, 6  ;;  %v8614_v24 = vrot.slane %v16664_v3, 2  ;;  %8502 = vst.msk [vmem:[#allocation2 + $0x110] sm:$0xff] %vm563_vm1, %v16664_v3  ;;  %8557 = vrot.lane.b32.xlu0 %v8526_v32, %s11659_s0  ;;  %10922 = vmatmul.mubr.msk.f32.gmra.mxu1 %vm563_vm1, %v8662_v61  ;;  %8388 = vst.msk [vmem:[#allocation2 + $0xd8] sm:$0xff] %vm563_vm1, %v8369_v18  ;;  %v8401_v27 = vrot.slane %v16496_v17, 7  ;;  %v8515_v38 = vrot.slane %v16502_v46, 1 }
0x146e   :  { %8389 = vst.msk [vmem:[#allocation2 + $0xf0] sm:$0xff] %vm563_vm1, %v8368_v49  ;;  %v8413_v53 = vsel %vm592_vm5, %v8399_v31, %v8400_v42  ;;  %v8402_v26 = vrot.slane %v16630_v35, 7  ;;  %v8516_v16 = vrot.slane %v16664_v3, 1  ;;  %v8403_v37 = vrot.slane %v16502_v46, 7 }
0x146f   :  { %v8618_v45 = vsel %vm805_vm2, %v8614_v24, %v8615_v10  ;;  %v8619_v58 = vsel %vm805_vm2, %v8613_v60, %v8614_v24  ;;  %v8665_v7 = vld [vmem:[#allocation2 + $0xa0] sm:$0xff]  ;;  %v8668_v4 = vld [vmem:[#allocation2 + $0xb8] sm:$0xff]  ;;  %v8525_v10 = vsel %vm706_vm3, %v8511_v54, %v8512_v19  ;;  %v8367_v43 = vsel %vm548_vm4, %v8361_v62, %v8362_v40  ;;  %v8683_v60 = vld [vmem:[#allocation2 + $0x130] sm:$0xff] }
0x1470   :  { %8641 = vst.msk [vmem:[#allocation2 + $0x100] sm:$0xff] %vm563_vm1, %v8619_v58  ;;  %8642 = vst.msk [vmem:[#allocation2 + $0x118] sm:$0xff] %vm563_vm1, %v8618_v45  ;;  %8445 = vrot.lane.b32.xlu1 %v8415_v51, %s11659_s0  ;;  %10924 = vmatprep.mubr.msk.f32.mxu1 %vm563_vm1, %v8665_v7  ;;  %v8366_v5 = vsel %vm548_vm4, %v8362_v40, %v8363_v55  ;;  %v8514_v55 = vrot.slane %v16630_v35, 1  ;;  %v8412_v54 = vsel %vm592_vm5, %v8400_v42, %v8401_v27 }
0x1471   :  { %8559 = vrot.lane.b32.xlu0 %v8525_v10, %s11659_s0  ;;  %10925 = vmatmul.mubr.msk.f32.gmra.mxu1 %vm563_vm1, %v8668_v4  ;;  %8390 = vst.msk [vmem:[#allocation2 + $0x108] sm:$0xff] %vm563_vm1, %v8367_v43  ;;  %8391 = vst.msk [vmem:[#allocation2 + $0x120] sm:$0xff] %vm563_vm1, %v8366_v5  ;;  %v8411_v17 = vsel %vm592_vm5, %v8401_v27, %v8402_v26  ;;  %v8521_v35 = vsel %vm706_vm3, %v8515_v38, %v8516_v16  ;;  %v8517_v41 = vrot.slane %v16508_v33, 1 }
0x1472   :  { %v8523_v23 = vsel %vm706_vm3, %v8513_v57, %v8514_v55  ;;  %v8522_v52 = vsel %vm706_vm3, %v8514_v55, %v8515_v38  ;;  %v8410_v20 = vsel %vm592_vm5, %v8402_v26, %v8403_v37  ;;  %v8404_v61 = vrot.slane %v16664_v3, 7 }
0x1473   :  { %v8671_v48 = vld [vmem:[#allocation2 + $0xd0] sm:$0xff]  ;;  %v8674_v28 = vld [vmem:[#allocation2 + $0xe8] sm:$0xff]  ;;  %v8520_v47 = vsel %vm706_vm3, %v8516_v16, %v8517_v41  ;;  %v8518_v62 = vrot.slane %v16514_v21, 1  ;;  %v8405_v3 = vrot.slane %v16508_v33, 7 }
0x1474   :  { %8447 = vrot.lane.b32.xlu1 %v8414_v8, %s11659_s0  ;;  %10927 = vmatprep.mubr.msk.f32.mxu1 %vm563_vm1, %v8671_v48  ;;  %v8409_v32 = vsel %vm592_vm5, %v8403_v37, %v8404_v61 }
0x1475   :  { %8561 = vrot.lane.b32.xlu0 %v8524_v29, %s11659_s0  ;;  %10928 = vmatmul.mubr.msk.f32.gmra.mxu1 %vm563_vm1, %v8674_v28  ;;  %v8519_v46 = vsel %vm706_vm3, %v8517_v41, %v8518_v62  ;;  %v8408_v19 = vsel %vm592_vm5, %v8404_v61, %v8405_v3  ;;  %v8532_v40 = vsel %vm706_vm3, %v8518_v62, %v8505_v50 }
0x1476   :  { %v8407_v24 = vsel %vm592_vm5, %v8405_v3, %v8406_v63 }
0x1477   :  { %v8677_v34 = vld [vmem:[#allocation2 + $0x100] sm:$0xff]  ;;  %v8680_v15 = vld [vmem:[#allocation2 + $0x118] sm:$0xff] }
0x1478   :  { %8449 = vrot.lane.b32.xlu1 %v8413_v53, %s11659_s0  ;;  %10930 = vmatprep.mubr.msk.f32.mxu1 %vm563_vm1, %v8677_v34 }
0x1479   :  { %8563 = vrot.lane.b32.xlu0 %v8523_v23, %s11659_s0  ;;  %10931 = vmatmul.mubr.msk.f32.gmra.mxu1 %vm563_vm1, %v8680_v15 }
0x147a   :  { %10933 = vmatprep.mubr.msk.f32.mxu1 %vm563_vm1, %v8683_v60 }
0x147c   :  { %8451 = vrot.lane.b32.xlu1 %v8412_v54, %s11659_s0 }
0x147d   :  { %8565 = vrot.lane.b32.xlu0 %v8522_v52, %s11659_s0  ;;  %10934 = vmatmul.mubr.msk.f32.gmra.mxu1 %vm563_vm1, %v8686_v11 }
0x1480   :  { %8453 = vrot.lane.b32.xlu1 %v8411_v17, %s11659_s0 }
0x1481   :  { %8567 = vrot.lane.b32.xlu0 %v8521_v35, %s11659_s0 }
0x1484   :  { %8455 = vrot.lane.b32.xlu1 %v8410_v20, %s11659_s0 }
0x1485   :  { %8569 = vrot.lane.b32.xlu0 %v8520_v47, %s11659_s0 }
0x1488   :  { %8457 = vrot.lane.b32.xlu1 %v8409_v32, %s11659_s0 }
0x1489   :  { %8571 = vrot.lane.b32.xlu0 %v8519_v46, %s11659_s0 }
0x148c   :  { %8459 = vrot.lane.b32.xlu1 %v8408_v19, %s11659_s0 }
0x148d   :  { %8573 = vrot.lane.b32.xlu0 %v8532_v40, %s11659_s0 }
0x1490   :  { %8461 = vrot.lane.b32.xlu1 %v8407_v24, %s11659_s0 }
0x149e   :  { %v8548_v33 = vpop.permute.xlu0 %8547 }
0x149f   :  { %8589 = vst.msk [vmem:[#allocation2 + $0x8] sm:$0xff] %vm663_vm6, %v8548_v33 }
0x14a2   :  { %v8550_v18 = vpop.permute.xlu0 %8549 }
0x14a3   :  { %8590 = vst.msk [vmem:[#allocation2 + $0x20] sm:$0xff] %vm663_vm6, %v8550_v18 }
0x14a6   :  { %v8646_v56 = vld [vmem:[#allocation2 + $0x8] sm:$0xff] }
0x14a7   :  { %8842 = vmatprep.mubr.f32.mxu0 %v8646_v56 }
0x14aa   :  { %v8649_v58 = vld [vmem:[#allocation2 + $0x20] sm:$0xff] }
0x14ce   :  { %v8436_v50 = vpop.permute.xlu1 %8435 }
0x14cf   :  { %8477 = vst.msk [vmem:[#allocation2] sm:$0xff] %vm663_vm6, %v8436_v50 }
0x14d2   :  { %v8438_v49 = vpop.permute.xlu1 %8437  ;;  %v8552_v45 = vpop.permute.xlu0 %8551 }
0x14d3   :  { %8478 = vst.msk [vmem:[#allocation2 + $0x18] sm:$0xff] %vm663_vm6, %v8438_v49  ;;  %8591 = vst.msk [vmem:[#allocation2 + $0x38] sm:$0xff] %vm663_vm6, %v8552_v45 }
0x14d6   :  { %v8440_v30 = vpop.permute.xlu1 %8439  ;;  %v8554_v21 = vpop.permute.xlu0 %8553  ;;  %v8645_v63 = vld [vmem:[#allocation2] sm:$0xff] }
0x14d7   :  { %8479 = vst.msk [vmem:[#allocation2 + $0x30] sm:$0xff] %vm663_vm6, %v8440_v30  ;;  %8592 = vst.msk [vmem:[#allocation2 + $0x50] sm:$0xff] %vm663_vm6, %v8554_v21  ;;  %8843 = vmatmul.mubr.f32.vlgmr.msra.gmra.mxu0 %v8645_v63  ;;  %v16809_v63 = vld [vmem:[#allocation8 + $0x9] ss:$0 sm:$0xff] }
0x14d8   :  { %8847 = vmatprep.mubr.f32.mxu0 %v8649_v58 }
0x14da   :  { %v8442_v51 = vpop.permute.xlu1 %8441  ;;  %v8648_v7 = vld [vmem:[#allocation2 + $0x18] sm:$0xff] }
0x14db   :  { %v8652_v4 = vld [vmem:[#allocation2 + $0x38] sm:$0xff]  ;;  %8480 = vst.msk [vmem:[#allocation2 + $0x48] sm:$0xff] %vm663_vm6, %v8442_v51  ;;  %v8556_v10 = vpop.permute.xlu0 %8555  ;;  %8848 = vmatmul.mubr.f32.gmra.mxu0 %v8648_v7 }
0x14dc   :  { %8593 = vst.msk [vmem:[#allocation2 + $0x68] sm:$0xff] %vm663_vm6, %v8556_v10  ;;  %8852 = vmatprep.mubr.f32.mxu0 %v8652_v4 }
0x14de   :  { %v8444_v43 = vpop.permute.xlu1 %8443  ;;  %v8651_v31 = vld [vmem:[#allocation2 + $0x30] sm:$0xff] }
0x14df   :  { %v8655_v5 = vld [vmem:[#allocation2 + $0x50] sm:$0xff]  ;;  %8481 = vst.msk [vmem:[#allocation2 + $0x60] sm:$0xff] %vm663_vm6, %v8444_v43  ;;  %v8558_v57 = vpop.permute.xlu0 %8557  ;;  %8853 = vmatmul.mubr.f32.gmra.mxu0 %v8651_v31 }
0x14e0   :  { %8594 = vst.msk [vmem:[#allocation2 + $0x80] sm:$0xff] %vm663_vm6, %v8558_v57  ;;  %8857 = vmatprep.mubr.f32.mxu0 %v8655_v5 }
0x14e2   :  { %v8446_v8 = vpop.permute.xlu1 %8445  ;;  %v8654_v48 = vld [vmem:[#allocation2 + $0x48] sm:$0xff] }
0x14e3   :  { %8482 = vst.msk [vmem:[#allocation2 + $0x78] sm:$0xff] %vm663_vm6, %v8446_v8  ;;  %v8560_v28 = vpop.permute.xlu0 %8559  ;;  %8858 = vmatmul.mubr.f32.gmra.mxu0 %v8654_v48  ;;  %v8658_v42 = vld [vmem:[#allocation2 + $0x68] sm:$0xff] }
0x14e4   :  { %8595 = vst.msk [vmem:[#allocation2 + $0x98] sm:$0xff] %vm663_vm6, %v8560_v28  ;;  %8862 = vmatprep.mubr.f32.mxu0 %v8658_v42 }
0x14e6   :  { %v8448_v29 = vpop.permute.xlu1 %8447  ;;  %v8657_v55 = vld [vmem:[#allocation2 + $0x60] sm:$0xff] }
0x14e7   :  { %8483 = vst.msk [vmem:[#allocation2 + $0x90] sm:$0xff] %vm663_vm6, %v8448_v29  ;;  %v8562_v53 = vpop.permute.xlu0 %8561  ;;  %8863 = vmatmul.mubr.f32.gmra.mxu0 %v8657_v55  ;;  %v8661_v34 = vld [vmem:[#allocation2 + $0x80] sm:$0xff] }
0x14e8   :  { %8596 = vst.msk [vmem:[#allocation2 + $0xb0] sm:$0xff] %vm663_vm6, %v8562_v53  ;;  %8867 = vmatprep.mubr.f32.mxu0 %v8661_v34 }
0x14ea   :  { %v8450_v15 = vpop.permute.xlu1 %8449  ;;  %v8660_v23 = vld [vmem:[#allocation2 + $0x78] sm:$0xff] }
0x14eb   :  { %8484 = vst.msk [vmem:[#allocation2 + $0xa8] sm:$0xff] %vm663_vm6, %v8450_v15  ;;  %v8564_v60 = vpop.permute.xlu0 %8563  ;;  %8868 = vmatmul.mubr.f32.gmra.mxu0 %v8660_v23  ;;  %v8664_v27 = vld [vmem:[#allocation2 + $0x98] sm:$0xff] }
0x14ec   :  { %8597 = vst.msk [vmem:[#allocation2 + $0xc8] sm:$0xff] %vm663_vm6, %v8564_v60  ;;  %8872 = vmatprep.mubr.f32.mxu0 %v8664_v27 }
0x14ee   :  { %v8452_v38 = vpop.permute.xlu1 %8451  ;;  %v8663_v54 = vld [vmem:[#allocation2 + $0x90] sm:$0xff] }
0x14ef   :  { %8485 = vst.msk [vmem:[#allocation2 + $0xc0] sm:$0xff] %vm663_vm6, %v8452_v38  ;;  %v8566_v26 = vpop.permute.xlu0 %8565  ;;  %8873 = vmatmul.mubr.f32.gmra.mxu0 %v8663_v54  ;;  %v8667_v52 = vld [vmem:[#allocation2 + $0xb0] sm:$0xff] }
0x14f0   :  { %8598 = vst.msk [vmem:[#allocation2 + $0xe0] sm:$0xff] %vm663_vm6, %v8566_v26  ;;  %8877 = vmatprep.mubr.f32.mxu0 %v8667_v52 }
0x14f2   :  { %v8454_v11 = vpop.permute.xlu1 %8453  ;;  %v8666_v16 = vld [vmem:[#allocation2 + $0xa8] sm:$0xff] }
0x14f3   :  { %8486 = vst.msk [vmem:[#allocation2 + $0xd8] sm:$0xff] %vm663_vm6, %v8454_v11  ;;  %v8568_v17 = vpop.permute.xlu0 %8567  ;;  %8878 = vmatmul.mubr.f32.gmra.mxu0 %v8666_v16  ;;  %v8670_v35 = vld [vmem:[#allocation2 + $0xc8] sm:$0xff] }
0x14f4   :  { %8599 = vst.msk [vmem:[#allocation2 + $0xf8] sm:$0xff] %vm663_vm6, %v8568_v17  ;;  %8882 = vmatprep.mubr.f32.mxu0 %v8670_v35 }
0x14f6   :  { %v8456_v37 = vpop.permute.xlu1 %8455  ;;  %v8669_v41 = vld [vmem:[#allocation2 + $0xc0] sm:$0xff] }
0x14f7   :  { %8487 = vst.msk [vmem:[#allocation2 + $0xf0] sm:$0xff] %vm663_vm6, %v8456_v37  ;;  %v8570_v20 = vpop.permute.xlu0 %8569  ;;  %8883 = vmatmul.mubr.f32.gmra.mxu0 %v8669_v41  ;;  %v8673_v61 = vld [vmem:[#allocation2 + $0xe0] sm:$0xff] }
0x14f8   :  { %8600 = vst.msk [vmem:[#allocation2 + $0x110] sm:$0xff] %vm663_vm6, %v8570_v20  ;;  %8887 = vmatprep.mubr.f32.mxu0 %v8673_v61  ;;  %v10917_v21 = vpop.f32.mrf.mxu1 }
0x14fa   :  { %v8458_v47 = vpop.permute.xlu1 %8457  ;;  %v8672_v62 = vld [vmem:[#allocation2 + $0xd8] sm:$0xff]  ;;  %v8979_v10 = vpop.f32.mrf.mxu1 }
0x14fb   :  { %8488 = vst.msk [vmem:[#allocation2 + $0x108] sm:$0xff] %vm663_vm6, %v8458_v47  ;;  %v8572_v32 = vpop.permute.xlu0 %8571  ;;  %8888 = vmatmul.mubr.f32.gmra.mxu0 %v8672_v62  ;;  %v8676_v46 = vld [vmem:[#allocation2 + $0xf8] sm:$0xff] }
0x14fc   :  { %8601 = vst.msk [vmem:[#allocation2 + $0x128] sm:$0xff] %vm663_vm6, %v8572_v32  ;;  %8892 = vmatprep.mubr.f32.mxu0 %v8676_v46 }
0x14fe   :  { %v8460_v3 = vpop.permute.xlu1 %8459  ;;  %v8675_v19 = vld [vmem:[#allocation2 + $0xf0] sm:$0xff] }
0x14ff   :  { %8489 = vst.msk [vmem:[#allocation2 + $0x120] sm:$0xff] %vm663_vm6, %v8460_v3  ;;  %v8574_v40 = vpop.permute.xlu0 %8573  ;;  %8893 = vmatmul.mubr.f32.gmra.mxu0 %v8675_v19  ;;  %v8679_v24 = vld [vmem:[#allocation2 + $0x110] sm:$0xff] }
0x1500   :  { %8602 = vst.msk [vmem:[#allocation2 + $0x140] sm:$0xff] %vm663_vm6, %v8574_v40  ;;  %8897 = vmatprep.mubr.f32.mxu0 %v8679_v24 }
0x1502   :  { %v8462_v33 = vpop.permute.xlu1 %8461  ;;  %v8678_v18 = vld [vmem:[#allocation2 + $0x108] sm:$0xff] }
0x1503   :  { %8490 = vst.msk [vmem:[#allocation2 + $0x138] sm:$0xff] %vm663_vm6, %v8462_v33  ;;  %8898 = vmatmul.mubr.f32.gmra.mxu0 %v8678_v18  ;;  %v8682_v56 = vld [vmem:[#allocation2 + $0x128] sm:$0xff] }
0x1504   :  { %8902 = vmatprep.mubr.f32.mxu0 %v8682_v56 }
0x1506   :  { %v8681_v50 = vld [vmem:[#allocation2 + $0x120] sm:$0xff] }
0x1507   :  { %8903 = vmatmul.mubr.f32.gmra.mxu0 %v8681_v50  ;;  %v8685_v49 = vld [vmem:[#allocation2 + $0x140] sm:$0xff] }
0x1508   :  { %8907 = vmatprep.mubr.f32.mxu0 %v8685_v49 }
0x150a   :  { %v8684_v45 = vld [vmem:[#allocation2 + $0x138] sm:$0xff] }
0x150b   :  { %8908 = vmatmul.mubr.f32.gmra.mxu0 %v8684_v45 }
0x1529   :  { %v10920_v28 = vpop.f32.mrf.mxu1 }
0x152b   :  { %v8989_v23 = vpop.f32.mrf.mxu1 }
0x152d   :  { %v10923_v11 = vpop.f32.mrf.mxu1 }
0x152f   :  { %v8999_v61 = vpop.f32.mrf.mxu1 }
0x1531   :  { %v10926_v33 = vpop.f32.mrf.mxu1 }
0x1597   :  { %v10471_v30 = vpop.f32.mrf.mxu0 }
0x1599   :  { %v10472_v58 = vpop.f32.mrf.mxu0 }
0x159a   :  { %v10473_v51 = vadd.f32 %v10472_v58, %v10471_v30 }
0x159b   :  { %v10474_v7 = vpop.f32.mrf.mxu0 }
0x159c   :  { %v8845_v4 = vadd.f32 %v10473_v51, %v16809_v63  ;;  %v9009_v51 = vpop.f32.mrf.mxu1 }
0x159d   :  { %v10475_v43 = vpop.f32.mrf.mxu0 }
0x159e   :  { %v16812_v31 = vadd.f32 %v8979_v10, %v8845_v4  ;;  %v10476_v5 = vadd.f32 %v10475_v43, %v10474_v7 }
0x159f   :  { %v10477_v57 = vpop.f32.mrf.mxu0 }
0x15a0   :  { %v9542_v8 = vmul.f32 -1.442695, %v16812_v31  ;;  %v8850_v48 = vadd.f32 %v10476_v5, %v16809_v63 }
0x15a1   :  { %v10478_v42 = vpop.f32.mrf.mxu0 }
0x15a2   :  { %11508 = vpow2.f32 %v9542_v8  ;;  %v16816_v29 = vadd.f32 %v10917_v21, %v8850_v48  ;;  %v10479_v55 = vadd.f32 %v10478_v42, %v10477_v57 }
0x15a3   :  { %v10480_v53 = vpop.f32.mrf.mxu0 }
0x15a4   :  { %v9543_v34 = vmul.f32 -1.442695, %v16816_v29  ;;  %v8855_v15 = vadd.f32 %v10479_v55, %v16809_v63 }
0x15a5   :  { %v10481_v60 = vpop.f32.mrf.mxu0 }
0x15a6   :  { %11510 = vpow2.f32 %v9543_v34  ;;  %v16820_v27 = vadd.f32 %v8989_v23, %v8855_v15  ;;  %v10482_v38 = vadd.f32 %v10481_v60, %v10480_v53 }
0x15a7   :  { %v10483_v54 = vpop.f32.mrf.mxu0 }
0x15a8   :  { %v9544_v26 = vmul.f32 -1.442695, %v16820_v27  ;;  %v8860_v52 = vadd.f32 %v10482_v38, %v16809_v63 }
0x15a9   :  { %v10484_v16 = vpop.f32.mrf.mxu0 }
0x15aa   :  { %11512 = vpow2.f32 %v9544_v26  ;;  %v16824_v17 = vadd.f32 %v10920_v28, %v8860_v52  ;;  %v10485_v35 = vadd.f32 %v10484_v16, %v10483_v54  ;;  %v10929_v28 = vpop.f32.mrf.mxu1 }
0x15ab   :  { %v10486_v37 = vpop.f32.mrf.mxu0 }
0x15ac   :  { %v9545_v41 = vmul.f32 -1.442695, %v16824_v17  ;;  %v8865_v20 = vadd.f32 %v10485_v35, %v16809_v63  ;;  %v9019_v54 = vpop.f32.mrf.mxu1 }
0x15ad   :  { %v10487_v47 = vpop.f32.mrf.mxu0 }
0x15ae   :  { %11514 = vpow2.f32 %v9545_v41  ;;  %v16828_v62 = vadd.f32 %v8999_v61, %v8865_v20  ;;  %v10488_v32 = vadd.f32 %v10487_v47, %v10486_v37  ;;  %v10932_v61 = vpop.f32.mrf.mxu1 }
0x15af   :  { %v11509_v46 = vpop.eup %11508  ;;  %v10489_v3 = vpop.f32.mrf.mxu0 }
0x15b0   :  { %v9090_v19 = vadd.f32 1.0, %v11509_v46  ;;  %v9546_v40 = vmul.f32 -1.442695, %v16828_v62  ;;  %v8870_v24 = vadd.f32 %v10488_v32, %v16809_v63 }
0x15b1   :  { %v10490_v18 = vpop.f32.mrf.mxu0 }
0x15b2   :  { %11516 = vrcp.f32 %v9090_v19  ;;  %v16832_v56 = vadd.f32 %v10923_v11, %v8870_v24  ;;  %v10491_v50 = vadd.f32 %v10490_v18, %v10489_v3 }
0x15b3   :  { %v11511_v49 = vpop.eup %11510  ;;  %11518 = vpow2.f32 %v9546_v40  ;;  %v10492_v45 = vpop.f32.mrf.mxu0 }
0x15b4   :  { %v9091_v30 = vadd.f32 1.0, %v11511_v49  ;;  %v9547_v21 = vmul.f32 -1.442695, %v16832_v56  ;;  %v8875_v58 = vadd.f32 %v10491_v50, %v16809_v63  ;;  %v9029_v50 = vpop.f32.mrf.mxu1 }
0x15b5   :  { %v10493_v7 = vpop.f32.mrf.mxu0 }
0x15b6   :  { %11520 = vrcp.f32 %v9091_v30  ;;  %v16836_v4 = vadd.f32 %v9009_v51, %v8875_v58  ;;  %v10494_v10 = vadd.f32 %v10493_v7, %v10492_v45 }
0x15b7   :  { %v11513_v43 = vpop.eup %11512  ;;  %11522 = vpow2.f32 %v9547_v21  ;;  %v10495_v5 = vpop.f32.mrf.mxu0 }
0x15b8   :  { %v9092_v57 = vadd.f32 1.0, %v11513_v43  ;;  %v9548_v8 = vmul.f32 -1.442695, %v16836_v4  ;;  %v8880_v48 = vadd.f32 %v10494_v10, %v16809_v63 }
0x15b9   :  { %v10496_v42 = vpop.f32.mrf.mxu0 }
0x15ba   :  { %11524 = vrcp.f32 %v9092_v57  ;;  %v16840_v55 = vadd.f32 %v10926_v33, %v8880_v48  ;;  %v10497_v53 = vadd.f32 %v10496_v42, %v10495_v5  ;;  %v10935_v5 = vpop.f32.mrf.mxu1 }
0x15bb   :  { %v11515_v34 = vpop.eup %11514  ;;  %11526 = vpow2.f32 %v9548_v8  ;;  %v10498_v15 = vpop.f32.mrf.mxu0 }
0x15bc   :  { %v9093_v23 = vadd.f32 1.0, %v11515_v34  ;;  %v9549_v60 = vmul.f32 -1.442695, %v16840_v55  ;;  %v8885_v38 = vadd.f32 %v10497_v53, %v16809_v63 }
0x15bd   :  { %v10499_v26 = vpop.f32.mrf.mxu0 }
0x15be   :  { %11528 = vrcp.f32 %v9093_v23  ;;  %v16844_v52 = vadd.f32 %v9019_v54, %v8885_v38  ;;  %v10500_v11 = vadd.f32 %v10499_v26, %v10498_v15 }
0x15bf   :  { %v11517_v16 = vpop.eup %11516  ;;  %11530 = vpow2.f32 %v9549_v60  ;;  %v10501_v35 = vpop.f32.mrf.mxu0 }
0x15c0   :  { %v11519_v37 = vpop.eup %11518  ;;  %v9550_v41 = vmul.f32 -1.442695, %v16844_v52  ;;  %v8890_v20 = vadd.f32 %v10500_v11, %v16809_v63  ;;  %9146 = vrot.lane.b32.xlu0 %v11517_v16, %s11659_s0  ;;  %v9039_v60 = vpop.f32.mrf.mxu1 }
0x15c1   :  { %v9094_v47 = vadd.f32 1.0, %v11519_v37  ;;  %v10502_v32 = vpop.f32.mrf.mxu0 }
0x15c2   :  { %11532 = vpow2.f32 %v9550_v41  ;;  %v16849_v46 = vadd.f32 %v10929_v28, %v8890_v20  ;;  %v10503_v3 = vadd.f32 %v10502_v32, %v10501_v35 }
0x15c3   :  { %v11521_v19 = vpop.eup %11520  ;;  %11534 = vrcp.f32 %v9094_v47  ;;  %v10504_v40 = vpop.f32.mrf.mxu0 }
0x15c4   :  { %v11523_v24 = vpop.eup %11522  ;;  %v9551_v33 = vmul.f32 -1.442695, %v16849_v46  ;;  %v8895_v18 = vadd.f32 %v10503_v3, %v16809_v63  ;;  %9148 = vrot.lane.b32.xlu1 %v11521_v19, %s11659_s0 }
0x15c5   :  { %v9095_v49 = vadd.f32 1.0, %v11523_v24  ;;  %v10505_v45 = vpop.f32.mrf.mxu0 }
0x15c6   :  { %11536 = vpow2.f32 %v9551_v33  ;;  %v16854_v30 = vadd.f32 %v9029_v50, %v8895_v18  ;;  %v10506_v21 = vadd.f32 %v10505_v45, %v10504_v40 }
0x15c7   :  { %v11525_v58 = vpop.eup %11524  ;;  %11538 = vrcp.f32 %v9095_v49  ;;  %v10507_v51 = vpop.f32.mrf.mxu0 }
0x15c8   :  { %v11527_v7 = vpop.eup %11526  ;;  %v9552_v10 = vmul.f32 -1.442695, %v16854_v30  ;;  %v8900_v43 = vadd.f32 %v10506_v21, %v16809_v63  ;;  %9150 = vrot.lane.b32.xlu0 %v11525_v58, %s11659_s0 }
0x15c9   :  { %v9096_v57 = vadd.f32 1.0, %v11527_v7  ;;  %v10508_v8 = vpop.f32.mrf.mxu0 }
0x15ca   :  { %11540 = vpow2.f32 %v9552_v10  ;;  %v16859_v48 = vadd.f32 %v10932_v61, %v8900_v43  ;;  %v10509_v28 = vadd.f32 %v10508_v8, %v10507_v51 }
0x15cb   :  { %v11529_v42 = vpop.eup %11528  ;;  %11542 = vrcp.f32 %v9096_v57  ;;  %v10510_v53 = vpop.f32.mrf.mxu0 }
0x15cc   :  { %v11531_v34 = vpop.eup %11530  ;;  %v9553_v15 = vmul.f32 -1.442695, %v16859_v48  ;;  %v8905_v23 = vadd.f32 %v10509_v28, %v16809_v63  ;;  %9152 = vrot.lane.b32.xlu1 %v11529_v42, %s11659_s0 }
0x15cd   :  { %v9097_v38 = vadd.f32 1.0, %v11531_v34  ;;  %v10511_v54 = vpop.f32.mrf.mxu0 }
0x15ce   :  { %11544 = vpow2.f32 %v9553_v15  ;;  %v16864_v26 = vadd.f32 %v9039_v60, %v8905_v23  ;;  %v10512_v11 = vadd.f32 %v10511_v54, %v10510_v53 }
0x15cf   :  { %v11533_v16 = vpop.eup %11532  ;;  %11546 = vrcp.f32 %v9097_v38 }
0x15d0   :  { %v11535_v35 = vpop.eup %11534  ;;  %v9098_v37 = vadd.f32 1.0, %v11533_v16  ;;  %v9554_v41 = vmul.f32 -1.442695, %v16864_v26  ;;  %v8910_v20 = vadd.f32 %v10512_v11, %v16809_v63 }
0x15d1   :  { %9154 = vrot.lane.b32.xlu0 %v11535_v35, %s11659_s0 }
0x15d2   :  { %11548 = vrcp.f32 %v9098_v37  ;;  %v16869_v61 = vadd.f32 %v10935_v5, %v8910_v20 }
0x15d3   :  { %v11537_v47 = vpop.eup %11536  ;;  %11550 = vpow2.f32 %v9554_v41 }
0x15d4   :  { %v11539_v32 = vpop.eup %11538  ;;  %v9099_v3 = vadd.f32 1.0, %v11537_v47  ;;  %v9555_v19 = vmul.f32 -1.442695, %v16869_v61 }
0x15d5   :  { %9156 = vrot.lane.b32.xlu1 %v11539_v32, %s11659_s0 }
0x15d6   :  { %11552 = vrcp.f32 %v9099_v3 }
0x15d7   :  { %v11541_v40 = vpop.eup %11540  ;;  %11554 = vpow2.f32 %v9555_v19 }
0x15d8   :  { %v11543_v24 = vpop.eup %11542  ;;  %v9100_v33 = vadd.f32 1.0, %v11541_v40 }
0x15d9   :  { %9158 = vrot.lane.b32.xlu0 %v11543_v24, %s11659_s0 }
0x15da   :  { %11556 = vrcp.f32 %v9100_v33 }
0x15db   :  { %v11545_v63 = vpop.eup %11544 }
0x15dc   :  { %v11547_v18 = vpop.eup %11546  ;;  %v9101_v50 = vadd.f32 1.0, %v11545_v63 }
0x15dd   :  { %9160 = vrot.lane.b32.xlu1 %v11547_v18, %s11659_s0 }
0x15de   :  { %11558 = vrcp.f32 %v9101_v50 }
0x15df   :  { %v11549_v49 = vpop.eup %11548 }
0x15e0   :  { %v11551_v45 = vpop.eup %11550  ;;  %9162 = vrot.lane.b32.xlu0 %v11549_v49, %s11659_s0 }
0x15e1   :  { %v9102_v21 = vadd.f32 1.0, %v11551_v45 }
0x15e3   :  { %v11553_v58 = vpop.eup %11552  ;;  %11560 = vrcp.f32 %v9102_v21 }
0x15e4   :  { %v11555_v51 = vpop.eup %11554  ;;  %9164 = vrot.lane.b32.xlu1 %v11553_v58, %s11659_s0 }
0x15e5   :  { %v9103_v7 = vadd.f32 1.0, %v11555_v51 }
0x15e7   :  { %v11557_v10 = vpop.eup %11556  ;;  %11562 = vrcp.f32 %v9103_v7 }
0x15e8   :  { %9166 = vrot.lane.b32.xlu0 %v11557_v10, %s11659_s0 }
0x15eb   :  { %v11559_v43 = vpop.eup %11558 }
0x15ec   :  { %9168 = vrot.lane.b32.xlu1 %v11559_v43, %s11659_s0 }
0x15f0   :  { %v11561_v5 = vpop.eup %11560 }
0x15f1   :  { %9170 = vrot.lane.b32.xlu0 %v11561_v5, %s11659_s0 }
0x15f4   :  { %v11563_v57 = vpop.eup %11562 }
0x15f5   :  { %9172 = vrot.lane.b32.xlu1 %v11563_v57, %s11659_s0 }
0x1632   :  { %v9147_v8 = vpop.permute.xlu0 %9146 }
0x1633   :  { %v9188_v28 = vmul.f32 %v9147_v8, %v16812_v31 }
0x1635   :  { %v9202_v42 = vmul.f32 %v9188_v28, %v11880_v12 }
0x1636   :  { %v9149_v53 = vpop.permute.xlu1 %9148 }
0x1637   :  { %9216 = vst.msk [vmem:[%s16971_s6] sm:$0xff] %vm563_vm1, %v9202_v42  ;;  %v9189_v34 = vmul.f32 %v9149_v53, %v16816_v29 }
0x1639   :  { %v9203_v15 = vmul.f32 %v9189_v34, %v11882_v13 }
0x163a   :  { %v9151_v23 = vpop.permute.xlu0 %9150 }
0x163b   :  { %9217 = vst.msk [vmem:[%s16971_s6 + $0x8] sm:$0xff] %vm563_vm1, %v9203_v15  ;;  %v9190_v31 = vmul.f32 %v9151_v23, %v16820_v27 }
0x163d   :  { %v9204_v12 = vmul.f32 %v9190_v31, %v11930_v59 }
0x163e   :  { %v9153_v60 = vpop.permute.xlu1 %9152 }
0x163f   :  { %9218 = vst.msk [vmem:[%s16971_s6 + $0x10] sm:$0xff] %vm563_vm1, %v9204_v12  ;;  %v9191_v29 = vmul.f32 %v9153_v60, %v16824_v17 }
0x1641   :  { %v9205_v13 = vmul.f32 %v9191_v29, %v11932_v1 }
0x1643   :  { %9219 = vst.msk [vmem:[%s16971_s6 + $0x18] sm:$0xff] %vm563_vm1, %v9205_v13  ;;  %v9155_v38 = vpop.permute.xlu0 %9154 }
0x1644   :  { %v9192_v27 = vmul.f32 %v9155_v38, %v16828_v62 }
0x1646   :  { %v9206_v59 = vmul.f32 %v9192_v27, %v11935_v9 }
0x1647   :  { %v9157_v54 = vpop.permute.xlu1 %9156 }
0x1648   :  { %9220 = vst.msk [vmem:[%s16971_s6 + $0x20] sm:$0xff] %vm563_vm1, %v9206_v59  ;;  %v9193_v17 = vmul.f32 %v9157_v54, %v16832_v56 }
0x164a   :  { %v9207_v1 = vmul.f32 %v9193_v17, %v11941_v22 }
0x164b   :  { %v9159_v11 = vpop.permute.xlu0 %9158 }
0x164c   :  { %9221 = vst.msk [vmem:[%s16971_s6 + $0x28] sm:$0xff] %vm563_vm1, %v9207_v1  ;;  %v9194_v62 = vmul.f32 %v9159_v11, %v16836_v4 }
0x164e   :  { %v9208_v9 = vmul.f32 %v9194_v62, %v11979_v44 }
0x164f   :  { %v9161_v16 = vpop.permute.xlu1 %9160 }
0x1650   :  { %9222 = vst.msk [vmem:[%s16971_s6 + $0x30] sm:$0xff] %vm563_vm1, %v9208_v9  ;;  %v9195_v56 = vmul.f32 %v9161_v16, %v16840_v55 }
0x1652   :  { %v9209_v22 = vmul.f32 %v9195_v56, %v12021_v2  ;;  %v9163_v35 = vpop.permute.xlu0 %9162 }
0x1653   :  { %v9196_v37 = vmul.f32 %v9163_v35, %v16844_v52 }
0x1654   :  { %9223 = vst.msk [vmem:[%s16971_s6 + $0x38] sm:$0xff] %vm563_vm1, %v9209_v22 }
0x1655   :  { %v9210_v44 = vmul.f32 %v9196_v37, %v12056_v25 }
0x1656   :  { %v9165_v4 = vpop.permute.xlu1 %9164 }
0x1657   :  { %9224 = vst.msk [vmem:[%s16971_s6 + $0x40] sm:$0xff] %vm563_vm1, %v9210_v44  ;;  %v9197_v55 = vmul.f32 %v9165_v4, %v16849_v46 }
0x1659   :  { %v9211_v2 = vmul.f32 %v9197_v55, %v12092_v0 }
0x165a   :  { %v9167_v41 = vpop.permute.xlu0 %9166 }
0x165b   :  { %9225 = vst.msk [vmem:[%s16971_s6 + $0x48] sm:$0xff] %vm563_vm1, %v9211_v2  ;;  %v9198_v52 = vmul.f32 %v9167_v41, %v16854_v30 }
0x165d   :  { %v9212_v25 = vmul.f32 %v9198_v52, %v12129_v36 }
0x165e   :  { %v9169_v20 = vpop.permute.xlu1 %9168 }
0x165f   :  { %9226 = vst.msk [vmem:[%s16971_s6 + $0x50] sm:$0xff] %vm563_vm1, %v9212_v25  ;;  %v9199_v46 = vmul.f32 %v9169_v20, %v16859_v48 }
0x1661   :  { %v9213_v0 = vmul.f32 %v9199_v46, %v16985_v6 }
0x1663   :  { %9227 = vst.msk [vmem:[%s16971_s6 + $0x58] sm:$0xff] %vm563_vm1, %v9213_v0  ;;  %v9171_v47 = vpop.permute.xlu0 %9170 }
0x1664   :  { %v9200_v30 = vmul.f32 %v9171_v47, %v16864_v26 }
0x1666   :  { %v9214_v36 = vmul.f32 %v9200_v30, %v12202_v39 }
0x1667   :  { %v9173_v32 = vpop.permute.xlu1 %9172 }
0x1668   :  { %9228 = vst.msk [vmem:[%s16971_s6 + $0x60] sm:$0xff] %vm563_vm1, %v9214_v36  ;;  %v9201_v48 = vmul.f32 %v9173_v32, %v16869_v61 }
0x166a   :  { %v9215_v6 = vmul.f32 %v9201_v48, %v11884_v14 }
0x166c   :  { %9229 = vst.msk [vmem:[%s16971_s6 + $0x68] sm:$0xff] %vm563_vm1, %v9215_v6 }
0x166d   :  { %9234 = vsyncpa [#allocation4], 1 }
0x166e   :  { %9235 = vsyncpa [#allocation6], 1 }
0x166f   :  { %9236 = vsyncpa [#allocation9], 1 }

</bundles_post_ra>
